<compile_context>
chip_gen: v6e
topology: v6e:2x2x1
jax: 0.10.0
libtpu: 0.0.40
codegen_flags: <defaults>
</compile_context>

<pallas_src>
import functools

import numpy as np

import jax
import jax.numpy as jnp
from jax.experimental import pallas as pl
from jax.experimental.pallas import tpu as pltpu

# ---- MoCo.__init__ defaults (small synthetic sizes where allowed) -----------
DIM = 128          # feature dimension (module default)
K_QUEUE = 256      # queue size (small stand-in for the default 4096/65536)
M_MOM = 0.99       # key-encoder momentum
TEMP = 0.1         # softmax temperature
BN_SPLITS = 2      # SplitBatchNorm num_splits
BN_EPS = 1e-5
STEM_C = 512       # backbone output width (resnet18 -> fc expects 512)

QUEUE_BLOCK = 128  # l_neg queue row tile (grid axis; scales to the real K / v7x VMEM)
KD_PAD = 32        # conv contraction (3*3*3=27) zero-padded to the bf16 sublane tile
S_PAD = 8          # BN-split selector rows padded to the f32 sublane tile


# =============================== Pallas kernels ===============================

def _encoder_fused_kernel(cols_t_ref, wmat_ref, ssel_ref, gsel_ref,
                          bnw_ref, bnb_ref, w1_ref, b1_ref, w2_ref, b2_ref,
                          out_ref, *, inv_count):
    """conv3x3(s2) -> SplitBN (both splits) -> ReLU -> GAP -> fc MLP, one invocation."""
    f32 = jnp.float32
    bf16 = jnp.bfloat16

    # conv as a lane-dense im2col matmul: contract the zero-padded kd axis of both
    # operands (== cols_t.T @ wmat). Operands arrive bf16; accumulation is f32.
    x = jax.lax.dot_general(
        cols_t_ref[...], wmat_ref[...],
        dimension_numbers=(((0,), (0,)), ((), ())),
        preferred_element_type=f32)                                    # (N*P, C)
    xb = x.astype(bf16)

    # SplitBatchNorm training statistics on the MXU: per-split sum / sum-of-squares
    # via a 0/1 selector matmul (conv/fc matmuls under-fill the MXU, so this is ~free
    # and keeps the large cross-sublane reductions off the VPU/XLU).
    # TODO(synk): one-pass E[x^2]-mean^2 can cancel badly if the stem changes scale.
    sums = jnp.dot(ssel_ref[...], xb, preferred_element_type=f32)      # (S_PAD, C)
    sqs = jnp.dot(ssel_ref[...], xb * xb, preferred_element_type=f32)  # (S_PAD, C)
    mean = sums * inv_count
    var = jnp.maximum(sqs * inv_count - mean * mean, 0.0)              # biased (training BN)
    scale = jax.lax.rsqrt(var + BN_EPS) * bnw_ref[...]                 # gamma folded in
    shift = bnb_ref[...] - mean * scale                                # beta folded in

    # Broadcast the per-split affine back to rows with the same (transposed) selector,
    # then BN + ReLU as a single multiply-add on the VPU.
    scale_r = jax.lax.dot_general(ssel_ref[...], scale.astype(bf16),
                                  dimension_numbers=(((0,), (0,)), ((), ())),
                                  preferred_element_type=f32)          # (N*P, C)
    shift_r = jax.lax.dot_general(ssel_ref[...], shift.astype(bf16),
                                  dimension_numbers=(((0,), (0,)), ((), ())),
                                  preferred_element_type=f32)
    y = jnp.maximum(x * scale_r + shift_r, 0.0)

    # Global average pool as an MXU matmul against a (N, N*P) block-averaging matrix.
    g = jnp.dot(gsel_ref[...], y.astype(bf16), preferred_element_type=f32)   # (N, C)

    # fc head: Linear(512,256) -> ReLU -> Linear(256,128); weights arrive in bf16.
    h = jnp.maximum(
        jnp.dot(g.astype(bf16), w1_ref[...], preferred_element_type=f32) + b1_ref[...],
        0.0)
    out_ref[...] = (jnp.dot(h.astype(bf16), w2_ref[...],
                            preferred_element_type=f32) + b2_ref[...])        # (N, DIM)


def encoder_forward(params, x_nchw):
    """Stand-in encoder: a single fused pallas_call (no grid).

    Both BN splits are computed inside one invocation: on v5e/v6e a 2-step grid is a
    serial loop that only doubles per-step overhead.  TODO(synk): on v7x, split the
    spatial/BN work across the two TensorCores (core_parallel) and tile ho*wo with a
    stats accumulator before scaling to real 224x224 images.
    """
    n, cin, h, w = x_nchw.shape
    kh = kw = 3
    stride, pad = 2, 1
    ho = (h + 2 * pad - kh) // stride + 1
    wo = (w + 2 * pad - kw) // stride + 1
    p = ho * wo
    npix = n * p
    kd = kh * kw * cin

    assert n % BN_SPLITS == 0
    ns = n // BN_SPLITS

    # Lane-dense im2col: (kd, N*Ho*Wo); kd ordering is (cin, kh, kw) to match OIHW.
    xpad = jnp.pad(x_nchw.astype(jnp.float32),
                   ((0, 0), (0, 0), (pad, pad), (pad, pad)))
    patches = [xpad[:, c, i:i + stride * ho:stride, j:j + stride * wo:stride]
               for c in range(cin) for i in range(kh) for j in range(kw)]   # (N, ho, wo)
    cols_t = jnp.stack(patches, axis=0).reshape(kd, npix)
    cols_t = jnp.pad(cols_t, ((0, KD_PAD - kd), (0, 0))).astype(jnp.bfloat16)

    # conv weight OIHW -> (kd, C), zero-padded to KD_PAD, pre-cast to bf16.
    wmat = jnp.pad(params["conv_w"].reshape(STEM_C, kd).T,
                   ((0, KD_PAD - kd), (0, 0))).astype(jnp.bfloat16)

    # Selector matrices (exact in bf16): split membership follows PyTorch's
    # input.view(-1, C*num_splits, H, W), i.e. split = sample_index % num_splits.
    row_sample = jnp.arange(npix, dtype=jnp.int32) // p                       # (N*P,)
    ssel = (row_sample[None, :] % BN_SPLITS ==
            jnp.arange(BN_SPLITS, dtype=jnp.int32)[:, None]).astype(jnp.float32)
    ssel = jnp.pad(ssel, ((0, S_PAD - BN_SPLITS), (0, 0))).astype(jnp.bfloat16)
    gsel = ((row_sample[None, :] == jnp.arange(n, dtype=jnp.int32)[:, None])
            .astype(jnp.float32) / p).astype(jnp.bfloat16)                    # (N, N*P)

    out = pl.pallas_call(
        functools.partial(_encoder_fused_kernel, inv_count=1.0 / (ns * p)),
        out_shape=jax.ShapeDtypeStruct((n, DIM), jnp.float32),
    )(cols_t, wmat, ssel, gsel,
      params["bn_w"].reshape(1, -1), params["bn_b"].reshape(1, -1),
      params["fc1_w"].astype(jnp.bfloat16), params["fc1_b"].reshape(1, -1),
      params["fc2_w"].astype(jnp.bfloat16), params["fc2_b"].reshape(1, -1))

    # TODO(synk): running_mean/running_var buffer updates (training side effect) are
    # not propagated because MoCo.forward's return values do not include them.
    return out


def _moco_logits_kernel(ptr_ref, q_ref, k_ref, queue_ref,
                        lpos_ref, lneg_ref, qout_ref, *, inv_temp):
    del ptr_ref  # only consumed by the enqueue output's index_map
    q = q_ref[...]
    k = k_ref[...]
    # F.normalize(x, dim=1) == x * rsqrt(max(||x||^2, 1e-24)); 1/T is folded into qn,
    # so the elementwise scale is N*C instead of N*(1+K).
    qn = q * (jax.lax.rsqrt(jnp.maximum(jnp.sum(q * q, axis=1, keepdims=True), 1e-24))
              * inv_temp)
    kn = k * jax.lax.rsqrt(jnp.maximum(jnp.sum(k * k, axis=1, keepdims=True), 1e-24))
    # l_neg for this queue row block: einsum('nc,kc->nk') against the bf16 queue slice;
    # lane-dense (N, TK) store, no in-kernel concat.
    lneg_ref[...] = jax.lax.dot_general(
        qn.astype(jnp.bfloat16), queue_ref[...],
        dimension_numbers=(((1,), (1,)), ((), ())),
        preferred_element_type=jnp.float32)
    # l_pos (einsum('nc,nc->n') / T) and the fused enqueue rows: both output blocks are
    # grid-resident (constant index), so these stores are tiny and idempotent per step;
    # the HBM write-back lands once, after every queue block has been read for l_neg,
    # matching PyTorch's "logits before _dequeue_and_enqueue" ordering.
    lpos_ref[...] = jnp.sum(qn * kn, axis=1, keepdims=True)
    qout_ref[...] = kn.astype(jnp.bfloat16)


def moco_logits_and_enqueue(q, k, queue_rows, queue_ptr, temp):
    """Normalize q/k, l_pos, tiled l_neg (/T folded), and in-place queue enqueue."""
    n, c = q.shape
    kq = queue_rows.shape[0]
    assert kq % QUEUE_BLOCK == 0
    assert kq % n == 0                       # MoCo's `assert self.K % batch_size == 0`
    nkb = kq // QUEUE_BLOCK
    ptr_blk = (queue_ptr // n).astype(jnp.int32).reshape(1)   # enqueue row-block index

    grid_spec = pltpu.PrefetchScalarGridSpec(
        num_scalar_prefetch=1,
        grid=(nkb,),
        in_specs=[
            pl.BlockSpec((n, c), lambda i, ptr: (0, 0)),                # q (f32)
            pl.BlockSpec((n, c), lambda i, ptr: (0, 0)),                # k (f32)
            pl.BlockSpec((QUEUE_BLOCK, c), lambda i, ptr: (i, 0)),      # queue slice (bf16)
        ],
        out_specs=[
            pl.BlockSpec((n, 1), lambda i, ptr: (0, 0)),                # l_pos
            pl.BlockSpec((n, QUEUE_BLOCK), lambda i, ptr: (0, i)),      # l_neg (lane-dense)
            pl.BlockSpec((n, c), lambda i, ptr: (ptr[0], 0)),           # enqueue rows
        ],
    )
    l_pos, l_neg, new_queue = pl.pallas_call(
        functools.partial(_moco_logits_kernel, inv_temp=1.0 / temp),
        grid_spec=grid_spec,
        out_shape=(
            jax.ShapeDtypeStruct((n, 1), jnp.float32),
            jax.ShapeDtypeStruct((n, kq), jnp.float32),
            jax.ShapeDtypeStruct((kq, c), queue_rows.dtype),
        ),
        # Call operands are (ptr_blk, q, k, queue_rows): the queue (index 3) aliases
        # output 2, so the only HBM write for the enqueue is the (n, c) block at ptr.
        input_output_aliases={3: 2},
        compiler_params=pltpu.CompilerParams(
            # 'arbitrary': the l_pos / enqueue output blocks are grid-resident and the
            # in-place enqueue must not race with another core's queue reads.
            dimension_semantics=("arbitrary",),
            vmem_limit_bytes=32 * 1024 * 1024,
        ),
    )(ptr_blk, q, k, queue_rows)
    return l_pos, l_neg, new_queue


# ================================ MoCo forward ================================

@functools.partial(jax.jit, donate_argnums=(2,))   # donate queue_rows -> true in-place enqueue
def moco_forward(params_q, params_k, queue_rows, queue_ptr, im_q, im_k, shuffle_key):
    n = im_q.shape[0]

    # query features
    q = encoder_forward(params_q, im_q)

    # momentum update of the key encoder (torch.no_grad -> stop_gradient)
    params_k = jax.tree_util.tree_map(
        lambda pk, pq: jax.lax.stop_gradient(pk * M_MOM + pq * (1.0 - M_MOM)),
        params_k, params_q)

    # batch shuffle (changes SplitBatchNorm split statistics), encode keys, unshuffle
    idx_shuffle = jax.random.permutation(shuffle_key, n)
    idx_unshuffle = jnp.argsort(idx_shuffle)
    k = encoder_forward(params_k, im_k[idx_shuffle])
    k = jax.lax.stop_gradient(k[idx_unshuffle])   # l2-normalize commutes with row permutation

    # contrastive logits + fused in-place dequeue/enqueue
    l_pos, l_neg, new_queue = moco_logits_and_enqueue(q, k, queue_rows, queue_ptr, TEMP)
    logits = jnp.concatenate([l_pos, l_neg], axis=1)        # (N, 1+K), l_pos in column 0
    labels = jnp.zeros((n,), dtype=jnp.int32)               # torch.long -> int32

    new_ptr = (queue_ptr + n) % K_QUEUE
    return logits, labels, new_queue, new_ptr, params_k


# ================================== setup =====================================

def init_params(key):
    k1, k2, k3 = jax.random.split(key, 3)
    return {
        "conv_w": jax.random.normal(k1, (STEM_C, 3, 3, 3), jnp.float32) * 0.1,   # OIHW
        "bn_w": jnp.ones((STEM_C,), jnp.float32),
        "bn_b": jnp.zeros((STEM_C,), jnp.float32),
        "fc1_w": jax.random.normal(k2, (512, 256), jnp.float32) / jnp.sqrt(512.0),
        "fc1_b": jnp.zeros((256,), jnp.float32),
        "fc2_w": jax.random.normal(k3, (256, DIM), jnp.float32) / jnp.sqrt(256.0),
        "fc2_b": jnp.zeros((DIM,), jnp.float32),
    }


if __name__ == "__main__":
    key = jax.random.PRNGKey(0)
    kp, kq_img, kk_img, kqueue, kshuf = jax.random.split(key, 5)

    params_q = init_params(kp)
    params_k = jax.tree_util.tree_map(lambda p: p, params_q)   # param_k.copy_(param_q)

    batch = 8   # divisible by bn_splits; K_QUEUE % batch == 0
    im_q = jax.random.normal(kq_img, (batch, 3, 16, 16), jnp.float32)   # NCHW
    im_k = jax.random.normal(kk_img, (batch, 3, 16, 16), jnp.float32)   # NCHW

    # Queue stored as (K, DIM) rows in bf16 (keys are l2-normalized), unit-norm per key
    # — equivalent to torch.randn(dim, K) normalized along dim=0, then transposed.
    queue = jax.random.normal(kqueue, (K_QUEUE, DIM), jnp.float32)
    queue = (queue / jnp.linalg.norm(queue, axis=1, keepdims=True)).astype(jnp.bfloat16)
    queue_ptr = jnp.int32(0)

    # Host copies for correctness checks (queue is donated to moco_forward).
    queue_head_before = np.asarray(jax.device_get(queue[:batch]), dtype=np.float32)
    queue_next_before = np.asarray(jax.device_get(queue[batch:2 * batch]), dtype=np.float32)

    logits, labels, new_queue, new_ptr, _ = moco_forward(
        params_q, params_k, queue, queue_ptr, im_q, im_k, kshuf)
    jax.block_until_ready((logits, labels, new_queue, new_ptr))

    assert logits.shape == (batch, 1 + K_QUEUE)
    assert labels.shape == (batch,)
    assert new_queue.shape == (K_QUEUE, DIM) and new_queue.dtype == jnp.bfloat16
    assert bool(jnp.all(jnp.isfinite(logits)))
    assert int(new_ptr) == batch

    nq_host = np.asarray(jax.device_get(new_queue), dtype=np.float32)
    # The fused enqueue must have overwritten exactly rows [ptr, ptr+batch) ...
    assert not np.array_equal(nq_host[:batch], queue_head_before)
    # ... while the aliased, untouched rows keep their original values bit-for-bit.
    assert np.array_equal(nq_host[batch:2 * batch], queue_next_before)

    print("KERNEL_OK")
</pallas_src>

<mosaic_0001>
module attributes {stable_mosaic.version = 11 : i64} {
  func.func @_encoder_fused_kernel(%arg0: memref<32x512xbf16, #tpu.memory_space<vmem>>, %arg1: memref<32x512xbf16, #tpu.memory_space<vmem>>, %arg2: memref<8x512xbf16, #tpu.memory_space<vmem>>, %arg3: memref<8x512xbf16, #tpu.memory_space<vmem>>, %arg4: memref<1x512xf32, #tpu.memory_space<vmem>>, %arg5: memref<1x512xf32, #tpu.memory_space<vmem>>, %arg6: memref<512x256xbf16, #tpu.memory_space<vmem>>, %arg7: memref<1x256xf32, #tpu.memory_space<vmem>>, %arg8: memref<256x128xbf16, #tpu.memory_space<vmem>>, %arg9: memref<1x128xf32, #tpu.memory_space<vmem>>, %arg10: memref<8x128xf32, #tpu.memory_space<vmem>>) attributes {dimension_semantics = [], scalar_prefetch = 0 : i64, scratch_operands = 0 : i64, tpu.core_type = #tpu.core_type<tc>} {
    %c0 = arith.constant 0 : index
    %c0_0 = arith.constant 0 : index
    %0 = vector.load %arg0[%c0, %c0_0] : memref<32x512xbf16, #tpu.memory_space<vmem>>, vector<32x512xbf16>
    %c0_1 = arith.constant 0 : index
    %c0_2 = arith.constant 0 : index
    %1 = vector.load %arg1[%c0_1, %c0_2] : memref<32x512xbf16, #tpu.memory_space<vmem>>, vector<32x512xbf16>
    %cst = arith.constant dense<0.000000e+00> : vector<512x512xf32>
    %2 = tpu.matmul %0, %1, %cst {dimension_numbers = #tpu.dot_dimension_numbers<[0], [0], [1], [1], [0, 1, 1, 1], [], []>} : vector<32x512xbf16>, vector<32x512xbf16>, vector<512x512xf32> -> vector<512x512xf32>
    %3 = arith.truncf %2 : vector<512x512xf32> to vector<512x512xbf16>
    %c0_3 = arith.constant 0 : index
    %c0_4 = arith.constant 0 : index
    %4 = vector.load %arg2[%c0_3, %c0_4] : memref<8x512xbf16, #tpu.memory_space<vmem>>, vector<8x512xbf16>
    %cst_5 = arith.constant dense<0.000000e+00> : vector<8x512xf32>
    %5 = tpu.matmul %4, %3, %cst_5 {dimension_numbers = #tpu.dot_dimension_numbers<[1], [0], [0], [1], [0, 0, 1, 1], [], []>} : vector<8x512xbf16>, vector<512x512xbf16>, vector<8x512xf32> -> vector<8x512xf32>
    %c0_6 = arith.constant 0 : index
    %c0_7 = arith.constant 0 : index
    %6 = vector.load %arg2[%c0_6, %c0_7] : memref<8x512xbf16, #tpu.memory_space<vmem>>, vector<8x512xbf16>
    %7 = arith.mulf %3, %3 : vector<512x512xbf16>
    %cst_8 = arith.constant dense<0.000000e+00> : vector<8x512xf32>
    %8 = tpu.matmul %6, %7, %cst_8 {dimension_numbers = #tpu.dot_dimension_numbers<[1], [0], [0], [1], [0, 0, 1, 1], [], []>} : vector<8x512xbf16>, vector<512x512xbf16>, vector<8x512xf32> -> vector<8x512xf32>
    %cst_9 = arith.constant 3.906250e-03 : f32
    %9 = vector.broadcast %cst_9 : f32 to vector<8x512xf32>
    %10 = arith.mulf %5, %9 : vector<8x512xf32>
    %cst_10 = arith.constant 3.906250e-03 : f32
    %11 = vector.broadcast %cst_10 : f32 to vector<8x512xf32>
    %12 = arith.mulf %8, %11 : vector<8x512xf32>
    %13 = arith.mulf %10, %10 : vector<8x512xf32>
    %14 = arith.subf %12, %13 : vector<8x512xf32>
    %cst_11 = arith.constant 0.000000e+00 : f32
    %15 = vector.broadcast %cst_11 : f32 to vector<8x512xf32>
    %16 = arith.maximumf %14, %15 : vector<8x512xf32>
    %cst_12 = arith.constant 9.99999974E-6 : f32
    %17 = vector.broadcast %cst_12 : f32 to vector<8x512xf32>
    %18 = arith.addf %16, %17 : vector<8x512xf32>
    %19 = math.rsqrt %18 : vector<8x512xf32>
    %c0_13 = arith.constant 0 : index
    %c0_14 = arith.constant 0 : index
    %20 = vector.load %arg4[%c0_13, %c0_14] : memref<1x512xf32, #tpu.memory_space<vmem>>, vector<1x512xf32>
    %21 = vector.broadcast %20 : vector<1x512xf32> to vector<8x512xf32>
    %22 = arith.mulf %19, %21 : vector<8x512xf32>
    %c0_15 = arith.constant 0 : index
    %c0_16 = arith.constant 0 : index
    %23 = vector.load %arg5[%c0_15, %c0_16] : memref<1x512xf32, #tpu.memory_space<vmem>>, vector<1x512xf32>
    %24 = arith.mulf %10, %22 : vector<8x512xf32>
    %25 = vector.broadcast %23 : vector<1x512xf32> to vector<8x512xf32>
    %26 = arith.subf %25, %24 : vector<8x512xf32>
    %c0_17 = arith.constant 0 : index
    %c0_18 = arith.constant 0 : index
    %27 = vector.load %arg2[%c0_17, %c0_18] : memref<8x512xbf16, #tpu.memory_space<vmem>>, vector<8x512xbf16>
    %28 = arith.truncf %22 : vector<8x512xf32> to vector<8x512xbf16>
    %cst_19 = arith.constant dense<0.000000e+00> : vector<512x512xf32>
    %29 = tpu.matmul %27, %28, %cst_19 {dimension_numbers = #tpu.dot_dimension_numbers<[0], [0], [1], [1], [0, 1, 1, 1], [], []>} : vector<8x512xbf16>, vector<8x512xbf16>, vector<512x512xf32> -> vector<512x512xf32>
    %c0_20 = arith.constant 0 : index
    %c0_21 = arith.constant 0 : index
    %30 = vector.load %arg2[%c0_20, %c0_21] : memref<8x512xbf16, #tpu.memory_space<vmem>>, vector<8x512xbf16>
    %31 = arith.truncf %26 : vector<8x512xf32> to vector<8x512xbf16>
    %cst_22 = arith.constant dense<0.000000e+00> : vector<512x512xf32>
    %32 = tpu.matmul %30, %31, %cst_22 {dimension_numbers = #tpu.dot_dimension_numbers<[0], [0], [1], [1], [0, 1, 1, 1], [], []>} : vector<8x512xbf16>, vector<8x512xbf16>, vector<512x512xf32> -> vector<512x512xf32>
    %33 = arith.mulf %2, %29 : vector<512x512xf32>
    %34 = arith.addf %33, %32 : vector<512x512xf32>
    %cst_23 = arith.constant 0.000000e+00 : f32
    %35 = vector.broadcast %cst_23 : f32 to vector<512x512xf32>
    %36 = arith.maximumf %34, %35 : vector<512x512xf32>
    %c0_24 = arith.constant 0 : index
    %c0_25 = arith.constant 0 : index
    %37 = vector.load %arg3[%c0_24, %c0_25] : memref<8x512xbf16, #tpu.memory_space<vmem>>, vector<8x512xbf16>
    %38 = arith.truncf %36 : vector<512x512xf32> to vector<512x512xbf16>
    %cst_26 = arith.constant dense<0.000000e+00> : vector<8x512xf32>
    %39 = tpu.matmul %37, %38, %cst_26 {dimension_numbers = #tpu.dot_dimension_numbers<[1], [0], [0], [1], [0, 0, 1, 1], [], []>} : vector<8x512xbf16>, vector<512x512xbf16>, vector<8x512xf32> -> vector<8x512xf32>
    %40 = arith.truncf %39 : vector<8x512xf32> to vector<8x512xbf16>
    %c0_27 = arith.constant 0 : index
    %c0_28 = arith.constant 0 : index
    %41 = vector.load %arg6[%c0_27, %c0_28] : memref<512x256xbf16, #tpu.memory_space<vmem>>, vector<512x256xbf16>
    %cst_29 = arith.constant dense<0.000000e+00> : vector<8x256xf32>
    %42 = tpu.matmul %40, %41, %cst_29 {dimension_numbers = #tpu.dot_dimension_numbers<[1], [0], [0], [1], [0, 0, 1, 1], [], []>} : vector<8x512xbf16>, vector<512x256xbf16>, vector<8x256xf32> -> vector<8x256xf32>
    %c0_30 = arith.constant 0 : index
    %c0_31 = arith.constant 0 : index
    %43 = vector.load %arg7[%c0_30, %c0_31] : memref<1x256xf32, #tpu.memory_space<vmem>>, vector<1x256xf32>
    %44 = vector.broadcast %43 : vector<1x256xf32> to vector<8x256xf32>
    %45 = arith.addf %42, %44 : vector<8x256xf32>
    %cst_32 = arith.constant 0.000000e+00 : f32
    %46 = vector.broadcast %cst_32 : f32 to vector<8x256xf32>
    %47 = arith.maximumf %45, %46 : vector<8x256xf32>
    %48 = arith.truncf %47 : vector<8x256xf32> to vector<8x256xbf16>
    %c0_33 = arith.constant 0 : index
    %c0_34 = arith.constant 0 : index
    %49 = vector.load %arg8[%c0_33, %c0_34] : memref<256x128xbf16, #tpu.memory_space<vmem>>, vector<256x128xbf16>
    %cst_35 = arith.constant dense<0.000000e+00> : vector<8x128xf32>
    %50 = tpu.matmul %48, %49, %cst_35 {dimension_numbers = #tpu.dot_dimension_numbers<[1], [0], [0], [1], [0, 0, 1, 1], [], []>} : vector<8x256xbf16>, vector<256x128xbf16>, vector<8x128xf32> -> vector<8x128xf32>
    %c0_36 = arith.constant 0 : index
    %c0_37 = arith.constant 0 : index
    %51 = vector.load %arg9[%c0_36, %c0_37] : memref<1x128xf32, #tpu.memory_space<vmem>>, vector<1x128xf32>
    %52 = vector.broadcast %51 : vector<1x128xf32> to vector<8x128xf32>
    %53 = arith.addf %50, %52 : vector<8x128xf32>
    %c0_38 = arith.constant 0 : index
    %c0_39 = arith.constant 0 : index
    %54 = vector.load %arg10[%c0_38, %c0_39] : memref<8x128xf32, #tpu.memory_space<vmem>>, vector<8x128xf32>
    tpu.vector_store %arg10[%c0_38, %c0_39], %53 {strides = array<i32>} : memref<8x128xf32, #tpu.memory_space<vmem>>, vector<8x128xf32>,
    return
  }
}

module attributes {stable_mosaic.version = 11 : i64} {
  func.func @_moco_logits_kernel(%arg0: i32, %arg1: memref<1xi32, #tpu.memory_space<smem>>, %arg2: memref<8x128xf32, #tpu.memory_space<vmem>>, %arg3: memref<8x128xf32, #tpu.memory_space<vmem>>, %arg4: memref<128x128xbf16, #tpu.memory_space<vmem>>, %arg5: memref<8x1xf32, #tpu.memory_space<vmem>>, %arg6: memref<8x128xf32, #tpu.memory_space<vmem>>, %arg7: memref<8x128xbf16, #tpu.memory_space<vmem>>) attributes {dimension_semantics = [#tpu.dimension_semantics<arbitrary>], iteration_bounds = array<i64: 2>, scalar_prefetch = 1 : i64, scratch_operands = 0 : i64, tpu.core_type = #tpu.core_type<tc>, window_params = [{pipeline_mode = #tpu.pipeline_mode<synchronous>, transform_indices = @transform_0, window_bounds = array<i64: 8, 128>}, {pipeline_mode = #tpu.pipeline_mode<synchronous>, transform_indices = @transform_1, window_bounds = array<i64: 8, 128>}, {transform_indices = @transform_2, window_bounds = array<i64: 128, 128>}, {pipeline_mode = #tpu.pipeline_mode<synchronous>, transform_indices = @transform_3, window_bounds = array<i64: 8, 1>}, {transform_indices = @transform_4, window_bounds = array<i64: 8, 128>}, {transform_indices = @transform_5, window_bounds = array<i64: 8, 128>}]} {
    %c0 = arith.constant 0 : index
    %c0_0 = arith.constant 0 : index
    %0 = vector.load %arg2[%c0, %c0_0] : memref<8x128xf32, #tpu.memory_space<vmem>>, vector<8x128xf32>
    %c0_1 = arith.constant 0 : index
    %c0_2 = arith.constant 0 : index
    %1 = vector.load %arg3[%c0_1, %c0_2] : memref<8x128xf32, #tpu.memory_space<vmem>>, vector<8x128xf32>
    %2 = arith.mulf %0, %0 : vector<8x128xf32>
    %cst = arith.constant dense<0.000000e+00> : vector<8xf32>
    %3 = vector.multi_reduction <add>, %2, %cst [1] : vector<8x128xf32> to vector<8xf32>
    %4 = vector.shape_cast %3 : vector<8xf32> to vector<8x1xf32>
    %cst_3 = arith.constant 1.000000e-24 : f32
    %5 = vector.broadcast %cst_3 : f32 to vector<8x1xf32>
    %6 = arith.maximumf %4, %5 : vector<8x1xf32>
    %7 = math.rsqrt %6 : vector<8x1xf32>
    %cst_4 = arith.constant 1.000000e+01 : f32
    %8 = vector.broadcast %cst_4 : f32 to vector<8x1xf32>
    %9 = arith.mulf %7, %8 : vector<8x1xf32>
    %10 = vector.broadcast %9 : vector<8x1xf32> to vector<8x128xf32>
    %11 = arith.mulf %0, %10 : vector<8x128xf32>
    %12 = arith.mulf %1, %1 : vector<8x128xf32>
    %cst_5 = arith.constant dense<0.000000e+00> : vector<8xf32>
    %13 = vector.multi_reduction <add>, %12, %cst_5 [1] : vector<8x128xf32> to vector<8xf32>
    %14 = vector.shape_cast %13 : vector<8xf32> to vector<8x1xf32>
    %cst_6 = arith.constant 1.000000e-24 : f32
    %15 = vector.broadcast %cst_6 : f32 to vector<8x1xf32>
    %16 = arith.maximumf %14, %15 : vector<8x1xf32>
    %17 = math.rsqrt %16 : vector<8x1xf32>
    %18 = vector.broadcast %17 : vector<8x1xf32> to vector<8x128xf32>
    %19 = arith.mulf %1, %18 : vector<8x128xf32>
    %20 = arith.truncf %11 : vector<8x128xf32> to vector<8x128xbf16>
    %c0_7 = arith.constant 0 : index
    %c0_8 = arith.constant 0 : index
    %21 = vector.load %arg4[%c0_7, %c0_8] : memref<128x128xbf16, #tpu.memory_space<vmem>>, vector<128x128xbf16>
    %cst_9 = arith.constant dense<0.000000e+00> : vector<8x128xf32>
    %22 = tpu.matmul %20, %21, %cst_9 {dimension_numbers = #tpu.dot_dimension_numbers<[1], [1], [0], [0], [0, 0, 1, 0], [], []>} : vector<8x128xbf16>, vector<128x128xbf16>, vector<8x128xf32> -> vector<8x128xf32>
    %c0_10 = arith.constant 0 : index
    %c0_11 = arith.constant 0 : index
    %23 = vector.load %arg6[%c0_10, %c0_11] : memref<8x128xf32, #tpu.memory_space<vmem>>, vector<8x128xf32>
    tpu.vector_store %arg6[%c0_10, %c0_11], %22 {strides = array<i32>} : memref<8x128xf32, #tpu.memory_space<vmem>>, vector<8x128xf32>,
    %24 = arith.mulf %11, %19 : vector<8x128xf32>
    %cst_12 = arith.constant dense<0.000000e+00> : vector<8xf32>
    %25 = vector.multi_reduction <add>, %24, %cst_12 [1] : vector<8x128xf32> to vector<8xf32>
    %26 = vector.shape_cast %25 : vector<8xf32> to vector<8x1xf32>
    %c0_13 = arith.constant 0 : index
    %c0_14 = arith.constant 0 : index
    %27 = vector.load %arg5[%c0_13, %c0_14] : memref<8x1xf32, #tpu.memory_space<vmem>>, vector<8x1xf32>
    tpu.vector_store %arg5[%c0_13, %c0_14], %26 {strides = array<i32>} : memref<8x1xf32, #tpu.memory_space<vmem>>, vector<8x1xf32>,
    %28 = arith.truncf %19 : vector<8x128xf32> to vector<8x128xbf16>
    %c0_15 = arith.constant 0 : index
    %c0_16 = arith.constant 0 : index
    %29 = vector.load %arg7[%c0_15, %c0_16] : memref<8x128xbf16, #tpu.memory_space<vmem>>, vector<8x128xbf16>
    tpu.vector_store %arg7[%c0_15, %c0_16], %28 {strides = array<i32>} : memref<8x128xbf16, #tpu.memory_space<vmem>>, vector<8x128xbf16>,
    return
  }
  func.func @transform_0(%arg0: i32, %arg1: memref<1xi32, #tpu.memory_space<smem>>) -> (i32, i32) {
    %c0_i32 = arith.constant 0 : i32
    %c0_i32_0 = arith.constant 0 : i32
    %c0_i32_1 = arith.constant 0 : i32
    return %c0_i32, %c0_i32_0 : i32, i32
  }
  func.func @transform_1(%arg0: i32, %arg1: memref<1xi32, #tpu.memory_space<smem>>) -> (i32, i32) {
    %c0_i32 = arith.constant 0 : i32
    %c0_i32_0 = arith.constant 0 : i32
    %c0_i32_1 = arith.constant 0 : i32
    return %c0_i32, %c0_i32_0 : i32, i32
  }
  func.func @transform_2(%arg0: i32, %arg1: memref<1xi32, #tpu.memory_space<smem>>) -> (i32, i32) {
    %c0_i32 = arith.constant 0 : i32
    %c0_i32_0 = arith.constant 0 : i32
    return %arg0, %c0_i32 : i32, i32
  }
  func.func @transform_3(%arg0: i32, %arg1: memref<1xi32, #tpu.memory_space<smem>>) -> (i32, i32) {
    %c0_i32 = arith.constant 0 : i32
    %c0_i32_0 = arith.constant 0 : i32
    %c0_i32_1 = arith.constant 0 : i32
    return %c0_i32, %c0_i32_0 : i32, i32
  }
  func.func @transform_4(%arg0: i32, %arg1: memref<1xi32, #tpu.memory_space<smem>>) -> (i32, i32) {
    %c0_i32 = arith.constant 0 : i32
    %c0_i32_0 = arith.constant 0 : i32
    return %c0_i32, %arg0 : i32, i32
  }
  func.func @transform_5(%arg0: i32, %arg1: memref<1xi32, #tpu.memory_space<smem>>) -> (i32, i32) {
    %c0 = arith.constant 0 : index
    %0 = memref.load %arg1[%c0] : memref<1xi32, #tpu.memory_space<smem>>
    %c0_i32 = arith.constant 0 : i32
    %c0_i32_0 = arith.constant 0 : i32
    return %0, %c0_i32 : i32, i32
  }
}

</mosaic_0001>

<bundles_post_ra>
// kernel: moco_forward.5
= control target key start
LH: loop header
LB: loop body
LE: loop exit
PB: predicated region body
PF: predicated region fallthrough
CT: control target
= control target key end

     0   :  { %s577_s23 = smov 0   ;;  %s611_s0 = inlined_call_operand.<no memory space> [shape: s32[1], index: 0, kind: input, shape index: {}]   ;;  %s612_s1 = inlined_call_operand.vmem [shape: f32[8,128], index: 1, kind: input, shape index: {}]   ;;  %s613_s2 = inlined_call_operand.vmem [shape: f32[8,128], index: 2, kind: input, shape index: {}]   ;;  %s614_s3 = inlined_call_operand.vmem [shape: bf16[256,128], index: 3, kind: input, shape index: {}, may-alias: {3,6}]   ;;  %s615_s4 = inlined_call_operand.vmem [shape: f32[8,1], index: 4, kind: output, shape index: {0}]   ;;  %s616_s5 = inlined_call_operand.vmem [shape: f32[8,256], index: 5, kind: output, shape index: {1}]   ;;  %s617_s6 = inlined_call_operand.vmem [shape: bf16[256,128], index: 6, kind: output, shape index: {2}, may-alias: {3,6}]  }
   0x1   :  { %12 = sst [smem:[#allocation3]] %s611_s0 }
   0x2 LB: > { %s583_s24 = sadd.s32 4294967295, %s535_s23   ;;  %p463_p0 = scmp.ge.s32.totalorder %s535_s23, 1  ;;  %s535_s23 = sphi %s577_s23, %s18_s23  }
   0x3   : > { %p192_p1 = scmp.lt.s32.totalorder %s535_s23, 3 }
   0x5   : > { %p193_p2 = pnand %p463_p0, %p192_p1 }
   0x6   : > { %s464_s28 = sshll.u32 (!%p193_p2), %s583_s24, 4  ;;  %s234_s9 = sld [smem:[#allocation3]] (!%p193_p2) }
   0x7   : > { %196 = sbr.rel (%p193_p2) target bundleno = 374 (0x176), region = 32  ;;  %p225_p3 = scmp.lt.s32.totalorder (!%p193_p2), %s464_s28, 31 }
   0x8   : > { %p230_p5 = scmp.lt.s32.totalorder (!%p193_p2), %s583_s24, 1 }
   0xc   : > { %v241_v0 = vld [vmem:[%s612_s1] sm:$0xff]  ;;  %v537_v3 = vmov 0.0   ;;  %s619_s28 = smov (!%p225_p3, %s464_s28), 31  ;;  %vm538_vm0 = vmmov 0   ;;  %p235_p4 = scmp.lt.s32.totalorder %s234_s9, 31  ;;  %vm365_vm1 = vcmask 7168  }
   0xd   : > { %v242_v1 = vld [vmem:[%s613_s2] sm:$0xff]  ;;  %v243_v2 = vmul.f32 %v241_v0, %v241_v0  ;;  %487 = vmatprep.subr.bf16.mxu0 %v537_v3  ;;  %s465_s29 = sshll.u32 %s619_s28, 2  ;;  %503 = vmatprep.mubr.msk.bf16.mxu0 %vm538_vm0, %v537_v3  ;;  %s623_s24 = smov (!%p230_p5, %s583_s24), 1 }
   0xe   : > { %v250_v4 = vmul.f32 %v242_v1, %v242_v1  ;;  %s228_s8 = scalar_lea.vmem %s614_s3, %s465_s29  ;;  %s621_s9 = smov (!%p235_p4, %s234_s9), 31 }
   0xf   : > { %244 = vadd.xlane.f32.xlu0 %v243_v2  ;;  %v517_v5 = vld [vmem:[%s228_s8 + $0x38] sm:$0xff]   ;;  %v518_v6 = vld [vmem:[%s228_s8 + $0x30] sm:$0xff]   ;;  %v519_v7 = vld [vmem:[%s228_s8 + $0x28] sm:$0xff]   ;;  %s467_s10 = sshll.u32 %s621_s9, 2  ;;  %s466_s16 = sshll.u32 %s623_s24, 3 }
  0x10   : > { %488 = vmatpush3.bf16.xpose.msra.mxu0 %v517_v5  ;;  %v520_v8 = vld [vmem:[%s228_s8 + $0x20] sm:$0xff]   ;;  %v521_v9 = vld [vmem:[%s228_s8 + $0x18] sm:$0xff]   ;;  %v522_v10 = vld [vmem:[%s228_s8 + $0x10] sm:$0xff]   ;;  %s238_s13 = scalar_lea.vmem %s617_s6, %s467_s10  ;;  %s233_s19 = scalar_lea.vmem %s616_s5, %s466_s16 }
  0x11   : > { %489 = vmatprep.subr.bf16.mxu0 %v537_v3  ;;  %v523_v11 = vld [vmem:[%s228_s8 + $0x8] sm:$0xff]   ;;  %v524_v12 = vld [vmem:[%s228_s8] sm:$0xff]  }
  0x13   : > { %251 = vadd.xlane.f32.xlu0 %v250_v4 }
  0x18   : > { %490 = vmatpush3.bf16.xpose.msra.mxu0 %v518_v6 }
  0x19   : > { %491 = vmatprep.subr.bf16.mxu0 %v537_v3 }
  0x20   : > { %492 = vmatpush3.bf16.xpose.msra.mxu0 %v519_v7 }
  0x21   : > { %493 = vmatprep.subr.bf16.mxu0 %v537_v3 }
  0x28   : > { %494 = vmatpush3.bf16.xpose.msra.mxu0 %v520_v8 }
  0x29   : > { %495 = vmatprep.subr.bf16.mxu0 %v537_v3 }
  0x30   : > { %496 = vmatpush3.bf16.xpose.msra.mxu0 %v521_v9 }
  0x31   : > { %497 = vmatprep.subr.bf16.mxu0 %v537_v3 }
  0x38   : > { %498 = vmatpush3.bf16.xpose.msra.mxu0 %v522_v10 }
  0x39   : > { %499 = vmatprep.subr.bf16.mxu0 %v537_v3 }
  0x40   : > { %500 = vmatpush3.bf16.xpose.msra.mxu0 %v523_v11 }
  0x41   : > { %501 = vmatprep.subr.bf16.mxu0 %v537_v3 }
  0x48   : > { %502 = vmatpush3.bf16.xpose.msra.mxu0 %v524_v12 }
  0x98   : > { %v245_v13 = vpop.xlane.xlu0 %244 }
  0x99   : > { %v246_v14 = vmax.f32 %v245_v13, 1e-24 }
  0x9b   : > { %525 = vrsqrt.f32 %v246_v14 }
  0x9c   : > { %v252_v15 = vpop.xlane.xlu0 %251 }
  0x9d   : > { %v253_v16 = vmax.f32 %v252_v15, 1e-24 }
  0x9f   : > { %527 = vrsqrt.f32 %v253_v16 }
  0xa8   : > { %v526_v17 = vpop.eup %525 }
  0xa9   : > { %v248_v18 = vmul.f32 10.0, %v526_v17 }
  0xab   : > { %v249_v19 = vmul.f32 %v248_v18, %v241_v0 }
  0xac   : > { %v528_v20 = vpop.eup %527 }
  0xad   : > { %v256_v21 = vpack.c.bf16 %v249_v19, %v249_v19  ;;  %v255_v22 = vmul.f32 %v528_v20, %v242_v1 }
  0xaf   : > { %504 = vmatmul.mubr.bf16.vlgmr.msra.gmra.mxu0 %v256_v21  ;;  %v362_v23 = vmul.f32 %v255_v22, %v249_v19  ;;  %v367_v24 = vpack.c.bf16 %v255_v22, %v255_v22 }
  0xb1   : > { %363 = vadd.xlane.f32.xlu1 %v362_v23  ;;  %368 = vst [vmem:[%s238_s13] sm:$0xf] %v367_v24 }
 0x13a   : > { %v364_v25 = vpop.xlane.xlu1 %363 }
 0x13b   : > { %366 = vst.msk [vmem:[%s615_s4] sm:$0xff] %vm365_vm1, %v364_v25 }
 0x16f   : > { %v355_v26 = vpop.f32.mrf.mxu0 }
 0x170   : > { %361 = vst [vmem:[%s233_s19] sm:$0xff] %v355_v26 }
 0x171   : > { %v505_v27 = vpop.f32.mrf.mxu0 }
 0x173   : > { %v358_v28 = vpop.f32.mrf.mxu0 }
 0x175   : > { %v506_v29 = vpop.f32.mrf.mxu0 }
 0x176 PF: > { %s18_s23 = sadd.s32 1, %s535_s23  }
 0x177   : > { %p15_p6 = scmp.ge.s32.totalorder %s18_s23, 4  }
 0x179   :  { %17 = sbr.rel (!%p15_p6) target bundleno = 2 (0x2), region = 82 }

// kernel: moco_forward.3
= control target key start
LH: loop header
LB: loop body
LE: loop exit
PB: predicated region body
PF: predicated region fallthrough
CT: control target
= control target key end

     0   :  { %v9390_v1 = vmov 0   ;;  %vm196_vm0 = vcmask 261120   ;;  %vm1848_vm1 = vcmask 1043456   ;;  %vm1751_vm2 = vcmask 64512   ;;  %s9375_s0 = inlined_call_operand.vmem [shape: bf16[32,512], index: 0, kind: input, shape index: {}]   ;;  %s9376_s1 = inlined_call_operand.vmem [shape: bf16[32,512], index: 1, kind: input, shape index: {}]   ;;  %s9377_s2 = inlined_call_operand.vmem [shape: bf16[8,512], index: 2, kind: input, shape index: {}]   ;;  %s9378_s4 = inlined_call_operand.vmem [shape: f32[1,512], index: 4, kind: input, shape index: {}]   ;;  %s9379_s5 = inlined_call_operand.vmem [shape: f32[1,512], index: 5, kind: input, shape index: {}]   ;;  %s9380_s3 = inlined_call_operand.vmem [shape: bf16[8,512], index: 3, kind: input, shape index: {}]   ;;  %s9381_s6 = inlined_call_operand.vmem [shape: bf16[512,256], index: 6, kind: input, shape index: {}]   ;;  %s9382_s8 = inlined_call_operand.vmem [shape: bf16[256,128], index: 8, kind: input, shape index: {}]   ;;  %s9383_s7 = inlined_call_operand.vmem [shape: f32[1,256], index: 7, kind: input, shape index: {}]   ;;  %s9384_s9 = inlined_call_operand.vmem [shape: f32[1,128], index: 9, kind: input, shape index: {}]   ;;  %s9385_s10 = inlined_call_operand.vmem [shape: f32[8,128], index: 10, kind: output, shape index: {}]  }
   0x1   :  { %v5359_v0 = vld [vmem:[%s9375_s0 + $0xc] ss:$16 sps:$4 sm:$0xff]   ;;  %325 = vmatprep.mubr.bf16.mxu0 %v9390_v1  ;;  %625 = vmatprep.mubr.bf16.mxu1 %v9390_v1  ;;  %v5361_v2 = vld [vmem:[%s9375_s0] ss:$16 sps:$4 sm:$0xff]   ;;  %v5370_v5 = vld [vmem:[%s9376_s1 + $0x24] ss:$16 sps:$4 sm:$0xff]  }
   0x2   :  { %140 = vxpose.xlu1.c.b16.start [1/2] (short) %v5359_v0, 128  ;;  %92 = vxpose.xlu0.c.b16.start [1/2] (short) %v5361_v2, 128  ;;  %v5365_v3 = vld [vmem:[%s9375_s0 + $0x2c] ss:$16 sps:$4 sm:$0xff]   ;;  %v5366_v4 = vld [vmem:[%s9375_s0 + $0x20] ss:$16 sps:$4 sm:$0xff]   ;;  %v5373_v7 = vld [vmem:[%s9376_s1 + $0x4] ss:$16 sps:$4 sm:$0xff]  }
   0x3   :  { %v5372_v6 = vld [vmem:[%s9376_s1 + $0x20] ss:$16 sps:$4 sm:$0xff]   ;;  %305 = vmatprep.subr.bf16.mxu0 %v5370_v5  ;;  %5354 = vmatprep.subr.bf16.mxu1 %v5370_v5  ;;  %v5379_v9 = vld [vmem:[%s9376_s1 + $0x2c] ss:$16 sps:$4 sm:$0xff]   ;;  %v5376_v10 = vld [vmem:[%s9375_s0 + $0x8] ss:$16 sps:$4 sm:$0xff]  }
   0x4   :  { %306 = vmatpush1.bf16.msra.mxu0 %v5372_v6  ;;  %v5375_v8 = vld [vmem:[%s9376_s1] ss:$16 sps:$4 sm:$0xff]   ;;  %5356 = vmatpush1.bf16.msra.mxu1 %v5372_v6  ;;  %v5369_v11 = vld [vmem:[%s9375_s0 + $0x4] ss:$16 sps:$4 sm:$0xff]   ;;  %v5363_v12 = vld [vmem:[%s9375_s0 + $0x28] ss:$16 sps:$4 sm:$0xff]  }
   0x5   :  { %307 = vmatprep.subr.bf16.mxu0 %v5373_v7  ;;  %5355 = vmatprep.subr.bf16.mxu1 %v5373_v7  ;;  %v5368_v13 = vld [vmem:[%s9375_s0 + $0x24] ss:$16 sps:$4 sm:$0xff]   ;;  %v5377_v24 = vld [vmem:[%s9376_s1 + $0x28] ss:$16 sps:$4 sm:$0xff]   ;;  %v5382_v26 = vld [vmem:[%s9376_s1 + $0xc] ss:$16 sps:$4 sm:$0xff]  }
   0x6   :  { %141 = vxpose.xlu1.c.b16.end [2/2] (short) %v5365_v3, 128  ;;  %93 = vxpose.xlu0.c.b16.end [2/2] (short) %v5366_v4, 128  ;;  %v5380_v27 = vld [vmem:[%s9376_s1 + $0x8] ss:$16 sps:$4 sm:$0xff]   ;;  %v1127_v6 = vld [vmem:[%s9377_s2] sm:$0xff] }
   0x8   :  { %308 = vmatpush1.bf16.msra.mxu0 %v5375_v8  ;;  %5357 = vmatpush1.bf16.msra.mxu1 %v5375_v8  ;;  %v5793_v8 = vcombine.high %v1127_v6, %v1127_v6 }
   0x9   :  { %658 = vmatprep.subr.bf16.mxu1 %v5379_v9 }
  0x1f   :  { %124 = vxpose.xlu1.c.b16.start [1/2] (short) %v5376_v10, 128  ;;  %108 = vxpose.xlu0.c.b16.start [1/2] (short) %v5369_v11, 128  ;;  %v5800_v10 = vcombine.low %v1127_v6, %v1127_v6 }
  0x23   :  { %125 = vxpose.xlu1.c.b16.end [2/2] (short) %v5363_v12, 128  ;;  %109 = vxpose.xlu0.c.b16.end [2/2] (short) %v5368_v13, 128 }
  0x3c   :  { %1703 = vxpose.xlu1.c.b16.start.end [1/1] (short) %v5793_v8, 128  ;;  %1687 = vxpose.xlu0.c.b16.start.end [1/1] (short) %v5800_v10, 128 }
  0x64   :  { %v5610_v14 = vpop.trf.xlu1  ;;  %v100_v15 = vpop.trf.xlu0 }
  0x65   :  { %5047 = vmatmul.mubr.msk.bf16.vlgmr.msra.gmra.mxu0 %vm196_vm0, %v100_v15 }
  0x66   :  { %335 = vmatprep.mubr.bf16.mxu0 %v9390_v1 }
  0x68   :  { %v5614_v16 = vpop.trf.xlu1  ;;  %v101_v17 = vpop.trf.xlu0 }
  0x6c   :  { %v5616_v18 = vpop.trf.xlu1  ;;  %v102_v20 = vpop.trf.xlu0 }
  0x6d   :  { %5048 = vmatmul.mubr.msk.bf16.gmra.mxu0 %vm196_vm0, %v101_v17 }
  0x6e   :  { %345 = vmatprep.mubr.bf16.mxu0 %v9390_v1 }
  0x70   :  { %v5620_v19 = vpop.trf.xlu1  ;;  %v103_v23 = vpop.trf.xlu0 }
  0x74   :  { %v5622_v21 = vpop.trf.xlu1  ;;  %v104_v29 = vpop.trf.xlu0 }
  0x75   :  { %5049 = vmatmul.mubr.msk.bf16.gmra.mxu0 %vm196_vm0, %v102_v20 }
  0x76   :  { %355 = vmatprep.mubr.bf16.mxu0 %v9390_v1 }
  0x78   :  { %v5626_v22 = vpop.trf.xlu1  ;;  %v105_v30 = vpop.trf.xlu0 }
  0x7c   :  { %v5631_v25 = vpop.trf.xlu1  ;;  %v106_v31 = vpop.trf.xlu0 }
  0x7d   :  { %5077 = vmatmul.mubr.msk.bf16.vlgmr.msra.gmra.mxu1 %vm196_vm0, %v5631_v25  ;;  %5050 = vmatmul.mubr.msk.bf16.gmra.mxu0 %vm196_vm0, %v103_v23 }
  0x7e   :  { %635 = vmatprep.mubr.bf16.mxu1 %v9390_v1  ;;  %365 = vmatprep.mubr.bf16.mxu0 %v9390_v1 }
  0x7f   :  { %659 = vmatpush1.bf16.msra.mxu1 %v5377_v24 }
  0x80   :  { %660 = vmatprep.subr.bf16.mxu1 %v5382_v26  ;;  %v5644_v28 = vpop.trf.xlu1  ;;  %v107_v32 = vpop.trf.xlu0 }
  0x83   :  { %661 = vmatpush1.bf16.msra.mxu1 %v5380_v27 }
  0x84   :  { %v116_v33 = vpop.trf.xlu0  ;;  %v132_v41 = vpop.trf.xlu1 }
  0x85   :  { %5078 = vmatmul.mubr.msk.bf16.gmra.mxu1 %vm196_vm0, %v5644_v28  ;;  %5051 = vmatmul.mubr.msk.bf16.gmra.mxu0 %vm196_vm0, %v104_v29 }
  0x86   :  { %678 = vmatprep.mubr.bf16.mxu1 %v9390_v1  ;;  %375 = vmatprep.mubr.bf16.mxu0 %v9390_v1 }
  0x88   :  { %v117_v34 = vpop.trf.xlu0  ;;  %v133_v42 = vpop.trf.xlu1 }
  0x8c   :  { %v118_v35 = vpop.trf.xlu0  ;;  %v134_v43 = vpop.trf.xlu1 }
  0x8d   :  { %5079 = vmatmul.mubr.msk.bf16.vlgmr.msra.gmra.mxu1 %vm196_vm0, %v100_v15  ;;  %5052 = vmatmul.mubr.msk.bf16.gmra.mxu0 %vm196_vm0, %v105_v30 }
  0x8e   :  { %688 = vmatprep.mubr.bf16.mxu1 %v9390_v1  ;;  %385 = vmatprep.mubr.bf16.mxu0 %v9390_v1 }
  0x90   :  { %v119_v36 = vpop.trf.xlu0  ;;  %v135_v44 = vpop.trf.xlu1 }
  0x94   :  { %v120_v37 = vpop.trf.xlu0  ;;  %v136_v45 = vpop.trf.xlu1 }
  0x95   :  { %5080 = vmatmul.mubr.msk.bf16.gmra.mxu1 %vm196_vm0, %v101_v17  ;;  %5053 = vmatmul.mubr.msk.bf16.gmra.mxu0 %vm196_vm0, %v106_v31 }
  0x96   :  { %698 = vmatprep.mubr.bf16.mxu1 %v9390_v1  ;;  %395 = vmatprep.mubr.bf16.mxu0 %v9390_v1 }
  0x98   :  { %v121_v38 = vpop.trf.xlu0  ;;  %v137_v46 = vpop.trf.xlu1 }
  0x9c   :  { %v122_v39 = vpop.trf.xlu0  ;;  %v138_v47 = vpop.trf.xlu1 }
  0x9d   :  { %5081 = vmatmul.mubr.msk.bf16.gmra.mxu1 %vm196_vm0, %v102_v20  ;;  %5054 = vmatmul.mubr.msk.bf16.gmra.mxu0 %vm196_vm0, %v107_v32 }
  0x9e   :  { %708 = vmatprep.mubr.bf16.mxu1 %v9390_v1  ;;  %405 = vmatprep.mubr.bf16.mxu0 %v9390_v1 }
  0xa0   :  { %v123_v40 = vpop.trf.xlu0  ;;  %v139_v48 = vpop.trf.xlu1 }
  0xa5   :  { %5082 = vmatmul.mubr.msk.bf16.gmra.mxu1 %vm196_vm0, %v103_v23  ;;  %5055 = vmatmul.mubr.msk.bf16.gmra.mxu0 %vm196_vm0, %v116_v33 }
  0xa6   :  { %718 = vmatprep.mubr.bf16.mxu1 %v9390_v1  ;;  %415 = vmatprep.mubr.bf16.mxu0 %v9390_v1 }
  0xad   :  { %5083 = vmatmul.mubr.msk.bf16.gmra.mxu1 %vm196_vm0, %v104_v29  ;;  %5056 = vmatmul.mubr.msk.bf16.gmra.mxu0 %vm196_vm0, %v117_v34 }
  0xae   :  { %728 = vmatprep.mubr.bf16.mxu1 %v9390_v1  ;;  %425 = vmatprep.mubr.bf16.mxu0 %v9390_v1 }
  0xb5   :  { %5084 = vmatmul.mubr.msk.bf16.gmra.mxu1 %vm196_vm0, %v105_v30  ;;  %5057 = vmatmul.mubr.msk.bf16.gmra.mxu0 %vm196_vm0, %v118_v35 }
  0xb6   :  { %738 = vmatprep.mubr.bf16.mxu1 %v9390_v1  ;;  %435 = vmatprep.mubr.bf16.mxu0 %v9390_v1 }
  0xbd   :  { %5085 = vmatmul.mubr.msk.bf16.gmra.mxu1 %vm196_vm0, %v106_v31  ;;  %5058 = vmatmul.mubr.msk.bf16.gmra.mxu0 %vm196_vm0, %v119_v36 }
  0xbe   :  { %748 = vmatprep.mubr.bf16.mxu1 %v9390_v1  ;;  %445 = vmatprep.mubr.bf16.mxu0 %v9390_v1 }
  0xc5   :  { %5086 = vmatmul.mubr.msk.bf16.gmra.mxu1 %vm196_vm0, %v107_v32  ;;  %5059 = vmatmul.mubr.msk.bf16.gmra.mxu0 %vm196_vm0, %v120_v37 }
  0xc6   :  { %758 = vmatprep.mubr.bf16.mxu1 %v9390_v1  ;;  %455 = vmatprep.mubr.bf16.mxu0 %v9390_v1 }
  0xcd   :  { %5087 = vmatmul.mubr.msk.bf16.gmra.mxu1 %vm196_vm0, %v116_v33  ;;  %5060 = vmatmul.mubr.msk.bf16.gmra.mxu0 %vm196_vm0, %v121_v38 }
  0xce   :  { %768 = vmatprep.mubr.bf16.mxu1 %v9390_v1  ;;  %465 = vmatprep.mubr.bf16.mxu0 %v9390_v1 }
  0xd5   :  { %5088 = vmatmul.mubr.msk.bf16.gmra.mxu1 %vm196_vm0, %v117_v34  ;;  %5061 = vmatmul.mubr.msk.bf16.gmra.mxu0 %vm196_vm0, %v122_v39 }
  0xd6   :  { %778 = vmatprep.mubr.bf16.mxu1 %v9390_v1  ;;  %475 = vmatprep.mubr.bf16.mxu0 %v9390_v1 }
  0xdd   :  { %5089 = vmatmul.mubr.msk.bf16.gmra.mxu1 %vm196_vm0, %v118_v35  ;;  %5062 = vmatmul.mubr.msk.bf16.gmra.mxu0 %vm196_vm0, %v123_v40 }
  0xde   :  { %788 = vmatprep.mubr.bf16.mxu1 %v9390_v1  ;;  %485 = vmatprep.mubr.bf16.mxu0 %v9390_v1 }
  0xe5   :  { %5090 = vmatmul.mubr.msk.bf16.gmra.mxu1 %vm196_vm0, %v119_v36  ;;  %5063 = vmatmul.mubr.msk.bf16.gmra.mxu0 %vm196_vm0, %v132_v41 }
  0xe6   :  { %798 = vmatprep.mubr.bf16.mxu1 %v9390_v1  ;;  %495 = vmatprep.mubr.bf16.mxu0 %v9390_v1 }
  0xed   :  { %5091 = vmatmul.mubr.msk.bf16.gmra.mxu1 %vm196_vm0, %v120_v37  ;;  %5064 = vmatmul.mubr.msk.bf16.gmra.mxu0 %vm196_vm0, %v133_v42 }
  0xee   :  { %808 = vmatprep.mubr.bf16.mxu1 %v9390_v1  ;;  %505 = vmatprep.mubr.bf16.mxu0 %v9390_v1 }
  0xf5   :  { %5092 = vmatmul.mubr.msk.bf16.gmra.mxu1 %vm196_vm0, %v121_v38  ;;  %5065 = vmatmul.mubr.msk.bf16.gmra.mxu0 %vm196_vm0, %v134_v43 }
  0xf6   :  { %818 = vmatprep.mubr.bf16.mxu1 %v9390_v1  ;;  %515 = vmatprep.mubr.bf16.mxu0 %v9390_v1 }
  0xfd   :  { %5093 = vmatmul.mubr.msk.bf16.gmra.mxu1 %vm196_vm0, %v122_v39  ;;  %5066 = vmatmul.mubr.msk.bf16.gmra.mxu0 %vm196_vm0, %v135_v44 }
  0xfe   :  { %828 = vmatprep.mubr.bf16.mxu1 %v9390_v1  ;;  %525 = vmatprep.mubr.bf16.mxu0 %v9390_v1 }
 0x105   :  { %5094 = vmatmul.mubr.msk.bf16.gmra.mxu1 %vm196_vm0, %v123_v40  ;;  %5067 = vmatmul.mubr.msk.bf16.gmra.mxu0 %vm196_vm0, %v136_v45 }
 0x106   :  { %838 = vmatprep.mubr.bf16.mxu1 %v9390_v1  ;;  %535 = vmatprep.mubr.bf16.mxu0 %v9390_v1 }
 0x10d   :  { %5095 = vmatmul.mubr.msk.bf16.gmra.mxu1 %vm196_vm0, %v132_v41  ;;  %5068 = vmatmul.mubr.msk.bf16.gmra.mxu0 %vm196_vm0, %v137_v46 }
 0x10e   :  { %848 = vmatprep.mubr.bf16.mxu1 %v9390_v1  ;;  %545 = vmatprep.mubr.bf16.mxu0 %v9390_v1 }
 0x115   :  { %5096 = vmatmul.mubr.msk.bf16.gmra.mxu1 %vm196_vm0, %v133_v42  ;;  %5069 = vmatmul.mubr.msk.bf16.gmra.mxu0 %vm196_vm0, %v138_v47 }
 0x116   :  { %858 = vmatprep.mubr.bf16.mxu1 %v9390_v1  ;;  %555 = vmatprep.mubr.bf16.mxu0 %v9390_v1 }
 0x11d   :  { %5097 = vmatmul.mubr.msk.bf16.gmra.mxu1 %vm196_vm0, %v134_v43  ;;  %5070 = vmatmul.mubr.msk.bf16.gmra.mxu0 %vm196_vm0, %v139_v48 }
 0x11e   :  { %868 = vmatprep.mubr.bf16.mxu1 %v9390_v1  ;;  %565 = vmatprep.mubr.bf16.mxu0 %v9390_v1 }
 0x125   :  { %5098 = vmatmul.mubr.msk.bf16.gmra.mxu1 %vm196_vm0, %v135_v44  ;;  %v5728_v49 = vpop.f32.mrf.mxu0  ;;  %5071 = vmatmul.mubr.msk.bf16.gmra.mxu0 %vm196_vm0, %v5610_v14 }
 0x126   :  { %9740 = vst [vmem:[#allocation2_spill] sm:$0xff] %v5728_v49  ;;  %878 = vmatprep.mubr.bf16.mxu1 %v9390_v1  ;;  %575 = vmatprep.mubr.bf16.mxu0 %v9390_v1 }
 0x127   :  { %v5734_v50 = vpop.f32.mrf.mxu0 }
 0x128   :  { %9741 = vst [vmem:[#allocation3_spill] sm:$0xff] %v5734_v50 }
 0x129   :  { %v5736_v51 = vpop.f32.mrf.mxu0 }
 0x12a   :  { %9742 = vst [vmem:[#allocation4_spill] sm:$0xff] %v5736_v51 }
 0x12b   :  { %v5738_v52 = vpop.f32.mrf.mxu0 }
 0x12c   :  { %9743 = vst [vmem:[#allocation5_spill] sm:$0xff] %v5738_v52 }
 0x12d   :  { %5099 = vmatmul.mubr.msk.bf16.gmra.mxu1 %vm196_vm0, %v136_v45  ;;  %v5741_v53 = vpop.f32.mrf.mxu0  ;;  %5072 = vmatmul.mubr.msk.bf16.gmra.mxu0 %vm196_vm0, %v5614_v16 }
 0x12e   :  { %9744 = vst [vmem:[#allocation6_spill] sm:$0xff] %v5741_v53  ;;  %888 = vmatprep.mubr.bf16.mxu1 %v9390_v1  ;;  %585 = vmatprep.mubr.bf16.mxu0 %v9390_v1 }
 0x12f   :  { %v5747_v54 = vpop.f32.mrf.mxu0 }
 0x130   :  { %9745 = vst [vmem:[#allocation7_spill] sm:$0xff] %v5747_v54 }
 0x131   :  { %v5749_v55 = vpop.f32.mrf.mxu0 }
 0x132   :  { %9746 = vst [vmem:[#allocation8_spill] sm:$0xff] %v5749_v55 }
 0x133   :  { %v5751_v56 = vpop.f32.mrf.mxu0 }
 0x134   :  { %9747 = vst [vmem:[#allocation9_spill] sm:$0xff] %v5751_v56 }
 0x135   :  { %5100 = vmatmul.mubr.msk.bf16.gmra.mxu1 %vm196_vm0, %v137_v46  ;;  %v5754_v57 = vpop.f32.mrf.mxu0  ;;  %5073 = vmatmul.mubr.msk.bf16.gmra.mxu0 %vm196_vm0, %v5616_v18 }
 0x136   :  { %9748 = vst [vmem:[#allocation10_spill] sm:$0xff] %v5754_v57  ;;  %898 = vmatprep.mubr.bf16.mxu1 %v9390_v1  ;;  %595 = vmatprep.mubr.bf16.mxu0 %v9390_v1 }
 0x137   :  { %v5760_v58 = vpop.f32.mrf.mxu0 }
 0x138   :  { %9749 = vst [vmem:[#allocation11_spill] sm:$0xff] %v5760_v58 }
 0x139   :  { %v5762_v59 = vpop.f32.mrf.mxu0 }
 0x13a   :  { %9750 = vst [vmem:[#allocation12_spill] sm:$0xff] %v5762_v59 }
 0x13b   :  { %v5764_v60 = vpop.f32.mrf.mxu0 }
 0x13c   :  { %9751 = vst [vmem:[#allocation13_spill] sm:$0xff] %v5764_v60 }
 0x13d   :  { %v5766_v61 = vpop.f32.mrf.mxu1  ;;  %5101 = vmatmul.mubr.msk.bf16.gmra.mxu1 %vm196_vm0, %v138_v47  ;;  %v5769_v62 = vpop.f32.mrf.mxu0  ;;  %5074 = vmatmul.mubr.msk.bf16.gmra.mxu0 %vm196_vm0, %v5620_v19 }
 0x13e   :  { %9752 = vst [vmem:[#allocation14_spill] sm:$0xff] %v5766_v61  ;;  %9753 = vst [vmem:[#allocation15_spill] sm:$0xff] %v5769_v62  ;;  %908 = vmatprep.mubr.bf16.mxu1 %v9390_v1  ;;  %605 = vmatprep.mubr.bf16.mxu0 %v9390_v1 }
 0x13f   :  { %v5774_v63 = vpop.f32.mrf.mxu1  ;;  %v5777_v0 = vpop.f32.mrf.mxu0 }
 0x140   :  { %9754 = vst [vmem:[#allocation16_spill] sm:$0xff] %v5774_v63  ;;  %9755 = vst [vmem:[#allocation17_spill] sm:$0xff] %v5777_v0 }
 0x141   :  { %v5779_v2 = vpop.f32.mrf.mxu1  ;;  %v5781_v3 = vpop.f32.mrf.mxu0 }
 0x142   :  { %9756 = vst [vmem:[#allocation18_spill] sm:$0xff] %v5779_v2  ;;  %9757 = vst [vmem:[#allocation19_spill] sm:$0xff] %v5781_v3 }
 0x143   :  { %v5783_v4 = vpop.f32.mrf.mxu1  ;;  %v5785_v5 = vpop.f32.mrf.mxu0 }
 0x144   :  { %9758 = vst [vmem:[#allocation20_spill] sm:$0xff] %v5783_v4  ;;  %9759 = vst [vmem:[#allocation21_spill] sm:$0xff] %v5785_v5 }
 0x145   :  { %v5790_v7 = vpop.f32.mrf.mxu1  ;;  %5102 = vmatmul.mubr.msk.bf16.gmra.mxu1 %vm196_vm0, %v139_v48  ;;  %v5795_v9 = vpop.f32.mrf.mxu0  ;;  %5075 = vmatmul.mubr.msk.bf16.gmra.mxu0 %vm196_vm0, %v5622_v21 }
 0x146   :  { %9760 = vst [vmem:[#allocation22_spill] sm:$0xff] %v5790_v7  ;;  %9761 = vst [vmem:[#allocation23_spill] sm:$0xff] %v5795_v9  ;;  %918 = vmatprep.mubr.bf16.mxu1 %v9390_v1  ;;  %615 = vmatprep.mubr.bf16.mxu0 %v9390_v1 }
 0x147   :  { %v5802_v11 = vpop.f32.mrf.mxu1  ;;  %v5806_v12 = vpop.f32.mrf.mxu0 }
 0x148   :  { %9762 = vst [vmem:[#allocation24_spill] sm:$0xff] %v5802_v11  ;;  %9763 = vst [vmem:[#allocation25_spill] sm:$0xff] %v5806_v12 }
 0x149   :  { %v5809_v13 = vpop.f32.mrf.mxu1  ;;  %v5811_v15 = vpop.f32.mrf.mxu0 }
 0x14a   :  { %9764 = vst [vmem:[#allocation26_spill] sm:$0xff] %v5809_v13  ;;  %9765 = vst [vmem:[#allocation27_spill] sm:$0xff] %v5811_v15 }
 0x14b   :  { %v5813_v17 = vpop.f32.mrf.mxu1  ;;  %v5815_v20 = vpop.f32.mrf.mxu0 }
 0x14c   :  { %9766 = vst [vmem:[#allocation28_spill] sm:$0xff] %v5813_v17  ;;  %9767 = vst [vmem:[#allocation29_spill] sm:$0xff] %v5815_v20 }
 0x14d   :  { %v5817_v23 = vpop.f32.mrf.mxu1  ;;  %5103 = vmatmul.mubr.msk.bf16.gmra.mxu1 %vm196_vm0, %v5610_v14  ;;  %v5821_v24 = vpop.f32.mrf.mxu0  ;;  %5076 = vmatmul.mubr.msk.bf16.gmra.mxu0 %vm196_vm0, %v5626_v22 }
 0x14e   :  { %9768 = vst [vmem:[#allocation30_spill] sm:$0xff] %v5817_v23  ;;  %9769 = vst [vmem:[#allocation31_spill] sm:$0xff] %v5821_v24  ;;  %928 = vmatprep.mubr.bf16.mxu1 %v9390_v1  ;;  %1175 = vmatprep.mubr.bf16.mxu0 %v5793_v8 }
 0x14f   :  { %v5826_v26 = vpop.f32.mrf.mxu1  ;;  %v5829_v27 = vpop.f32.mrf.mxu0 }
 0x150   :  { %9770 = vst [vmem:[#allocation32_spill] sm:$0xff] %v5826_v26  ;;  %9771 = vst [vmem:[#allocation33_spill] sm:$0xff] %v5829_v27 }
 0x151   :  { %v5831_v29 = vpop.f32.mrf.mxu1  ;;  %v5833_v30 = vpop.f32.mrf.mxu0 }
 0x152   :  { %9772 = vst [vmem:[#allocation34_spill] sm:$0xff] %v5831_v29  ;;  %9773 = vst [vmem:[#allocation35_spill] sm:$0xff] %v5833_v30 }
 0x153   :  { %v5835_v31 = vpop.f32.mrf.mxu1  ;;  %v5837_v14 = vpop.f32.mrf.mxu0 }
 0x154   :  { %9774 = vst [vmem:[#allocation36_spill] sm:$0xff] %v5835_v31  ;;  %9775 = vst [vmem:[#allocation37_spill] sm:$0xff] %v5837_v14 }
 0x155   :  { %v5839_v32 = vpop.f32.mrf.mxu1  ;;  %5104 = vmatmul.mubr.msk.bf16.gmra.mxu1 %vm196_vm0, %v5614_v16  ;;  %v5843_v33 = vpop.f32.mrf.mxu0 }
 0x156   :  { %9776 = vst [vmem:[#allocation38_spill] sm:$0xff] %v5839_v32  ;;  %9777 = vst [vmem:[#allocation39_spill] sm:$0xff] %v5843_v33  ;;  %938 = vmatprep.mubr.bf16.mxu1 %v9390_v1 }
 0x157   :  { %v5846_v34 = vpop.f32.mrf.mxu1  ;;  %v5848_v35 = vpop.f32.mrf.mxu0 }
 0x158   :  { %9778 = vst [vmem:[#allocation40_spill] sm:$0xff] %v5846_v34  ;;  %9779 = vst [vmem:[#allocation41_spill] sm:$0xff] %v5848_v35 }
 0x159   :  { %v5850_v36 = vpop.f32.mrf.mxu1  ;;  %v5852_v37 = vpop.f32.mrf.mxu0 }
 0x15a   :  { %9780 = vst [vmem:[#allocation42_spill] sm:$0xff] %v5850_v36  ;;  %9781 = vst [vmem:[#allocation43_spill] sm:$0xff] %v5852_v37 }
 0x15b   :  { %v5854_v38 = vpop.f32.mrf.mxu1  ;;  %v5856_v39 = vpop.f32.mrf.mxu0 }
 0x15c   :  { %9782 = vst [vmem:[#allocation44_spill] sm:$0xff] %v5854_v38  ;;  %9783 = vst [vmem:[#allocation45_spill] sm:$0xff] %v5856_v39  ;;  %v5894_v2 = vpack.c.bf16 %v5856_v39, %v5848_v35 }
 0x15d   :  { %v5858_v40 = vpop.f32.mrf.mxu1  ;;  %5105 = vmatmul.mubr.msk.bf16.gmra.mxu1 %vm196_vm0, %v5616_v18  ;;  %v5862_v16 = vpop.f32.mrf.mxu0 }
 0x15e   :  { %9784 = vst [vmem:[#allocation46_spill] sm:$0xff] %v5858_v40  ;;  %9785 = vst [vmem:[#allocation47_spill] sm:$0xff] %v5862_v16  ;;  %948 = vmatprep.mubr.bf16.mxu1 %v9390_v1 }
 0x15f   :  { %v5865_v41 = vpop.f32.mrf.mxu1  ;;  %v5867_v42 = vpop.f32.mrf.mxu0  ;;  %9796 = vst [vmem:[#allocation58_spill] sm:$0xff] %v5894_v2 }
 0x160   :  { %9786 = vst [vmem:[#allocation48_spill] sm:$0xff] %v5865_v41  ;;  %9787 = vst [vmem:[#allocation49_spill] sm:$0xff] %v5867_v42 }
 0x161   :  { %v5869_v43 = vpop.f32.mrf.mxu1  ;;  %v5871_v44 = vpop.f32.mrf.mxu0 }
 0x162   :  { %9788 = vst [vmem:[#allocation50_spill] sm:$0xff] %v5869_v43  ;;  %9789 = vst [vmem:[#allocation51_spill] sm:$0xff] %v5871_v44  ;;  %v5887_v48 = vpack.c.bf16 %v5871_v44, %v5862_v16  ;;  %v5907_v44 = vpack.c.bf16 %v5852_v37, %v5843_v33  ;;  %v5913_v16 = vpack.c.bf16 %v5837_v14, %v5829_v27  ;;  %v9808_v14 = vmov 0  }
 0x163   :  { %v5873_v45 = vpop.f32.mrf.mxu1  ;;  %v5875_v46 = vpop.f32.mrf.mxu0  ;;  %v5927_v37 = vpack.c.bf16 %v5833_v30, %v5821_v24  ;;  %v5934_v27 = vpack.c.bf16 %v5815_v20, %v5806_v12  ;;  %v5946_v30 = vpack.c.bf16 %v5811_v15, %v5795_v9  ;;  %v5952_v20 = vpack.c.bf16 %v5785_v5, %v5777_v0 }
 0x164   :  { %9790 = vst [vmem:[#allocation52_spill] sm:$0xff] %v5873_v45  ;;  %9791 = vst [vmem:[#allocation53_spill] sm:$0xff] %v5875_v46  ;;  %v5879_v47 = vpack.c.bf16 %v5875_v46, %v5867_v42  ;;  %v5966_v15 = vpack.c.bf16 %v5781_v3, %v5769_v62  ;;  %v5973_v5 = vpack.c.bf16 %v5764_v60, %v5760_v58 }
 0x165   :  { %v5881_v18 = vpop.f32.mrf.mxu1  ;;  %5106 = vmatmul.mubr.msk.bf16.gmra.mxu1 %vm196_vm0, %v5620_v19  ;;  %9794 = vst [vmem:[#allocation56_spill] sm:$0xff] %v5887_v48  ;;  %v5889_v6 = vpop.f32.mrf.mxu0  ;;  %9800 = vst [vmem:[#allocation62_spill] sm:$0xff] %v5907_v44  ;;  %v5985_v3 = vpack.c.bf16 %v5762_v59, %v5754_v57  ;;  %v5991_v60 = vpack.c.bf16 %v5751_v56, %v5747_v54  ;;  %v6005_v59 = vpack.c.bf16 %v5749_v55, %v5741_v53 }
 0x166   :  { %9792 = vst [vmem:[#allocation54_spill] sm:$0xff] %v5879_v47  ;;  %9793 = vst [vmem:[#allocation55_spill] sm:$0xff] %v5881_v18  ;;  %958 = vmatprep.mubr.bf16.mxu1 %v9390_v1  ;;  %1143 = vmatprep.subr.bf16.mxu0 %v5879_v47  ;;  %v6012_v56 = vpack.c.bf16 %v5738_v52, %v5734_v50  ;;  %v6024_v55 = vpack.c.bf16 %v5736_v51, %v5728_v49 }
 0x167   :  { %9795 = vst [vmem:[#allocation57_spill] sm:$0xff] %v5889_v6  ;;  %v5897_v46 = vpop.f32.mrf.mxu1  ;;  %v5899_v42 = vpop.f32.mrf.mxu0  ;;  %1144 = vmatpush1.bf16.msra.mxu0 %v5887_v48  ;;  %9802 = vst [vmem:[#allocation64_spill] sm:$0xff] %v5913_v16 }
 0x168   :  { %9797 = vst [vmem:[#allocation59_spill] sm:$0xff] %v5897_v46  ;;  %9798 = vst [vmem:[#allocation60_spill] sm:$0xff] %v5899_v42  ;;  %1145 = vmatprep.subr.bf16.mxu0 %v5894_v2 }
 0x169   :  { %v5903_v19 = vpop.f32.mrf.mxu1  ;;  %v5909_v1 = vpop.f32.mrf.mxu0  ;;  %9806 = vst [vmem:[#allocation68_spill] sm:$0xff] %v5927_v37  ;;  %9809 = vst [vmem:[#allocation70_spill] sm:$0xff] %v5934_v27 }
 0x16a   :  { %9799 = vst [vmem:[#allocation61_spill] sm:$0xff] %v5903_v19  ;;  %9801 = vst [vmem:[#allocation63_spill] sm:$0xff] %v5909_v1 }
 0x16b   :  { %v5915_v39 = vpop.f32.mrf.mxu1  ;;  %v5917_v35 = vpop.f32.mrf.mxu0  ;;  %1146 = vmatpush1.bf16.msra.mxu0 %v5907_v44  ;;  %9813 = vst [vmem:[#allocation74_spill] sm:$0xff] %v5946_v30  ;;  %9815 = vst [vmem:[#allocation76_spill] sm:$0xff] %v5952_v20 }
 0x16c   :  { %9803 = vst [vmem:[#allocation65_spill] sm:$0xff] %v5915_v39  ;;  %9804 = vst [vmem:[#allocation66_spill] sm:$0xff] %v5917_v35  ;;  %1147 = vmatprep.subr.bf16.mxu0 %v5913_v16 }
 0x16d   :  { %v5921_v61 = vpop.f32.mrf.mxu1  ;;  %5107 = vmatmul.mubr.msk.bf16.gmra.mxu1 %vm196_vm0, %v5622_v21  ;;  %v5929_v33 = vpop.f32.mrf.mxu0  ;;  %9819 = vst [vmem:[#allocation80_spill] sm:$0xff] %v5966_v15  ;;  %9821 = vst [vmem:[#allocation82_spill] sm:$0xff] %v5973_v5 }
 0x16e   :  { %9805 = vst [vmem:[#allocation67_spill] sm:$0xff] %v5921_v61  ;;  %9807 = vst [vmem:[#allocation69_spill] sm:$0xff] %v5929_v33  ;;  %968 = vmatprep.mubr.bf16.mxu1 %v9808_v14 }
 0x16f   :  { %v5936_v44 = vpop.f32.mrf.mxu1  ;;  %v5938_v16 = vpop.f32.mrf.mxu0  ;;  %1148 = vmatpush1.bf16.msra.mxu0 %v5927_v37  ;;  %9825 = vst [vmem:[#allocation86_spill] sm:$0xff] %v5985_v3  ;;  %9827 = vst [vmem:[#allocation88_spill] sm:$0xff] %v5991_v60 }
 0x170   :  { %9810 = vst [vmem:[#allocation71_spill] sm:$0xff] %v5936_v44  ;;  %9811 = vst [vmem:[#allocation72_spill] sm:$0xff] %v5938_v16  ;;  %1149 = vmatprep.subr.bf16.mxu0 %v5934_v27 }
 0x171   :  { %v5942_v21 = vpop.f32.mrf.mxu1  ;;  %v5948_v24 = vpop.f32.mrf.mxu0  ;;  %9831 = vst [vmem:[#allocation92_spill] sm:$0xff] %v6005_v59  ;;  %9833 = vst [vmem:[#allocation94_spill] sm:$0xff] %v6012_v56 }
 0x172   :  { %9812 = vst [vmem:[#allocation73_spill] sm:$0xff] %v5942_v21  ;;  %9814 = vst [vmem:[#allocation75_spill] sm:$0xff] %v5948_v24 }
 0x173   :  { %v5954_v12 = vpop.f32.mrf.mxu1  ;;  %v5956_v2 = vpop.f32.mrf.mxu0  ;;  %1150 = vmatpush1.bf16.msra.mxu0 %v5946_v30  ;;  %9837 = vst [vmem:[#allocation98_spill] sm:$0xff] %v6024_v55 }
 0x174   :  { %9816 = vst [vmem:[#allocation77_spill] sm:$0xff] %v5954_v12  ;;  %9817 = vst [vmem:[#allocation78_spill] sm:$0xff] %v5956_v2  ;;  %1151 = vmatprep.subr.bf16.mxu0 %v5952_v20 }
 0x175   :  { %v5960_v27 = vpop.f32.mrf.mxu1  ;;  %5108 = vmatmul.mubr.msk.bf16.gmra.mxu1 %vm196_vm0, %v5626_v22  ;;  %v5968_v9 = vpop.f32.mrf.mxu0 }
 0x176   :  { %9818 = vst [vmem:[#allocation79_spill] sm:$0xff] %v5960_v27  ;;  %9820 = vst [vmem:[#allocation81_spill] sm:$0xff] %v5968_v9  ;;  %978 = vmatprep.mubr.bf16.mxu1 %v9808_v14 }
 0x177   :  { %v5975_v0 = vpop.f32.mrf.mxu1  ;;  %v5977_v20 = vpop.f32.mrf.mxu0  ;;  %1152 = vmatpush1.bf16.msra.mxu0 %v5966_v15 }
 0x178   :  { %9822 = vst [vmem:[#allocation83_spill] sm:$0xff] %v5975_v0  ;;  %9823 = vst [vmem:[#allocation84_spill] sm:$0xff] %v5977_v20  ;;  %1153 = vmatprep.subr.bf16.mxu0 %v5973_v5 }
 0x179   :  { %v5981_v22 = vpop.f32.mrf.mxu1  ;;  %v5987_v62 = vpop.f32.mrf.mxu0 }
 0x17a   :  { %9824 = vst [vmem:[#allocation85_spill] sm:$0xff] %v5981_v22  ;;  %9826 = vst [vmem:[#allocation87_spill] sm:$0xff] %v5987_v62 }
 0x17b   :  { %v5993_v58 = vpop.f32.mrf.mxu1  ;;  %v5995_v30 = vpop.f32.mrf.mxu0  ;;  %1154 = vmatpush1.bf16.msra.mxu0 %v5985_v3 }
 0x17c   :  { %9828 = vst [vmem:[#allocation89_spill] sm:$0xff] %v5993_v58  ;;  %9829 = vst [vmem:[#allocation90_spill] sm:$0xff] %v5995_v30  ;;  %1155 = vmatprep.subr.bf16.mxu0 %v5991_v60 }
 0x17d   :  { %v5999_v5 = vpop.f32.mrf.mxu1  ;;  %5109 = vmatmul.mubr.msk.bf16.gmra.mxu1 %vm196_vm0, %v5631_v25  ;;  %v6007_v57 = vpop.f32.mrf.mxu0 }
 0x17e   :  { %9830 = vst [vmem:[#allocation91_spill] sm:$0xff] %v5999_v5  ;;  %9832 = vst [vmem:[#allocation93_spill] sm:$0xff] %v6007_v57  ;;  %988 = vmatprep.mubr.bf16.mxu1 %v9808_v14 }
 0x17f   :  { %v6014_v54 = vpop.f32.mrf.mxu1  ;;  %v6016_v60 = vpop.f32.mrf.mxu0  ;;  %1156 = vmatpush1.bf16.msra.mxu0 %v6005_v59 }
 0x180   :  { %9834 = vst [vmem:[#allocation95_spill] sm:$0xff] %v6014_v54  ;;  %9835 = vst [vmem:[#allocation96_spill] sm:$0xff] %v6016_v60  ;;  %1157 = vmatprep.subr.bf16.mxu0 %v6012_v56 }
 0x181   :  { %v6020_v25 = vpop.f32.mrf.mxu1  ;;  %v6026_v53 = vpop.f32.mrf.mxu0 }
 0x182   :  { %9836 = vst [vmem:[#allocation97_spill] sm:$0xff] %v6020_v25  ;;  %9838 = vst [vmem:[#allocation99_spill] sm:$0xff] %v6026_v53 }
 0x183   :  { %v6028_v14 = vpop.f32.mrf.mxu1  ;;  %v6030_v52 = vpop.f32.mrf.mxu0  ;;  %1158 = vmatpush1.bf16.msra.mxu0 %v6024_v55 }
 0x184   :  { %9839 = vst [vmem:[#allocation100_spill] sm:$0xff] %v6028_v14  ;;  %9840 = vst [vmem:[#allocation101_spill] sm:$0xff] %v6030_v52 }
 0x185   :  { %v6033_v50 = vpop.f32.mrf.mxu1  ;;  %5110 = vmatmul.mubr.msk.bf16.gmra.mxu1 %vm196_vm0, %v5644_v28  ;;  %v6037_v56 = vpop.f32.mrf.mxu0 }
 0x186   :  { %9841 = vst [vmem:[#allocation102_spill] sm:$0xff] %v6033_v50  ;;  %9842 = vst [vmem:[#allocation103_spill] sm:$0xff] %v6037_v56 }
 0x187   :  { %v6039_v59 = vpop.f32.mrf.mxu1  ;;  %v6041_v3 = vpop.f32.mrf.mxu0 }
 0x188   :  { %9843 = vst [vmem:[#allocation104_spill] sm:$0xff] %v6039_v59  ;;  %9844 = vst [vmem:[#allocation105_spill] sm:$0xff] %v6041_v3 }
 0x189   :  { %v6043_v51 = vpop.f32.mrf.mxu1  ;;  %v6045_v49 = vpop.f32.mrf.mxu0 }
 0x18a   :  { %9845 = vst [vmem:[#allocation106_spill] sm:$0xff] %v6043_v51  ;;  %9846 = vst [vmem:[#allocation107_spill] sm:$0xff] %v6045_v49 }
 0x18b   :  { %v6047_v15 = vpop.f32.mrf.mxu1  ;;  %v6049_v37 = vpop.f32.mrf.mxu0 }
 0x18c   :  { %9847 = vst [vmem:[#allocation108_spill] sm:$0xff] %v6047_v15  ;;  %9848 = vst [vmem:[#allocation109_spill] sm:$0xff] %v6049_v37 }
 0x18d   :  { %v6051_v55 = vpop.f32.mrf.mxu1  ;;  %v6053_v4 = vpop.f32.mrf.mxu0 }
 0x18e   :  { %9849 = vst [vmem:[#allocation110_spill] sm:$0xff] %v6051_v55  ;;  %9850 = vst [vmem:[#allocation111_spill] sm:$0xff] %v6053_v4 }
 0x18f   :  { %v6055_v63 = vpop.f32.mrf.mxu1  ;;  %v6057_v28 = vpop.f32.mrf.mxu0 }
 0x190   :  { %9851 = vst [vmem:[#allocation112_spill] sm:$0xff] %v6055_v63  ;;  %9852 = vst [vmem:[#allocation113_spill] sm:$0xff] %v6057_v28 }
 0x191   :  { %v6059_v48 = vpop.f32.mrf.mxu1  ;;  %v6061_v13 = vpop.f32.mrf.mxu0 }
 0x192   :  { %9853 = vst [vmem:[#allocation114_spill] sm:$0xff] %v6059_v48  ;;  %9854 = vst [vmem:[#allocation115_spill] sm:$0xff] %v6061_v13 }
 0x193   :  { %v6063_v7 = vpop.f32.mrf.mxu1  ;;  %v6065_v47 = vpop.f32.mrf.mxu0 }
 0x194   :  { %9855 = vst [vmem:[#allocation116_spill] sm:$0xff] %v6063_v7  ;;  %9856 = vst [vmem:[#allocation117_spill] sm:$0xff] %v6065_v47 }
 0x195   :  { %v6067_v17 = vpop.f32.mrf.mxu1  ;;  %v6069_v11 = vpop.f32.mrf.mxu0 }
 0x196   :  { %9857 = vst [vmem:[#allocation118_spill] sm:$0xff] %v6067_v17  ;;  %9858 = vst [vmem:[#allocation119_spill] sm:$0xff] %v6069_v11 }
 0x197   :  { %v6071_v29 = vpop.f32.mrf.mxu1  ;;  %v6073_v55 = vpop.f32.mrf.mxu0 }
 0x198   :  { %9859 = vst [vmem:[#allocation120_spill] sm:$0xff] %v6071_v29  ;;  %9860 = vst [vmem:[#allocation121_spill] sm:$0xff] %v6073_v55 }
 0x199   :  { %v6075_v23 = vpop.f32.mrf.mxu1  ;;  %v6077_v63 = vpop.f32.mrf.mxu0 }
 0x19a   :  { %9861 = vst [vmem:[#allocation122_spill] sm:$0xff] %v6075_v23  ;;  %9862 = vst [vmem:[#allocation123_spill] sm:$0xff] %v6077_v63 }
 0x19b   :  { %v6079_v31 = vpop.f32.mrf.mxu1  ;;  %v6081_v48 = vpop.f32.mrf.mxu0 }
 0x19c   :  { %9863 = vst [vmem:[#allocation124_spill] sm:$0xff] %v6079_v31  ;;  %9864 = vst [vmem:[#allocation125_spill] sm:$0xff] %v6081_v48 }
 0x19d   :  { %v6083_v26 = vpop.f32.mrf.mxu1  ;;  %v6085_v7 = vpop.f32.mrf.mxu0 }
 0x19e   :  { %9865 = vst [vmem:[#allocation126_spill] sm:$0xff] %v6083_v26  ;;  %9866 = vst [vmem:[#allocation127_spill] sm:$0xff] %v6085_v7 }
 0x19f   :  { %v6087_v36 = vpop.f32.mrf.mxu1  ;;  %v6089_v17 = vpop.f32.mrf.mxu0 }
 0x1a0   :  { %9867 = vst [vmem:[#allocation128_spill] sm:$0xff] %v6087_v36  ;;  %9868 = vst [vmem:[#allocation129_spill] sm:$0xff] %v6089_v17 }
 0x1a1   :  { %v6091_v32 = vpop.f32.mrf.mxu1  ;;  %v6093_v29 = vpop.f32.mrf.mxu0 }
 0x1a2   :  { %9869 = vst [vmem:[#allocation130_spill] sm:$0xff] %v6091_v32  ;;  %9870 = vst [vmem:[#allocation131_spill] sm:$0xff] %v6093_v29  ;;  %v6107_v26 = vpack.c.bf16 %v6093_v29, %v6085_v7  ;;  %v6113_v32 = vpack.c.bf16 %v6081_v48, %v6073_v55  ;;  %v6126_v29 = vpack.c.bf16 %v6077_v63, %v6069_v11  ;;  %v1128_v55 = vld [vmem:[%s9377_s2 + $0x8] sm:$0xff] }
 0x1a3   :  { %v6095_v38 = vpop.f32.mrf.mxu1  ;;  %v6097_v23 = vpop.f32.mrf.mxu0  ;;  %v6132_v7 = vpack.c.bf16 %v6065_v47, %v6057_v28  ;;  %v6147_v11 = vcombine.low %v1128_v55, %v1128_v55  ;;  %v6151_v47 = vpack.c.bf16 %v6061_v13, %v6053_v4  ;;  %v6172_v4 = vpack.c.bf16 %v6045_v49, %v6037_v56 }
 0x1a4   :  { %9871 = vst [vmem:[#allocation132_spill] sm:$0xff] %v6095_v38  ;;  %9872 = vst [vmem:[#allocation133_spill] sm:$0xff] %v6097_v23  ;;  %v6101_v31 = vpack.c.bf16 %v6097_v23, %v6089_v17  ;;  %v6190_v49 = vpack.c.bf16 %v6026_v53, %v6007_v57  ;;  %v6208_v53 = vpack.c.bf16 %v5987_v62, %v5968_v9 }
 0x1a5   :  { %v6103_v34 = vpop.f32.mrf.mxu1  ;;  %9875 = vst [vmem:[#allocation136_spill] sm:$0xff] %v6107_v26  ;;  %v6109_v36 = vpop.f32.mrf.mxu0  ;;  %9877 = vst [vmem:[#allocation138_spill] sm:$0xff] %v6113_v32  ;;  %1719 = vxpose.xlu0.c.b16.start.end [1/1] (short) %v6147_v11, 128  ;;  %v6226_v62 = vpack.c.bf16 %v5948_v24, %v5929_v33  ;;  %v6244_v24 = vpack.c.bf16 %v5909_v1, %v5889_v6  ;;  %v6262_v1 = vpack.c.bf16 %v6043_v51, %v6033_v50 }
 0x1a6   :  { %9873 = vst [vmem:[#allocation134_spill] sm:$0xff] %v6101_v31  ;;  %9874 = vst [vmem:[#allocation135_spill] sm:$0xff] %v6103_v34  ;;  %1159 = vmatprep.subr.bf16.mxu0 %v6101_v31  ;;  %v6282_v50 = vpack.c.bf16 %v6020_v25, %v5999_v5  ;;  %v6300_v25 = vpack.c.bf16 %v5981_v22, %v5960_v27  ;;  %v6318_v22 = vpack.c.bf16 %v5942_v21, %v5921_v61 }
 0x1a7   :  { %9876 = vst [vmem:[#allocation137_spill] sm:$0xff] %v6109_v36  ;;  %v6116_v38 = vpop.f32.mrf.mxu1  ;;  %v6118_v43 = vpop.f32.mrf.mxu0  ;;  %1160 = vmatpush2.bf16.msra.mxu0 %v6107_v26  ;;  %9881 = vst [vmem:[#allocation142_spill] sm:$0xff] %v6126_v29  ;;  %v6336_v21 = vpack.c.bf16 %v5903_v19, %v5881_v18 }
 0x1a8   :  { %9878 = vst [vmem:[#allocation139_spill] sm:$0xff] %v6116_v38  ;;  %9879 = vst [vmem:[#allocation140_spill] sm:$0xff] %v6118_v43  ;;  %1161 = vmatprep.subr.bf16.mxu0 %v6113_v32  ;;  %v6142_v32 = vcombine.high %v1128_v55, %v1128_v55 }
 0x1a9   :  { %v6122_v23 = vpop.f32.mrf.mxu1  ;;  %v6128_v17 = vpop.f32.mrf.mxu0  ;;  %9887 = vst [vmem:[#allocation148_spill] sm:$0xff] %v6147_v11  ;;  %9888 = vst [vmem:[#allocation149_spill] sm:$0xff] %v6151_v47 }
 0x1aa   :  { %9880 = vst [vmem:[#allocation141_spill] sm:$0xff] %v6122_v23  ;;  %9882 = vst [vmem:[#allocation143_spill] sm:$0xff] %v6128_v17  ;;  %1216 = vmatprep.mubr.bf16.mxu1 %v6142_v32  ;;  %1735 = vxpose.xlu1.c.b16.start.end [1/1] (short) %v6142_v32, 128 }
 0x1ab   :  { %v6134_v48 = vpop.f32.mrf.mxu1  ;;  %v6139_v26 = vpop.f32.mrf.mxu0  ;;  %1162 = vmatpush2.bf16.msra.mxu0 %v6126_v29  ;;  %9885 = vst [vmem:[#allocation146_spill] sm:$0xff] %v6142_v32  ;;  %v6159_v29 = vpack.c.bf16 %v6049_v37, %v6041_v3  ;;  %9894 = vst [vmem:[#allocation155_spill] sm:$0xff] %v6172_v4  ;;  %v6178_v37 = vpack.c.bf16 %v6030_v52, %v6016_v60  ;;  %v6196_v52 = vpack.c.bf16 %v5995_v30, %v5977_v20 }
 0x1ac   :  { %9883 = vst [vmem:[#allocation144_spill] sm:$0xff] %v6134_v48  ;;  %9884 = vst [vmem:[#allocation145_spill] sm:$0xff] %v6139_v26  ;;  %1163 = vmatprep.subr.bf16.mxu0 %v6132_v7  ;;  %v6214_v30 = vpack.c.bf16 %v5956_v2, %v5938_v16  ;;  %v6232_v2 = vpack.c.bf16 %v5917_v35, %v5899_v42  ;;  %v6250_v35 = vpack.c.bf16 %v6047_v15, %v6039_v59 }
 0x1ad   :  { %v6145_v63 = vpop.f32.mrf.mxu1  ;;  %v6153_v28 = vpop.f32.mrf.mxu0  ;;  %9890 = vst [vmem:[#allocation151_spill] sm:$0xff] %v6159_v29  ;;  %9896 = vst [vmem:[#allocation157_spill] sm:$0xff] %v6178_v37  ;;  %v6268_v15 = vpack.c.bf16 %v6028_v14, %v6014_v54  ;;  %v6288_v54 = vpack.c.bf16 %v5993_v58, %v5975_v0  ;;  %v6306_v58 = vpack.c.bf16 %v5954_v12, %v5936_v44 }
 0x1ae   :  { %9886 = vst [vmem:[#allocation147_spill] sm:$0xff] %v6145_v63  ;;  %9889 = vst [vmem:[#allocation150_spill] sm:$0xff] %v6153_v28  ;;  %v6324_v12 = vpack.c.bf16 %v5915_v39, %v5897_v46  ;;  %v6342_v39 = vpack.c.bf16 %v5873_v45, %v5865_v41 }
 0x1af   :  { %v6161_v31 = vpop.f32.mrf.mxu1  ;;  %v6164_v55 = vpop.f32.mrf.mxu0  ;;  %1164 = vmatpush2.bf16.msra.mxu0 %v6151_v47  ;;  %9900 = vst [vmem:[#allocation161_spill] sm:$0xff] %v6190_v49  ;;  %9902 = vst [vmem:[#allocation163_spill] sm:$0xff] %v6196_v52 }
 0x1b0   :  { %9891 = vst [vmem:[#allocation152_spill] sm:$0xff] %v6161_v31  ;;  %9892 = vst [vmem:[#allocation153_spill] sm:$0xff] %v6164_v55  ;;  %1165 = vmatprep.subr.bf16.mxu0 %v6159_v29 }
 0x1b1   :  { %v6168_v13 = vpop.f32.mrf.mxu1  ;;  %v6174_v32 = vpop.f32.mrf.mxu0  ;;  %9906 = vst [vmem:[#allocation167_spill] sm:$0xff] %v6208_v53  ;;  %9908 = vst [vmem:[#allocation169_spill] sm:$0xff] %v6214_v30 }
 0x1b2   :  { %9893 = vst [vmem:[#allocation154_spill] sm:$0xff] %v6168_v13  ;;  %9895 = vst [vmem:[#allocation156_spill] sm:$0xff] %v6174_v32 }
 0x1b3   :  { %v6180_v3 = vpop.f32.mrf.mxu1  ;;  %v6182_v11 = vpop.f32.mrf.mxu0  ;;  %1166 = vmatpush2.bf16.msra.mxu0 %v6172_v4  ;;  %9912 = vst [vmem:[#allocation173_spill] sm:$0xff] %v6226_v62  ;;  %9914 = vst [vmem:[#allocation175_spill] sm:$0xff] %v6232_v2 }
 0x1b4   :  { %9897 = vst [vmem:[#allocation158_spill] sm:$0xff] %v6180_v3  ;;  %9898 = vst [vmem:[#allocation159_spill] sm:$0xff] %v6182_v11  ;;  %1167 = vmatprep.subr.bf16.mxu0 %v6178_v37 }
 0x1b5   :  { %v6186_v29 = vpop.f32.mrf.mxu1  ;;  %v6192_v56 = vpop.f32.mrf.mxu0  ;;  %9918 = vst [vmem:[#allocation179_spill] sm:$0xff] %v6244_v24  ;;  %9920 = vst [vmem:[#allocation181_spill] sm:$0xff] %v6250_v35 }
 0x1b6   :  { %9899 = vst [vmem:[#allocation160_spill] sm:$0xff] %v6186_v29  ;;  %9901 = vst [vmem:[#allocation162_spill] sm:$0xff] %v6192_v56 }
 0x1b7   :  { %v6198_v60 = vpop.f32.mrf.mxu1  ;;  %v6200_v47 = vpop.f32.mrf.mxu0  ;;  %1168 = vmatpush2.bf16.msra.mxu0 %v6190_v49  ;;  %9924 = vst [vmem:[#allocation185_spill] sm:$0xff] %v6262_v1  ;;  %9926 = vst [vmem:[#allocation187_spill] sm:$0xff] %v6268_v15 }
 0x1b8   :  { %9903 = vst [vmem:[#allocation164_spill] sm:$0xff] %v6198_v60  ;;  %9904 = vst [vmem:[#allocation165_spill] sm:$0xff] %v6200_v47  ;;  %1169 = vmatprep.subr.bf16.mxu0 %v6196_v52 }
 0x1b9   :  { %v6204_v37 = vpop.f32.mrf.mxu1  ;;  %v6210_v57 = vpop.f32.mrf.mxu0  ;;  %9930 = vst [vmem:[#allocation191_spill] sm:$0xff] %v6282_v50  ;;  %9932 = vst [vmem:[#allocation193_spill] sm:$0xff] %v6288_v54 }
 0x1ba   :  { %9905 = vst [vmem:[#allocation166_spill] sm:$0xff] %v6204_v37  ;;  %9907 = vst [vmem:[#allocation168_spill] sm:$0xff] %v6210_v57 }
 0x1bb   :  { %v6216_v20 = vpop.f32.mrf.mxu1  ;;  %v6218_v4 = vpop.f32.mrf.mxu0  ;;  %1170 = vmatpush2.bf16.msra.mxu0 %v6208_v53  ;;  %9936 = vst [vmem:[#allocation197_spill] sm:$0xff] %v6300_v25  ;;  %9938 = vst [vmem:[#allocation199_spill] sm:$0xff] %v6306_v58 }
 0x1bc   :  { %9909 = vst [vmem:[#allocation170_spill] sm:$0xff] %v6216_v20  ;;  %9910 = vst [vmem:[#allocation171_spill] sm:$0xff] %v6218_v4  ;;  %1171 = vmatprep.subr.bf16.mxu0 %v6214_v30 }
 0x1bd   :  { %v6222_v52 = vpop.f32.mrf.mxu1  ;;  %v6228_v9 = vpop.f32.mrf.mxu0  ;;  %9942 = vst [vmem:[#allocation203_spill] sm:$0xff] %v6318_v22  ;;  %9944 = vst [vmem:[#allocation205_spill] sm:$0xff] %v6324_v12 }
 0x1be   :  { %9911 = vst [vmem:[#allocation172_spill] sm:$0xff] %v6222_v52  ;;  %9913 = vst [vmem:[#allocation174_spill] sm:$0xff] %v6228_v9 }
 0x1bf   :  { %v6234_v16 = vpop.f32.mrf.mxu1  ;;  %v6236_v49 = vpop.f32.mrf.mxu0  ;;  %1172 = vmatpush2.bf16.msra.mxu0 %v6226_v62  ;;  %9948 = vst [vmem:[#allocation209_spill] sm:$0xff] %v6336_v21  ;;  %9950 = vst [vmem:[#allocation211_spill] sm:$0xff] %v6342_v39 }
 0x1c0   :  { %9915 = vst [vmem:[#allocation176_spill] sm:$0xff] %v6234_v16  ;;  %9916 = vst [vmem:[#allocation177_spill] sm:$0xff] %v6236_v49  ;;  %1173 = vmatprep.subr.bf16.mxu0 %v6232_v2 }
 0x1c1   :  { %v6240_v30 = vpop.f32.mrf.mxu1  ;;  %v6246_v33 = vpop.f32.mrf.mxu0 }
 0x1c2   :  { %9917 = vst [vmem:[#allocation178_spill] sm:$0xff] %v6240_v30  ;;  %9919 = vst [vmem:[#allocation180_spill] sm:$0xff] %v6246_v33 }
 0x1c3   :  { %v6252_v42 = vpop.f32.mrf.mxu1  ;;  %v6254_v53 = vpop.f32.mrf.mxu0  ;;  %1174 = vmatpush2.bf16.msra.mxu0 %v6244_v24 }
 0x1c4   :  { %9921 = vst [vmem:[#allocation182_spill] sm:$0xff] %v6252_v42  ;;  %9922 = vst [vmem:[#allocation183_spill] sm:$0xff] %v6254_v53  ;;  %1225 = vmatprep.subr.bf16.mxu0 %v6250_v35 }
 0x1c5   :  { %v6258_v2 = vpop.f32.mrf.mxu1  ;;  %v6264_v6 = vpop.f32.mrf.mxu0 }
 0x1c6   :  { %9923 = vst [vmem:[#allocation184_spill] sm:$0xff] %v6258_v2  ;;  %9925 = vst [vmem:[#allocation186_spill] sm:$0xff] %v6264_v6  ;;  %1176 = vmatmul.mubr.bf16.vlgmr.msra.gmra.mxu0 %v5800_v10 }
 0x1c7   :  { %v6270_v59 = vpop.f32.mrf.mxu1  ;;  %v6273_v62 = vpop.f32.mrf.mxu0  ;;  %1226 = vmatpush1.bf16.msra.mxu0 %v6262_v1  ;;  %1257 = vmatprep.mubr.bf16.mxu0 %v5793_v8 }
 0x1c8   :  { %9927 = vst [vmem:[#allocation188_spill] sm:$0xff] %v6270_v59  ;;  %9928 = vst [vmem:[#allocation189_spill] sm:$0xff] %v6273_v62  ;;  %1227 = vmatprep.subr.bf16.mxu0 %v6268_v15 }
 0x1c9   :  { %v6278_v51 = vpop.f32.mrf.mxu1  ;;  %v6284_v14 = vpop.f32.mrf.mxu0 }
 0x1ca   :  { %9929 = vst [vmem:[#allocation190_spill] sm:$0xff] %v6278_v51  ;;  %9931 = vst [vmem:[#allocation192_spill] sm:$0xff] %v6284_v14 }
 0x1cb   :  { %v6290_v35 = vpop.f32.mrf.mxu1  ;;  %v6292_v24 = vpop.f32.mrf.mxu0  ;;  %1228 = vmatpush1.bf16.msra.mxu0 %v6282_v50  ;;  %v9958_v50 = vld [vmem:[#allocation44_spill] sm:$0xff] }
 0x1cc   :  { %9933 = vst [vmem:[#allocation194_spill] sm:$0xff] %v6290_v35  ;;  %9934 = vst [vmem:[#allocation195_spill] sm:$0xff] %v6292_v24  ;;  %1229 = vmatprep.subr.bf16.mxu0 %v6288_v54 }
 0x1cd   :  { %v6296_v15 = vpop.f32.mrf.mxu1  ;;  %v6302_v5 = vpop.f32.mrf.mxu0 }
 0x1ce   :  { %9935 = vst [vmem:[#allocation196_spill] sm:$0xff] %v6296_v15  ;;  %9937 = vst [vmem:[#allocation198_spill] sm:$0xff] %v6302_v5 }
 0x1cf   :  { %v6308_v0 = vpop.f32.mrf.mxu1  ;;  %v6310_v1 = vpop.f32.mrf.mxu0  ;;  %1230 = vmatpush1.bf16.msra.mxu0 %v6300_v25 }
 0x1d0   :  { %9939 = vst [vmem:[#allocation200_spill] sm:$0xff] %v6308_v0  ;;  %9940 = vst [vmem:[#allocation201_spill] sm:$0xff] %v6310_v1  ;;  %1231 = vmatprep.subr.bf16.mxu0 %v6306_v58  ;;  %v9964_v0 = vld [vmem:[#allocation42_spill] sm:$0xff] }
 0x1d1   :  { %v6314_v54 = vpop.f32.mrf.mxu1  ;;  %v6320_v27 = vpop.f32.mrf.mxu0 }
 0x1d2   :  { %9941 = vst [vmem:[#allocation202_spill] sm:$0xff] %v6314_v54  ;;  %9943 = vst [vmem:[#allocation204_spill] sm:$0xff] %v6320_v27  ;;  %v9957_v54 = vld [vmem:[#allocation40_spill] sm:$0xff] }
 0x1d3   :  { %v6326_v44 = vpop.f32.mrf.mxu1  ;;  %v6328_v15 = vpop.f32.mrf.mxu0  ;;  %1232 = vmatpush1.bf16.msra.mxu0 %v6318_v22  ;;  %v9954_v22 = vld [vmem:[#allocation50_spill] sm:$0xff]  ;;  %v6360_v45 = vpack.c.bf16 %v9958_v50, %v9957_v54 }
 0x1d4   :  { %9945 = vst [vmem:[#allocation206_spill] sm:$0xff] %v6326_v44  ;;  %9946 = vst [vmem:[#allocation207_spill] sm:$0xff] %v6328_v15  ;;  %1233 = vmatprep.subr.bf16.mxu0 %v6324_v12  ;;  %v6354_v19 = vpack.c.bf16 %v9954_v22, %v5858_v40 }
 0x1d5   :  { %v6332_v58 = vpop.f32.mrf.mxu1  ;;  %v6338_v61 = vpop.f32.mrf.mxu0  ;;  %9959 = vst [vmem:[#allocation217_spill] sm:$0xff] %v6360_v45 }
 0x1d6   :  { %9947 = vst [vmem:[#allocation208_spill] sm:$0xff] %v6332_v58  ;;  %9949 = vst [vmem:[#allocation210_spill] sm:$0xff] %v6338_v61  ;;  %v9967_v58 = vld [vmem:[#allocation36_spill] sm:$0xff] }
 0x1d7   :  { %v6344_v46 = vpop.f32.mrf.mxu1  ;;  %v6346_v25 = vpop.f32.mrf.mxu0  ;;  %1234 = vmatpush1.bf16.msra.mxu0 %v6336_v21  ;;  %9955 = vst [vmem:[#allocation215_spill] sm:$0xff] %v6354_v19  ;;  %v9963_v21 = vld [vmem:[#allocation38_spill] sm:$0xff] }
 0x1d8   :  { %9951 = vst [vmem:[#allocation212_spill] sm:$0xff] %v6344_v46  ;;  %9952 = vst [vmem:[#allocation213_spill] sm:$0xff] %v6346_v25  ;;  %1235 = vmatprep.subr.bf16.mxu0 %v6342_v39  ;;  %v6372_v22 = vpack.c.bf16 %v9964_v0, %v9963_v21  ;;  %v9973_v46 = vld [vmem:[#allocation34_spill] sm:$0xff] }
 0x1d9   :  { %v6350_v12 = vpop.f32.mrf.mxu1  ;;  %v6356_v18 = vpop.f32.mrf.mxu0 }
 0x1da   :  { %9953 = vst [vmem:[#allocation214_spill] sm:$0xff] %v6350_v12  ;;  %9956 = vst [vmem:[#allocation216_spill] sm:$0xff] %v6356_v18  ;;  %v9966_v12 = vld [vmem:[#allocation32_spill] sm:$0xff] }
 0x1db   :  { %v6362_v41 = vpop.f32.mrf.mxu1  ;;  %v6364_v44 = vpop.f32.mrf.mxu0  ;;  %1236 = vmatpush1.bf16.msra.mxu0 %v6354_v19  ;;  %v6378_v50 = vpack.c.bf16 %v9967_v58, %v9966_v12  ;;  %v9972_v19 = vld [vmem:[#allocation30_spill] sm:$0xff]  ;;  %v6396_v58 = vpack.c.bf16 %v6290_v35, %v6270_v59 }
 0x1dc   :  { %9960 = vst [vmem:[#allocation218_spill] sm:$0xff] %v6362_v41  ;;  %9961 = vst [vmem:[#allocation219_spill] sm:$0xff] %v6364_v44  ;;  %1237 = vmatprep.subr.bf16.mxu0 %v6360_v45  ;;  %v6390_v0 = vpack.c.bf16 %v9973_v46, %v9972_v19  ;;  %v6412_v19 = vpack.c.bf16 %v6278_v51, %v6258_v2  ;;  %v6441_v2 = vpack.c.bf16 %v6240_v30, %v6222_v52 }
 0x1dd   :  { %v6368_v39 = vpop.f32.mrf.mxu1  ;;  %v6374_v40 = vpop.f32.mrf.mxu0  ;;  %9968 = vst [vmem:[#allocation222_spill] sm:$0xff] %v6378_v50  ;;  %v6473_v52 = vpack.c.bf16 %v6320_v27, %v6302_v5  ;;  %v6497_v27 = vpack.c.bf16 %v6168_v13, %v6145_v63  ;;  %v6529_v63 = vpack.c.bf16 %v6246_v33, %v6228_v9  ;;  %v10020_v33 = vld [vmem:[#allocation126_spill] sm:$0xff] }
 0x1de   :  { %9962 = vst [vmem:[#allocation220_spill] sm:$0xff] %v6368_v39  ;;  %9965 = vst [vmem:[#allocation221_spill] sm:$0xff] %v6374_v40 }
 0x1df   :  { %v6380_v54 = vpop.f32.mrf.mxu1  ;;  %v6382_v41 = vpop.f32.mrf.mxu0  ;;  %1238 = vmatpush1.bf16.msra.mxu0 %v6372_v22  ;;  %9974 = vst [vmem:[#allocation226_spill] sm:$0xff] %v6390_v0  ;;  %9986 = vst [vmem:[#allocation238_spill] sm:$0xff] %v6441_v2 }
 0x1e0   :  { %9969 = vst [vmem:[#allocation223_spill] sm:$0xff] %v6380_v54  ;;  %9970 = vst [vmem:[#allocation224_spill] sm:$0xff] %v6382_v41  ;;  %1239 = vmatprep.subr.bf16.mxu0 %v6378_v50 }
 0x1e1   :  { %v6386_v45 = vpop.f32.mrf.mxu1  ;;  %v6392_v21 = vpop.f32.mrf.mxu0  ;;  %9995 = vst [vmem:[#allocation247_spill] sm:$0xff] %v6473_v52  ;;  %10002 = vst [vmem:[#allocation254_spill] sm:$0xff] %v6497_v27 }
 0x1e2   :  { %9971 = vst [vmem:[#allocation225_spill] sm:$0xff] %v6386_v45  ;;  %9975 = vst [vmem:[#allocation227_spill] sm:$0xff] %v6392_v21  ;;  %v6416_v35 = vpack.c.bf16 %v6392_v21, %v6374_v40  ;;  %v6445_v40 = vpack.c.bf16 %v6356_v18, %v6338_v61  ;;  %v6469_v18 = vpack.c.bf16 %v6204_v37, %v6186_v29 }
 0x1e3   :  { %v6398_v12 = vpop.f32.mrf.mxu1  ;;  %v6400_v39 = vpop.f32.mrf.mxu0  ;;  %1240 = vmatpush1.bf16.msra.mxu0 %v6390_v0  ;;  %v6422_v0 = vpack.c.bf16 %v6252_v42, %v6234_v16  ;;  %v6455_v16 = vpack.c.bf16 %v6328_v15, %v6310_v1  ;;  %v6483_v15 = vpack.c.bf16 %v6292_v24, %v6273_v62  ;;  %v6501_v29 = vpack.c.bf16 %v6284_v14, %v6264_v6 }
 0x1e4   :  { %9976 = vst [vmem:[#allocation228_spill] sm:$0xff] %v6398_v12  ;;  %9977 = vst [vmem:[#allocation229_spill] sm:$0xff] %v6400_v39  ;;  %v6405_v50 = vpack.c.bf16 %v6400_v39, %v6382_v41  ;;  %1241 = vmatprep.subr.bf16.mxu0 %v6396_v58  ;;  %v6426_v39 = vpack.c.bf16 %v6364_v44, %v6346_v25  ;;  %v6451_v44 = vpack.c.bf16 %v6216_v20, %v6198_v60 }
 0x1e5   :  { %v6408_v46 = vpop.f32.mrf.mxu1  ;;  %9980 = vst [vmem:[#allocation232_spill] sm:$0xff] %v6416_v35  ;;  %v6418_v59 = vpop.f32.mrf.mxu0  ;;  %9987 = vst [vmem:[#allocation239_spill] sm:$0xff] %v6445_v40  ;;  %v6479_v20 = vpack.c.bf16 %v6180_v3, %v6161_v31  ;;  %v6507_v3 = vpack.c.bf16 %v6134_v48, %v6116_v38  ;;  %v6511_v24 = vpack.c.bf16 %v6254_v53, %v6236_v49  ;;  %v10013_v48 = vld [vmem:[#allocation128_spill] sm:$0xff] }
 0x1e6   :  { %9978 = vst [vmem:[#allocation230_spill] sm:$0xff] %v6405_v50  ;;  %9979 = vst [vmem:[#allocation231_spill] sm:$0xff] %v6408_v46  ;;  %1184 = vmatprep.subr.bf16.mxu1 %v6405_v50  ;;  %v6525_v14 = vpack.c.bf16 %v6122_v23, %v6103_v34  ;;  %v10014_v53 = vld [vmem:[#allocation132_spill] sm:$0xff]  ;;  %v6539_v49 = vpack.c.bf16 %v6218_v4, %v6200_v47  ;;  %v10021_v34 = vld [vmem:[#allocation130_spill] sm:$0xff] }
 0x1e7   :  { %9981 = vst [vmem:[#allocation233_spill] sm:$0xff] %v6418_v59  ;;  %9982 = vst [vmem:[#allocation234_spill] sm:$0xff] %v6426_v39  ;;  %v6429_v41 = vpop.f32.mrf.mxu1  ;;  %v6431_v51 = vpop.f32.mrf.mxu0  ;;  %1185 = vmatpush1.bf16.msra.mxu1 %v6416_v35  ;;  %1242 = vmatpush2.bf16.msra.mxu0 %v6412_v19  ;;  %v6535_v38 = vpack.c.bf16 %v10014_v53, %v10013_v48  ;;  %v6553_v9 = vpack.c.bf16 %v10021_v34, %v10020_v33  ;;  %v10025_v48 = vld [vmem:[#allocation120_spill] sm:$0xff]  ;;  %v10033_v33 = vld [vmem:[#allocation122_spill] sm:$0xff] }
 0x1e8   :  { %9983 = vst [vmem:[#allocation235_spill] sm:$0xff] %v6429_v41  ;;  %9984 = vst [vmem:[#allocation236_spill] sm:$0xff] %v6431_v51  ;;  %1186 = vmatprep.subr.bf16.mxu1 %v6426_v39  ;;  %1243 = vmatprep.subr.bf16.mxu0 %v6422_v0  ;;  %v6557_v53 = vpack.c.bf16 %v6210_v57, %v6192_v56  ;;  %v10026_v47 = vld [vmem:[#allocation124_spill] sm:$0xff]  ;;  %v10032_v57 = vld [vmem:[#allocation118_spill] sm:$0xff] }
 0x1e9   :  { %v6437_v21 = vpop.f32.mrf.mxu1  ;;  %v6447_v42 = vpop.f32.mrf.mxu0  ;;  %9989 = vst [vmem:[#allocation241_spill] sm:$0xff] %v6451_v44  ;;  %9990 = vst [vmem:[#allocation242_spill] sm:$0xff] %v6455_v16  ;;  %v6581_v56 = vpack.c.bf16 %v10033_v33, %v10032_v57  ;;  %v10045_v57 = vld [vmem:[#allocation114_spill] sm:$0xff] }
 0x1ea   :  { %9985 = vst [vmem:[#allocation237_spill] sm:$0xff] %v6437_v21  ;;  %9988 = vst [vmem:[#allocation240_spill] sm:$0xff] %v6447_v42  ;;  %v10080_v35 = vld [vmem:[#allocation70_spill] sm:$0xff] }
 0x1eb   :  { %v6457_v25 = vpop.f32.mrf.mxu1  ;;  %v6459_v39 = vpop.f32.mrf.mxu0  ;;  %1187 = vmatpush1.bf16.msra.mxu1 %v6445_v40  ;;  %1244 = vmatpush2.bf16.msra.mxu0 %v6441_v2  ;;  %9994 = vst [vmem:[#allocation246_spill] sm:$0xff] %v6469_v18  ;;  %9997 = vst [vmem:[#allocation249_spill] sm:$0xff] %v6479_v20 }
 0x1ec   :  { %9991 = vst [vmem:[#allocation243_spill] sm:$0xff] %v6457_v25  ;;  %9992 = vst [vmem:[#allocation244_spill] sm:$0xff] %v6459_v39  ;;  %1188 = vmatprep.subr.bf16.mxu1 %v6455_v16  ;;  %1245 = vmatprep.subr.bf16.mxu0 %v6451_v44 }
 0x1ed   :  { %v6465_v30 = vpop.f32.mrf.mxu1  ;;  %v6475_v61 = vpop.f32.mrf.mxu0  ;;  %9998 = vst [vmem:[#allocation250_spill] sm:$0xff] %v6483_v15  ;;  %10003 = vst [vmem:[#allocation255_spill] sm:$0xff] %v6501_v29 }
 0x1ee   :  { %9993 = vst [vmem:[#allocation245_spill] sm:$0xff] %v6465_v30  ;;  %9996 = vst [vmem:[#allocation248_spill] sm:$0xff] %v6475_v61 }
 0x1ef   :  { %v6485_v60 = vpop.f32.mrf.mxu1  ;;  %v6487_v1 = vpop.f32.mrf.mxu0  ;;  %1189 = vmatpush1.bf16.msra.mxu1 %v6473_v52  ;;  %1246 = vmatpush2.bf16.msra.mxu0 %v6469_v18  ;;  %10005 = vst [vmem:[#allocation257_spill] sm:$0xff] %v6507_v3  ;;  %10006 = vst [vmem:[#allocation258_spill] sm:$0xff] %v6511_v24  ;;  %v1324_v18 = vmul.bf16 %v10080_v35, %v10080_v35 }
 0x1f0   :  { %9999 = vst [vmem:[#allocation251_spill] sm:$0xff] %v6485_v60  ;;  %10000 = vst [vmem:[#allocation252_spill] sm:$0xff] %v6487_v1  ;;  %1190 = vmatprep.subr.bf16.mxu1 %v6483_v15  ;;  %1247 = vmatprep.subr.bf16.mxu0 %v6479_v20 }
 0x1f1   :  { %v6493_v37 = vpop.f32.mrf.mxu1  ;;  %v6503_v5 = vpop.f32.mrf.mxu0  ;;  %10010 = vst [vmem:[#allocation262_spill] sm:$0xff] %v6525_v14  ;;  %10011 = vst [vmem:[#allocation263_spill] sm:$0xff] %v6529_v63 }
 0x1f2   :  { %10001 = vst [vmem:[#allocation253_spill] sm:$0xff] %v6493_v37  ;;  %10004 = vst [vmem:[#allocation256_spill] sm:$0xff] %v6503_v5 }
 0x1f3   :  { %v6513_v31 = vpop.f32.mrf.mxu1  ;;  %v6515_v62 = vpop.f32.mrf.mxu0  ;;  %1191 = vmatpush1.bf16.msra.mxu1 %v6501_v29  ;;  %1248 = vmatpush2.bf16.msra.mxu0 %v6497_v27  ;;  %10015 = vst [vmem:[#allocation265_spill] sm:$0xff] %v6535_v38  ;;  %10016 = vst [vmem:[#allocation266_spill] sm:$0xff] %v6539_v49 }
 0x1f4   :  { %10007 = vst [vmem:[#allocation259_spill] sm:$0xff] %v6513_v31  ;;  %10008 = vst [vmem:[#allocation260_spill] sm:$0xff] %v6515_v62  ;;  %1192 = vmatprep.subr.bf16.mxu1 %v6511_v24  ;;  %1249 = vmatprep.subr.bf16.mxu0 %v6507_v3  ;;  %v10062_v3 = vld [vmem:[#allocation20_spill] sm:$0xff] }
 0x1f5   :  { %v6521_v13 = vpop.f32.mrf.mxu1  ;;  %v6531_v6 = vpop.f32.mrf.mxu0  ;;  %10022 = vst [vmem:[#allocation270_spill] sm:$0xff] %v6553_v9  ;;  %10023 = vst [vmem:[#allocation271_spill] sm:$0xff] %v6557_v53 }
 0x1f6   :  { %10009 = vst [vmem:[#allocation261_spill] sm:$0xff] %v6521_v13  ;;  %10012 = vst [vmem:[#allocation264_spill] sm:$0xff] %v6531_v6 }
 0x1f7   :  { %v6541_v24 = vpop.f32.mrf.mxu1  ;;  %v6543_v29 = vpop.f32.mrf.mxu0  ;;  %1193 = vmatpush1.bf16.msra.mxu1 %v6529_v63  ;;  %1250 = vmatpush2.bf16.msra.mxu0 %v6525_v14  ;;  %v6563_v63 = vpack.c.bf16 %v10026_v47, %v10025_v48  ;;  %10034 = vst [vmem:[#allocation278_spill] sm:$0xff] %v6581_v56  ;;  %v6585_v47 = vpack.c.bf16 %v6174_v32, %v6153_v28  ;;  %v10037_v48 = vld [vmem:[#allocation112_spill] sm:$0xff]  ;;  %v10044_v32 = vld [vmem:[#allocation110_spill] sm:$0xff] }
 0x1f8   :  { %10017 = vst [vmem:[#allocation267_spill] sm:$0xff] %v6541_v24  ;;  %10018 = vst [vmem:[#allocation268_spill] sm:$0xff] %v6543_v29  ;;  %1194 = vmatprep.subr.bf16.mxu1 %v6539_v49  ;;  %1251 = vmatprep.subr.bf16.mxu0 %v6535_v38  ;;  %v6567_v49 = vpack.c.bf16 %v6182_v11, %v6164_v55  ;;  %v10038_v55 = vld [vmem:[#allocation116_spill] sm:$0xff]  ;;  %v6609_v28 = vpack.c.bf16 %v10045_v57, %v10044_v32  ;;  %v10057_v32 = vld [vmem:[#allocation26_spill] sm:$0xff] }
 0x1f9   :  { %v6549_v23 = vpop.f32.mrf.mxu1  ;;  %v6559_v4 = vpop.f32.mrf.mxu0  ;;  %10027 = vst [vmem:[#allocation273_spill] sm:$0xff] %v6563_v63  ;;  %10035 = vst [vmem:[#allocation279_spill] sm:$0xff] %v6585_v47 }
 0x1fa   :  { %10019 = vst [vmem:[#allocation269_spill] sm:$0xff] %v6549_v23  ;;  %10024 = vst [vmem:[#allocation272_spill] sm:$0xff] %v6559_v4 }
 0x1fb   :  { %10028 = vst [vmem:[#allocation274_spill] sm:$0xff] %v6567_v49  ;;  %v6569_v38 = vpop.f32.mrf.mxu1  ;;  %v6571_v15 = vpop.f32.mrf.mxu0  ;;  %1195 = vmatpush1.bf16.msra.mxu1 %v6557_v53  ;;  %1252 = vmatpush2.bf16.msra.mxu0 %v6553_v9  ;;  %v6591_v53 = vpack.c.bf16 %v10038_v55, %v10037_v48  ;;  %10046 = vst [vmem:[#allocation286_spill] sm:$0xff] %v6609_v28  ;;  %v6613_v55 = vpack.c.bf16 %v6128_v17, %v6109_v36  ;;  %v10049_v48 = vld [vmem:[#allocation24_spill] sm:$0xff]  ;;  %v10056_v17 = vld [vmem:[#allocation22_spill] sm:$0xff] }
 0x1fc   :  { %10029 = vst [vmem:[#allocation275_spill] sm:$0xff] %v6569_v38  ;;  %10030 = vst [vmem:[#allocation276_spill] sm:$0xff] %v6571_v15  ;;  %1196 = vmatprep.subr.bf16.mxu1 %v6567_v49  ;;  %1253 = vmatprep.subr.bf16.mxu0 %v6563_v63  ;;  %v6595_v49 = vpack.c.bf16 %v6139_v26, %v6118_v43  ;;  %v10050_v43 = vld [vmem:[#allocation28_spill] sm:$0xff] }
 0x1fd   :  { %v6577_v34 = vpop.f32.mrf.mxu1  ;;  %v6587_v11 = vpop.f32.mrf.mxu0  ;;  %10039 = vst [vmem:[#allocation281_spill] sm:$0xff] %v6591_v53  ;;  %10047 = vst [vmem:[#allocation287_spill] sm:$0xff] %v6613_v55 }
 0x1fe   :  { %10031 = vst [vmem:[#allocation277_spill] sm:$0xff] %v6577_v34  ;;  %10036 = vst [vmem:[#allocation280_spill] sm:$0xff] %v6587_v11 }
 0x1ff   :  { %10040 = vst [vmem:[#allocation282_spill] sm:$0xff] %v6595_v49  ;;  %v6597_v63 = vpop.f32.mrf.mxu1  ;;  %v6599_v9 = vpop.f32.mrf.mxu0  ;;  %1197 = vmatpush1.bf16.msra.mxu1 %v6585_v47  ;;  %1254 = vmatpush2.bf16.msra.mxu0 %v6581_v56  ;;  %v6619_v47 = vpack.c.bf16 %v10050_v43, %v10049_v48  ;;  %v6634_v43 = vpack.c.bf16 %v10057_v32, %v10056_v17  ;;  %v10059_v48 = vld [vmem:[#allocation56_spill] sm:$0xff]  ;;  %v10068_v32 = vld [vmem:[#allocation14_spill] sm:$0xff] }
 0x200   :  { %10041 = vst [vmem:[#allocation283_spill] sm:$0xff] %v6597_v63  ;;  %10042 = vst [vmem:[#allocation284_spill] sm:$0xff] %v6599_v9  ;;  %1198 = vmatprep.subr.bf16.mxu1 %v6595_v49  ;;  %1255 = vmatprep.subr.bf16.mxu0 %v6591_v53  ;;  %v10053_v49 = vld [vmem:[#allocation54_spill] sm:$0xff]  ;;  %v1335_v36 = vmul.bf16 %v10059_v48, %v10059_v48 }
 0x201   :  { %v6605_v33 = vpop.f32.mrf.mxu1  ;;  %v6615_v26 = vpop.f32.mrf.mxu0  ;;  %10051 = vst [vmem:[#allocation289_spill] sm:$0xff] %v6619_v47  ;;  %v1336_v53 = vmul.bf16 %v10053_v49, %v10053_v49  ;;  %10058 = vst [vmem:[#allocation292_spill] sm:$0xff] %v6634_v43  ;;  %v10061_v49 = vld [vmem:[#allocation16_spill] sm:$0xff]  ;;  %v10069_v17 = vld [vmem:[#allocation18_spill] sm:$0xff] }
 0x202   :  { %10043 = vst [vmem:[#allocation285_spill] sm:$0xff] %v6605_v33  ;;  %10048 = vst [vmem:[#allocation288_spill] sm:$0xff] %v6615_v26  ;;  %v6642_v16 = vpack.c.bf16 %v10062_v3, %v10061_v49  ;;  %v6657_v3 = vpack.c.bf16 %v10069_v17, %v10068_v32  ;;  %v10071_v49 = vld [vmem:[#allocation62_spill] sm:$0xff]  ;;  %v10077_v17 = vld [vmem:[#allocation68_spill] sm:$0xff] }
 0x203   :  { %v6621_v56 = vpop.f32.mrf.mxu1  ;;  %v6625_v52 = vpop.f32.mrf.mxu0  ;;  %1199 = vmatpush1.bf16.msra.mxu1 %v6613_v55  ;;  %1256 = vmatpush2.bf16.msra.mxu0 %v6609_v28  ;;  %v1331_v40 = vmul.bf16 %v10071_v49, %v10071_v49  ;;  %v1327_v49 = vmul.bf16 %v10077_v17, %v10077_v17  ;;  %v10086_v17 = vld [vmem:[#allocation76_spill] sm:$0xff] }
 0x204   :  { %10052 = vst [vmem:[#allocation290_spill] sm:$0xff] %v6621_v56  ;;  %10054 = vst [vmem:[#allocation54_spill] sm:$0xff] %v6625_v52  ;;  %1200 = vmatprep.subr.bf16.mxu1 %v6619_v47  ;;  %1435 = vmatprep.subr.bf16.mxu0 %v1336_v53  ;;  %v10065_v53 = vld [vmem:[#allocation58_spill] sm:$0xff] }
 0x205   :  { %v6630_v57 = vpop.f32.mrf.mxu1  ;;  %v6638_v14 = vpop.f32.mrf.mxu0  ;;  %10063 = vst [vmem:[#allocation293_spill] sm:$0xff] %v6642_v16  ;;  %v1332_v47 = vmul.bf16 %v10065_v53, %v10065_v53  ;;  %10070 = vst [vmem:[#allocation296_spill] sm:$0xff] %v6657_v3 }
 0x206   :  { %10055 = vst [vmem:[#allocation291_spill] sm:$0xff] %v6630_v57  ;;  %10060 = vst [vmem:[#allocation56_spill] sm:$0xff] %v6638_v14  ;;  %1258 = vmatmul.mubr.bf16.vlgmr.msra.gmra.mxu0 %v5800_v10 }
 0x207   :  { %v6644_v55 = vpop.f32.mrf.mxu1  ;;  %v6649_v28 = vpop.f32.mrf.mxu0  ;;  %1201 = vmatpush2.bf16.msra.mxu1 %v6634_v43  ;;  %1436 = vmatpush1.bf16.msra.mxu0 %v1335_v36  ;;  %v10074_v43 = vld [vmem:[#allocation64_spill] sm:$0xff] }
 0x208   :  { %10064 = vst [vmem:[#allocation294_spill] sm:$0xff] %v6644_v55  ;;  %10066 = vst [vmem:[#allocation58_spill] sm:$0xff] %v6649_v28  ;;  %1202 = vmatprep.subr.bf16.mxu1 %v6642_v16  ;;  %1437 = vmatprep.subr.bf16.mxu0 %v1332_v47  ;;  %v1328_v36 = vmul.bf16 %v10074_v43, %v10074_v43 }
 0x209   :  { %v6653_v48 = vpop.f32.mrf.mxu1  ;;  %v6661_v27 = vpop.f32.mrf.mxu0  ;;  %1467 = vmatprep.mubr.bf16.mxu0 %v5793_v8 }
 0x20a   :  { %10067 = vst [vmem:[#allocation295_spill] sm:$0xff] %v6653_v48  ;;  %10072 = vst [vmem:[#allocation62_spill] sm:$0xff] %v6661_v27 }
 0x20b   :  { %v6664_v53 = vpop.f32.mrf.mxu1  ;;  %v6668_v16 = vpop.f32.mrf.mxu0  ;;  %1203 = vmatpush2.bf16.msra.mxu1 %v6657_v3  ;;  %1438 = vmatpush1.bf16.msra.mxu0 %v1331_v40  ;;  %v10083_v40 = vld [vmem:[#allocation74_spill] sm:$0xff] }
 0x20c   :  { %10073 = vst [vmem:[#allocation297_spill] sm:$0xff] %v6664_v53  ;;  %10075 = vst [vmem:[#allocation64_spill] sm:$0xff] %v6668_v16  ;;  %1439 = vmatprep.subr.bf16.mxu0 %v1328_v36  ;;  %v1323_v36 = vmul.bf16 %v10083_v40, %v10083_v40 }
 0x20d   :  { %v6671_v47 = vpop.f32.mrf.mxu1  ;;  %v6675_v32 = vpop.f32.mrf.mxu0 }
 0x20e   :  { %10076 = vst [vmem:[#allocation298_spill] sm:$0xff] %v6671_v47  ;;  %10078 = vst [vmem:[#allocation68_spill] sm:$0xff] %v6675_v32  ;;  %v1320_v47 = vmul.bf16 %v10086_v17, %v10086_v17  ;;  %v6709_v17 = vpack.c.bf16 %v6668_v16, %v6649_v28  ;;  %v6728_v16 = vpack.c.bf16 %v6625_v52, %v6599_v9  ;;  %v10095_v28 = vld [vmem:[#allocation88_spill] sm:$0xff]  ;;  %v10099_v9 = vld [vmem:[#allocation94_spill] sm:$0xff] }
 0x20f   :  { %v6677_v20 = vpop.f32.mrf.mxu1  ;;  %v6681_v44 = vpop.f32.mrf.mxu0  ;;  %1440 = vmatpush1.bf16.msra.mxu0 %v1327_v49  ;;  %v10089_v49 = vld [vmem:[#allocation80_spill] sm:$0xff]  ;;  %v6746_v52 = vpack.c.bf16 %v6571_v15, %v6543_v29  ;;  %v6764_v15 = vpack.c.bf16 %v6515_v62, %v6487_v1  ;;  %v10103_v29 = vld [vmem:[#allocation134_spill] sm:$0xff]  ;;  %v6782_v62 = vpack.c.bf16 %v6459_v39, %v6431_v51  ;;  %v6800_v39 = vpack.c.bf16 %v6664_v53, %v6644_v55 }
 0x210   :  { %10079 = vst [vmem:[#allocation299_spill] sm:$0xff] %v6677_v20  ;;  %10081 = vst [vmem:[#allocation70_spill] sm:$0xff] %v6681_v44  ;;  %1441 = vmatprep.subr.bf16.mxu0 %v1324_v18  ;;  %v1319_v40 = vmul.bf16 %v10089_v49, %v10089_v49  ;;  %v10107_v1 = vld [vmem:[#allocation138_spill] sm:$0xff]  ;;  %v6814_v53 = vpack.c.bf16 %v6653_v48, %v6630_v57  ;;  %v6818_v55 = vpack.c.bf16 %v6621_v56, %v6597_v63  ;;  %v10114_v51 = vld [vmem:[#allocation148_spill] sm:$0xff] }
 0x211   :  { %v6683_v43 = vpop.f32.mrf.mxu1  ;;  %v6687_v3 = vpop.f32.mrf.mxu0  ;;  %v10117_v48 = vld [vmem:[#allocation155_spill] sm:$0xff]  ;;  %v6833_v56 = vpack.c.bf16 %v6605_v33, %v6577_v34  ;;  %v10119_v63 = vld [vmem:[#allocation146_spill] sm:$0xff]  ;;  %v10123_v33 = vld [vmem:[#allocation161_spill] sm:$0xff] }
 0x212   :  { %10082 = vst [vmem:[#allocation300_spill] sm:$0xff] %v6683_v43  ;;  %10084 = vst [vmem:[#allocation74_spill] sm:$0xff] %v6687_v3  ;;  %v6705_v43 = vpack.c.bf16 %v6687_v3, %v6675_v32  ;;  %v10093_v3 = vld [vmem:[#allocation86_spill] sm:$0xff]  ;;  %v6724_v32 = vpack.c.bf16 %v6661_v27, %v6638_v14  ;;  %v6742_v14 = vpack.c.bf16 %v6615_v26, %v6587_v11 }
 0x213   :  { %v6689_v50 = vpop.f32.mrf.mxu1  ;;  %v6693_v2 = vpop.f32.mrf.mxu0  ;;  %1442 = vmatpush1.bf16.msra.mxu0 %v1323_v36  ;;  %v6760_v11 = vpack.c.bf16 %v6559_v4, %v6531_v6  ;;  %v6778_v6 = vpack.c.bf16 %v6503_v5, %v6475_v61  ;;  %v6796_v61 = vpack.c.bf16 %v6447_v42, %v6418_v59  ;;  %v1355_v57 = vmul.bf16 %v10117_v48, %v10117_v48 }
 0x214   :  { %10085 = vst [vmem:[#allocation301_spill] sm:$0xff] %v6689_v50  ;;  %10087 = vst [vmem:[#allocation76_spill] sm:$0xff] %v6693_v2  ;;  %v6697_v35 = vpack.c.bf16 %v6693_v2, %v6681_v44  ;;  %1443 = vmatprep.subr.bf16.mxu0 %v1320_v47  ;;  %v10091_v2 = vld [vmem:[#allocation82_spill] sm:$0xff]  ;;  %v1315_v44 = vmul.bf16 %v10093_v3, %v10093_v3  ;;  %v1351_v34 = vmul.bf16 %v10123_v33, %v10123_v33 }
 0x215   :  { %v6699_v18 = vpop.f32.mrf.mxu1  ;;  %v1316_v47 = vmul.bf16 %v10091_v2, %v10091_v2 }
 0x216   :  { %10088 = vst [vmem:[#allocation302_spill] sm:$0xff] %v6699_v18  ;;  %1204 = vmatprep.subr.bf16.mxu1 %v6697_v35 }
 0x217   :  { %v6712_v36 = vpop.f32.mrf.mxu1  ;;  %1205 = vmatpush2.bf16.msra.mxu1 %v6705_v43  ;;  %1444 = vmatpush1.bf16.msra.mxu0 %v1319_v40  ;;  %v1312_v40 = vmul.bf16 %v10095_v28, %v10095_v28 }
 0x218   :  { %10090 = vst [vmem:[#allocation80_spill] sm:$0xff] %v6712_v36  ;;  %1206 = vmatprep.subr.bf16.mxu1 %v6709_v17  ;;  %1445 = vmatprep.subr.bf16.mxu0 %v1316_v47  ;;  %v10097_v47 = vld [vmem:[#allocation92_spill] sm:$0xff] }
 0x219   :  { %v6718_v49 = vpop.f32.mrf.mxu1  ;;  %v1311_v27 = vmul.bf16 %v10097_v47, %v10097_v47  ;;  %v10101_v47 = vld [vmem:[#allocation98_spill] sm:$0xff] }
 0x21a   :  { %10092 = vst [vmem:[#allocation82_spill] sm:$0xff] %v6718_v49  ;;  %v1307_v26 = vmul.bf16 %v10101_v47, %v10101_v47  ;;  %v10105_v47 = vld [vmem:[#allocation136_spill] sm:$0xff] }
 0x21b   :  { %v6730_v2 = vpop.f32.mrf.mxu1  ;;  %1207 = vmatpush2.bf16.msra.mxu1 %v6724_v32  ;;  %1446 = vmatpush1.bf16.msra.mxu0 %v1315_v44  ;;  %v1308_v44 = vmul.bf16 %v10099_v9, %v10099_v9  ;;  %v1367_v4 = vmul.bf16 %v10105_v47, %v10105_v47  ;;  %v10109_v47 = vld [vmem:[#allocation142_spill] sm:$0xff] }
 0x21c   :  { %10094 = vst [vmem:[#allocation86_spill] sm:$0xff] %v6730_v2  ;;  %1208 = vmatprep.subr.bf16.mxu1 %v6728_v16  ;;  %1447 = vmatprep.subr.bf16.mxu0 %v1312_v40  ;;  %v1363_v5 = vmul.bf16 %v10109_v47, %v10109_v47  ;;  %v10112_v47 = vld [vmem:[#allocation149_spill] sm:$0xff] }
 0x21d   :  { %v6736_v3 = vpop.f32.mrf.mxu1  ;;  %v1359_v42 = vmul.bf16 %v10112_v47, %v10112_v47 }
 0x21e   :  { %10096 = vst [vmem:[#allocation88_spill] sm:$0xff] %v6736_v3 }
 0x21f   :  { %v6748_v28 = vpop.f32.mrf.mxu1  ;;  %1209 = vmatpush2.bf16.msra.mxu1 %v6742_v14  ;;  %1448 = vmatpush1.bf16.msra.mxu0 %v1311_v27  ;;  %v1368_v27 = vmul.bf16 %v10103_v29, %v10103_v29 }
 0x220   :  { %10098 = vst [vmem:[#allocation92_spill] sm:$0xff] %v6748_v28  ;;  %1210 = vmatprep.subr.bf16.mxu1 %v6746_v52  ;;  %1449 = vmatprep.subr.bf16.mxu0 %v1308_v44 }
 0x221   :  { %v6754_v40 = vpop.f32.mrf.mxu1 }
 0x222   :  { %10100 = vst [vmem:[#allocation94_spill] sm:$0xff] %v6754_v40 }
 0x223   :  { %v6766_v9 = vpop.f32.mrf.mxu1  ;;  %1211 = vmatpush2.bf16.msra.mxu1 %v6760_v11  ;;  %1450 = vmatpush1.bf16.msra.mxu0 %v1307_v26  ;;  %v1364_v26 = vmul.bf16 %v10107_v1, %v10107_v1 }
 0x224   :  { %10102 = vst [vmem:[#allocation98_spill] sm:$0xff] %v6766_v9  ;;  %1212 = vmatprep.subr.bf16.mxu1 %v6764_v15  ;;  %1451 = vmatprep.subr.bf16.mxu0 %v1368_v27 }
 0x225   :  { %v6772_v44 = vpop.f32.mrf.mxu1 }
 0x226   :  { %10104 = vst [vmem:[#allocation134_spill] sm:$0xff] %v6772_v44 }
 0x227   :  { %v6784_v29 = vpop.f32.mrf.mxu1  ;;  %1213 = vmatpush2.bf16.msra.mxu1 %v6778_v6  ;;  %1452 = vmatpush2.bf16.msra.mxu0 %v1367_v4  ;;  %v1360_v4 = vmul.bf16 %v6132_v7, %v6132_v7 }
 0x228   :  { %10106 = vst [vmem:[#allocation136_spill] sm:$0xff] %v6784_v29  ;;  %1214 = vmatprep.subr.bf16.mxu1 %v6782_v62  ;;  %1453 = vmatprep.subr.bf16.mxu0 %v1364_v26 }
 0x229   :  { %v6790_v27 = vpop.f32.mrf.mxu1 }
 0x22a   :  { %10108 = vst [vmem:[#allocation138_spill] sm:$0xff] %v6790_v27 }
 0x22b   :  { %v6802_v1 = vpop.f32.mrf.mxu1  ;;  %1215 = vmatpush2.bf16.msra.mxu1 %v6796_v61  ;;  %1454 = vmatpush2.bf16.msra.mxu0 %v1363_v5  ;;  %v10115_v5 = vld [vmem:[#allocation151_spill] sm:$0xff] }
 0x22c   :  { %10110 = vst [vmem:[#allocation142_spill] sm:$0xff] %v6802_v1  ;;  %1266 = vmatprep.subr.bf16.mxu1 %v6800_v39  ;;  %1455 = vmatprep.subr.bf16.mxu0 %v1360_v4  ;;  %v1356_v4 = vmul.bf16 %v10115_v5, %v10115_v5  ;;  %10118 = vst [vmem:[#allocation151_spill] sm:$0xff] %v6833_v56  ;;  %v6838_v5 = vpack.c.bf16 %v6569_v38, %v6541_v24 }
 0x22d   :  { %v6808_v26 = vpop.f32.mrf.mxu1  ;;  %v6852_v38 = vpack.c.bf16 %v6549_v23, %v6521_v13  ;;  %v6856_v24 = vpack.c.bf16 %v6513_v31, %v6485_v60  ;;  %v6870_v13 = vpack.c.bf16 %v6493_v37, %v6465_v30  ;;  %v6874_v31 = vpack.c.bf16 %v6457_v25, %v6429_v41  ;;  %v10133_v60 = vld [vmem:[#allocation169_spill] sm:$0xff]  ;;  %v10139_v41 = vld [vmem:[#allocation175_spill] sm:$0xff] }
 0x22e   :  { %10111 = vst [vmem:[#allocation303_spill] sm:$0xff] %v6808_v26  ;;  %1217 = vmatmul.mubr.bf16.vlgmr.msra.gmra.mxu1 %v10114_v51  ;;  %v6888_v30 = vpack.c.bf16 %v6437_v21, %v6408_v46  ;;  %v6892_v25 = vpack.c.bf16 %v6398_v12, %v6380_v54  ;;  %v10142_v46 = vld [vmem:[#allocation220_spill] sm:$0xff] }
 0x22f   :  { %v6820_v7 = vpop.f32.mrf.mxu1  ;;  %1267 = vmatpush1.bf16.msra.mxu1 %v6814_v53  ;;  %1456 = vmatpush2.bf16.msra.mxu0 %v1359_v42  ;;  %v10121_v42 = vld [vmem:[#allocation157_spill] sm:$0xff]  ;;  %10125 = vst [vmem:[#allocation161_spill] sm:$0xff] %v6856_v24  ;;  %10131 = vst [vmem:[#allocation305_spill] sm:$0xff] %v6874_v31  ;;  %v6906_v12 = vpack.c.bf16 %v6386_v45, %v10142_v46  ;;  %v10144_v54 = vld [vmem:[#allocation212_spill] sm:$0xff] }
 0x230   :  { %10113 = vst [vmem:[#allocation149_spill] sm:$0xff] %v6820_v7  ;;  %1268 = vmatprep.subr.bf16.mxu1 %v6818_v55  ;;  %1457 = vmatprep.subr.bf16.mxu0 %v1356_v4  ;;  %v1352_v4 = vmul.bf16 %v10121_v42, %v10121_v42  ;;  %10124 = vst [vmem:[#allocation157_spill] sm:$0xff] %v6852_v38  ;;  %v10151_v46 = vld [vmem:[#allocation208_spill] sm:$0xff] }
 0x231   :  { %v6827_v47 = vpop.f32.mrf.mxu1  ;;  %1298 = vmatprep.mubr.bf16.mxu1 %v10119_v63  ;;  %10137 = vst [vmem:[#allocation307_spill] sm:$0xff] %v6892_v25 }
 0x232   :  { %10116 = vst [vmem:[#allocation148_spill] sm:$0xff] %v6827_v47 }
 0x233   :  { %v6840_v59 = vpop.f32.mrf.mxu1  ;;  %1269 = vmatpush1.bf16.msra.mxu1 %v6833_v56  ;;  %1458 = vmatpush2.bf16.msra.mxu0 %v1355_v57  ;;  %v10127_v56 = vld [vmem:[#allocation163_spill] sm:$0xff] }
 0x234   :  { %10120 = vst [vmem:[#allocation155_spill] sm:$0xff] %v6840_v59  ;;  %1270 = vmatprep.subr.bf16.mxu1 %v6838_v5  ;;  %1459 = vmatprep.subr.bf16.mxu0 %v1352_v4  ;;  %v1348_v57 = vmul.bf16 %v10127_v56, %v10127_v56  ;;  %v10129_v4 = vld [vmem:[#allocation167_spill] sm:$0xff] }
 0x235   :  { %v6846_v48 = vpop.f32.mrf.mxu1  ;;  %v1347_v23 = vmul.bf16 %v10129_v4, %v10129_v4  ;;  %10130 = vst [vmem:[#allocation167_spill] sm:$0xff] %v6870_v13  ;;  %v10135_v4 = vld [vmem:[#allocation173_spill] sm:$0xff] }
 0x236   :  { %10122 = vst [vmem:[#allocation146_spill] sm:$0xff] %v6846_v48  ;;  %v1343_v37 = vmul.bf16 %v10135_v4, %v10135_v4  ;;  %10136 = vst [vmem:[#allocation173_spill] sm:$0xff] %v6888_v30  ;;  %v10141_v4 = vld [vmem:[#allocation179_spill] sm:$0xff] }
 0x237   :  { %v6858_v42 = vpop.f32.mrf.mxu1  ;;  %1271 = vmatpush1.bf16.msra.mxu1 %v6852_v38  ;;  %1460 = vmatpush2.bf16.msra.mxu0 %v1351_v34  ;;  %v1344_v34 = vmul.bf16 %v10133_v60, %v10133_v60  ;;  %v1339_v21 = vmul.bf16 %v10141_v4, %v10141_v4  ;;  %10143 = vst [vmem:[#allocation179_spill] sm:$0xff] %v6906_v12  ;;  %v10150_v4 = vld [vmem:[#allocation185_spill] sm:$0xff] }
 0x238   :  { %10126 = vst [vmem:[#allocation304_spill] sm:$0xff] %v6858_v42  ;;  %1272 = vmatprep.subr.bf16.mxu1 %v6856_v24  ;;  %1461 = vmatprep.subr.bf16.mxu0 %v1348_v57  ;;  %v1337_v45 = vmul.bf16 %v10150_v4, %v10150_v4  ;;  %v10155_v24 = vld [vmem:[#allocation206_spill] sm:$0xff] }
 0x239   :  { %v6864_v33 = vpop.f32.mrf.mxu1 }
 0x23a   :  { %10128 = vst [vmem:[#allocation163_spill] sm:$0xff] %v6864_v33 }
 0x23b   :  { %v6876_v56 = vpop.f32.mrf.mxu1  ;;  %1273 = vmatpush1.bf16.msra.mxu1 %v6870_v13  ;;  %1462 = vmatpush2.bf16.msra.mxu0 %v1347_v23  ;;  %v1340_v23 = vmul.bf16 %v10139_v41, %v10139_v41 }
 0x23c   :  { %10132 = vst [vmem:[#allocation306_spill] sm:$0xff] %v6876_v56  ;;  %1274 = vmatprep.subr.bf16.mxu1 %v6874_v31  ;;  %1463 = vmatprep.subr.bf16.mxu0 %v1344_v34  ;;  %v10145_v31 = vld [vmem:[#allocation218_spill] sm:$0xff] }
 0x23d   :  { %v6882_v57 = vpop.f32.mrf.mxu1  ;;  %v6910_v13 = vpack.c.bf16 %v10145_v31, %v10144_v54  ;;  %v10154_v54 = vld [vmem:[#allocation200_spill] sm:$0xff] }
 0x23e   :  { %10134 = vst [vmem:[#allocation169_spill] sm:$0xff] %v6882_v57  ;;  %v6928_v38 = vpack.c.bf16 %v10155_v24, %v10154_v54  ;;  %v10160_v24 = vld [vmem:[#allocation196_spill] sm:$0xff]  ;;  %v10161_v54 = vld [vmem:[#allocation202_spill] sm:$0xff] }
 0x23f   :  { %v6894_v60 = vpop.f32.mrf.mxu1  ;;  %1275 = vmatpush1.bf16.msra.mxu1 %v6888_v30  ;;  %1464 = vmatpush2.bf16.msra.mxu0 %v1343_v37  ;;  %10146 = vst [vmem:[#allocation309_spill] sm:$0xff] %v6910_v13  ;;  %v10148_v30 = vld [vmem:[#allocation181_spill] sm:$0xff] }
 0x240   :  { %10138 = vst [vmem:[#allocation308_spill] sm:$0xff] %v6894_v60  ;;  %1276 = vmatprep.subr.bf16.mxu1 %v6892_v25  ;;  %1465 = vmatprep.subr.bf16.mxu0 %v1340_v23  ;;  %v1338_v37 = vmul.bf16 %v10148_v30, %v10148_v30  ;;  %v10152_v25 = vld [vmem:[#allocation214_spill] sm:$0xff] }
 0x241   :  { %v6900_v34 = vpop.f32.mrf.mxu1  ;;  %v6924_v31 = vpack.c.bf16 %v10152_v25, %v10151_v46  ;;  %v10159_v25 = vld [vmem:[#allocation191_spill] sm:$0xff] }
 0x242   :  { %10140 = vst [vmem:[#allocation175_spill] sm:$0xff] %v6900_v34  ;;  %v1333_v46 = vmul.bf16 %v10159_v25, %v10159_v25  ;;  %v10164_v25 = vld [vmem:[#allocation197_spill] sm:$0xff] }
 0x243   :  { %v6912_v41 = vpop.f32.mrf.mxu1  ;;  %1277 = vmatpush1.bf16.msra.mxu1 %v6906_v12  ;;  %1466 = vmatpush2.bf16.msra.mxu0 %v1339_v21  ;;  %10153 = vst [vmem:[#allocation185_spill] sm:$0xff] %v6924_v31  ;;  %v10157_v21 = vld [vmem:[#allocation187_spill] sm:$0xff] }
 0x244   :  { %10147 = vst [vmem:[#allocation310_spill] sm:$0xff] %v6912_v41  ;;  %1278 = vmatprep.subr.bf16.mxu1 %v6910_v13  ;;  %1517 = vmatprep.subr.bf16.mxu0 %v1338_v37  ;;  %v1334_v37 = vmul.bf16 %v10157_v21, %v10157_v21  ;;  %v6943_v13 = vpack.c.bf16 %v10161_v54, %v10160_v24  ;;  %v10163_v21 = vld [vmem:[#allocation193_spill] sm:$0xff] }
 0x245   :  { %v6918_v23 = vpop.f32.mrf.mxu1 }
 0x246   :  { %10149 = vst [vmem:[#allocation181_spill] sm:$0xff] %v6918_v23  ;;  %1468 = vmatmul.mubr.bf16.vlgmr.msra.gmra.mxu0 %v5800_v10 }
 0x247   :  { %v6930_v30 = vpop.f32.mrf.mxu1  ;;  %1279 = vmatpush1.bf16.msra.mxu1 %v6924_v31  ;;  %1518 = vmatpush1.bf16.msra.mxu0 %v1337_v45  ;;  %v1330_v31 = vmul.bf16 %v10163_v21, %v10163_v21  ;;  %v10165_v21 = vld [vmem:[#allocation199_spill] sm:$0xff] }
 0x248   :  { %10156 = vst [vmem:[#allocation311_spill] sm:$0xff] %v6930_v30  ;;  %1280 = vmatprep.subr.bf16.mxu1 %v6928_v38  ;;  %1519 = vmatprep.subr.bf16.mxu0 %v1334_v37  ;;  %v1329_v37 = vmul.bf16 %v10164_v25, %v10164_v25  ;;  %v6974_v25 = vpack.c.bf16 %v6900_v34, %v6882_v57  ;;  %v10172_v57 = vld [vmem:[#allocation222_spill] sm:$0xff] }
 0x249   :  { %v6937_v4 = vpop.f32.mrf.mxu1  ;;  %1549 = vmatprep.mubr.bf16.mxu0 %v5793_v8  ;;  %v6964_v8 = vpack.c.bf16 %v6912_v41, %v6894_v60  ;;  %v10169_v41 = vld [vmem:[#allocation211_spill] sm:$0xff]  ;;  %v7006_v34 = vpack.c.bf16 %v6802_v1, %v6784_v29  ;;  %v10171_v60 = vld [vmem:[#allocation217_spill] sm:$0xff] }
 0x24a   :  { %10158 = vst [vmem:[#allocation187_spill] sm:$0xff] %v6937_v4  ;;  %v6959_v54 = vpack.c.bf16 %v6937_v4, %v6918_v23  ;;  %v6978_v4 = vpack.c.bf16 %v6876_v56, %v6858_v42  ;;  %v6992_v23 = vpack.c.bf16 %v6840_v59, %v6820_v7  ;;  %v7034_v56 = vpack.c.bf16 %v6730_v2, %v6712_v36  ;;  %v10186_v29 = vld [vmem:[#allocation257_spill] sm:$0xff] }
 0x24b   :  { %v6946_v12 = vpop.f32.mrf.mxu1  ;;  %1281 = vmatpush1.bf16.msra.mxu1 %v6943_v13  ;;  %1520 = vmatpush1.bf16.msra.mxu0 %v1333_v46 }
 0x24c   :  { %10162 = vst [vmem:[#allocation191_spill] sm:$0xff] %v6946_v12  ;;  %v6952_v45 = vpack.c.bf16 %v6946_v12, %v6930_v30  ;;  %1521 = vmatprep.subr.bf16.mxu0 %v1330_v31  ;;  %v1326_v12 = vmul.bf16 %v10165_v21, %v10165_v21  ;;  %v10166_v31 = vld [vmem:[#allocation203_spill] sm:$0xff]  ;;  %v10167_v30 = vld [vmem:[#allocation205_spill] sm:$0xff] }
 0x24d   :  { %v1325_v46 = vmul.bf16 %v10166_v31, %v10166_v31  ;;  %v1322_v21 = vmul.bf16 %v10167_v30, %v10167_v30  ;;  %v6988_v31 = vpack.c.bf16 %v6864_v33, %v6846_v48  ;;  %v1318_v30 = vmul.bf16 %v10169_v41, %v10169_v41  ;;  %v10176_v33 = vld [vmem:[#allocation300_spill] sm:$0xff]  ;;  %v10177_v48 = vld [vmem:[#allocation230_spill] sm:$0xff] }
 0x24e   :  { %1282 = vmatprep.subr.bf16.mxu1 %v6952_v45  ;;  %v1314_v41 = vmul.bf16 %v10171_v60, %v10171_v60  ;;  %v1310_v60 = vmul.bf16 %v10172_v57, %v10172_v57  ;;  %v1370_v57 = vmul.bf16 %v6396_v58, %v6396_v58  ;;  %v1366_v58 = vmul.bf16 %v6422_v0, %v6422_v0  ;;  %v10179_v0 = vld [vmem:[#allocation246_spill] sm:$0xff] }
 0x24f   :  { %1283 = vmatpush2.bf16.msra.mxu1 %v6959_v54  ;;  %1522 = vmatpush1.bf16.msra.mxu0 %v1329_v37  ;;  %v1400_v59 = vmul.bf16 %v10177_v48, %v10177_v48  ;;  %v10182_v48 = vld [vmem:[#allocation249_spill] sm:$0xff] }
 0x250   :  { %1284 = vmatprep.subr.bf16.mxu1 %v6964_v8  ;;  %1523 = vmatprep.subr.bf16.mxu0 %v1326_v12  ;;  %v10168_v12 = vld [vmem:[#allocation209_spill] sm:$0xff] }
 0x251   :  { %v1321_v37 = vmul.bf16 %v10168_v12, %v10168_v12  ;;  %v7002_v12 = vpack.c.bf16 %v6827_v47, %v6808_v26  ;;  %v10178_v47 = vld [vmem:[#allocation241_spill] sm:$0xff]  ;;  %v10181_v26 = vld [vmem:[#allocation234_spill] sm:$0xff] }
 0x252   :  { %v1362_v7 = vmul.bf16 %v10178_v47, %v10178_v47  ;;  %v1396_v1 = vmul.bf16 %v10181_v26, %v10181_v26  ;;  %v10184_v47 = vld [vmem:[#allocation239_spill] sm:$0xff]  ;;  %v1354_v26 = vmul.bf16 %v10186_v29, %v10186_v29  ;;  %v10191_v29 = vld [vmem:[#allocation270_spill] sm:$0xff] }
 0x253   :  { %1285 = vmatpush2.bf16.msra.mxu1 %v6974_v25  ;;  %1524 = vmatpush1.bf16.msra.mxu0 %v1325_v46  ;;  %v10170_v46 = vld [vmem:[#allocation215_spill] sm:$0xff] }
 0x254   :  { %1286 = vmatprep.subr.bf16.mxu1 %v6978_v4  ;;  %1525 = vmatprep.subr.bf16.mxu0 %v1322_v21  ;;  %v1317_v21 = vmul.bf16 %v10170_v46, %v10170_v46  ;;  %v7020_v46 = vpack.c.bf16 %v6766_v9, %v6748_v28 }
 0x257   :  { %1287 = vmatpush2.bf16.msra.mxu1 %v6988_v31  ;;  %1526 = vmatpush1.bf16.msra.mxu0 %v1321_v37  ;;  %v1313_v37 = vmul.bf16 %v6372_v22, %v6372_v22 }
 0x258   :  { %1288 = vmatprep.subr.bf16.mxu1 %v6992_v23  ;;  %1527 = vmatprep.subr.bf16.mxu0 %v1318_v30  ;;  %v7016_v30 = vpack.c.bf16 %v6790_v27, %v6772_v44  ;;  %v1358_v27 = vmul.bf16 %v10182_v48, %v10182_v48  ;;  %v10189_v48 = vld [vmem:[#allocation250_spill] sm:$0xff] }
 0x25b   :  { %1289 = vmatpush2.bf16.msra.mxu1 %v7002_v12  ;;  %1528 = vmatpush1.bf16.msra.mxu0 %v1317_v21  ;;  %v10173_v21 = vld [vmem:[#allocation226_spill] sm:$0xff] }
 0x25c   :  { %1290 = vmatprep.subr.bf16.mxu1 %v7006_v34  ;;  %1529 = vmatprep.subr.bf16.mxu0 %v1314_v41  ;;  %v1309_v22 = vmul.bf16 %v10173_v21, %v10173_v21  ;;  %v7030_v41 = vpack.c.bf16 %v6754_v40, %v6736_v3  ;;  %v7048_v21 = vpack.c.bf16 %v6689_v50, %v6677_v20 }
 0x25f   :  { %1291 = vmatpush2.bf16.msra.mxu1 %v7016_v30  ;;  %1530 = vmatpush1.bf16.msra.mxu0 %v1313_v37  ;;  %v1369_v37 = vmul.bf16 %v6412_v19, %v6412_v19 }
 0x260   :  { %1292 = vmatprep.subr.bf16.mxu1 %v7020_v46  ;;  %1531 = vmatprep.subr.bf16.mxu0 %v1310_v60  ;;  %v7044_v60 = vpack.c.bf16 %v6718_v49, %v6699_v18 }
 0x263   :  { %1293 = vmatpush2.bf16.msra.mxu1 %v7030_v41  ;;  %1532 = vmatpush1.bf16.msra.mxu0 %v1309_v22  ;;  %v10174_v22 = vld [vmem:[#allocation238_spill] sm:$0xff] }
 0x264   :  { %1294 = vmatprep.subr.bf16.mxu1 %v7034_v56  ;;  %1533 = vmatprep.subr.bf16.mxu0 %v1370_v57  ;;  %v1365_v19 = vmul.bf16 %v10174_v22, %v10174_v22  ;;  %v10175_v57 = vld [vmem:[#allocation298_spill] sm:$0xff] }
 0x265   :  { %v7058_v42 = vpack.c.bf16 %v10176_v33, %v10175_v57 }
 0x267   :  { %1295 = vmatpush2.bf16.msra.mxu1 %v7044_v60  ;;  %1534 = vmatpush2.bf16.msra.mxu0 %v1369_v37  ;;  %v1361_v37 = vmul.bf16 %v10179_v0, %v10179_v0  ;;  %v10185_v0 = vld [vmem:[#allocation242_spill] sm:$0xff] }
 0x268   :  { %1296 = vmatprep.subr.bf16.mxu1 %v7048_v21  ;;  %1535 = vmatprep.subr.bf16.mxu0 %v1366_v58  ;;  %v10180_v58 = vld [vmem:[#allocation232_spill] sm:$0xff] }
 0x269   :  { %v1399_v22 = vmul.bf16 %v10180_v58, %v10180_v58  ;;  %v1392_v58 = vmul.bf16 %v10185_v0, %v10185_v0 }
 0x26b   :  { %1297 = vmatpush2.bf16.msra.mxu1 %v7058_v42  ;;  %1536 = vmatpush2.bf16.msra.mxu0 %v1365_v19  ;;  %v1395_v19 = vmul.bf16 %v10184_v47, %v10184_v47  ;;  %v10190_v47 = vld [vmem:[#allocation265_spill] sm:$0xff] }
 0x26c   :  { %1476 = vmatprep.subr.bf16.mxu1 %v1400_v59  ;;  %1537 = vmatprep.subr.bf16.mxu0 %v1362_v7  ;;  %v10183_v59 = vld [vmem:[#allocation254_spill] sm:$0xff]  ;;  %v1350_v44 = vmul.bf16 %v10190_v47, %v10190_v47 }
 0x26d   :  { %v1357_v7 = vmul.bf16 %v10183_v59, %v10183_v59  ;;  %v1388_v59 = vmul.bf16 %v10189_v48, %v10189_v48 }
 0x26e   :  { %1299 = vmatmul.mubr.bf16.vlgmr.msra.gmra.mxu1 %v10114_v51 }
 0x26f   :  { %1477 = vmatpush1.bf16.msra.mxu1 %v1399_v22  ;;  %1538 = vmatpush2.bf16.msra.mxu0 %v1361_v37  ;;  %v10188_v37 = vld [vmem:[#allocation247_spill] sm:$0xff] }
 0x270   :  { %1478 = vmatprep.subr.bf16.mxu1 %v1396_v1  ;;  %1539 = vmatprep.subr.bf16.mxu0 %v1358_v27  ;;  %v10187_v1 = vld [vmem:[#allocation262_spill] sm:$0xff]  ;;  %v1391_v22 = vmul.bf16 %v10188_v37, %v10188_v37 }
 0x271   :  { %1508 = vmatprep.mubr.bf16.mxu1 %v10119_v63  ;;  %v1353_v27 = vmul.bf16 %v10187_v1, %v10187_v1  ;;  %v10194_v1 = vld [vmem:[#allocation273_spill] sm:$0xff] }
 0x272   :  { %v1346_v37 = vmul.bf16 %v10194_v1, %v10194_v1  ;;  %v10201_v1 = vld [vmem:[#allocation274_spill] sm:$0xff] }
 0x273   :  { %1479 = vmatpush1.bf16.msra.mxu1 %v1395_v19  ;;  %1540 = vmatpush2.bf16.msra.mxu0 %v1357_v7  ;;  %v1349_v7 = vmul.bf16 %v10191_v29, %v10191_v29  ;;  %v10192_v19 = vld [vmem:[#allocation255_spill] sm:$0xff]  ;;  %v10198_v29 = vld [vmem:[#allocation281_spill] sm:$0xff] }
 0x274   :  { %1480 = vmatprep.subr.bf16.mxu1 %v1392_v58  ;;  %1541 = vmatprep.subr.bf16.mxu0 %v1354_v26  ;;  %v1387_v0 = vmul.bf16 %v10192_v19, %v10192_v19  ;;  %v10193_v58 = vld [vmem:[#allocation258_spill] sm:$0xff]  ;;  %v1342_v19 = vmul.bf16 %v10198_v29, %v10198_v29 }
 0x275   :  { %v1384_v26 = vmul.bf16 %v10193_v58, %v10193_v58  ;;  %v10200_v58 = vld [vmem:[#allocation271_spill] sm:$0xff] }
 0x277   :  { %1481 = vmatpush1.bf16.msra.mxu1 %v1391_v22  ;;  %1542 = vmatpush2.bf16.msra.mxu0 %v1353_v27  ;;  %v10195_v22 = vld [vmem:[#allocation278_spill] sm:$0xff] }
 0x278   :  { %1482 = vmatprep.subr.bf16.mxu1 %v1388_v59  ;;  %1543 = vmatprep.subr.bf16.mxu0 %v1350_v44  ;;  %v1345_v27 = vmul.bf16 %v10195_v22, %v10195_v22  ;;  %v10196_v44 = vld [vmem:[#allocation263_spill] sm:$0xff]  ;;  %v10197_v59 = vld [vmem:[#allocation266_spill] sm:$0xff] }
 0x279   :  { %v1383_v48 = vmul.bf16 %v10196_v44, %v10196_v44  ;;  %v1380_v47 = vmul.bf16 %v10197_v59, %v10197_v59  ;;  %v10202_v22 = vld [vmem:[#allocation279_spill] sm:$0xff]  ;;  %v10203_v59 = vld [vmem:[#allocation282_spill] sm:$0xff] }
 0x27a   :  { %v1375_v44 = vmul.bf16 %v10202_v22, %v10202_v22  ;;  %v10208_v22 = vld [vmem:[#allocation293_spill] sm:$0xff] }
 0x27b   :  { %1483 = vmatpush1.bf16.msra.mxu1 %v1387_v0  ;;  %1544 = vmatpush2.bf16.msra.mxu0 %v1349_v7  ;;  %v10199_v0 = vld [vmem:[#allocation286_spill] sm:$0xff] }
 0x27c   :  { %1484 = vmatprep.subr.bf16.mxu1 %v1384_v26  ;;  %1545 = vmatprep.subr.bf16.mxu0 %v1346_v37  ;;  %v1341_v7 = vmul.bf16 %v10199_v0, %v10199_v0  ;;  %v1379_v26 = vmul.bf16 %v10200_v58, %v10200_v58  ;;  %v1376_v37 = vmul.bf16 %v10201_v1, %v10201_v1 }
 0x27f   :  { %1485 = vmatpush1.bf16.msra.mxu1 %v1383_v48  ;;  %1546 = vmatpush2.bf16.msra.mxu0 %v1345_v27  ;;  %v1372_v27 = vmul.bf16 %v10203_v59, %v10203_v59  ;;  %v10209_v59 = vld [vmem:[#allocation296_spill] sm:$0xff] }
 0x280   :  { %1486 = vmatprep.subr.bf16.mxu1 %v1380_v47  ;;  %1547 = vmatprep.subr.bf16.mxu0 %v1342_v19  ;;  %v10204_v47 = vmov 0   ;;  %v10205_v19 = vld [vmem:[#allocation287_spill] sm:$0xff] }
 0x281   :  { %v1371_v0 = vmul.bf16 %v10205_v19, %v10205_v19  ;;  %v1424_v19 = vmul.bf16 %v6697_v35, %v6697_v35  ;;  %v1415_v35 = vmul.bf16 %v6742_v14, %v6742_v14  ;;  %v1402_v14 = vmul.bf16 %v6800_v39, %v6800_v39 }
 0x282   :  { %v1394_v39 = vmul.bf16 %v6838_v5, %v6838_v5 }
 0x283   :  { %1487 = vmatpush1.bf16.msra.mxu1 %v1379_v26  ;;  %1548 = vmatpush2.bf16.msra.mxu0 %v1341_v7  ;;  %v10206_v7 = vld [vmem:[#allocation289_spill] sm:$0xff] }
 0x284   :  { %1488 = vmatprep.subr.bf16.mxu1 %v1376_v37  ;;  %v1432_v58 = vmul.bf16 %v10206_v7, %v10206_v7  ;;  %v10207_v37 = vld [vmem:[#allocation292_spill] sm:$0xff]  ;;  %v1420_v7 = vmul.bf16 %v6709_v17, %v6709_v17  ;;  %v1408_v17 = vmul.bf16 %v6764_v15, %v6764_v15  ;;  %v1398_v15 = vmul.bf16 %v6818_v55, %v6818_v55  ;;  %v10213_v55 = vld [vmem:[#allocation167_spill] sm:$0xff] }
 0x286   :  { %1550 = vmatmul.mubr.bf16.vlgmr.msra.gmra.mxu0 %v5800_v10  ;;  %v7118_v48 = vpop.f32.mrf.mxu0  ;;  %v1431_v10 = vmul.bf16 %v10207_v37, %v10207_v37  ;;  %v10212_v37 = vld [vmem:[#allocation161_spill] sm:$0xff] }
 0x287   :  { %1489 = vmatpush1.bf16.msra.mxu1 %v1375_v44  ;;  %1893 = vmatprep.mubr.bf16.mxu0 %v10204_v47  ;;  %v1428_v44 = vmul.bf16 %v10208_v22, %v10208_v22  ;;  %v10214_v22 = vld [vmem:[#allocation305_spill] sm:$0xff] }
 0x288   :  { %1490 = vmatprep.subr.bf16.mxu1 %v1372_v27  ;;  %v7121_v29 = vpop.f32.mrf.mxu0  ;;  %v1427_v27 = vmul.bf16 %v10209_v59, %v10209_v59  ;;  %v10215_v59 = vld [vmem:[#allocation173_spill] sm:$0xff] }
 0x289   :  { %v1385_v5 = vmul.bf16 %v10215_v59, %v10215_v59 }
 0x28a   :  { %v1181_v26 = vpop.f32.mrf.mxu0 }
 0x28b   :  { %1491 = vmatpush1.bf16.msra.mxu1 %v1371_v0  ;;  %v1423_v0 = vmul.bf16 %v6705_v43, %v6705_v43  ;;  %v1416_v26 = vmul.bf16 %v6728_v16, %v6728_v16  ;;  %v1411_v43 = vmul.bf16 %v6760_v11, %v6760_v11  ;;  %v1404_v16 = vmul.bf16 %v6782_v62, %v6782_v62  ;;  %v10210_v62 = vld [vmem:[#allocation151_spill] sm:$0xff] }
 0x28c   :  { %1492 = vmatprep.subr.bf16.mxu1 %v1432_v58  ;;  %v1182_v1 = vpop.f32.mrf.mxu0  ;;  %v1419_v58 = vmul.bf16 %v6724_v32, %v6724_v32  ;;  %v1407_v32 = vmul.bf16 %v6778_v6, %v6778_v6  ;;  %v1401_v11 = vmul.bf16 %v6814_v53, %v6814_v53  ;;  %v10211_v6 = vld [vmem:[#allocation157_spill] sm:$0xff] }
 0x28d   :  { %v1412_v1 = vmul.bf16 %v6746_v52, %v6746_v52  ;;  %v1403_v52 = vmul.bf16 %v6796_v61, %v6796_v61  ;;  %v1397_v61 = vmul.bf16 %v10210_v62, %v10210_v62  ;;  %v1393_v53 = vmul.bf16 %v10211_v6, %v10211_v6 }
 0x28e   :  { %v1429_v62 = vmul.bf16 %v6974_v25, %v6974_v25  ;;  %v1414_v25 = vmul.bf16 %v7020_v46, %v7020_v46 }
 0x28f   :  { %1493 = vmatpush2.bf16.msra.mxu1 %v1431_v10  ;;  %v1390_v10 = vmul.bf16 %v10212_v37, %v10212_v37 }
 0x290   :  { %1494 = vmatprep.subr.bf16.mxu1 %v1428_v44  ;;  %v1386_v44 = vmul.bf16 %v10214_v22, %v10214_v22 }
 0x293   :  { %1495 = vmatpush2.bf16.msra.mxu1 %v1427_v27  ;;  %v10216_v27 = vld [vmem:[#allocation307_spill] sm:$0xff] }
 0x294   :  { %1496 = vmatprep.subr.bf16.mxu1 %v1424_v19  ;;  %v1382_v19 = vmul.bf16 %v10216_v27, %v10216_v27 }
 0x297   :  { %1497 = vmatpush2.bf16.msra.mxu1 %v1423_v0  ;;  %v10217_v0 = vld [vmem:[#allocation179_spill] sm:$0xff] }
 0x298   :  { %1498 = vmatprep.subr.bf16.mxu1 %v1420_v7  ;;  %v1381_v7 = vmul.bf16 %v10217_v0, %v10217_v0 }
 0x29b   :  { %1499 = vmatpush2.bf16.msra.mxu1 %v1419_v58  ;;  %v10218_v58 = vld [vmem:[#allocation309_spill] sm:$0xff] }
 0x29c   :  { %1500 = vmatprep.subr.bf16.mxu1 %v1416_v26  ;;  %v1378_v26 = vmul.bf16 %v10218_v58, %v10218_v58 }
 0x29f   :  { %1501 = vmatpush2.bf16.msra.mxu1 %v1415_v35  ;;  %v10219_v35 = vld [vmem:[#allocation185_spill] sm:$0xff] }
 0x2a0   :  { %1502 = vmatprep.subr.bf16.mxu1 %v1412_v1  ;;  %v1377_v1 = vmul.bf16 %v10219_v35, %v10219_v35 }
 0x2a3   :  { %1503 = vmatpush2.bf16.msra.mxu1 %v1411_v43  ;;  %v1374_v43 = vmul.bf16 %v6928_v38, %v6928_v38  ;;  %v1430_v38 = vmul.bf16 %v6964_v8, %v6964_v8  ;;  %v1418_v8 = vmul.bf16 %v7006_v34, %v7006_v34  ;;  %v1409_v34 = vmul.bf16 %v7044_v60, %v7044_v60 }
 0x2a4   :  { %1504 = vmatprep.subr.bf16.mxu1 %v1408_v17 }
 0x2a7   :  { %1505 = vmatpush2.bf16.msra.mxu1 %v1407_v32 }
 0x2a8   :  { %1506 = vmatprep.subr.bf16.mxu1 %v1404_v16  ;;  %v1373_v16 = vmul.bf16 %v6943_v13, %v6943_v13  ;;  %v1426_v13 = vmul.bf16 %v6978_v4, %v6978_v4  ;;  %v1417_v4 = vmul.bf16 %v7016_v30, %v7016_v30  ;;  %v1405_v30 = vmul.bf16 %v7058_v42, %v7058_v42 }
 0x2a9   :  { %v1629_v42 = vlaneseq }
 0x2ab   :  { %1507 = vmatpush2.bf16.msra.mxu1 %v1403_v52  ;;  %v1434_v52 = vmul.bf16 %v6952_v45, %v6952_v45  ;;  %v1425_v45 = vmul.bf16 %v6988_v31, %v6988_v31  ;;  %v1410_v31 = vmul.bf16 %v7034_v56, %v7034_v56  ;;  %v7233_v22 = vshrl.u32 %v1629_v42, 7 }
 0x2ac   :  { %1558 = vmatprep.subr.bf16.mxu1 %v1402_v14 }
 0x2ad   :  { %v1643_v59 = vsub.s32 3, %v7233_v22 }
 0x2ae   :  { %1509 = vmatmul.mubr.bf16.vlgmr.msra.gmra.mxu1 %v10114_v51 }
 0x2af   :  { %1559 = vmatpush1.bf16.msra.mxu1 %v1401_v11  ;;  %1590 = vmatprep.mubr.bf16.mxu1 %v10119_v63  ;;  %v1389_v63 = vmul.bf16 %v10213_v55, %v10213_v55 }
 0x2b0   :  { %1560 = vmatprep.subr.bf16.mxu1 %v1398_v15  ;;  %v1433_v15 = vmul.bf16 %v6959_v54, %v6959_v54  ;;  %v1421_v54 = vmul.bf16 %v7002_v12, %v7002_v12  ;;  %v1406_v12 = vmul.bf16 %v7048_v21, %v7048_v21 }
 0x2b3   :  { %1561 = vmatpush1.bf16.msra.mxu1 %v1397_v61  ;;  %v1422_v61 = vmul.bf16 %v6992_v23, %v6992_v23  ;;  %v1413_v23 = vmul.bf16 %v7030_v41, %v7030_v41 }
 0x2b4   :  { %1562 = vmatprep.subr.bf16.mxu1 %v1394_v39 }
 0x2b7   :  { %1563 = vmatpush1.bf16.msra.mxu1 %v1393_v53 }
 0x2b8   :  { %1564 = vmatprep.subr.bf16.mxu1 %v1390_v10 }
 0x2bb   :  { %1565 = vmatpush1.bf16.msra.mxu1 %v1389_v63 }
 0x2bc   :  { %1566 = vmatprep.subr.bf16.mxu1 %v1386_v44  ;;  %v1627_v44 = vld [vmem:[%s9378_s4] sm:$0xf] }
 0x2bf   :  { %1567 = vmatpush1.bf16.msra.mxu1 %v1385_v5 }
 0x2c0   :  { %1568 = vmatprep.subr.bf16.mxu1 %v1382_v19  ;;  %v7248_v19 = vrot.slane %v1627_v44, %v1643_v59 }
 0x2c3   :  { %1569 = vmatpush1.bf16.msra.mxu1 %v1381_v7 }
 0x2c4   :  { %1570 = vmatprep.subr.bf16.mxu1 %v1378_v26 }
 0x2c6   :  { %v7189_v17 = vpop.f32.mrf.mxu0 }
 0x2c7   :  { %1571 = vmatpush1.bf16.msra.mxu1 %v1377_v1 }
 0x2c8   :  { %1572 = vmatprep.subr.bf16.mxu1 %v1374_v43  ;;  %v7191_v32 = vpop.f32.mrf.mxu0 }
 0x2ca   :  { %v1263_v14 = vpop.f32.mrf.mxu0 }
 0x2cb   :  { %1573 = vmatpush1.bf16.msra.mxu1 %v1373_v16 }
 0x2cc   :  { %1574 = vmatprep.subr.bf16.mxu1 %v1434_v52  ;;  %v1264_v11 = vpop.f32.mrf.mxu0 }
 0x2cf   :  { %1575 = vmatpush2.bf16.msra.mxu1 %v1433_v15 }
 0x2d0   :  { %1576 = vmatprep.subr.bf16.mxu1 %v1430_v38 }
 0x2d3   :  { %1577 = vmatpush2.bf16.msra.mxu1 %v1429_v62 }
 0x2d4   :  { %1578 = vmatprep.subr.bf16.mxu1 %v1426_v13 }
 0x2d7   :  { %1579 = vmatpush2.bf16.msra.mxu1 %v1425_v45 }
 0x2d8   :  { %1580 = vmatprep.subr.bf16.mxu1 %v1422_v61 }
 0x2db   :  { %1581 = vmatpush2.bf16.msra.mxu1 %v1421_v54 }
 0x2dc   :  { %1582 = vmatprep.subr.bf16.mxu1 %v1418_v8 }
 0x2df   :  { %1583 = vmatpush2.bf16.msra.mxu1 %v1417_v4 }
 0x2e0   :  { %1584 = vmatprep.subr.bf16.mxu1 %v1414_v25 }
 0x2e3   :  { %1585 = vmatpush2.bf16.msra.mxu1 %v1413_v23 }
 0x2e4   :  { %1586 = vmatprep.subr.bf16.mxu1 %v1410_v31  ;;  %v7258_v31 = vsub.s32 1, %v7233_v22 }
 0x2e6   :  { %10221 = vst [vmem:[#allocation197_spill] sm:$0xff] %v7258_v31 }
 0x2e7   :  { %1587 = vmatpush2.bf16.msra.mxu1 %v1409_v34 }
 0x2e8   :  { %1588 = vmatprep.subr.bf16.mxu1 %v1406_v12  ;;  %v7264_v12 = vld [vmem:[%s9379_s5] sm:$0xf] }
 0x2eb   :  { %1589 = vmatpush2.bf16.msra.mxu1 %v1405_v30  ;;  %v1636_v30 = vrot.slane %v1627_v44, %v7258_v31 }
 0x2ee   :  { %1591 = vmatmul.mubr.bf16.vlgmr.msra.gmra.mxu1 %v10114_v51  ;;  %v1218_v46 = vpop.f32.mrf.mxu1  ;;  %v1639_v51 = vsub.s32 2, %v7233_v22 }
 0x2ef   :  { %2246 = vmatprep.mubr.bf16.mxu1 %v10204_v47  ;;  %v1219_v26 = vadd.f32 %v1218_v46, %v7118_v48 }
 0x2f0   :  { %v1220_v56 = vpop.f32.mrf.mxu1  ;;  %v7242_v5 = vrot.slane %v1627_v44, %v1639_v51 }
 0x2f1   :  { %v1221_v35 = vadd.f32 %v1220_v56, %v7121_v29  ;;  %v1599_v1 = vmul.f32 0.00390625, %v1219_v26  ;;  %v7255_v29 = vsub.s32 0, %v7233_v22  ;;  %v7273_v26 = vpop.trf.xlu0 }
 0x2f2   :  { %v1222_v41 = vpop.f32.mrf.mxu1 }
 0x2f3   :  { %v1600_v16 = vmul.f32 0.00390625, %v1221_v35  ;;  %v1607_v11 = vmul.f32 %v1599_v1, %v1599_v1  ;;  %10220 = vst [vmem:[#allocation193_spill] sm:$0xff] %v7255_v29  ;;  %v1632_v34 = vrot.slane %v1627_v44, %v7255_v29  ;;  %v1662_v41 = vrot.slane %v7264_v12, %v7255_v29 }
 0x2f4   :  { %v1223_v39 = vpop.f32.mrf.mxu1 }
 0x2f5   :  { %v1608_v13 = vmul.f32 %v1600_v16, %v1600_v16 }
 0x306   :  { %v1469_v6 = vpop.f32.mrf.mxu0 }
 0x308   :  { %v1471_v53 = vpop.f32.mrf.mxu0 }
 0x30a   :  { %v1473_v60 = vpop.f32.mrf.mxu0 }
 0x30b   :  { %v1666_v60 = vrot.slane %v7264_v12, %v7258_v31 }
 0x30c   :  { %v1474_v37 = vpop.f32.mrf.mxu0 }
 0x32e   :  { %v7229_v10 = vpop.f32.mrf.mxu1 }
 0x330   :  { %v7231_v21 = vpop.f32.mrf.mxu1 }
 0x332   :  { %v1304_v55 = vpop.f32.mrf.mxu1 }
 0x334   :  { %v1305_v63 = vpop.f32.mrf.mxu1 }
 0x346   :  { %v7244_v27 = vpop.f32.mrf.mxu0 }
 0x348   :  { %v7250_v0 = vpop.f32.mrf.mxu0 }
 0x34a   :  { %v1555_v7 = vpop.f32.mrf.mxu0 }
 0x34c   :  { %v1556_v58 = vpop.f32.mrf.mxu0 }
 0x36e   :  { %v1510_v43 = vpop.f32.mrf.mxu1 }
 0x36f   :  { %v1511_v52 = vadd.f32 %v1510_v43, %v1469_v6  ;;  %v7280_v43 = vpop.trf.xlu0 }
 0x370   :  { %v1512_v14 = vpop.f32.mrf.mxu1 }
 0x371   :  { %v1603_v15 = vmul.f32 0.00390625, %v1511_v52  ;;  %v1513_v38 = vadd.f32 %v1512_v14, %v1471_v53  ;;  %v1301_v14 = vadd.f32 %v7229_v10, %v7189_v17 }
 0x372   :  { %v1514_v62 = vpop.f32.mrf.mxu1 }
 0x373   :  { %v1611_v45 = vsub.f32 %v1603_v15, %v1607_v11  ;;  %v1604_v61 = vmul.f32 0.00390625, %v1513_v38  ;;  %v1303_v11 = vadd.f32 %v7231_v21, %v7191_v32  ;;  %v1601_v15 = vmul.f32 0.00390625, %v1301_v14 }
 0x374   :  { %v1515_v54 = vpop.f32.mrf.mxu1 }
 0x375   :  { %v1615_v8 = vmax.f32 %v1611_v45, 0.0  ;;  %v1612_v4 = vsub.f32 %v1604_v61, %v1608_v13  ;;  %v1602_v13 = vmul.f32 0.00390625, %v1303_v11  ;;  %v1609_v54 = vmul.f32 %v1601_v15, %v1601_v15 }
 0x377   :  { %v1619_v25 = vadd.f32 1e-05, %v1615_v8  ;;  %v1616_v23 = vmax.f32 %v1612_v4, 0.0  ;;  %v1610_v4 = vmul.f32 %v1602_v13, %v1602_v13 }
 0x379   :  { %5503 = vrsqrt.f32 %v1619_v25  ;;  %v1620_v48 = vadd.f32 1e-05, %v1616_v23 }
 0x37b   :  { %5505 = vrsqrt.f32 %v1620_v48 }
 0x386   :  { %v5504_v46 = vpop.eup %5503 }
 0x387   :  { %v1649_v56 = vmul.f32 %v5504_v46, %v1632_v34 }
 0x388   :  { %v5506_v39 = vpop.eup %5505 }
 0x389   :  { %v1650_v6 = vmul.f32 %v5506_v39, %v1636_v30  ;;  %v1683_v53 = vpack.c.bf16 %v1649_v56, %v1649_v56  ;;  %v1654_v37 = vmul.f32 %v1649_v56, %v1599_v1 }
 0x38b   :  { %v1684_v55 = vpack.c.bf16 %v1650_v6, %v1650_v6  ;;  %v1655_v63 = vmul.f32 %v1650_v6, %v1600_v16  ;;  %v1679_v42 = vsub.f32 %v1662_v41, %v1654_v37  ;;  %v1850_v44 = vsel %vm1848_vm1, %v1683_v53, 0  ;;  %v7285_v16 = vpop.trf.xlu0 }
 0x38c   :  { %v1670_v6 = vrot.slane %v7264_v12, %v1639_v51 }
 0x38d   :  { %5115 = vmatprep.subr.msk.bf16.mxu0 %vm1848_vm1, %v1684_v55  ;;  %v1680_v7 = vsub.f32 %v1666_v60, %v1655_v63  ;;  %v2567_v58 = vpack.c.bf16 %v1679_v42, %v1679_v42  ;;  %v1674_v55 = vrot.slane %v7264_v12, %v1643_v59 }
 0x38e   :  { %1876 = vmatpush1.bf16.msra.mxu0 %v1850_v44 }
 0x38f   :  { %v2568_v35 = vpack.c.bf16 %v1680_v7, %v1680_v7  ;;  %v2572_v1 = vsel %vm1848_vm1, %v2567_v58, 0  ;;  %v7290_v52 = vpop.trf.xlu0  ;;  %v7331_v58 = vpop.trf.xlu1 }
 0x391   :  { %5116 = vmatmul.mubr.msk.bf16.vlgmr.msra.gmra.mxu0 %vm1751_vm2, %v7273_v26  ;;  %5181 = vmatprep.subr.msk.bf16.mxu0 %vm1848_vm1, %v2568_v35 }
 0x392   :  { %2598 = vmatpush1.bf16.msra.mxu0 %v2572_v1  ;;  %1903 = vmatprep.mubr.bf16.mxu0 %v10204_v47 }
 0x393   :  { %v7299_v62 = vpop.trf.xlu0  ;;  %v7341_v59 = vpop.trf.xlu1 }
 0x397   :  { %v7306_v34 = vpop.trf.xlu0  ;;  %v7349_v12 = vpop.trf.xlu1 }
 0x399   :  { %5117 = vmatmul.mubr.msk.bf16.gmra.mxu0 %vm1751_vm2, %v7280_v43 }
 0x39a   :  { %1913 = vmatprep.mubr.bf16.mxu0 %v10204_v47 }
 0x39b   :  { %v7357_v1 = vpop.trf.xlu1 }
 0x39f   :  { %v7365_v14 = vpop.trf.xlu1 }
 0x3a1   :  { %5118 = vmatmul.mubr.msk.bf16.gmra.mxu0 %vm1751_vm2, %v7285_v16 }
 0x3a2   :  { %1923 = vmatprep.mubr.bf16.mxu0 %v10204_v47 }
 0x3a3   :  { %v7373_v11 = vpop.trf.xlu1 }
 0x3a9   :  { %5119 = vmatmul.mubr.msk.bf16.gmra.mxu0 %vm1751_vm2, %v7290_v52 }
 0x3aa   :  { %1933 = vmatprep.mubr.bf16.mxu0 %v10204_v47 }
 0x3ae   :  { %v1592_v38 = vpop.f32.mrf.mxu1 }
 0x3af   :  { %v1593_v45 = vadd.f32 %v1592_v38, %v7244_v27 }
 0x3b0   :  { %v1594_v61 = vpop.f32.mrf.mxu1 }
 0x3b1   :  { %v1605_v8 = vmul.f32 0.00390625, %v1593_v45  ;;  %v1595_v17 = vadd.f32 %v1594_v61, %v7250_v0  ;;  %5120 = vmatmul.mubr.msk.bf16.gmra.mxu0 %vm1751_vm2, %v7299_v62  ;;  %v7311_v0 = vpop.trf.xlu0 }
 0x3b2   :  { %1943 = vmatprep.mubr.bf16.mxu0 %v10204_v47  ;;  %v1596_v10 = vpop.f32.mrf.mxu1 }
 0x3b3   :  { %v1613_v32 = vsub.f32 %v1605_v8, %v1609_v54  ;;  %v1606_v21 = vmul.f32 0.00390625, %v1595_v17 }
 0x3b4   :  { %v1597_v25 = vpop.f32.mrf.mxu1 }
 0x3b5   :  { %v1617_v23 = vmax.f32 %v1613_v32, 0.0  ;;  %v1614_v48 = vsub.f32 %v1606_v21, %v1610_v4  ;;  %v7316_v41 = vpop.trf.xlu0 }
 0x3b7   :  { %v1621_v27 = vadd.f32 1e-05, %v1617_v23  ;;  %v1618_v30 = vmax.f32 %v1614_v48, 0.0 }
 0x3b9   :  { %5507 = vrsqrt.f32 %v1621_v27  ;;  %v1622_v46 = vadd.f32 1e-05, %v1618_v30  ;;  %5121 = vmatmul.mubr.msk.bf16.gmra.mxu0 %vm1751_vm2, %v7306_v34 }
 0x3ba   :  { %1953 = vmatprep.mubr.bf16.mxu0 %v10204_v47 }
 0x3bb   :  { %5509 = vrsqrt.f32 %v1622_v46 }
 0x3c1   :  { %5122 = vmatmul.mubr.msk.bf16.gmra.mxu0 %vm1751_vm2, %v7311_v0 }
 0x3c2   :  { %1963 = vmatprep.mubr.bf16.mxu0 %v10204_v47 }
 0x3c6   :  { %v5508_v56 = vpop.eup %5507 }
 0x3c7   :  { %v1651_v39 = vmul.f32 %v5508_v56, %v7242_v5 }
 0x3c8   :  { %v5510_v53 = vpop.eup %5509 }
 0x3c9   :  { %5123 = vmatmul.mubr.msk.bf16.gmra.mxu0 %vm1751_vm2, %v7316_v41  ;;  %v1652_v60 = vmul.f32 %v5510_v53, %v7248_v19  ;;  %v1685_v37 = vpack.c.bf16 %v1651_v39, %v1651_v39  ;;  %v1656_v63 = vmul.f32 %v1651_v39, %v1601_v15  ;;  %v7381_v15 = vpop.trf.xlu1 }
 0x3ca   :  { %1973 = vmatprep.mubr.bf16.mxu0 %v10204_v47 }
 0x3cb   :  { %v1686_v42 = vpack.c.bf16 %v1652_v60, %v1652_v60  ;;  %v1657_v5 = vmul.f32 %v1652_v60, %v1602_v13  ;;  %v1681_v44 = vsub.f32 %v1670_v6, %v1656_v63  ;;  %v1856_v51 = vsel %vm1848_vm1, %v1685_v37, 0  ;;  %v7397_v13 = vpop.trf.xlu0 }
 0x3cd   :  { %5148 = vmatprep.subr.msk.bf16.mxu1 %vm1848_vm1, %v1686_v42  ;;  %v1682_v7 = vsub.f32 %v1674_v55, %v1657_v5  ;;  %v2569_v19 = vpack.c.bf16 %v1681_v44, %v1681_v44  ;;  %v7389_v38 = vpop.trf.xlu1 }
 0x3ce   :  { %2229 = vmatpush1.bf16.msra.mxu1 %v1856_v51 }
 0x3cf   :  { %v2570_v35 = vpack.c.bf16 %v1682_v7, %v1682_v7  ;;  %v2578_v22 = vsel %vm1848_vm1, %v2569_v19, 0  ;;  %v7405_v45 = vpop.trf.xlu0 }
 0x3d1   :  { %5124 = vmatmul.mubr.msk.bf16.gmra.mxu0 %vm1751_vm2, %v7331_v58  ;;  %5149 = vmatmul.mubr.msk.bf16.vlgmr.msra.gmra.mxu1 %vm1751_vm2, %v7273_v26  ;;  %v7461_v32 = vpop.trf.xlu1 }
 0x3d2   :  { %5214 = vmatprep.subr.msk.bf16.mxu1 %vm1848_vm1, %v2570_v35  ;;  %1983 = vmatprep.mubr.bf16.mxu0 %v10204_v47 }
 0x3d3   :  { %2951 = vmatpush1.bf16.msra.mxu1 %v2578_v22  ;;  %2256 = vmatprep.mubr.bf16.mxu1 %v10204_v47  ;;  %v7413_v61 = vpop.trf.xlu0 }
 0x3d5   :  { %v7475_v48 = vpop.trf.xlu1 }
 0x3d7   :  { %v7421_v54 = vpop.trf.xlu0 }
 0x3d9   :  { %5125 = vmatmul.mubr.msk.bf16.gmra.mxu0 %vm1751_vm2, %v7341_v59  ;;  %5150 = vmatmul.mubr.msk.bf16.gmra.mxu1 %vm1751_vm2, %v7280_v43  ;;  %v7491_v39 = vpop.trf.xlu1 }
 0x3da   :  { %1993 = vmatprep.mubr.bf16.mxu0 %v10204_v47  ;;  %2266 = vmatprep.mubr.bf16.mxu1 %v10204_v47 }
 0x3db   :  { %v7429_v8 = vpop.trf.xlu0 }
 0x3dd   :  { %v7507_v55 = vpop.trf.xlu1 }
 0x3df   :  { %v7437_v17 = vpop.trf.xlu0 }
 0x3e1   :  { %5126 = vmatmul.mubr.msk.bf16.gmra.mxu0 %vm1751_vm2, %v7349_v12  ;;  %5151 = vmatmul.mubr.msk.bf16.gmra.mxu1 %vm1751_vm2, %v7285_v16  ;;  %v7523_v51 = vpop.trf.xlu1 }
 0x3e2   :  { %2003 = vmatprep.mubr.bf16.mxu0 %v10204_v47  ;;  %2276 = vmatprep.mubr.bf16.mxu1 %v10204_v47 }
 0x3e3   :  { %v7445_v10 = vpop.trf.xlu0 }
 0x3e5   :  { %v7539_v31 = vpop.trf.xlu1 }
 0x3e7   :  { %v7453_v4 = vpop.trf.xlu0 }
 0x3e9   :  { %5127 = vmatmul.mubr.msk.bf16.gmra.mxu0 %vm1751_vm2, %v7357_v1  ;;  %5152 = vmatmul.mubr.msk.bf16.gmra.mxu1 %vm1751_vm2, %v7290_v52  ;;  %v7555_v3 = vpop.trf.xlu1 }
 0x3ea   :  { %2013 = vmatprep.mubr.bf16.mxu0 %v10204_v47  ;;  %2286 = vmatprep.mubr.bf16.mxu1 %v10204_v47 }
 0x3ed   :  { %v7571_v50 = vpop.trf.xlu1 }
 0x3f1   :  { %5128 = vmatmul.mubr.msk.bf16.gmra.mxu0 %vm1751_vm2, %v7365_v14  ;;  %5153 = vmatmul.mubr.msk.bf16.gmra.mxu1 %vm1751_vm2, %v7299_v62 }
 0x3f2   :  { %2023 = vmatprep.mubr.bf16.mxu0 %v10204_v47  ;;  %2296 = vmatprep.mubr.bf16.mxu1 %v10204_v47 }
 0x3f9   :  { %5129 = vmatmul.mubr.msk.bf16.gmra.mxu0 %vm1751_vm2, %v7373_v11  ;;  %5154 = vmatmul.mubr.msk.bf16.gmra.mxu1 %vm1751_vm2, %v7306_v34 }
 0x3fa   :  { %2033 = vmatprep.mubr.bf16.mxu0 %v10204_v47  ;;  %2306 = vmatprep.mubr.bf16.mxu1 %v10204_v47 }
 0x401   :  { %5130 = vmatmul.mubr.msk.bf16.gmra.mxu0 %vm1751_vm2, %v7381_v15  ;;  %5155 = vmatmul.mubr.msk.bf16.gmra.mxu1 %vm1751_vm2, %v7311_v0 }
 0x402   :  { %2043 = vmatprep.mubr.bf16.mxu0 %v10204_v47  ;;  %2316 = vmatprep.mubr.bf16.mxu1 %v10204_v47 }
 0x409   :  { %5131 = vmatmul.mubr.msk.bf16.gmra.mxu0 %vm1751_vm2, %v7389_v38  ;;  %5156 = vmatmul.mubr.msk.bf16.gmra.mxu1 %vm1751_vm2, %v7316_v41 }
 0x40a   :  { %2053 = vmatprep.mubr.bf16.mxu0 %v10204_v47  ;;  %2326 = vmatprep.mubr.bf16.mxu1 %v10204_v47 }
 0x411   :  { %5132 = vmatmul.mubr.msk.bf16.gmra.mxu0 %vm1751_vm2, %v7397_v13  ;;  %5157 = vmatmul.mubr.msk.bf16.gmra.mxu1 %vm1751_vm2, %v7331_v58 }
 0x412   :  { %2063 = vmatprep.mubr.bf16.mxu0 %v10204_v47  ;;  %2336 = vmatprep.mubr.bf16.mxu1 %v10204_v47 }
 0x419   :  { %5133 = vmatmul.mubr.msk.bf16.gmra.mxu0 %vm1751_vm2, %v7405_v45  ;;  %5158 = vmatmul.mubr.msk.bf16.gmra.mxu1 %vm1751_vm2, %v7341_v59 }
 0x41a   :  { %2073 = vmatprep.mubr.bf16.mxu0 %v10204_v47  ;;  %2346 = vmatprep.mubr.bf16.mxu1 %v10204_v47 }
 0x421   :  { %5134 = vmatmul.mubr.msk.bf16.gmra.mxu0 %vm1751_vm2, %v7413_v61  ;;  %5159 = vmatmul.mubr.msk.bf16.gmra.mxu1 %vm1751_vm2, %v7349_v12 }
 0x422   :  { %2083 = vmatprep.mubr.bf16.mxu0 %v10204_v47  ;;  %2356 = vmatprep.mubr.bf16.mxu1 %v10204_v47 }
 0x429   :  { %5135 = vmatmul.mubr.msk.bf16.gmra.mxu0 %vm1751_vm2, %v7421_v54  ;;  %5160 = vmatmul.mubr.msk.bf16.gmra.mxu1 %vm1751_vm2, %v7357_v1 }
 0x42a   :  { %2093 = vmatprep.mubr.bf16.mxu0 %v10204_v47  ;;  %2366 = vmatprep.mubr.bf16.mxu1 %v10204_v47 }
 0x431   :  { %5136 = vmatmul.mubr.msk.bf16.gmra.mxu0 %vm1751_vm2, %v7429_v8  ;;  %5161 = vmatmul.mubr.msk.bf16.gmra.mxu1 %vm1751_vm2, %v7365_v14 }
 0x432   :  { %2103 = vmatprep.mubr.bf16.mxu0 %v10204_v47  ;;  %2376 = vmatprep.mubr.bf16.mxu1 %v10204_v47 }
 0x439   :  { %5137 = vmatmul.mubr.msk.bf16.gmra.mxu0 %vm1751_vm2, %v7437_v17  ;;  %5162 = vmatmul.mubr.msk.bf16.gmra.mxu1 %vm1751_vm2, %v7373_v11 }
 0x43a   :  { %2113 = vmatprep.mubr.bf16.mxu0 %v10204_v47  ;;  %2386 = vmatprep.mubr.bf16.mxu1 %v10204_v47 }
 0x441   :  { %5138 = vmatmul.mubr.msk.bf16.gmra.mxu0 %vm1751_vm2, %v7445_v10  ;;  %5163 = vmatmul.mubr.msk.bf16.gmra.mxu1 %vm1751_vm2, %v7381_v15 }
 0x442   :  { %2123 = vmatprep.mubr.bf16.mxu0 %v10204_v47  ;;  %2396 = vmatprep.mubr.bf16.mxu1 %v10204_v47 }
 0x449   :  { %5139 = vmatmul.mubr.msk.bf16.gmra.mxu0 %vm1751_vm2, %v7453_v4  ;;  %5164 = vmatmul.mubr.msk.bf16.gmra.mxu1 %vm1751_vm2, %v7389_v38 }
 0x44a   :  { %2133 = vmatprep.mubr.bf16.mxu0 %v10204_v47  ;;  %2406 = vmatprep.mubr.bf16.mxu1 %v10204_v47 }
 0x451   :  { %v7463_v21 = vpop.f32.mrf.mxu0  ;;  %5140 = vmatmul.mubr.msk.bf16.gmra.mxu0 %vm1751_vm2, %v7461_v32  ;;  %5165 = vmatmul.mubr.msk.bf16.gmra.mxu1 %vm1751_vm2, %v7397_v13 }
 0x452   :  { %2143 = vmatprep.mubr.bf16.mxu0 %v10204_v47  ;;  %2416 = vmatprep.mubr.bf16.mxu1 %v10204_v47 }
 0x453   :  { %v7471_v25 = vpop.f32.mrf.mxu0 }
 0x455   :  { %v7473_v23 = vpop.f32.mrf.mxu0 }
 0x457   :  { %v7477_v27 = vpop.f32.mrf.mxu0 }
 0x459   :  { %v7479_v30 = vpop.f32.mrf.mxu0  ;;  %5141 = vmatmul.mubr.msk.bf16.gmra.mxu0 %vm1751_vm2, %v7475_v48  ;;  %5166 = vmatmul.mubr.msk.bf16.gmra.mxu1 %vm1751_vm2, %v7405_v45 }
 0x45a   :  { %2153 = vmatprep.mubr.bf16.mxu0 %v10204_v47  ;;  %2426 = vmatprep.mubr.bf16.mxu1 %v10204_v47 }
 0x45b   :  { %v7487_v46 = vpop.f32.mrf.mxu0 }
 0x45d   :  { %v7489_v56 = vpop.f32.mrf.mxu0 }
 0x45f   :  { %v7493_v6 = vpop.f32.mrf.mxu0 }
 0x461   :  { %v7495_v53 = vpop.f32.mrf.mxu0  ;;  %5142 = vmatmul.mubr.msk.bf16.gmra.mxu0 %vm1751_vm2, %v7491_v39  ;;  %5167 = vmatmul.mubr.msk.bf16.gmra.mxu1 %vm1751_vm2, %v7413_v61 }
 0x462   :  { %2163 = vmatprep.mubr.bf16.mxu0 %v10204_v47  ;;  %2436 = vmatprep.mubr.bf16.mxu1 %v10204_v47 }
 0x463   :  { %v7503_v60 = vpop.f32.mrf.mxu0 }
 0x465   :  { %v7505_v37 = vpop.f32.mrf.mxu0 }
 0x467   :  { %v7509_v63 = vpop.f32.mrf.mxu0 }
 0x469   :  { %v7511_v42 = vpop.f32.mrf.mxu0  ;;  %5143 = vmatmul.mubr.msk.bf16.gmra.mxu0 %vm1751_vm2, %v7507_v55  ;;  %5168 = vmatmul.mubr.msk.bf16.gmra.mxu1 %vm1751_vm2, %v7421_v54 }
 0x46a   :  { %2173 = vmatprep.mubr.bf16.mxu0 %v10204_v47  ;;  %2446 = vmatprep.mubr.bf16.mxu1 %v10204_v47 }
 0x46b   :  { %v7519_v5 = vpop.f32.mrf.mxu0 }
 0x46d   :  { %v7521_v44 = vpop.f32.mrf.mxu0 }
 0x46f   :  { %v7525_v7 = vpop.f32.mrf.mxu0 }
 0x471   :  { %v7527_v19 = vpop.f32.mrf.mxu0  ;;  %5144 = vmatmul.mubr.msk.bf16.gmra.mxu0 %vm1751_vm2, %v7523_v51  ;;  %5169 = vmatmul.mubr.msk.bf16.gmra.mxu1 %vm1751_vm2, %v7429_v8 }
 0x472   :  { %2183 = vmatprep.mubr.bf16.mxu0 %v10204_v47  ;;  %2456 = vmatprep.mubr.bf16.mxu1 %v10204_v47 }
 0x473   :  { %v7535_v35 = vpop.f32.mrf.mxu0 }
 0x475   :  { %v7537_v22 = vpop.f32.mrf.mxu0 }
 0x477   :  { %v7541_v29 = vpop.f32.mrf.mxu0 }
 0x479   :  { %v7543_v9 = vpop.f32.mrf.mxu0  ;;  %5145 = vmatmul.mubr.msk.bf16.gmra.mxu0 %vm1751_vm2, %v7539_v31  ;;  %5170 = vmatmul.mubr.msk.bf16.gmra.mxu1 %vm1751_vm2, %v7437_v17 }
 0x47a   :  { %2193 = vmatprep.mubr.bf16.mxu0 %v10204_v47  ;;  %2466 = vmatprep.mubr.bf16.mxu1 %v10204_v47 }
 0x47b   :  { %v7551_v40 = vpop.f32.mrf.mxu0 }
 0x47d   :  { %v7553_v28 = vpop.f32.mrf.mxu0 }
 0x47f   :  { %v7557_v2 = vpop.f32.mrf.mxu0 }
 0x480   :  { %10222 = vst [vmem:[#allocation199_spill] sm:$0xff] %v7557_v2 }
 0x481   :  { %v7559_v49 = vpop.f32.mrf.mxu0  ;;  %5146 = vmatmul.mubr.msk.bf16.gmra.mxu0 %vm1751_vm2, %v7555_v3  ;;  %5171 = vmatmul.mubr.msk.bf16.gmra.mxu1 %vm1751_vm2, %v7445_v10 }
 0x482   :  { %10223 = vst [vmem:[#allocation203_spill] sm:$0xff] %v7559_v49  ;;  %2203 = vmatprep.mubr.bf16.mxu0 %v10204_v47  ;;  %2476 = vmatprep.mubr.bf16.mxu1 %v10204_v47 }
 0x483   :  { %v7567_v36 = vpop.f32.mrf.mxu0 }
 0x484   :  { %10224 = vst [vmem:[#allocation205_spill] sm:$0xff] %v7567_v36 }
 0x485   :  { %v7569_v18 = vpop.f32.mrf.mxu0 }
 0x486   :  { %10225 = vst [vmem:[#allocation209_spill] sm:$0xff] %v7569_v18 }
 0x487   :  { %v7573_v33 = vpop.f32.mrf.mxu0 }
 0x488   :  { %10226 = vst [vmem:[#allocation211_spill] sm:$0xff] %v7573_v33 }
 0x489   :  { %v7575_v20 = vpop.f32.mrf.mxu0  ;;  %5147 = vmatmul.mubr.msk.bf16.gmra.mxu0 %vm1751_vm2, %v7571_v50  ;;  %5172 = vmatmul.mubr.msk.bf16.gmra.mxu1 %vm1751_vm2, %v7453_v4 }
 0x48a   :  { %10227 = vst [vmem:[#allocation215_spill] sm:$0xff] %v7575_v20  ;;  %2486 = vmatprep.mubr.bf16.mxu1 %v10204_v47  ;;  %2615 = vmatprep.mubr.bf16.mxu0 %v10204_v47 }
 0x48b   :  { %v7583_v57 = vpop.f32.mrf.mxu0 }
 0x48c   :  { %10228 = vst [vmem:[#allocation217_spill] sm:$0xff] %v7583_v57 }
 0x48d   :  { %v7585_v24 = vpop.f32.mrf.mxu0 }
 0x48e   :  { %10229 = vst [vmem:[#allocation222_spill] sm:$0xff] %v7585_v24 }
 0x48f   :  { %v7587_v18 = vpop.f32.mrf.mxu0 }
 0x490   :  { %10230 = vst [vmem:[#allocation226_spill] sm:$0xff] %v7587_v18 }
 0x491   :  { %v7589_v36 = vpop.f32.mrf.mxu0  ;;  %v7591_v33 = vpop.f32.mrf.mxu1  ;;  %5173 = vmatmul.mubr.msk.bf16.gmra.mxu1 %vm1751_vm2, %v7461_v32  ;;  %5182 = vmatmul.mubr.msk.bf16.vlgmr.msra.gmra.mxu0 %vm1751_vm2, %v7273_v26 }
 0x492   :  { %10231 = vst [vmem:[#allocation238_spill] sm:$0xff] %v7589_v36  ;;  %10232 = vst [vmem:[#allocation230_spill] sm:$0xff] %v7591_v33  ;;  %2496 = vmatprep.mubr.bf16.mxu1 %v10204_v47  ;;  %2625 = vmatprep.mubr.bf16.mxu0 %v10204_v47 }
 0x493   :  { %v7599_v20 = vpop.f32.mrf.mxu0  ;;  %v7601_v57 = vpop.f32.mrf.mxu1 }
 0x494   :  { %10233 = vst [vmem:[#allocation241_spill] sm:$0xff] %v7599_v20  ;;  %10234 = vst [vmem:[#allocation246_spill] sm:$0xff] %v7601_v57 }
 0x495   :  { %v7603_v24 = vpop.f32.mrf.mxu0  ;;  %v7605_v18 = vpop.f32.mrf.mxu1 }
 0x496   :  { %10235 = vst [vmem:[#allocation232_spill] sm:$0xff] %v7603_v24  ;;  %10236 = vst [vmem:[#allocation234_spill] sm:$0xff] %v7605_v18 }
 0x497   :  { %v7607_v36 = vpop.f32.mrf.mxu0  ;;  %v7609_v33 = vpop.f32.mrf.mxu1 }
 0x498   :  { %10237 = vst [vmem:[#allocation249_spill] sm:$0xff] %v7607_v36  ;;  %10238 = vst [vmem:[#allocation254_spill] sm:$0xff] %v7609_v33 }
 0x499   :  { %v7611_v49 = vpop.f32.mrf.mxu0  ;;  %v7613_v2 = vpop.f32.mrf.mxu1  ;;  %5174 = vmatmul.mubr.msk.bf16.gmra.mxu1 %vm1751_vm2, %v7475_v48  ;;  %5183 = vmatmul.mubr.msk.bf16.gmra.mxu0 %vm1751_vm2, %v7280_v43 }
 0x49a   :  { %10239 = vst [vmem:[#allocation239_spill] sm:$0xff] %v7611_v49  ;;  %10240 = vst [vmem:[#allocation242_spill] sm:$0xff] %v7613_v2  ;;  %2506 = vmatprep.mubr.bf16.mxu1 %v10204_v47  ;;  %2635 = vmatprep.mubr.bf16.mxu0 %v10204_v47 }
 0x49b   :  { %v7621_v24 = vpop.f32.mrf.mxu0  ;;  %v7623_v18 = vpop.f32.mrf.mxu1 }
 0x49c   :  { %10241 = vst [vmem:[#allocation257_spill] sm:$0xff] %v7621_v24  ;;  %10242 = vst [vmem:[#allocation262_spill] sm:$0xff] %v7623_v18 }
 0x49d   :  { %v7625_v36 = vpop.f32.mrf.mxu0  ;;  %v7627_v33 = vpop.f32.mrf.mxu1 }
 0x49e   :  { %10243 = vst [vmem:[#allocation247_spill] sm:$0xff] %v7625_v36  ;;  %10244 = vst [vmem:[#allocation250_spill] sm:$0xff] %v7627_v33 }
 0x49f   :  { %v7629_v49 = vpop.f32.mrf.mxu0  ;;  %v7631_v2 = vpop.f32.mrf.mxu1 }
 0x4a0   :  { %10245 = vst [vmem:[#allocation265_spill] sm:$0xff] %v7629_v49  ;;  %10246 = vst [vmem:[#allocation270_spill] sm:$0xff] %v7631_v2 }
 0x4a1   :  { %v7633_v57 = vpop.f32.mrf.mxu0  ;;  %v7635_v20 = vpop.f32.mrf.mxu1  ;;  %5175 = vmatmul.mubr.msk.bf16.gmra.mxu1 %vm1751_vm2, %v7491_v39  ;;  %5184 = vmatmul.mubr.msk.bf16.gmra.mxu0 %vm1751_vm2, %v7285_v16 }
 0x4a2   :  { %10247 = vst [vmem:[#allocation255_spill] sm:$0xff] %v7633_v57  ;;  %10248 = vst [vmem:[#allocation258_spill] sm:$0xff] %v7635_v20  ;;  %2516 = vmatprep.mubr.bf16.mxu1 %v10204_v47  ;;  %2645 = vmatprep.mubr.bf16.mxu0 %v10204_v47 }
 0x4a3   :  { %v7643_v36 = vpop.f32.mrf.mxu0  ;;  %v7645_v33 = vpop.f32.mrf.mxu1 }
 0x4a4   :  { %10249 = vst [vmem:[#allocation273_spill] sm:$0xff] %v7643_v36  ;;  %10250 = vst [vmem:[#allocation278_spill] sm:$0xff] %v7645_v33 }
 0x4a5   :  { %v7647_v49 = vpop.f32.mrf.mxu0  ;;  %v7649_v2 = vpop.f32.mrf.mxu1 }
 0x4a6   :  { %10251 = vst [vmem:[#allocation263_spill] sm:$0xff] %v7647_v49  ;;  %10252 = vst [vmem:[#allocation266_spill] sm:$0xff] %v7649_v2 }
 0x4a7   :  { %v7651_v57 = vpop.f32.mrf.mxu0  ;;  %v7653_v20 = vpop.f32.mrf.mxu1 }
 0x4a8   :  { %10253 = vst [vmem:[#allocation281_spill] sm:$0xff] %v7651_v57  ;;  %10254 = vst [vmem:[#allocation286_spill] sm:$0xff] %v7653_v20 }
 0x4a9   :  { %v7655_v18 = vpop.f32.mrf.mxu0  ;;  %v7657_v24 = vpop.f32.mrf.mxu1  ;;  %5176 = vmatmul.mubr.msk.bf16.gmra.mxu1 %vm1751_vm2, %v7507_v55  ;;  %5185 = vmatmul.mubr.msk.bf16.gmra.mxu0 %vm1751_vm2, %v7290_v52 }
 0x4aa   :  { %10255 = vst [vmem:[#allocation271_spill] sm:$0xff] %v7655_v18  ;;  %10256 = vst [vmem:[#allocation274_spill] sm:$0xff] %v7657_v24  ;;  %2526 = vmatprep.mubr.bf16.mxu1 %v10204_v47  ;;  %2655 = vmatprep.mubr.bf16.mxu0 %v10204_v47 }
 0x4ab   :  { %v7665_v49 = vpop.f32.mrf.mxu0  ;;  %v7667_v2 = vpop.f32.mrf.mxu1 }
 0x4ac   :  { %10257 = vst [vmem:[#allocation279_spill] sm:$0xff] %v7665_v49  ;;  %10258 = vst [vmem:[#allocation282_spill] sm:$0xff] %v7667_v2 }
 0x4ad   :  { %v7669_v57 = vpop.f32.mrf.mxu0  ;;  %v7671_v20 = vpop.f32.mrf.mxu1 }
 0x4ae   :  { %10259 = vst [vmem:[#allocation287_spill] sm:$0xff] %v7669_v57  ;;  %10260 = vst [vmem:[#allocation289_spill] sm:$0xff] %v7671_v20 }
 0x4af   :  { %v7673_v18 = vpop.f32.mrf.mxu0  ;;  %v7675_v24 = vpop.f32.mrf.mxu1 }
 0x4b0   :  { %10261 = vst [vmem:[#allocation292_spill] sm:$0xff] %v7673_v18  ;;  %10262 = vst [vmem:[#allocation293_spill] sm:$0xff] %v7675_v24 }
 0x4b1   :  { %v7677_v36 = vpop.f32.mrf.mxu0  ;;  %v7679_v33 = vpop.f32.mrf.mxu1  ;;  %5177 = vmatmul.mubr.msk.bf16.gmra.mxu1 %vm1751_vm2, %v7523_v51  ;;  %5186 = vmatmul.mubr.msk.bf16.gmra.mxu0 %vm1751_vm2, %v7299_v62 }
 0x4b2   :  { %10263 = vst [vmem:[#allocation296_spill] sm:$0xff] %v7677_v36  ;;  %10264 = vst [vmem:[#allocation151_spill] sm:$0xff] %v7679_v33  ;;  %2536 = vmatprep.mubr.bf16.mxu1 %v10204_v47  ;;  %2665 = vmatprep.mubr.bf16.mxu0 %v10204_v47 }
 0x4b3   :  { %v7687_v57 = vpop.f32.mrf.mxu0  ;;  %v7689_v20 = vpop.f32.mrf.mxu1 }
 0x4b4   :  { %10265 = vst [vmem:[#allocation157_spill] sm:$0xff] %v7687_v57  ;;  %10266 = vst [vmem:[#allocation161_spill] sm:$0xff] %v7689_v20 }
 0x4b5   :  { %v7691_v18 = vpop.f32.mrf.mxu0  ;;  %v7693_v24 = vpop.f32.mrf.mxu1 }
 0x4b6   :  { %10267 = vst [vmem:[#allocation167_spill] sm:$0xff] %v7691_v18  ;;  %10268 = vst [vmem:[#allocation305_spill] sm:$0xff] %v7693_v24 }
 0x4b7   :  { %v7695_v36 = vpop.f32.mrf.mxu0  ;;  %v7697_v33 = vpop.f32.mrf.mxu1 }
 0x4b8   :  { %10269 = vst [vmem:[#allocation173_spill] sm:$0xff] %v7695_v36  ;;  %10270 = vst [vmem:[#allocation307_spill] sm:$0xff] %v7697_v33 }
 0x4b9   :  { %v7699_v49 = vpop.f32.mrf.mxu0  ;;  %v7701_v2 = vpop.f32.mrf.mxu1  ;;  %5178 = vmatmul.mubr.msk.bf16.gmra.mxu1 %vm1751_vm2, %v7539_v31  ;;  %5187 = vmatmul.mubr.msk.bf16.gmra.mxu0 %vm1751_vm2, %v7306_v34 }
 0x4ba   :  { %10271 = vst [vmem:[#allocation179_spill] sm:$0xff] %v7699_v49  ;;  %10272 = vst [vmem:[#allocation309_spill] sm:$0xff] %v7701_v2  ;;  %2546 = vmatprep.mubr.bf16.mxu1 %v10204_v47  ;;  %2675 = vmatprep.mubr.bf16.mxu0 %v10204_v47 }
 0x4bb   :  { %v7709_v18 = vpop.f32.mrf.mxu0  ;;  %v7711_v24 = vpop.f32.mrf.mxu1 }
 0x4bc   :  { %10273 = vst [vmem:[#allocation185_spill] sm:$0xff] %v7709_v18  ;;  %10274 = vst [vmem:[#allocation312_spill] sm:$0xff] %v7711_v24 }
 0x4bd   :  { %v7713_v36 = vpop.f32.mrf.mxu0  ;;  %v7715_v33 = vpop.f32.mrf.mxu1 }
 0x4be   :  { %10275 = vst [vmem:[#allocation313_spill] sm:$0xff] %v7713_v36  ;;  %10276 = vst [vmem:[#allocation314_spill] sm:$0xff] %v7715_v33 }
 0x4bf   :  { %v7717_v49 = vpop.f32.mrf.mxu0  ;;  %v7719_v2 = vpop.f32.mrf.mxu1 }
 0x4c0   :  { %10277 = vst [vmem:[#allocation315_spill] sm:$0xff] %v7717_v49  ;;  %10278 = vst [vmem:[#allocation316_spill] sm:$0xff] %v7719_v2 }
 0x4c1   :  { %v7721_v57 = vpop.f32.mrf.mxu0  ;;  %v7723_v20 = vpop.f32.mrf.mxu1  ;;  %5179 = vmatmul.mubr.msk.bf16.gmra.mxu1 %vm1751_vm2, %v7555_v3  ;;  %5188 = vmatmul.mubr.msk.bf16.gmra.mxu0 %vm1751_vm2, %v7311_v0 }
 0x4c2   :  { %10279 = vst [vmem:[#allocation317_spill] sm:$0xff] %v7721_v57  ;;  %10280 = vst [vmem:[#allocation318_spill] sm:$0xff] %v7723_v20  ;;  %2556 = vmatprep.mubr.bf16.mxu1 %v10204_v47  ;;  %2685 = vmatprep.mubr.bf16.mxu0 %v10204_v47 }
 0x4c3   :  { %v7731_v36 = vpop.f32.mrf.mxu0  ;;  %v7733_v33 = vpop.f32.mrf.mxu1 }
 0x4c4   :  { %10281 = vst [vmem:[#allocation319_spill] sm:$0xff] %v7731_v36  ;;  %10282 = vst [vmem:[#allocation320_spill] sm:$0xff] %v7733_v33 }
 0x4c5   :  { %v7735_v49 = vpop.f32.mrf.mxu0  ;;  %v7737_v2 = vpop.f32.mrf.mxu1 }
 0x4c6   :  { %10283 = vst [vmem:[#allocation321_spill] sm:$0xff] %v7735_v49  ;;  %10284 = vst [vmem:[#allocation322_spill] sm:$0xff] %v7737_v2 }
 0x4c7   :  { %v7739_v57 = vpop.f32.mrf.mxu0  ;;  %v7741_v20 = vpop.f32.mrf.mxu1 }
 0x4c8   :  { %10285 = vst [vmem:[#allocation323_spill] sm:$0xff] %v7739_v57  ;;  %10286 = vst [vmem:[#allocation324_spill] sm:$0xff] %v7741_v20 }
 0x4c9   :  { %v7743_v24 = vpop.f32.mrf.mxu0  ;;  %v7745_v18 = vpop.f32.mrf.mxu1  ;;  %5180 = vmatmul.mubr.msk.bf16.gmra.mxu1 %vm1751_vm2, %v7571_v50  ;;  %5189 = vmatmul.mubr.msk.bf16.gmra.mxu0 %vm1751_vm2, %v7316_v41 }
 0x4ca   :  { %10287 = vst [vmem:[#allocation325_spill] sm:$0xff] %v7743_v24  ;;  %10288 = vst [vmem:[#allocation326_spill] sm:$0xff] %v7745_v18  ;;  %2695 = vmatprep.mubr.bf16.mxu0 %v10204_v47  ;;  %2968 = vmatprep.mubr.bf16.mxu1 %v10204_v47 }
 0x4cb   :  { %v7753_v49 = vpop.f32.mrf.mxu0  ;;  %v7755_v2 = vpop.f32.mrf.mxu1 }
 0x4cc   :  { %10289 = vst [vmem:[#allocation327_spill] sm:$0xff] %v7753_v49  ;;  %10290 = vst [vmem:[#allocation328_spill] sm:$0xff] %v7755_v2 }
 0x4cd   :  { %v7757_v57 = vpop.f32.mrf.mxu0  ;;  %v7759_v20 = vpop.f32.mrf.mxu1 }
 0x4ce   :  { %10291 = vst [vmem:[#allocation329_spill] sm:$0xff] %v7757_v57  ;;  %10292 = vst [vmem:[#allocation330_spill] sm:$0xff] %v7759_v20 }
 0x4cf   :  { %v7761_v24 = vpop.f32.mrf.mxu0  ;;  %v7763_v18 = vpop.f32.mrf.mxu1 }
 0x4d0   :  { %10293 = vst [vmem:[#allocation331_spill] sm:$0xff] %v7761_v24  ;;  %10294 = vst [vmem:[#allocation332_spill] sm:$0xff] %v7763_v18 }
 0x4d1   :  { %v7765_v33 = vpop.f32.mrf.mxu0  ;;  %v7767_v36 = vpop.f32.mrf.mxu1  ;;  %5190 = vmatmul.mubr.msk.bf16.gmra.mxu0 %vm1751_vm2, %v7331_v58  ;;  %5215 = vmatmul.mubr.msk.bf16.vlgmr.msra.gmra.mxu1 %vm1751_vm2, %v7273_v26 }
 0x4d2   :  { %10295 = vst [vmem:[#allocation333_spill] sm:$0xff] %v7765_v33  ;;  %10296 = vst [vmem:[#allocation334_spill] sm:$0xff] %v7767_v36  ;;  %2705 = vmatprep.mubr.bf16.mxu0 %v10204_v47  ;;  %2978 = vmatprep.mubr.bf16.mxu1 %v10204_v47 }
 0x4d3   :  { %v7775_v57 = vpop.f32.mrf.mxu0  ;;  %v7777_v20 = vpop.f32.mrf.mxu1 }
 0x4d4   :  { %10297 = vst [vmem:[#allocation335_spill] sm:$0xff] %v7777_v20 }
 0x4d5   :  { %v7779_v24 = vpop.f32.mrf.mxu0  ;;  %v7781_v18 = vpop.f32.mrf.mxu1 }
 0x4d6   :  { %10298 = vst [vmem:[#allocation336_spill] sm:$0xff] %v7779_v24  ;;  %10299 = vst [vmem:[#allocation337_spill] sm:$0xff] %v7781_v18 }
 0x4d7   :  { %v7783_v33 = vpop.f32.mrf.mxu0  ;;  %v7785_v36 = vpop.f32.mrf.mxu1 }
 0x4d8   :  { %10300 = vst [vmem:[#allocation338_spill] sm:$0xff] %v7783_v33  ;;  %10301 = vst [vmem:[#allocation339_spill] sm:$0xff] %v7785_v36 }
 0x4d9   :  { %v7787_v2 = vpop.f32.mrf.mxu0  ;;  %v7789_v49 = vpop.f32.mrf.mxu1  ;;  %5191 = vmatmul.mubr.msk.bf16.gmra.mxu0 %vm1751_vm2, %v7341_v59  ;;  %5216 = vmatmul.mubr.msk.bf16.gmra.mxu1 %vm1751_vm2, %v7280_v43 }
 0x4da   :  { %10302 = vst [vmem:[#allocation340_spill] sm:$0xff] %v7787_v2  ;;  %10303 = vst [vmem:[#allocation341_spill] sm:$0xff] %v7789_v49  ;;  %2715 = vmatprep.mubr.bf16.mxu0 %v10204_v47  ;;  %2988 = vmatprep.mubr.bf16.mxu1 %v10204_v47 }
 0x4db   :  { %v7797_v26 = vpop.f32.mrf.mxu0  ;;  %v7799_v18 = vpop.f32.mrf.mxu1 }
 0x4dc   :  { %10304 = vst [vmem:[#allocation342_spill] sm:$0xff] %v7799_v18 }
 0x4dd   :  { %v7801_v33 = vpop.f32.mrf.mxu0  ;;  %v7803_v36 = vpop.f32.mrf.mxu1 }
 0x4de   :  { %10305 = vst [vmem:[#allocation343_spill] sm:$0xff] %v7801_v33  ;;  %10306 = vst [vmem:[#allocation344_spill] sm:$0xff] %v7803_v36 }
 0x4df   :  { %v7805_v2 = vpop.f32.mrf.mxu0  ;;  %v7807_v49 = vpop.f32.mrf.mxu1 }
 0x4e0   :  { %10307 = vst [vmem:[#allocation345_spill] sm:$0xff] %v7805_v2  ;;  %10308 = vst [vmem:[#allocation346_spill] sm:$0xff] %v7807_v49 }
 0x4e1   :  { %v7809_v24 = vpop.f32.mrf.mxu0  ;;  %v7811_v20 = vpop.f32.mrf.mxu1  ;;  %5192 = vmatmul.mubr.msk.bf16.gmra.mxu0 %vm1751_vm2, %v7349_v12  ;;  %5217 = vmatmul.mubr.msk.bf16.gmra.mxu1 %vm1751_vm2, %v7285_v16 }
 0x4e2   :  { %10309 = vst [vmem:[#allocation347_spill] sm:$0xff] %v7809_v24  ;;  %10310 = vst [vmem:[#allocation348_spill] sm:$0xff] %v7811_v20  ;;  %2725 = vmatprep.mubr.bf16.mxu0 %v10204_v47  ;;  %2998 = vmatprep.mubr.bf16.mxu1 %v10204_v47 }
 0x4e3   :  { %v7819_v43 = vpop.f32.mrf.mxu0  ;;  %v7821_v36 = vpop.f32.mrf.mxu1 }
 0x4e4   :  { %10311 = vst [vmem:[#allocation349_spill] sm:$0xff] %v7821_v36 }
 0x4e5   :  { %v7823_v2 = vpop.f32.mrf.mxu0  ;;  %v7825_v49 = vpop.f32.mrf.mxu1 }
 0x4e6   :  { %10312 = vst [vmem:[#allocation350_spill] sm:$0xff] %v7823_v2  ;;  %10313 = vst [vmem:[#allocation351_spill] sm:$0xff] %v7825_v49 }
 0x4e7   :  { %v7827_v24 = vpop.f32.mrf.mxu0  ;;  %v7829_v20 = vpop.f32.mrf.mxu1 }
 0x4e8   :  { %10314 = vst [vmem:[#allocation352_spill] sm:$0xff] %v7827_v24  ;;  %10315 = vst [vmem:[#allocation353_spill] sm:$0xff] %v7829_v20 }
 0x4e9   :  { %v7831_v33 = vpop.f32.mrf.mxu0  ;;  %v7833_v18 = vpop.f32.mrf.mxu1  ;;  %5193 = vmatmul.mubr.msk.bf16.gmra.mxu0 %vm1751_vm2, %v7357_v1  ;;  %5218 = vmatmul.mubr.msk.bf16.gmra.mxu1 %vm1751_vm2, %v7290_v52 }
 0x4ea   :  { %10316 = vst [vmem:[#allocation354_spill] sm:$0xff] %v7831_v33  ;;  %10317 = vst [vmem:[#allocation355_spill] sm:$0xff] %v7833_v18  ;;  %2735 = vmatprep.mubr.bf16.mxu0 %v10204_v47  ;;  %3008 = vmatprep.mubr.bf16.mxu1 %v10204_v47 }
 0x4eb   :  { %v7841_v16 = vpop.f32.mrf.mxu0  ;;  %v7843_v49 = vpop.f32.mrf.mxu1 }
 0x4ec   :  { %10318 = vst [vmem:[#allocation356_spill] sm:$0xff] %v7843_v49 }
 0x4ed   :  { %v7845_v24 = vpop.f32.mrf.mxu0  ;;  %v7847_v20 = vpop.f32.mrf.mxu1 }
 0x4ee   :  { %10319 = vst [vmem:[#allocation357_spill] sm:$0xff] %v7845_v24  ;;  %10320 = vst [vmem:[#allocation358_spill] sm:$0xff] %v7847_v20 }
 0x4ef   :  { %v7849_v33 = vpop.f32.mrf.mxu0  ;;  %v7851_v18 = vpop.f32.mrf.mxu1 }
 0x4f0   :  { %10321 = vst [vmem:[#allocation359_spill] sm:$0xff] %v7849_v33  ;;  %10322 = vst [vmem:[#allocation360_spill] sm:$0xff] %v7851_v18 }
 0x4f1   :  { %v7853_v2 = vpop.f32.mrf.mxu0  ;;  %v7855_v36 = vpop.f32.mrf.mxu1  ;;  %5194 = vmatmul.mubr.msk.bf16.gmra.mxu0 %vm1751_vm2, %v7365_v14  ;;  %5219 = vmatmul.mubr.msk.bf16.gmra.mxu1 %vm1751_vm2, %v7299_v62 }
 0x4f2   :  { %10323 = vst [vmem:[#allocation361_spill] sm:$0xff] %v7853_v2  ;;  %10324 = vst [vmem:[#allocation362_spill] sm:$0xff] %v7855_v36  ;;  %2745 = vmatprep.mubr.bf16.mxu0 %v10204_v47  ;;  %3018 = vmatprep.mubr.bf16.mxu1 %v10204_v47 }
 0x4f3   :  { %v7863_v52 = vpop.f32.mrf.mxu0  ;;  %v7865_v20 = vpop.f32.mrf.mxu1 }
 0x4f4   :  { %10325 = vst [vmem:[#allocation363_spill] sm:$0xff] %v7865_v20 }
 0x4f5   :  { %v7867_v33 = vpop.f32.mrf.mxu0  ;;  %v7869_v18 = vpop.f32.mrf.mxu1 }
 0x4f6   :  { %10326 = vst [vmem:[#allocation364_spill] sm:$0xff] %v7867_v33  ;;  %10327 = vst [vmem:[#allocation365_spill] sm:$0xff] %v7869_v18 }
 0x4f7   :  { %v7871_v2 = vpop.f32.mrf.mxu0  ;;  %v7873_v36 = vpop.f32.mrf.mxu1 }
 0x4f8   :  { %10328 = vst [vmem:[#allocation366_spill] sm:$0xff] %v7871_v2  ;;  %10329 = vst [vmem:[#allocation367_spill] sm:$0xff] %v7873_v36 }
 0x4f9   :  { %v7875_v24 = vpop.f32.mrf.mxu0  ;;  %v7877_v49 = vpop.f32.mrf.mxu1  ;;  %5195 = vmatmul.mubr.msk.bf16.gmra.mxu0 %vm1751_vm2, %v7373_v11  ;;  %5220 = vmatmul.mubr.msk.bf16.gmra.mxu1 %vm1751_vm2, %v7306_v34 }
 0x4fa   :  { %10330 = vst [vmem:[#allocation368_spill] sm:$0xff] %v7875_v24  ;;  %10331 = vst [vmem:[#allocation369_spill] sm:$0xff] %v7877_v49  ;;  %2755 = vmatprep.mubr.bf16.mxu0 %v10204_v47  ;;  %3028 = vmatprep.mubr.bf16.mxu1 %v10204_v47 }
 0x4fb   :  { %v7885_v62 = vpop.f32.mrf.mxu0  ;;  %v7887_v18 = vpop.f32.mrf.mxu1 }
 0x4fc   :  { %10332 = vst [vmem:[#allocation370_spill] sm:$0xff] %v7887_v18 }
 0x4fd   :  { %v7889_v2 = vpop.f32.mrf.mxu0  ;;  %v7891_v36 = vpop.f32.mrf.mxu1 }
 0x4fe   :  { %10333 = vst [vmem:[#allocation371_spill] sm:$0xff] %v7889_v2  ;;  %10334 = vst [vmem:[#allocation372_spill] sm:$0xff] %v7891_v36 }
 0x4ff   :  { %v7893_v24 = vpop.f32.mrf.mxu0  ;;  %v7895_v49 = vpop.f32.mrf.mxu1 }
 0x500   :  { %10335 = vst [vmem:[#allocation373_spill] sm:$0xff] %v7893_v24  ;;  %10336 = vst [vmem:[#allocation374_spill] sm:$0xff] %v7895_v49 }
 0x501   :  { %v7897_v33 = vpop.f32.mrf.mxu0  ;;  %v7899_v20 = vpop.f32.mrf.mxu1  ;;  %5196 = vmatmul.mubr.msk.bf16.gmra.mxu0 %vm1751_vm2, %v7381_v15  ;;  %5221 = vmatmul.mubr.msk.bf16.gmra.mxu1 %vm1751_vm2, %v7311_v0 }
 0x502   :  { %10337 = vst [vmem:[#allocation375_spill] sm:$0xff] %v7897_v33  ;;  %10338 = vst [vmem:[#allocation376_spill] sm:$0xff] %v7899_v20  ;;  %2765 = vmatprep.mubr.bf16.mxu0 %v10204_v47  ;;  %3038 = vmatprep.mubr.bf16.mxu1 %v10204_v47 }
 0x503   :  { %v7907_v34 = vpop.f32.mrf.mxu0  ;;  %v7909_v36 = vpop.f32.mrf.mxu1 }
 0x504   :  { %10339 = vst [vmem:[#allocation377_spill] sm:$0xff] %v7909_v36 }
 0x505   :  { %v7911_v24 = vpop.f32.mrf.mxu0  ;;  %v7913_v49 = vpop.f32.mrf.mxu1 }
 0x506   :  { %10340 = vst [vmem:[#allocation378_spill] sm:$0xff] %v7911_v24  ;;  %10341 = vst [vmem:[#allocation379_spill] sm:$0xff] %v7913_v49 }
 0x507   :  { %v7915_v33 = vpop.f32.mrf.mxu0  ;;  %v7917_v20 = vpop.f32.mrf.mxu1 }
 0x508   :  { %10342 = vst [vmem:[#allocation380_spill] sm:$0xff] %v7915_v33  ;;  %10343 = vst [vmem:[#allocation381_spill] sm:$0xff] %v7917_v20 }
 0x509   :  { %v7919_v2 = vpop.f32.mrf.mxu0  ;;  %v7921_v18 = vpop.f32.mrf.mxu1  ;;  %5197 = vmatmul.mubr.msk.bf16.gmra.mxu0 %vm1751_vm2, %v7389_v38  ;;  %5222 = vmatmul.mubr.msk.bf16.gmra.mxu1 %vm1751_vm2, %v7316_v41 }
 0x50a   :  { %10344 = vst [vmem:[#allocation382_spill] sm:$0xff] %v7919_v2  ;;  %10345 = vst [vmem:[#allocation383_spill] sm:$0xff] %v7921_v18  ;;  %2775 = vmatprep.mubr.bf16.mxu0 %v10204_v47  ;;  %3048 = vmatprep.mubr.bf16.mxu1 %v10204_v47 }
 0x50b   :  { %v7929_v0 = vpop.f32.mrf.mxu0  ;;  %v7931_v49 = vpop.f32.mrf.mxu1 }
 0x50c   :  { %10346 = vst [vmem:[#allocation384_spill] sm:$0xff] %v7929_v0  ;;  %10347 = vst [vmem:[#allocation385_spill] sm:$0xff] %v7931_v49 }
 0x50d   :  { %v7933_v33 = vpop.f32.mrf.mxu0  ;;  %v7935_v20 = vpop.f32.mrf.mxu1 }
 0x50e   :  { %10348 = vst [vmem:[#allocation386_spill] sm:$0xff] %v7933_v33  ;;  %10349 = vst [vmem:[#allocation387_spill] sm:$0xff] %v7935_v20 }
 0x50f   :  { %v7937_v2 = vpop.f32.mrf.mxu0  ;;  %v7939_v18 = vpop.f32.mrf.mxu1 }
 0x510   :  { %10350 = vst [vmem:[#allocation388_spill] sm:$0xff] %v7937_v2  ;;  %10351 = vst [vmem:[#allocation389_spill] sm:$0xff] %v7939_v18 }
 0x511   :  { %v7941_v24 = vpop.f32.mrf.mxu0  ;;  %v7943_v36 = vpop.f32.mrf.mxu1  ;;  %5198 = vmatmul.mubr.msk.bf16.gmra.mxu0 %vm1751_vm2, %v7397_v13  ;;  %5223 = vmatmul.mubr.msk.bf16.gmra.mxu1 %vm1751_vm2, %v7331_v58 }
 0x512   :  { %10352 = vst [vmem:[#allocation390_spill] sm:$0xff] %v7941_v24  ;;  %10353 = vst [vmem:[#allocation391_spill] sm:$0xff] %v7943_v36  ;;  %2785 = vmatprep.mubr.bf16.mxu0 %v10204_v47  ;;  %3058 = vmatprep.mubr.bf16.mxu1 %v10204_v47 }
 0x513   :  { %v7951_v41 = vpop.f32.mrf.mxu0  ;;  %v7953_v20 = vpop.f32.mrf.mxu1 }
 0x514   :  { %10354 = vst [vmem:[#allocation392_spill] sm:$0xff] %v7951_v41  ;;  %10355 = vst [vmem:[#allocation393_spill] sm:$0xff] %v7953_v20  ;;  %v10425_v41 = vld [vmem:[#allocation7_spill] sm:$0xff] }
 0x515   :  { %v7955_v2 = vpop.f32.mrf.mxu0  ;;  %v7957_v18 = vpop.f32.mrf.mxu1 }
 0x516   :  { %10356 = vst [vmem:[#allocation394_spill] sm:$0xff] %v7955_v2  ;;  %10357 = vst [vmem:[#allocation395_spill] sm:$0xff] %v7957_v18 }
 0x517   :  { %v7959_v24 = vpop.f32.mrf.mxu0  ;;  %v7961_v36 = vpop.f32.mrf.mxu1 }
 0x518   :  { %10358 = vst [vmem:[#allocation396_spill] sm:$0xff] %v7959_v24  ;;  %10359 = vst [vmem:[#allocation397_spill] sm:$0xff] %v7961_v36 }
 0x519   :  { %v7963_v33 = vpop.f32.mrf.mxu0  ;;  %v7965_v49 = vpop.f32.mrf.mxu1  ;;  %5199 = vmatmul.mubr.msk.bf16.gmra.mxu0 %vm1751_vm2, %v7405_v45  ;;  %5224 = vmatmul.mubr.msk.bf16.gmra.mxu1 %vm1751_vm2, %v7341_v59 }
 0x51a   :  { %10360 = vst [vmem:[#allocation398_spill] sm:$0xff] %v7963_v33  ;;  %10361 = vst [vmem:[#allocation399_spill] sm:$0xff] %v7965_v49  ;;  %2795 = vmatprep.mubr.bf16.mxu0 %v10204_v47  ;;  %3068 = vmatprep.mubr.bf16.mxu1 %v10204_v47 }
 0x51b   :  { %v7973_v58 = vpop.f32.mrf.mxu0  ;;  %v7975_v18 = vpop.f32.mrf.mxu1 }
 0x51c   :  { %10362 = vst [vmem:[#allocation400_spill] sm:$0xff] %v7973_v58  ;;  %10363 = vst [vmem:[#allocation401_spill] sm:$0xff] %v7975_v18 }
 0x51d   :  { %v7977_v24 = vpop.f32.mrf.mxu0  ;;  %v7979_v36 = vpop.f32.mrf.mxu1 }
 0x51e   :  { %10364 = vst [vmem:[#allocation402_spill] sm:$0xff] %v7977_v24  ;;  %10365 = vst [vmem:[#allocation403_spill] sm:$0xff] %v7979_v36 }
 0x51f   :  { %v7981_v33 = vpop.f32.mrf.mxu0  ;;  %v7983_v49 = vpop.f32.mrf.mxu1 }
 0x520   :  { %10366 = vst [vmem:[#allocation404_spill] sm:$0xff] %v7981_v33  ;;  %10367 = vst [vmem:[#allocation405_spill] sm:$0xff] %v7983_v49 }
 0x521   :  { %v7985_v2 = vpop.f32.mrf.mxu0  ;;  %v7987_v20 = vpop.f32.mrf.mxu1  ;;  %5200 = vmatmul.mubr.msk.bf16.gmra.mxu0 %vm1751_vm2, %v7413_v61  ;;  %5225 = vmatmul.mubr.msk.bf16.gmra.mxu1 %vm1751_vm2, %v7349_v12 }
 0x522   :  { %10368 = vst [vmem:[#allocation406_spill] sm:$0xff] %v7985_v2  ;;  %10369 = vst [vmem:[#allocation407_spill] sm:$0xff] %v7987_v20  ;;  %2805 = vmatprep.mubr.bf16.mxu0 %v10204_v47  ;;  %3078 = vmatprep.mubr.bf16.mxu1 %v10204_v47 }
 0x523   :  { %v7995_v59 = vpop.f32.mrf.mxu0  ;;  %v7997_v36 = vpop.f32.mrf.mxu1 }
 0x524   :  { %10370 = vst [vmem:[#allocation408_spill] sm:$0xff] %v7995_v59  ;;  %10371 = vst [vmem:[#allocation409_spill] sm:$0xff] %v7997_v36 }
 0x525   :  { %v7999_v33 = vpop.f32.mrf.mxu0  ;;  %v8001_v49 = vpop.f32.mrf.mxu1 }
 0x526   :  { %10372 = vst [vmem:[#allocation410_spill] sm:$0xff] %v7999_v33  ;;  %10373 = vst [vmem:[#allocation411_spill] sm:$0xff] %v8001_v49 }
 0x527   :  { %v8003_v2 = vpop.f32.mrf.mxu0  ;;  %v8005_v20 = vpop.f32.mrf.mxu1 }
 0x528   :  { %10374 = vst [vmem:[#allocation412_spill] sm:$0xff] %v8003_v2  ;;  %10375 = vst [vmem:[#allocation413_spill] sm:$0xff] %v8005_v20 }
 0x529   :  { %v8007_v24 = vpop.f32.mrf.mxu0  ;;  %v8009_v18 = vpop.f32.mrf.mxu1  ;;  %5201 = vmatmul.mubr.msk.bf16.gmra.mxu0 %vm1751_vm2, %v7421_v54  ;;  %5226 = vmatmul.mubr.msk.bf16.gmra.mxu1 %vm1751_vm2, %v7357_v1 }
 0x52a   :  { %10376 = vst [vmem:[#allocation414_spill] sm:$0xff] %v8007_v24  ;;  %10377 = vst [vmem:[#allocation415_spill] sm:$0xff] %v8009_v18  ;;  %2815 = vmatprep.mubr.bf16.mxu0 %v10204_v47  ;;  %3088 = vmatprep.mubr.bf16.mxu1 %v10204_v47 }
 0x52b   :  { %v8017_v12 = vpop.f32.mrf.mxu0  ;;  %v8019_v49 = vpop.f32.mrf.mxu1 }
 0x52c   :  { %10378 = vst [vmem:[#allocation416_spill] sm:$0xff] %v8017_v12  ;;  %10379 = vst [vmem:[#allocation417_spill] sm:$0xff] %v8019_v49 }
 0x52d   :  { %v8021_v2 = vpop.f32.mrf.mxu0  ;;  %v8023_v20 = vpop.f32.mrf.mxu1 }
 0x52e   :  { %10380 = vst [vmem:[#allocation418_spill] sm:$0xff] %v8021_v2  ;;  %10381 = vst [vmem:[#allocation419_spill] sm:$0xff] %v8023_v20 }
 0x52f   :  { %v8025_v24 = vpop.f32.mrf.mxu0  ;;  %v8027_v18 = vpop.f32.mrf.mxu1 }
 0x530   :  { %10382 = vst [vmem:[#allocation420_spill] sm:$0xff] %v8025_v24  ;;  %10383 = vst [vmem:[#allocation421_spill] sm:$0xff] %v8027_v18 }
 0x531   :  { %v8029_v33 = vpop.f32.mrf.mxu0  ;;  %v8031_v36 = vpop.f32.mrf.mxu1  ;;  %5202 = vmatmul.mubr.msk.bf16.gmra.mxu0 %vm1751_vm2, %v7429_v8  ;;  %5227 = vmatmul.mubr.msk.bf16.gmra.mxu1 %vm1751_vm2, %v7365_v14 }
 0x532   :  { %10384 = vst [vmem:[#allocation422_spill] sm:$0xff] %v8029_v33  ;;  %10385 = vst [vmem:[#allocation423_spill] sm:$0xff] %v8031_v36  ;;  %2825 = vmatprep.mubr.bf16.mxu0 %v10204_v47  ;;  %3098 = vmatprep.mubr.bf16.mxu1 %v10204_v47 }
 0x533   :  { %v8039_v1 = vpop.f32.mrf.mxu0  ;;  %v8041_v20 = vpop.f32.mrf.mxu1 }
 0x534   :  { %10386 = vst [vmem:[#allocation424_spill] sm:$0xff] %v8039_v1  ;;  %10387 = vst [vmem:[#allocation425_spill] sm:$0xff] %v8041_v20  ;;  %v10422_v1 = vld [vmem:[#allocation5_spill] sm:$0xff] }
 0x535   :  { %v8043_v24 = vpop.f32.mrf.mxu0  ;;  %v8045_v18 = vpop.f32.mrf.mxu1 }
 0x536   :  { %10388 = vst [vmem:[#allocation426_spill] sm:$0xff] %v8043_v24  ;;  %10389 = vst [vmem:[#allocation427_spill] sm:$0xff] %v8045_v18 }
 0x537   :  { %v8047_v33 = vpop.f32.mrf.mxu0  ;;  %v8049_v36 = vpop.f32.mrf.mxu1 }
 0x538   :  { %10390 = vst [vmem:[#allocation428_spill] sm:$0xff] %v8047_v33  ;;  %10391 = vst [vmem:[#allocation429_spill] sm:$0xff] %v8049_v36 }
 0x539   :  { %v8051_v2 = vpop.f32.mrf.mxu0  ;;  %v8053_v49 = vpop.f32.mrf.mxu1  ;;  %5203 = vmatmul.mubr.msk.bf16.gmra.mxu0 %vm1751_vm2, %v7437_v17  ;;  %5228 = vmatmul.mubr.msk.bf16.gmra.mxu1 %vm1751_vm2, %v7373_v11 }
 0x53a   :  { %10392 = vst [vmem:[#allocation430_spill] sm:$0xff] %v8051_v2  ;;  %10393 = vst [vmem:[#allocation431_spill] sm:$0xff] %v8053_v49  ;;  %2835 = vmatprep.mubr.bf16.mxu0 %v10204_v47  ;;  %3108 = vmatprep.mubr.bf16.mxu1 %v10204_v47 }
 0x53b   :  { %v8061_v14 = vpop.f32.mrf.mxu0  ;;  %v8063_v18 = vpop.f32.mrf.mxu1 }
 0x53c   :  { %10394 = vst [vmem:[#allocation432_spill] sm:$0xff] %v8061_v14  ;;  %10395 = vst [vmem:[#allocation433_spill] sm:$0xff] %v8063_v18 }
 0x53d   :  { %v8065_v33 = vpop.f32.mrf.mxu0  ;;  %v8067_v36 = vpop.f32.mrf.mxu1 }
 0x53e   :  { %10396 = vst [vmem:[#allocation434_spill] sm:$0xff] %v8065_v33  ;;  %10397 = vst [vmem:[#allocation435_spill] sm:$0xff] %v8067_v36 }
 0x53f   :  { %v8069_v2 = vpop.f32.mrf.mxu0  ;;  %v8071_v49 = vpop.f32.mrf.mxu1 }
 0x540   :  { %10398 = vst [vmem:[#allocation436_spill] sm:$0xff] %v8069_v2  ;;  %10399 = vst [vmem:[#allocation437_spill] sm:$0xff] %v8071_v49 }
 0x541   :  { %v8073_v24 = vpop.f32.mrf.mxu0  ;;  %v8075_v20 = vpop.f32.mrf.mxu1  ;;  %5204 = vmatmul.mubr.msk.bf16.gmra.mxu0 %vm1751_vm2, %v7445_v10  ;;  %5229 = vmatmul.mubr.msk.bf16.gmra.mxu1 %vm1751_vm2, %v7381_v15 }
 0x542   :  { %10400 = vst [vmem:[#allocation438_spill] sm:$0xff] %v8073_v24  ;;  %10401 = vst [vmem:[#allocation439_spill] sm:$0xff] %v8075_v20  ;;  %2845 = vmatprep.mubr.bf16.mxu0 %v10204_v47  ;;  %3118 = vmatprep.mubr.bf16.mxu1 %v10204_v47 }
 0x543   :  { %v8083_v11 = vpop.f32.mrf.mxu0  ;;  %v8085_v36 = vpop.f32.mrf.mxu1 }
 0x544   :  { %10402 = vst [vmem:[#allocation440_spill] sm:$0xff] %v8083_v11  ;;  %10403 = vst [vmem:[#allocation441_spill] sm:$0xff] %v8085_v36 }
 0x545   :  { %v8087_v2 = vpop.f32.mrf.mxu0  ;;  %v8089_v49 = vpop.f32.mrf.mxu1 }
 0x546   :  { %10404 = vst [vmem:[#allocation442_spill] sm:$0xff] %v8087_v2  ;;  %10405 = vst [vmem:[#allocation443_spill] sm:$0xff] %v8089_v49  ;;  %v10416_v2 = vld [vmem:[#allocation2_spill] sm:$0xff] }
 0x547   :  { %v8091_v24 = vpop.f32.mrf.mxu0  ;;  %v8093_v20 = vpop.f32.mrf.mxu1  ;;  %v3289_v36 = vmul.f32 %v7463_v21, %v10416_v2  ;;  %v10420_v21 = vld [vmem:[#allocation4_spill] sm:$0xff] }
 0x548   :  { %10406 = vst [vmem:[#allocation444_spill] sm:$0xff] %v8091_v24  ;;  %10407 = vst [vmem:[#allocation445_spill] sm:$0xff] %v8093_v20 }
 0x549   :  { %v8095_v33 = vpop.f32.mrf.mxu0  ;;  %v8097_v18 = vpop.f32.mrf.mxu1  ;;  %5205 = vmatmul.mubr.msk.bf16.gmra.mxu0 %vm1751_vm2, %v7453_v4  ;;  %5230 = vmatmul.mubr.msk.bf16.gmra.mxu1 %vm1751_vm2, %v7389_v38 }
 0x54a   :  { %10408 = vst [vmem:[#allocation446_spill] sm:$0xff] %v8095_v33  ;;  %10409 = vst [vmem:[#allocation447_spill] sm:$0xff] %v8097_v18  ;;  %2855 = vmatprep.mubr.bf16.mxu0 %v10204_v47  ;;  %3128 = vmatprep.mubr.bf16.mxu1 %v10204_v47 }
 0x54b   :  { %v8105_v15 = vpop.f32.mrf.mxu0  ;;  %v8107_v49 = vpop.f32.mrf.mxu1 }
 0x54c   :  { %10410 = vst [vmem:[#allocation448_spill] sm:$0xff] %v8105_v15  ;;  %10411 = vst [vmem:[#allocation449_spill] sm:$0xff] %v8107_v49  ;;  %v10418_v49 = vld [vmem:[#allocation3_spill] sm:$0xff] }
 0x54d   :  { %v8109_v24 = vpop.f32.mrf.mxu0  ;;  %v8111_v20 = vpop.f32.mrf.mxu1 }
 0x54e   :  { %10412 = vst [vmem:[#allocation450_spill] sm:$0xff] %v8109_v24  ;;  %10413 = vst [vmem:[#allocation451_spill] sm:$0xff] %v8111_v20  ;;  %v3290_v24 = vmul.f32 %v7471_v25, %v10418_v49  ;;  %v10424_v25 = vld [vmem:[#allocation6_spill] sm:$0xff] }
 0x54f   :  { %v8113_v33 = vpop.f32.mrf.mxu0  ;;  %v8115_v18 = vpop.f32.mrf.mxu1 }
 0x550   :  { %10414 = vst [vmem:[#allocation452_spill] sm:$0xff] %v8113_v33  ;;  %10415 = vst [vmem:[#allocation453_spill] sm:$0xff] %v8115_v18 }
 0x551   :  { %v8119_v38 = vpop.f32.mrf.mxu1  ;;  %v2617_v11 = vpop.f32.mrf.mxu0  ;;  %5206 = vmatmul.mubr.msk.bf16.gmra.mxu0 %vm1751_vm2, %v7461_v32  ;;  %5231 = vmatmul.mubr.msk.bf16.gmra.mxu1 %vm1751_vm2, %v7397_v13  ;;  %v3294_v13 = vmul.f32 %v7477_v27, %v10422_v1 }
 0x552   :  { %10417 = vst [vmem:[#allocation2_spill] sm:$0xff] %v8119_v38  ;;  %v3545_v20 = vadd.f32 %v3289_v36, %v2617_v11  ;;  %2865 = vmatprep.mubr.bf16.mxu0 %v10204_v47  ;;  %3138 = vmatprep.mubr.bf16.mxu1 %v10204_v47  ;;  %v3293_v38 = vmul.f32 %v7473_v23, %v10420_v21 }
 0x553   :  { %v8129_v18 = vpop.f32.mrf.mxu1  ;;  %v2619_v2 = vpop.f32.mrf.mxu0  ;;  %v3297_v11 = vmul.f32 %v7479_v30, %v10424_v25  ;;  %v3298_v23 = vmul.f32 %v7487_v46, %v10425_v41  ;;  %v10428_v41 = vld [vmem:[#allocation8_spill] sm:$0xff]  ;;  %v10432_v25 = vld [vmem:[#allocation10_spill] sm:$0xff] }
 0x554   :  { %10419 = vst [vmem:[#allocation3_spill] sm:$0xff] %v8129_v18  ;;  %v3546_v33 = vadd.f32 %v3290_v24, %v2619_v2  ;;  %v3801_v59 = vmax.f32 %v3545_v20, 0.0 }
 0x555   :  { %v8133_v15 = vpop.f32.mrf.mxu1  ;;  %v2621_v14 = vpop.f32.mrf.mxu0 }
 0x556   :  { %10421 = vst [vmem:[#allocation4_spill] sm:$0xff] %v8133_v15  ;;  %v3549_v12 = vadd.f32 %v3293_v38, %v2621_v14  ;;  %v3802_v27 = vmax.f32 %v3546_v33, 0.0 }
 0x557   :  { %v8137_v49 = vpop.f32.mrf.mxu1  ;;  %v2623_v36 = vpop.f32.mrf.mxu0 }
 0x558   :  { %10423 = vst [vmem:[#allocation5_spill] sm:$0xff] %v8137_v49  ;;  %v3805_v18 = vmax.f32 %v3549_v12, 0.0  ;;  %v3550_v58 = vadd.f32 %v3294_v13, %v2623_v36  ;;  %v3301_v12 = vmul.f32 %v7489_v56, %v10428_v41  ;;  %v10435_v41 = vld [vmem:[#allocation11_spill] sm:$0xff] }
 0x559   :  { %v8143_v24 = vpop.f32.mrf.mxu1  ;;  %v2627_v2 = vpop.f32.mrf.mxu0  ;;  %5207 = vmatmul.mubr.msk.bf16.gmra.mxu0 %vm1751_vm2, %v7475_v48  ;;  %5232 = vmatmul.mubr.msk.bf16.gmra.mxu1 %vm1751_vm2, %v7405_v45 }
 0x55a   :  { %10426 = vst [vmem:[#allocation6_spill] sm:$0xff] %v8143_v24  ;;  %v8149_v1 = vpack.c.bf16 %v3805_v18, %v3801_v59  ;;  %v3806_v14 = vmax.f32 %v3550_v58, 0.0  ;;  %v3553_v30 = vadd.f32 %v3297_v11, %v2627_v2  ;;  %2875 = vmatprep.mubr.bf16.mxu0 %v10204_v47  ;;  %3148 = vmatprep.mubr.bf16.mxu1 %v10204_v47  ;;  %v10430_v18 = vld [vmem:[#allocation9_spill] sm:$0xff] }
 0x55b   :  { %v8153_v20 = vpop.f32.mrf.mxu1  ;;  %v2629_v46 = vpop.f32.mrf.mxu0  ;;  %v3302_v45 = vmul.f32 %v7493_v6, %v10430_v18  ;;  %v3305_v11 = vmul.f32 %v7495_v53, %v10432_v25 }
 0x55c   :  { %10427 = vst [vmem:[#allocation7_spill] sm:$0xff] %v8153_v20  ;;  %v3554_v38 = vadd.f32 %v3298_v23, %v2629_v46  ;;  %v8157_v21 = vpack.c.bf16 %v3806_v14, %v3802_v27  ;;  %v3809_v2 = vmax.f32 %v3553_v30, 0.0 }
 0x55d   :  { %v8159_v13 = vpop.f32.mrf.mxu1  ;;  %v2631_v33 = vpop.f32.mrf.mxu0 }
 0x55e   :  { %10429 = vst [vmem:[#allocation8_spill] sm:$0xff] %v8159_v13  ;;  %v3557_v58 = vadd.f32 %v3301_v12, %v2631_v33  ;;  %v3810_v6 = vmax.f32 %v3554_v38, 0.0  ;;  %v3306_v12 = vmul.f32 %v7503_v60, %v10435_v41  ;;  %v10436_v33 = vld [vmem:[#allocation12_spill] sm:$0xff] }
 0x55f   :  { %v8163_v59 = vpop.f32.mrf.mxu1  ;;  %v2633_v36 = vpop.f32.mrf.mxu0  ;;  %v3309_v18 = vmul.f32 %v7505_v37, %v10436_v33  ;;  %v10441_v37 = vld [vmem:[#allocation15_spill] sm:$0xff]  ;;  %v10443_v33 = vld [vmem:[#allocation17_spill] sm:$0xff] }
 0x560   :  { %10431 = vst [vmem:[#allocation9_spill] sm:$0xff] %v8163_v59  ;;  %v3813_v20 = vmax.f32 %v3557_v58, 0.0  ;;  %v3558_v24 = vadd.f32 %v3302_v45, %v2633_v36  ;;  %v10506_v59 = vld [vmem:[#allocation239_spill] sm:$0xff] }
 0x561   :  { %v8167_v56 = vpop.f32.mrf.mxu1  ;;  %v2637_v23 = vpop.f32.mrf.mxu0  ;;  %5208 = vmatmul.mubr.msk.bf16.gmra.mxu0 %vm1751_vm2, %v7491_v39  ;;  %5233 = vmatmul.mubr.msk.bf16.gmra.mxu1 %vm1751_vm2, %v7413_v61 }
 0x562   :  { %10433 = vst [vmem:[#allocation10_spill] sm:$0xff] %v8167_v56  ;;  %v8173_v27 = vpack.c.bf16 %v3813_v20, %v3809_v2  ;;  %v3814_v14 = vmax.f32 %v3558_v24, 0.0  ;;  %v3561_v46 = vadd.f32 %v3305_v11, %v2637_v23  ;;  %2885 = vmatprep.mubr.bf16.mxu0 %v10204_v47  ;;  %3158 = vmatprep.mubr.bf16.mxu1 %v10204_v47  ;;  %v10438_v24 = vld [vmem:[#allocation13_spill] sm:$0xff] }
 0x563   :  { %v8177_v53 = vpop.f32.mrf.mxu1  ;;  %v2639_v30 = vpop.f32.mrf.mxu0  ;;  %v3310_v38 = vmul.f32 %v7509_v63, %v10438_v24  ;;  %v3313_v63 = vmul.f32 %v7511_v42, %v10441_v37  ;;  %v10505_v56 = vld [vmem:[#allocation69_spill] sm:$0xff] }
 0x564   :  { %10434 = vst [vmem:[#allocation454_spill] sm:$0xff] %v8177_v53  ;;  %v8183_v45 = vpack.c.bf16 %v3814_v14, %v3810_v6  ;;  %v3562_v58 = vadd.f32 %v3306_v12, %v2639_v30  ;;  %v3817_v2 = vmax.f32 %v3561_v46, 0.0  ;;  %v3361_v13 = vmul.f32 %v10506_v59, %v10505_v56 }
 0x565   :  { %v8185_v61 = vpop.f32.mrf.mxu1  ;;  %v2641_v20 = vpop.f32.mrf.mxu0 }
 0x566   :  { %10437 = vst [vmem:[#allocation11_spill] sm:$0xff] %v8185_v61  ;;  %v3565_v36 = vadd.f32 %v3309_v18, %v2641_v20  ;;  %v3818_v6 = vmax.f32 %v3562_v58, 0.0  ;;  %v3314_v18 = vmul.f32 %v7519_v5, %v10443_v33  ;;  %v10444_v20 = vld [vmem:[#allocation19_spill] sm:$0xff] }
 0x567   :  { %v8189_v25 = vpop.f32.mrf.mxu1  ;;  %v2643_v11 = vpop.f32.mrf.mxu0 }
 0x568   :  { %10439 = vst [vmem:[#allocation12_spill] sm:$0xff] %v8189_v25  ;;  %v3821_v23 = vmax.f32 %v3565_v36, 0.0  ;;  %v3566_v53 = vadd.f32 %v3310_v38, %v2643_v11  ;;  %v10496_v25 = vld [vmem:[#allocation246_spill] sm:$0xff] }
 0x569   :  { %v8191_v60 = vpop.f32.mrf.mxu1  ;;  %v2647_v41 = vpop.f32.mrf.mxu0  ;;  %5209 = vmatmul.mubr.msk.bf16.gmra.mxu0 %vm1751_vm2, %v7507_v55  ;;  %5234 = vmatmul.mubr.msk.bf16.gmra.mxu1 %vm1751_vm2, %v7421_v54  ;;  %v3317_v54 = vmul.f32 %v7521_v44, %v10444_v20  ;;  %v10451_v20 = vld [vmem:[#allocation25_spill] sm:$0xff] }
 0x56a   :  { %10440 = vst [vmem:[#allocation13_spill] sm:$0xff] %v8191_v60  ;;  %v8199_v14 = vpack.c.bf16 %v3821_v23, %v3817_v2  ;;  %v3822_v30 = vmax.f32 %v3566_v53, 0.0  ;;  %2895 = vmatprep.mubr.bf16.mxu0 %v10204_v47  ;;  %3168 = vmatprep.mubr.bf16.mxu1 %v10204_v47  ;;  %v3569_v24 = vadd.f32 %v3313_v63, %v2647_v41  ;;  %v10446_v53 = vld [vmem:[#allocation21_spill] sm:$0xff]  ;;  %v10449_v41 = vld [vmem:[#allocation23_spill] sm:$0xff] }
 0x56b   :  { %v8203_v46 = vpop.f32.mrf.mxu1  ;;  %v2649_v12 = vpop.f32.mrf.mxu0  ;;  %v3318_v36 = vmul.f32 %v7525_v7, %v10446_v53  ;;  %v3321_v7 = vmul.f32 %v7527_v19, %v10449_v41 }
 0x56c   :  { %10442 = vst [vmem:[#allocation15_spill] sm:$0xff] %v8203_v46  ;;  %v8209_v38 = vpack.c.bf16 %v3822_v30, %v3818_v6  ;;  %v3570_v11 = vadd.f32 %v3314_v18, %v2649_v12  ;;  %v3825_v46 = vmax.f32 %v3569_v24, 0.0  ;;  %v10452_v24 = vld [vmem:[#allocation27_spill] sm:$0xff] }
 0x56d   :  { %v8211_v42 = vpop.f32.mrf.mxu1  ;;  %v2651_v58 = vpop.f32.mrf.mxu0 }
 0x56e   :  { %10445 = vst [vmem:[#allocation17_spill] sm:$0xff] %v8211_v42  ;;  %v3573_v2 = vadd.f32 %v3317_v54, %v2651_v58  ;;  %v3826_v63 = vmax.f32 %v3570_v11, 0.0  ;;  %v3322_v54 = vmul.f32 %v7535_v35, %v10451_v20  ;;  %v10495_v42 = vld [vmem:[#allocation32_spill] sm:$0xff] }
 0x56f   :  { %v8215_v23 = vpop.f32.mrf.mxu1  ;;  %v2653_v37 = vpop.f32.mrf.mxu0 }
 0x570   :  { %10447 = vst [vmem:[#allocation19_spill] sm:$0xff] %v8215_v23  ;;  %v3829_v60 = vmax.f32 %v3573_v2, 0.0  ;;  %v3574_v5 = vadd.f32 %v3318_v36, %v2653_v37 }
 0x571   :  { %v8217_v33 = vpop.f32.mrf.mxu1  ;;  %v2657_v44 = vpop.f32.mrf.mxu0  ;;  %5210 = vmatmul.mubr.msk.bf16.gmra.mxu0 %vm1751_vm2, %v7523_v51  ;;  %5235 = vmatmul.mubr.msk.bf16.gmra.mxu1 %vm1751_vm2, %v7429_v8  ;;  %v3325_v8 = vmul.f32 %v7537_v22, %v10452_v24  ;;  %v10459_v24 = vld [vmem:[#allocation33_spill] sm:$0xff] }
 0x572   :  { %10448 = vst [vmem:[#allocation21_spill] sm:$0xff] %v8217_v33  ;;  %v8225_v6 = vpack.c.bf16 %v3829_v60, %v3825_v46  ;;  %v3830_v30 = vmax.f32 %v3574_v5, 0.0  ;;  %2905 = vmatprep.mubr.bf16.mxu0 %v10204_v47  ;;  %3178 = vmatprep.mubr.bf16.mxu1 %v10204_v47  ;;  %v3577_v58 = vadd.f32 %v3321_v7, %v2657_v44  ;;  %v10454_v46 = vld [vmem:[#allocation29_spill] sm:$0xff]  ;;  %v10457_v44 = vld [vmem:[#allocation31_spill] sm:$0xff] }
 0x573   :  { %v8229_v12 = vpop.f32.mrf.mxu1  ;;  %v2659_v18 = vpop.f32.mrf.mxu0  ;;  %v3326_v36 = vmul.f32 %v7541_v29, %v10454_v46  ;;  %v3329_v29 = vmul.f32 %v7543_v9, %v10457_v44 }
 0x574   :  { %10450 = vst [vmem:[#allocation23_spill] sm:$0xff] %v8229_v12  ;;  %v8235_v53 = vpack.c.bf16 %v3830_v30, %v3826_v63  ;;  %v3578_v11 = vadd.f32 %v3322_v54, %v2659_v18  ;;  %v3833_v41 = vmax.f32 %v3577_v58, 0.0  ;;  %v10460_v58 = vld [vmem:[#allocation35_spill] sm:$0xff] }
 0x575   :  { %v8237_v19 = vpop.f32.mrf.mxu1  ;;  %v2661_v60 = vpop.f32.mrf.mxu0 }
 0x576   :  { %10453 = vst [vmem:[#allocation25_spill] sm:$0xff] %v8237_v19  ;;  %v3581_v2 = vadd.f32 %v3325_v8, %v2661_v60  ;;  %v3834_v7 = vmax.f32 %v3578_v11, 0.0  ;;  %v3330_v8 = vmul.f32 %v7551_v40, %v10459_v24  ;;  %v10463_v11 = vld [vmem:[#allocation199_spill] sm:$0xff] }
 0x577   :  { %v8241_v37 = vpop.f32.mrf.mxu1  ;;  %v2663_v5 = vpop.f32.mrf.mxu0 }
 0x578   :  { %10455 = vst [vmem:[#allocation27_spill] sm:$0xff] %v8241_v37  ;;  %v3837_v12 = vmax.f32 %v3581_v2, 0.0  ;;  %v3582_v35 = vadd.f32 %v3326_v36, %v2663_v5  ;;  %v10462_v36 = vld [vmem:[#allocation37_spill] sm:$0xff] }
 0x579   :  { %v8243_v20 = vpop.f32.mrf.mxu1  ;;  %v2667_v22 = vpop.f32.mrf.mxu0  ;;  %5211 = vmatmul.mubr.msk.bf16.gmra.mxu0 %vm1751_vm2, %v7539_v31  ;;  %5236 = vmatmul.mubr.msk.bf16.gmra.mxu1 %vm1751_vm2, %v7437_v17  ;;  %v3333_v17 = vmul.f32 %v7553_v28, %v10460_v58  ;;  %v3334_v2 = vmul.f32 %v10463_v11, %v10462_v36  ;;  %v10471_v11 = vld [vmem:[#allocation43_spill] sm:$0xff] }
 0x57a   :  { %10456 = vst [vmem:[#allocation29_spill] sm:$0xff] %v8243_v20  ;;  %v8251_v63 = vpack.c.bf16 %v3837_v12, %v3833_v41  ;;  %v3838_v30 = vmax.f32 %v3582_v35, 0.0  ;;  %2915 = vmatprep.mubr.bf16.mxu0 %v10204_v47  ;;  %3188 = vmatprep.mubr.bf16.mxu1 %v10204_v47  ;;  %v3585_v60 = vadd.f32 %v3329_v29, %v2667_v22  ;;  %v10466_v22 = vld [vmem:[#allocation39_spill] sm:$0xff] }
 0x57b   :  { %v8255_v18 = vpop.f32.mrf.mxu1  ;;  %v2669_v54 = vpop.f32.mrf.mxu0  ;;  %v10467_v29 = vld [vmem:[#allocation203_spill] sm:$0xff] }
 0x57c   :  { %10458 = vst [vmem:[#allocation31_spill] sm:$0xff] %v8255_v18  ;;  %v8261_v46 = vpack.c.bf16 %v3838_v30, %v3834_v7  ;;  %v3586_v5 = vadd.f32 %v3330_v8, %v2669_v54  ;;  %v3841_v18 = vmax.f32 %v3585_v60, 0.0  ;;  %v3337_v7 = vmul.f32 %v10467_v29, %v10466_v22  ;;  %v4057_v60 = vld [vmem:[%s9380_s3] sm:$0xff]  ;;  %v10475_v22 = vld [vmem:[#allocation211_spill] sm:$0xff] }
 0x57d   :  { %v8263_v9 = vpop.f32.mrf.mxu1  ;;  %v2671_v12 = vpop.f32.mrf.mxu0 }
 0x57e   :  { %10461 = vst [vmem:[#allocation33_spill] sm:$0xff] %v8263_v9  ;;  %v3589_v41 = vadd.f32 %v3333_v17, %v2671_v12  ;;  %v3842_v30 = vmax.f32 %v3586_v5, 0.0  ;;  %v10469_v12 = vld [vmem:[#allocation41_spill] sm:$0xff] }
 0x57f   :  { %v8267_v35 = vpop.f32.mrf.mxu1  ;;  %v2673_v44 = vpop.f32.mrf.mxu0 }
 0x580   :  { %10464 = vst [vmem:[#allocation35_spill] sm:$0xff] %v8267_v35  ;;  %v3845_v20 = vmax.f32 %v3589_v41, 0.0  ;;  %v3590_v40 = vadd.f32 %v3334_v2, %v2673_v44  ;;  %v10472_v2 = vld [vmem:[#allocation209_spill] sm:$0xff]  ;;  %v8296_v35 = vcombine.high %v4057_v60, %v4057_v60 }
 0x581   :  { %v8269_v24 = vpop.f32.mrf.mxu1  ;;  %v2677_v28 = vpop.f32.mrf.mxu0  ;;  %5212 = vmatmul.mubr.msk.bf16.gmra.mxu0 %vm1751_vm2, %v7555_v3  ;;  %5237 = vmatmul.mubr.msk.bf16.gmra.mxu1 %vm1751_vm2, %v7445_v10  ;;  %v10470_v10 = vld [vmem:[#allocation205_spill] sm:$0xff]  ;;  %v3341_v5 = vmul.f32 %v10472_v2, %v10471_v11  ;;  %v10481_v2 = vld [vmem:[#allocation51_spill] sm:$0xff] }
 0x582   :  { %10465 = vst [vmem:[#allocation37_spill] sm:$0xff] %v8269_v24  ;;  %v8277_v54 = vpack.c.bf16 %v3845_v20, %v3841_v18  ;;  %v3846_v8 = vmax.f32 %v3590_v40, 0.0  ;;  %2925 = vmatprep.mubr.bf16.mxu0 %v10204_v47  ;;  %3198 = vmatprep.mubr.bf16.mxu1 %v10204_v47  ;;  %v3338_v36 = vmul.f32 %v10470_v10, %v10469_v12  ;;  %v10474_v40 = vld [vmem:[#allocation45_spill] sm:$0xff] }
 0x583   :  { %v8281_v58 = vpop.f32.mrf.mxu1  ;;  %v2679_v17 = vpop.f32.mrf.mxu0  ;;  %v3593_v20 = vadd.f32 %v3337_v7, %v2677_v28  ;;  %v3342_v29 = vmul.f32 %v10475_v22, %v10474_v40  ;;  %v10478_v7 = vld [vmem:[#allocation47_spill] sm:$0xff]  ;;  %v10484_v22 = vld [vmem:[#allocation217_spill] sm:$0xff] }
 0x584   :  { %10468 = vst [vmem:[#allocation199_spill] sm:$0xff] %v8281_v58  ;;  %v8290_v18 = vpack.c.bf16 %v3846_v8, %v3842_v30  ;;  %v3594_v58 = vadd.f32 %v3338_v36, %v2679_v17  ;;  %v10479_v30 = vld [vmem:[#allocation215_spill] sm:$0xff] }
 0x585   :  { %v8292_v41 = vpop.f32.mrf.mxu1  ;;  %v2681_v44 = vpop.f32.mrf.mxu0  ;;  %v3849_v12 = vmax.f32 %v3593_v20, 0.0  ;;  %v3345_v8 = vmul.f32 %v10479_v30, %v10478_v7 }
 0x586   :  { %10473 = vst [vmem:[#allocation39_spill] sm:$0xff] %v8292_v41  ;;  %v3597_v24 = vadd.f32 %v3341_v5, %v2681_v44  ;;  %v3850_v17 = vmax.f32 %v3594_v58, 0.0  ;;  %v10482_v5 = vld [vmem:[#allocation222_spill] sm:$0xff] }
 0x587   :  { %v8298_v9 = vpop.f32.mrf.mxu1  ;;  %v2683_v37 = vpop.f32.mrf.mxu0  ;;  %v3349_v20 = vmul.f32 %v10482_v5, %v10481_v2  ;;  %v10491_v2 = vld [vmem:[#allocation30_spill] sm:$0xff] }
 0x588   :  { %10476 = vst [vmem:[#allocation203_spill] sm:$0xff] %v8298_v9  ;;  %v3853_v10 = vmax.f32 %v3597_v24, 0.0  ;;  %v3598_v19 = vadd.f32 %v3342_v29, %v2683_v37  ;;  %v10489_v9 = vld [vmem:[#allocation238_spill] sm:$0xff] }
 0x589   :  { %v8300_v11 = vpop.f32.mrf.mxu1  ;;  %v2687_v28 = vpop.f32.mrf.mxu0  ;;  %5213 = vmatmul.mubr.msk.bf16.gmra.mxu0 %vm1751_vm2, %v7571_v50  ;;  %5238 = vmatmul.mubr.msk.bf16.gmra.mxu1 %vm1751_vm2, %v7453_v4  ;;  %v10483_v4 = vld [vmem:[#allocation49_spill] sm:$0xff] }
 0x58a   :  { %10477 = vst [vmem:[#allocation41_spill] sm:$0xff] %v8300_v11  ;;  %v8308_v60 = vpack.c.bf16 %v3853_v10, %v3849_v12  ;;  %v3854_v36 = vmax.f32 %v3598_v19, 0.0  ;;  %3208 = vmatprep.mubr.bf16.mxu1 %v10204_v47  ;;  %4233 = vmatprep.mubr.bf16.mxu0 %v8296_v35  ;;  %v3601_v44 = vadd.f32 %v3345_v8, %v2687_v28  ;;  %v10486_v12 = vld [vmem:[#allocation53_spill] sm:$0xff]  ;;  %v10487_v19 = vld [vmem:[#allocation226_spill] sm:$0xff] }
 0x58b   :  { %v8312_v37 = vpop.f32.mrf.mxu1  ;;  %v2689_v24 = vpop.f32.mrf.mxu0  ;;  %v3346_v29 = vmul.f32 %v10484_v22, %v10483_v4  ;;  %v3350_v10 = vmul.f32 %v10487_v19, %v10486_v12  ;;  %v10488_v11 = vld [vmem:[#allocation57_spill] sm:$0xff]  ;;  %v10492_v28 = vld [vmem:[#allocation230_spill] sm:$0xff]  ;;  %v10493_v4 = vld [vmem:[#allocation60_spill] sm:$0xff]  ;;  %v3292_v12 = vmul.f32 %v10496_v25, %v10495_v42 }
 0x58c   :  { %10480 = vst [vmem:[#allocation205_spill] sm:$0xff] %v8312_v37  ;;  %v4084_v40 = vpack.c.bf16 %v3854_v36, %v3850_v17  ;;  %v3353_v41 = vmul.f32 %v10489_v9, %v10488_v11  ;;  %v3291_v8 = vmul.f32 %v10492_v28, %v10491_v2  ;;  %v3857_v17 = vmax.f32 %v3601_v44, 0.0  ;;  %v10494_v22 = vld [vmem:[#allocation241_spill] sm:$0xff]  ;;  %v10499_v28 = vld [vmem:[#allocation34_spill] sm:$0xff] }
 0x58d   :  { %v8318_v7 = vpop.f32.mrf.mxu1  ;;  %v2691_v58 = vpop.f32.mrf.mxu0  ;;  %v3602_v37 = vadd.f32 %v3346_v29, %v2689_v24 }
 0x58e   :  { %10485 = vst [vmem:[#allocation43_spill] sm:$0xff] %v8318_v7  ;;  %v3605_v30 = vadd.f32 %v3349_v20, %v2691_v58  ;;  %v3354_v7 = vmul.f32 %v10494_v22, %v10493_v4  ;;  %v10500_v4 = vld [vmem:[#allocation234_spill] sm:$0xff] }
 0x58f   :  { %v8324_v33 = vpop.f32.mrf.mxu1  ;;  %v2693_v23 = vpop.f32.mrf.mxu0  ;;  %v3858_v44 = vmax.f32 %v3602_v37, 0.0  ;;  %v3295_v25 = vmul.f32 %v10500_v4, %v10499_v28 }
 0x590   :  { %10490 = vst [vmem:[#allocation209_spill] sm:$0xff] %v8324_v33  ;;  %v3861_v36 = vmax.f32 %v3605_v30, 0.0  ;;  %v3606_v5 = vadd.f32 %v3350_v10, %v2693_v23  ;;  %v10497_v10 = vld [vmem:[#allocation63_spill] sm:$0xff]  ;;  %v10498_v30 = vld [vmem:[#allocation232_spill] sm:$0xff] }
 0x591   :  { %v2697_v20 = vpop.f32.mrf.mxu0  ;;  %v2970_v58 = vpop.f32.mrf.mxu1  ;;  %5239 = vmatmul.mubr.msk.bf16.gmra.mxu1 %vm1751_vm2, %v7461_v32  ;;  %v3357_v2 = vmul.f32 %v10498_v30, %v10497_v10  ;;  %v10507_v10 = vld [vmem:[#allocation38_spill] sm:$0xff] }
 0x592   :  { %v4087_v9 = vpack.c.bf16 %v3861_v36, %v3857_v17  ;;  %v3862_v11 = vmax.f32 %v3606_v5, 0.0  ;;  %v3609_v24 = vadd.f32 %v3353_v41, %v2697_v20  ;;  %v3547_v29 = vadd.f32 %v3291_v8, %v2970_v58  ;;  %3218 = vmatprep.mubr.bf16.mxu1 %v10204_v47  ;;  %v10501_v17 = vld [vmem:[#allocation66_spill] sm:$0xff]  ;;  %v10502_v36 = vld [vmem:[#allocation249_spill] sm:$0xff]  ;;  %v10503_v8 = vld [vmem:[#allocation36_spill] sm:$0xff] }
 0x593   :  { %v2699_v19 = vpop.f32.mrf.mxu0  ;;  %v2972_v23 = vpop.f32.mrf.mxu1  ;;  %v3358_v41 = vmul.f32 %v10502_v36, %v10501_v17  ;;  %v10504_v5 = vld [vmem:[#allocation254_spill] sm:$0xff]  ;;  %v10509_v17 = vld [vmem:[#allocation72_spill] sm:$0xff]  ;;  %v10510_v36 = vld [vmem:[#allocation257_spill] sm:$0xff] }
 0x594   :  { %v3610_v42 = vadd.f32 %v3354_v7, %v2699_v19  ;;  %v3548_v22 = vadd.f32 %v3292_v12, %v2972_v23  ;;  %v4088_v32 = vpack.c.bf16 %v3862_v11, %v3858_v44  ;;  %v3296_v20 = vmul.f32 %v10504_v5, %v10503_v8  ;;  %v10508_v30 = vld [vmem:[#allocation242_spill] sm:$0xff]  ;;  %v10514_v5 = vld [vmem:[#allocation75_spill] sm:$0xff] }
 0x595   :  { %v2701_v33 = vpop.f32.mrf.mxu0  ;;  %v2974_v61 = vpop.f32.mrf.mxu1  ;;  %v3299_v49 = vmul.f32 %v10508_v30, %v10507_v10  ;;  %v3865_v28 = vmax.f32 %v3609_v24, 0.0  ;;  %v3803_v7 = vmax.f32 %v3547_v29, 0.0 }
 0x596   :  { %v3613_v37 = vadd.f32 %v3357_v2, %v2701_v33  ;;  %v3551_v58 = vadd.f32 %v3295_v25, %v2974_v61  ;;  %4201 = vmatprep.subr.bf16.mxu0 %v4088_v32  ;;  %v3362_v33 = vmul.f32 %v10510_v36, %v10509_v17  ;;  %v10511_v61 = vld [vmem:[#allocation40_spill] sm:$0xff]  ;;  %v10512_v2 = vld [vmem:[#allocation262_spill] sm:$0xff]  ;;  %v3866_v59 = vmax.f32 %v3610_v42, 0.0 }
 0x597   :  { %v2703_v12 = vpop.f32.mrf.mxu0  ;;  %v2976_v19 = vpop.f32.mrf.mxu1  ;;  %4202 = vmatpush1.bf16.msra.mxu0 %v4087_v9  ;;  %v3300_v25 = vmul.f32 %v10512_v2, %v10511_v61  ;;  %v3804_v56 = vmax.f32 %v3548_v22, 0.0  ;;  %v10517_v42 = vld [vmem:[#allocation250_spill] sm:$0xff]  ;;  %v10521_v36 = vld [vmem:[#allocation44_spill] sm:$0xff] }
 0x598   :  { %v3869_v11 = vmax.f32 %v3613_v37, 0.0  ;;  %v3807_v44 = vmax.f32 %v3551_v58, 0.0  ;;  %v3614_v23 = vadd.f32 %v3358_v41, %v2703_v12  ;;  %v3552_v4 = vadd.f32 %v3296_v20, %v2976_v19  ;;  %4203 = vmatprep.subr.bf16.mxu0 %v4084_v40  ;;  %v10515_v20 = vld [vmem:[#allocation247_spill] sm:$0xff]  ;;  %v10516_v58 = vld [vmem:[#allocation42_spill] sm:$0xff] }
 0x599   :  { %v2707_v8 = vpop.f32.mrf.mxu0  ;;  %v2980_v24 = vpop.f32.mrf.mxu1  ;;  %5240 = vmatmul.mubr.msk.bf16.gmra.mxu1 %vm1751_vm2, %v7475_v48  ;;  %v3365_v37 = vmul.f32 %v10515_v20, %v10514_v5  ;;  %v3303_v22 = vmul.f32 %v10517_v42, %v10516_v58  ;;  %v10525_v20 = vld [vmem:[#allocation46_spill] sm:$0xff] }
 0x59a   :  { %v8353_v29 = vpack.c.bf16 %v3869_v11, %v3865_v28  ;;  %v8355_v32 = vpack.c.bf16 %v3807_v44, %v3803_v7  ;;  %v3870_v41 = vmax.f32 %v3614_v23, 0.0  ;;  %v3808_v9 = vmax.f32 %v3552_v4, 0.0  ;;  %3228 = vmatprep.mubr.bf16.mxu1 %v10204_v47  ;;  %v10519_v23 = vld [vmem:[#allocation78_spill] sm:$0xff]  ;;  %v10520_v4 = vld [vmem:[#allocation265_spill] sm:$0xff] }
 0x59b   :  { %v3617_v40 = vadd.f32 %v3361_v13, %v2707_v8  ;;  %v3555_v10 = vadd.f32 %v3299_v49, %v2980_v24  ;;  %v2709_v30 = vpop.f32.mrf.mxu0  ;;  %v2982_v12 = vpop.f32.mrf.mxu1  ;;  %4204 = vmatpush1.bf16.msra.mxu0 %v8308_v60  ;;  %v3366_v17 = vmul.f32 %v10520_v4, %v10519_v23  ;;  %v10522_v13 = vld [vmem:[#allocation270_spill] sm:$0xff]  ;;  %v10524_v8 = vld [vmem:[#allocation255_spill] sm:$0xff] }
 0x59c   :  { %10513 = vst [vmem:[#allocation45_spill] sm:$0xff] %v8355_v32  ;;  %v8362_v19 = vpack.c.bf16 %v3870_v41, %v3866_v59  ;;  %v3618_v48 = vadd.f32 %v3362_v33, %v2709_v30  ;;  %v3556_v28 = vadd.f32 %v3300_v25, %v2982_v12  ;;  %v8365_v7 = vpack.c.bf16 %v3808_v9, %v3804_v56  ;;  %v10523_v59 = vld [vmem:[#allocation81_spill] sm:$0xff]  ;;  %v10526_v58 = vld [vmem:[#allocation258_spill] sm:$0xff]  ;;  %v10527_v30 = vld [vmem:[#allocation48_spill] sm:$0xff] }
 0x59d   :  { %4205 = vmatprep.subr.bf16.mxu0 %v8290_v18  ;;  %v2711_v11 = vpop.f32.mrf.mxu0  ;;  %v2984_v44 = vpop.f32.mrf.mxu1  ;;  %v3304_v49 = vmul.f32 %v10522_v13, %v10521_v36  ;;  %v3369_v33 = vmul.f32 %v10524_v8, %v10523_v59  ;;  %v3873_v25 = vmax.f32 %v3617_v40, 0.0  ;;  %v3811_v24 = vmax.f32 %v3555_v10, 0.0  ;;  %v10528_v12 = vld [vmem:[#allocation278_spill] sm:$0xff]  ;;  %v10531_v36 = vld [vmem:[#allocation273_spill] sm:$0xff] }
 0x59e   :  { %10518 = vst [vmem:[#allocation211_spill] sm:$0xff] %v8365_v7  ;;  %v3621_v61 = vadd.f32 %v3365_v37, %v2711_v11  ;;  %v3559_v2 = vadd.f32 %v3303_v22, %v2984_v44  ;;  %v3307_v42 = vmul.f32 %v10526_v58, %v10525_v20  ;;  %v3308_v37 = vmul.f32 %v10528_v12, %v10527_v30  ;;  %v10534_v8 = vld [vmem:[#allocation50_spill] sm:$0xff]  ;;  %v10539_v58 = vld [vmem:[#allocation52_spill] sm:$0xff]  ;;  %v10622_v7 = vld [vmem:[#allocation137_spill] sm:$0xff] }
 0x59f   :  { %v2713_v60 = vpop.f32.mrf.mxu0  ;;  %v2986_v56 = vpop.f32.mrf.mxu1  ;;  %4206 = vmatpush1.bf16.msra.mxu0 %v8277_v54  ;;  %v3874_v22 = vmax.f32 %v3618_v48, 0.0  ;;  %v3812_v11 = vmax.f32 %v3556_v28, 0.0  ;;  %v10532_v48 = vld [vmem:[#allocation87_spill] sm:$0xff] }
 0x5a0   :  { %v3877_v41 = vmax.f32 %v3621_v61, 0.0  ;;  %v3815_v9 = vmax.f32 %v3559_v2, 0.0  ;;  %v3622_v18 = vadd.f32 %v3366_v17, %v2713_v60  ;;  %v3560_v5 = vadd.f32 %v3304_v49, %v2986_v56  ;;  %4207 = vmatprep.subr.bf16.mxu0 %v8261_v46  ;;  %v10530_v17 = vld [vmem:[#allocation84_spill] sm:$0xff]  ;;  %v10533_v28 = vld [vmem:[#allocation263_spill] sm:$0xff] }
 0x5a1   :  { %v2717_v40 = vpop.f32.mrf.mxu0  ;;  %v2990_v10 = vpop.f32.mrf.mxu1  ;;  %5241 = vmatmul.mubr.msk.bf16.gmra.mxu1 %vm1751_vm2, %v7491_v39  ;;  %v3370_v13 = vmul.f32 %v10531_v36, %v10530_v17  ;;  %v3373_v49 = vmul.f32 %v10533_v28, %v10532_v48  ;;  %v10535_v39 = vld [vmem:[#allocation266_spill] sm:$0xff]  ;;  %v10543_v48 = vld [vmem:[#allocation55_spill] sm:$0xff] }
 0x5a2   :  { %v8382_v44 = vpack.c.bf16 %v3877_v41, %v3873_v25  ;;  %v8384_v23 = vpack.c.bf16 %v3815_v9, %v3811_v24  ;;  %v3878_v54 = vmax.f32 %v3622_v18, 0.0  ;;  %v3816_v4 = vmax.f32 %v3560_v5, 0.0  ;;  %3238 = vmatprep.mubr.bf16.mxu1 %v10204_v47  ;;  %v10537_v5 = vld [vmem:[#allocation90_spill] sm:$0xff] }
 0x5a3   :  { %v3625_v46 = vadd.f32 %v3369_v33, %v2717_v40  ;;  %v3563_v61 = vadd.f32 %v3307_v42, %v2990_v10  ;;  %v2719_v2 = vpop.f32.mrf.mxu0  ;;  %v2992_v59 = vpop.f32.mrf.mxu1  ;;  %v3311_v25 = vmul.f32 %v10535_v39, %v10534_v8  ;;  %4208 = vmatpush1.bf16.msra.mxu0 %v8251_v63  ;;  %v10538_v33 = vld [vmem:[#allocation281_spill] sm:$0xff]  ;;  %v10540_v42 = vld [vmem:[#allocation286_spill] sm:$0xff]  ;;  %v10542_v10 = vld [vmem:[#allocation271_spill] sm:$0xff] }
 0x5a4   :  { %10529 = vst [vmem:[#allocation47_spill] sm:$0xff] %v8384_v23  ;;  %v8393_v60 = vpack.c.bf16 %v3878_v54, %v3874_v22  ;;  %v3564_v24 = vadd.f32 %v3308_v37, %v2992_v59  ;;  %v8396_v56 = vpack.c.bf16 %v3816_v4, %v3812_v11  ;;  %v3626_v41 = vadd.f32 %v3370_v13, %v2719_v2  ;;  %v10541_v22 = vld [vmem:[#allocation93_spill] sm:$0xff]  ;;  %v10544_v28 = vld [vmem:[#allocation274_spill] sm:$0xff]  ;;  %v10545_v59 = vld [vmem:[#allocation59_spill] sm:$0xff] }
 0x5a5   :  { %4209 = vmatprep.subr.bf16.mxu0 %v8235_v53  ;;  %v2721_v9 = vpop.f32.mrf.mxu0  ;;  %v2994_v18 = vpop.f32.mrf.mxu1  ;;  %v3374_v20 = vmul.f32 %v10538_v33, %v10537_v5  ;;  %v3312_v30 = vmul.f32 %v10540_v42, %v10539_v58  ;;  %v3377_v37 = vmul.f32 %v10542_v10, %v10541_v22  ;;  %v3881_v54 = vmax.f32 %v3625_v46, 0.0  ;;  %v10546_v8 = vld [vmem:[#allocation282_spill] sm:$0xff]  ;;  %v10548_v33 = vld [vmem:[#allocation96_spill] sm:$0xff]  ;;  %v10552_v22 = vld [vmem:[#allocation61_spill] sm:$0xff] }
 0x5a6   :  { %10536 = vst [vmem:[#allocation215_spill] sm:$0xff] %v8396_v56  ;;  %v3629_v12 = vadd.f32 %v3373_v49, %v2721_v9  ;;  %v3567_v40 = vadd.f32 %v3311_v25, %v2994_v18  ;;  %v3819_v63 = vmax.f32 %v3563_v61, 0.0  ;;  %v3315_v2 = vmul.f32 %v10544_v28, %v10543_v48  ;;  %v10556_v48 = vld [vmem:[#allocation65_spill] sm:$0xff]  ;;  %v10624_v23 = vld [vmem:[#allocation110_spill] sm:$0xff] }
 0x5a7   :  { %v2723_v11 = vpop.f32.mrf.mxu0  ;;  %v2996_v4 = vpop.f32.mrf.mxu1  ;;  %4210 = vmatpush1.bf16.msra.mxu0 %v8225_v6  ;;  %v3316_v49 = vmul.f32 %v10546_v8, %v10545_v59  ;;  %v3882_v39 = vmax.f32 %v3626_v41, 0.0  ;;  %v3820_v25 = vmax.f32 %v3564_v24, 0.0  ;;  %v10550_v41 = vld [vmem:[#allocation99_spill] sm:$0xff]  ;;  %v10557_v28 = vld [vmem:[#allocation293_spill] sm:$0xff] }
 0x5a8   :  { %v3885_v17 = vmax.f32 %v3629_v12, 0.0  ;;  %v3823_v36 = vmax.f32 %v3567_v40, 0.0  ;;  %v3630_v53 = vadd.f32 %v3374_v20, %v2723_v11  ;;  %v3568_v13 = vadd.f32 %v3312_v30, %v2996_v4  ;;  %4211 = vmatprep.subr.bf16.mxu0 %v8209_v38  ;;  %v10549_v20 = vld [vmem:[#allocation279_spill] sm:$0xff] }
 0x5a9   :  { %v2727_v46 = vpop.f32.mrf.mxu0  ;;  %v3000_v61 = vpop.f32.mrf.mxu1  ;;  %5242 = vmatmul.mubr.msk.bf16.gmra.mxu1 %vm1751_vm2, %v7507_v55  ;;  %v3378_v58 = vmul.f32 %v10549_v20, %v10548_v33  ;;  %v10551_v24 = vld [vmem:[#allocation287_spill] sm:$0xff]  ;;  %v10553_v55 = vld [vmem:[#allocation289_spill] sm:$0xff] }
 0x5aa   :  { %v8413_v9 = vpack.c.bf16 %v3885_v17, %v3881_v54  ;;  %v8415_v18 = vpack.c.bf16 %v3823_v36, %v3819_v63  ;;  %v3886_v6 = vmax.f32 %v3630_v53, 0.0  ;;  %v3824_v5 = vmax.f32 %v3568_v13, 0.0  ;;  %3248 = vmatprep.mubr.bf16.mxu1 %v10204_v47  ;;  %v10554_v53 = vld [vmem:[#allocation101_spill] sm:$0xff] }
 0x5ab   :  { %v3381_v42 = vmul.f32 %v10551_v24, %v10550_v41  ;;  %v3633_v38 = vadd.f32 %v3377_v37, %v2727_v46  ;;  %v3571_v30 = vadd.f32 %v3315_v2, %v3000_v61  ;;  %v2729_v12 = vpop.f32.mrf.mxu0  ;;  %v3002_v40 = vpop.f32.mrf.mxu1  ;;  %v3319_v10 = vmul.f32 %v10553_v55, %v10552_v22  ;;  %4212 = vmatpush1.bf16.msra.mxu0 %v8199_v14  ;;  %v10555_v37 = vld [vmem:[#allocation292_spill] sm:$0xff]  ;;  %v10561_v41 = vld [vmem:[#allocation151_spill] sm:$0xff] }
 0x5ac   :  { %10547 = vst [vmem:[#allocation51_spill] sm:$0xff] %v8415_v18  ;;  %v8424_v54 = vpack.c.bf16 %v3886_v6, %v3882_v39  ;;  %v3572_v63 = vadd.f32 %v3316_v49, %v3002_v40  ;;  %v8427_v11 = vpack.c.bf16 %v3824_v5, %v3820_v25  ;;  %v3634_v4 = vadd.f32 %v3378_v58, %v2729_v12  ;;  %v10558_v39 = vld [vmem:[#allocation103_spill] sm:$0xff]  ;;  %v10559_v46 = vld [vmem:[#allocation296_spill] sm:$0xff]  ;;  %v10563_v40 = vld [vmem:[#allocation161_spill] sm:$0xff] }
 0x5ad   :  { %4213 = vmatprep.subr.bf16.mxu0 %v8183_v45  ;;  %v2731_v17 = vpop.f32.mrf.mxu0  ;;  %v3004_v36 = vpop.f32.mrf.mxu1  ;;  %v3382_v13 = vmul.f32 %v10555_v37, %v10554_v53  ;;  %v3320_v2 = vmul.f32 %v10557_v28, %v10556_v48  ;;  %v3385_v49 = vmul.f32 %v10559_v46, %v10558_v39  ;;  %v3889_v61 = vmax.f32 %v3633_v38, 0.0  ;;  %v10560_v58 = vld [vmem:[#allocation67_spill] sm:$0xff]  ;;  %v10564_v53 = vld [vmem:[#allocation105_spill] sm:$0xff] }
 0x5ae   :  { %v3637_v59 = vadd.f32 %v3381_v42, %v2731_v17  ;;  %v3575_v8 = vadd.f32 %v3319_v10, %v3004_v36  ;;  %v3827_v14 = vmax.f32 %v3571_v30, 0.0  ;;  %v3323_v24 = vmul.f32 %v10561_v41, %v10560_v58  ;;  %v10562_v12 = vld [vmem:[#allocation71_spill] sm:$0xff]  ;;  %v10565_v37 = vld [vmem:[#allocation157_spill] sm:$0xff] }
 0x5af   :  { %v2733_v25 = vpop.f32.mrf.mxu0  ;;  %v3006_v6 = vpop.f32.mrf.mxu1  ;;  %4214 = vmatpush1.bf16.msra.mxu0 %v8173_v27  ;;  %v3324_v42 = vmul.f32 %v10563_v40, %v10562_v12  ;;  %v3890_v22 = vmax.f32 %v3634_v4, 0.0  ;;  %v3828_v55 = vmax.f32 %v3572_v63, 0.0  ;;  %v10566_v4 = vld [vmem:[#allocation107_spill] sm:$0xff] }
 0x5b0   :  { %v3893_v5 = vmax.f32 %v3637_v59, 0.0  ;;  %v3831_v33 = vmax.f32 %v3575_v8, 0.0  ;;  %v3638_v45 = vadd.f32 %v3382_v13, %v2733_v25  ;;  %v3576_v20 = vadd.f32 %v3320_v2, %v3006_v6  ;;  %4215 = vmatprep.subr.bf16.mxu0 %v8157_v21  ;;  %v10567_v63 = vld [vmem:[#allocation167_spill] sm:$0xff]  ;;  %v10568_v8 = vld [vmem:[#allocation73_spill] sm:$0xff] }
 0x5b1   :  { %v2737_v38 = vpop.f32.mrf.mxu0  ;;  %v3010_v30 = vpop.f32.mrf.mxu1  ;;  %5243 = vmatmul.mubr.msk.bf16.gmra.mxu1 %vm1751_vm2, %v7523_v51  ;;  %v3386_v13 = vmul.f32 %v10565_v37, %v10564_v53  ;;  %v3389_v48 = vmul.f32 %v10567_v63, %v10566_v4  ;;  %v10569_v51 = vld [vmem:[#allocation305_spill] sm:$0xff]  ;;  %v10573_v58 = vld [vmem:[#allocation307_spill] sm:$0xff] }
 0x5b2   :  { %v8444_v10 = vpack.c.bf16 %v3893_v5, %v3889_v61  ;;  %v8446_v17 = vpack.c.bf16 %v3831_v33, %v3827_v14  ;;  %v3894_v27 = vmax.f32 %v3638_v45, 0.0  ;;  %v3832_v36 = vmax.f32 %v3576_v20, 0.0  ;;  %3258 = vmatprep.mubr.bf16.mxu1 %v10204_v47  ;;  %v10570_v33 = vld [vmem:[#allocation109_spill] sm:$0xff]  ;;  %v10575_v53 = vld [vmem:[#allocation179_spill] sm:$0xff] }
 0x5b3   :  { %v3641_v21 = vadd.f32 %v3385_v49, %v2737_v38  ;;  %v3579_v28 = vadd.f32 %v3323_v24, %v3010_v30  ;;  %v2739_v2 = vpop.f32.mrf.mxu0  ;;  %v3012_v59 = vpop.f32.mrf.mxu1  ;;  %v3327_v39 = vmul.f32 %v10569_v51, %v10568_v8  ;;  %4216 = vmatpush1.bf16.msra.mxu0 %v8149_v1  ;;  %v10571_v45 = vld [vmem:[#allocation173_spill] sm:$0xff]  ;;  %v10636_v18 = vld [vmem:[#allocation339_spill] sm:$0xff] }
 0x5b4   :  { %v8455_v46 = vpack.c.bf16 %v3894_v27, %v3890_v22  ;;  %v3580_v61 = vadd.f32 %v3324_v42, %v3012_v59  ;;  %v8458_v14 = vpack.c.bf16 %v3832_v36, %v3828_v55  ;;  %v3642_v25 = vadd.f32 %v3386_v13, %v2739_v2  ;;  %v10572_v49 = vld [vmem:[#allocation77_spill] sm:$0xff]  ;;  %v10574_v36 = vld [vmem:[#allocation111_spill] sm:$0xff] }
 0x5b5   :  { %v2741_v6 = vpop.f32.mrf.mxu0  ;;  %v3014_v5 = vpop.f32.mrf.mxu1  ;;  %v3390_v20 = vmul.f32 %v10571_v45, %v10570_v33  ;;  %v3328_v41 = vmul.f32 %v10573_v58, %v10572_v49  ;;  %v3897_v40 = vmax.f32 %v3641_v21, 0.0  ;;  %v3835_v38 = vmax.f32 %v3579_v28, 0.0  ;;  %v10576_v13 = vld [vmem:[#allocation79_spill] sm:$0xff]  ;;  %v10577_v4 = vld [vmem:[#allocation309_spill] sm:$0xff] }
 0x5b6   :  { %v3645_v24 = vadd.f32 %v3389_v48, %v2741_v6  ;;  %v3583_v12 = vadd.f32 %v3327_v39, %v3014_v5  ;;  %v3393_v37 = vmul.f32 %v10575_v53, %v10574_v36  ;;  %v3331_v63 = vmul.f32 %v10577_v4, %v10576_v13  ;;  %v10578_v6 = vld [vmem:[#allocation113_spill] sm:$0xff]  ;;  %v10580_v45 = vld [vmem:[#allocation83_spill] sm:$0xff] }
 0x5b7   :  { %v2743_v22 = vpop.f32.mrf.mxu0  ;;  %v3016_v30 = vpop.f32.mrf.mxu1  ;;  %v3898_v2 = vmax.f32 %v3642_v25, 0.0  ;;  %v3836_v59 = vmax.f32 %v3580_v61, 0.0  ;;  %v10579_v5 = vld [vmem:[#allocation185_spill] sm:$0xff]  ;;  %v10587_v13 = vld [vmem:[#allocation315_spill] sm:$0xff] }
 0x5b8   :  { %v3901_v42 = vmax.f32 %v3645_v24, 0.0  ;;  %v3839_v27 = vmax.f32 %v3583_v12, 0.0  ;;  %v3646_v1 = vadd.f32 %v3390_v20, %v2743_v22  ;;  %v3584_v55 = vadd.f32 %v3328_v41, %v3016_v30  ;;  %v10581_v20 = vld [vmem:[#allocation312_spill] sm:$0xff]  ;;  %v10582_v24 = vld [vmem:[#allocation115_spill] sm:$0xff]  ;;  %v10586_v53 = vld [vmem:[#allocation117_spill] sm:$0xff] }
 0x5b9   :  { %v2747_v8 = vpop.f32.mrf.mxu0  ;;  %v3020_v51 = vpop.f32.mrf.mxu1  ;;  %5244 = vmatmul.mubr.msk.bf16.gmra.mxu1 %vm1751_vm2, %v7539_v31  ;;  %v3394_v33 = vmul.f32 %v10579_v5, %v10578_v6  ;;  %v3332_v25 = vmul.f32 %v10581_v20, %v10580_v45  ;;  %v10583_v31 = vld [vmem:[#allocation313_spill] sm:$0xff] }
 0x5ba   :  { %v8470_v48 = vpack.c.bf16 %v3901_v42, %v3897_v40  ;;  %v8472_v21 = vpack.c.bf16 %v3839_v27, %v3835_v38  ;;  %v3902_v28 = vmax.f32 %v3646_v1, 0.0  ;;  %v3840_v39 = vmax.f32 %v3584_v55, 0.0  ;;  %3268 = vmatprep.mubr.bf16.mxu1 %v10204_v47  ;;  %v10584_v40 = vld [vmem:[#allocation85_spill] sm:$0xff]  ;;  %v10585_v38 = vld [vmem:[#allocation314_spill] sm:$0xff] }
 0x5bb   :  { %v3649_v61 = vadd.f32 %v3393_v37, %v2747_v8  ;;  %v3587_v49 = vadd.f32 %v3331_v63, %v3020_v51  ;;  %v2749_v58 = vpop.f32.mrf.mxu0  ;;  %v3022_v41 = vpop.f32.mrf.mxu1  ;;  %v3397_v12 = vmul.f32 %v10583_v31, %v10582_v24  ;;  %v3335_v22 = vmul.f32 %v10585_v38, %v10584_v40  ;;  %v10588_v4 = vld [vmem:[#allocation89_spill] sm:$0xff]  ;;  %v10589_v63 = vld [vmem:[#allocation316_spill] sm:$0xff]  ;;  %v10593_v31 = vld [vmem:[#allocation318_spill] sm:$0xff] }
 0x5bc   :  { %v8483_v30 = vpack.c.bf16 %v3902_v28, %v3898_v2  ;;  %v8485_v42 = vpack.c.bf16 %v3840_v39, %v3836_v59  ;;  %v3650_v27 = vadd.f32 %v3394_v33, %v2749_v58  ;;  %v3588_v1 = vadd.f32 %v3332_v25, %v3022_v41  ;;  %v10590_v33 = vld [vmem:[#allocation119_spill] sm:$0xff]  ;;  %v10591_v25 = vld [vmem:[#allocation317_spill] sm:$0xff] }
 0x5bd   :  { %v2751_v55 = vpop.f32.mrf.mxu0  ;;  %v3024_v36 = vpop.f32.mrf.mxu1  ;;  %v3398_v37 = vmul.f32 %v10587_v13, %v10586_v53  ;;  %v3336_v8 = vmul.f32 %v10589_v63, %v10588_v4  ;;  %v3905_v5 = vmax.f32 %v3649_v61, 0.0  ;;  %v3843_v45 = vmax.f32 %v3587_v49, 0.0  ;;  %v10592_v41 = vld [vmem:[#allocation91_spill] sm:$0xff] }
 0x5be   :  { %v3653_v51 = vadd.f32 %v3397_v12, %v2751_v55  ;;  %v3591_v6 = vadd.f32 %v3335_v22, %v3024_v36  ;;  %v3401_v58 = vmul.f32 %v10591_v25, %v10590_v33  ;;  %v3339_v40 = vmul.f32 %v10593_v31, %v10592_v41  ;;  %v10594_v55 = vld [vmem:[#allocation121_spill] sm:$0xff]  ;;  %v10595_v36 = vld [vmem:[#allocation319_spill] sm:$0xff] }
 0x5bf   :  { %v2753_v20 = vpop.f32.mrf.mxu0  ;;  %v3026_v24 = vpop.f32.mrf.mxu1  ;;  %v3906_v38 = vmax.f32 %v3650_v27, 0.0  ;;  %v3844_v53 = vmax.f32 %v3588_v1, 0.0  ;;  %v10596_v63 = vld [vmem:[#allocation95_spill] sm:$0xff]  ;;  %v10602_v31 = vld [vmem:[#allocation125_spill] sm:$0xff] }
 0x5c0   :  { %v3909_v2 = vmax.f32 %v3653_v51, 0.0  ;;  %v3847_v28 = vmax.f32 %v3591_v6, 0.0  ;;  %v3654_v59 = vadd.f32 %v3398_v37, %v2753_v20  ;;  %v3592_v39 = vadd.f32 %v3336_v8, %v3026_v24  ;;  %v10597_v8 = vld [vmem:[#allocation320_spill] sm:$0xff]  ;;  %v10598_v24 = vld [vmem:[#allocation123_spill] sm:$0xff] }
 0x5c1   :  { %v2757_v13 = vpop.f32.mrf.mxu0  ;;  %v3030_v4 = vpop.f32.mrf.mxu1  ;;  %5245 = vmatmul.mubr.msk.bf16.gmra.mxu1 %vm1751_vm2, %v7555_v3  ;;  %v3402_v37 = vmul.f32 %v10595_v36, %v10594_v55  ;;  %v3340_v27 = vmul.f32 %v10597_v8, %v10596_v63  ;;  %v10599_v3 = vld [vmem:[#allocation321_spill] sm:$0xff]  ;;  %v10603_v55 = vld [vmem:[#allocation323_spill] sm:$0xff] }
 0x5c2   :  { %v8497_v61 = vpack.c.bf16 %v3909_v2, %v3905_v5  ;;  %v8499_v49 = vpack.c.bf16 %v3847_v28, %v3843_v45  ;;  %v3910_v12 = vmax.f32 %v3654_v59, 0.0  ;;  %v3848_v22 = vmax.f32 %v3592_v39, 0.0  ;;  %3278 = vmatprep.mubr.bf16.mxu1 %v10204_v47  ;;  %v10600_v2 = vld [vmem:[#allocation97_spill] sm:$0xff]  ;;  %v10601_v45 = vld [vmem:[#allocation322_spill] sm:$0xff] }
 0x5c3   :  { %v3657_v1 = vadd.f32 %v3401_v58, %v2757_v13  ;;  %v3595_v51 = vadd.f32 %v3339_v40, %v3030_v4  ;;  %v2759_v6 = vpop.f32.mrf.mxu0  ;;  %v3032_v20 = vpop.f32.mrf.mxu1  ;;  %v3405_v5 = vmul.f32 %v10599_v3, %v10598_v24  ;;  %v3343_v28 = vmul.f32 %v10601_v45, %v10600_v2  ;;  %v10604_v40 = vld [vmem:[#allocation100_spill] sm:$0xff]  ;;  %v10609_v45 = vld [vmem:[#allocation326_spill] sm:$0xff] }
 0x5c4   :  { %v8510_v59 = vpack.c.bf16 %v3910_v12, %v3906_v38  ;;  %v8512_v39 = vpack.c.bf16 %v3848_v22, %v3844_v53  ;;  %v3658_v47 = vadd.f32 %v3402_v37, %v2759_v6  ;;  %v3596_v33 = vadd.f32 %v3340_v27, %v3032_v20  ;;  %v10605_v13 = vld [vmem:[#allocation324_spill] sm:$0xff]  ;;  %v10606_v37 = vld [vmem:[#allocation127_spill] sm:$0xff]  ;;  %v10607_v27 = vld [vmem:[#allocation325_spill] sm:$0xff] }
 0x5c5   :  { %v2761_v25 = vpop.f32.mrf.mxu0  ;;  %v3034_v41 = vpop.f32.mrf.mxu1  ;;  %v3406_v58 = vmul.f32 %v10603_v55, %v10602_v31  ;;  %v3344_v4 = vmul.f32 %v10605_v13, %v10604_v40  ;;  %v3913_v8 = vmax.f32 %v3657_v1, 0.0  ;;  %v3851_v24 = vmax.f32 %v3595_v51, 0.0  ;;  %v10608_v20 = vld [vmem:[#allocation102_spill] sm:$0xff]  ;;  %v10612_v13 = vld [vmem:[#allocation104_spill] sm:$0xff] }
 0x5c6   :  { %v3661_v36 = vadd.f32 %v3405_v5, %v2761_v25  ;;  %v3599_v63 = vadd.f32 %v3343_v28, %v3034_v41  ;;  %v3409_v6 = vmul.f32 %v10607_v27, %v10606_v37  ;;  %v3347_v15 = vmul.f32 %v10609_v45, %v10608_v20  ;;  %v10610_v25 = vld [vmem:[#allocation129_spill] sm:$0xff]  ;;  %v10611_v41 = vld [vmem:[#allocation327_spill] sm:$0xff] }
 0x5c7   :  { %v2763_v3 = vpop.f32.mrf.mxu0  ;;  %v3036_v2 = vpop.f32.mrf.mxu1  ;;  %v3914_v31 = vmax.f32 %v3658_v47, 0.0  ;;  %v3852_v55 = vmax.f32 %v3596_v33, 0.0  ;;  %v10615_v37 = vld [vmem:[#allocation329_spill] sm:$0xff] }
 0x5c8   :  { %v3917_v38 = vmax.f32 %v3661_v36, 0.0  ;;  %v3855_v12 = vmax.f32 %v3599_v63, 0.0  ;;  %v3662_v53 = vadd.f32 %v3406_v58, %v2763_v3  ;;  %v3600_v22 = vadd.f32 %v3344_v4, %v3036_v2  ;;  %v10613_v4 = vld [vmem:[#allocation328_spill] sm:$0xff]  ;;  %v10614_v2 = vld [vmem:[#allocation131_spill] sm:$0xff] }
 0x5c9   :  { %v2767_v32 = vpop.f32.mrf.mxu0  ;;  %v3040_v40 = vpop.f32.mrf.mxu1  ;;  %5246 = vmatmul.mubr.msk.bf16.gmra.mxu1 %vm1751_vm2, %v7571_v50  ;;  %v3410_v58 = vmul.f32 %v10611_v41, %v10610_v25  ;;  %v3348_v36 = vmul.f32 %v10613_v4, %v10612_v13  ;;  %v3413_v27 = vmul.f32 %v10615_v37, %v10614_v2  ;;  %v10616_v50 = vld [vmem:[#allocation106_spill] sm:$0xff]  ;;  %v10618_v25 = vld [vmem:[#allocation133_spill] sm:$0xff]  ;;  %v10619_v41 = vld [vmem:[#allocation331_spill] sm:$0xff] }
 0x5ca   :  { %v8524_v1 = vpack.c.bf16 %v3917_v38, %v3913_v8  ;;  %v8526_v51 = vpack.c.bf16 %v3855_v12, %v3851_v24  ;;  %v3918_v5 = vmax.f32 %v3662_v53, 0.0  ;;  %v3856_v28 = vmax.f32 %v3600_v22, 0.0  ;;  %v10617_v8 = vld [vmem:[#allocation330_spill] sm:$0xff]  ;;  %v10623_v2 = vld [vmem:[#allocation333_spill] sm:$0xff] }
 0x5cb   :  { %v3665_v63 = vadd.f32 %v3409_v6, %v2767_v32  ;;  %v3603_v47 = vadd.f32 %v3347_v15, %v3040_v40  ;;  %v2769_v33 = vpop.f32.mrf.mxu0  ;;  %v3042_v3 = vpop.f32.mrf.mxu1  ;;  %v3351_v38 = vmul.f32 %v10617_v8, %v10616_v50  ;;  %v3414_v13 = vmul.f32 %v10619_v41, %v10618_v25  ;;  %v10620_v32 = vld [vmem:[#allocation108_spill] sm:$0xff]  ;;  %v10625_v50 = vld [vmem:[#allocation334_spill] sm:$0xff] }
 0x5cc   :  { %v4116_v24 = vpack.c.bf16 %v3918_v5, %v3914_v31  ;;  %v8536_v12 = vpack.c.bf16 %v3856_v28, %v3852_v55  ;;  %v3666_v53 = vadd.f32 %v3410_v58, %v2769_v33  ;;  %v3604_v22 = vadd.f32 %v3348_v36, %v3042_v3  ;;  %v10621_v15 = vld [vmem:[#allocation332_spill] sm:$0xff] }
 0x5cd   :  { %v2771_v20 = vpop.f32.mrf.mxu0  ;;  %v3044_v45 = vpop.f32.mrf.mxu1  ;;  %v3352_v6 = vmul.f32 %v10621_v15, %v10620_v32  ;;  %v3417_v37 = vmul.f32 %v10623_v2, %v10622_v7  ;;  %v3355_v31 = vmul.f32 %v10625_v50, %v10624_v23  ;;  %v3921_v55 = vmax.f32 %v3665_v63, 0.0  ;;  %v10626_v25 = vld [vmem:[#allocation140_spill] sm:$0xff]  ;;  %v10629_v50 = vld [vmem:[#allocation143_spill] sm:$0xff] }
 0x5ce   :  { %v3669_v40 = vadd.f32 %v3413_v27, %v2771_v20  ;;  %v3607_v4 = vadd.f32 %v3351_v38, %v3044_v45  ;;  %v3859_v5 = vmax.f32 %v3603_v47, 0.0  ;;  %v3418_v41 = vmul.f32 %v7775_v57, %v10626_v25  ;;  %v10627_v32 = vld [vmem:[#allocation112_spill] sm:$0xff]  ;;  %v10628_v27 = vld [vmem:[#allocation335_spill] sm:$0xff] }
 0x5cf   :  { %v2773_v28 = vpop.f32.mrf.mxu0  ;;  %v3046_v58 = vpop.f32.mrf.mxu1  ;;  %v3356_v38 = vmul.f32 %v10628_v27, %v10627_v32  ;;  %v3922_v20 = vmax.f32 %v3666_v53, 0.0  ;;  %v3860_v45 = vmax.f32 %v3604_v22, 0.0 }
 0x5d0   :  { %v3925_v36 = vmax.f32 %v3669_v40, 0.0  ;;  %v3863_v33 = vmax.f32 %v3607_v4, 0.0  ;;  %v3670_v3 = vadd.f32 %v3414_v13, %v2773_v28  ;;  %v3608_v8 = vadd.f32 %v3352_v6, %v3046_v58  ;;  %v10630_v40 = vld [vmem:[#allocation336_spill] sm:$0xff]  ;;  %v10631_v13 = vld [vmem:[#allocation114_spill] sm:$0xff]  ;;  %v10632_v6 = vld [vmem:[#allocation337_spill] sm:$0xff] }
 0x5d1   :  { %v2777_v7 = vpop.f32.mrf.mxu0  ;;  %v3050_v15 = vpop.f32.mrf.mxu1  ;;  %v3421_v4 = vmul.f32 %v10630_v40, %v10629_v50  ;;  %v3359_v28 = vmul.f32 %v10632_v6, %v10631_v13 }
 0x5d2   :  { %v4119_v2 = vpack.c.bf16 %v3925_v36, %v3921_v55  ;;  %v8550_v23 = vpack.c.bf16 %v3863_v33, %v3859_v5  ;;  %v3926_v63 = vmax.f32 %v3670_v3, 0.0  ;;  %v3864_v47 = vmax.f32 %v3608_v8, 0.0  ;;  %v10633_v36 = vld [vmem:[#allocation145_spill] sm:$0xff]  ;;  %v10634_v33 = vld [vmem:[#allocation338_spill] sm:$0xff]  ;;  %v10635_v8 = vld [vmem:[#allocation116_spill] sm:$0xff] }
 0x5d3   :  { %v3673_v58 = vadd.f32 %v3417_v37, %v2777_v7  ;;  %v3611_v57 = vadd.f32 %v3355_v31, %v3050_v15  ;;  %v2779_v25 = vpop.f32.mrf.mxu0  ;;  %v3052_v56 = vpop.f32.mrf.mxu1  ;;  %v3422_v3 = vmul.f32 %v10634_v33, %v10633_v36  ;;  %v3360_v50 = vmul.f32 %v10636_v18, %v10635_v8  ;;  %v10637_v37 = vld [vmem:[#allocation150_spill] sm:$0xff]  ;;  %v10638_v31 = vld [vmem:[#allocation340_spill] sm:$0xff]  ;;  %v10641_v18 = vld [vmem:[#allocation153_spill] sm:$0xff] }
 0x5d4   :  { %v4120_v32 = vpack.c.bf16 %v3926_v63, %v3922_v20  ;;  %v8556_v53 = vpack.c.bf16 %v3864_v47, %v3860_v45  ;;  %v3674_v22 = vadd.f32 %v3418_v41, %v2779_v25  ;;  %v3612_v27 = vadd.f32 %v3356_v38, %v3052_v56  ;;  %v10639_v15 = vld [vmem:[#allocation118_spill] sm:$0xff]  ;;  %v10640_v20 = vld [vmem:[#allocation341_spill] sm:$0xff] }
 0x5d5   :  { %v2781_v55 = vpop.f32.mrf.mxu0  ;;  %v3054_v5 = vpop.f32.mrf.mxu1  ;;  %v3425_v7 = vmul.f32 %v10638_v31, %v10637_v37  ;;  %v3363_v45 = vmul.f32 %v10640_v20, %v10639_v15  ;;  %v3929_v63 = vmax.f32 %v3673_v58, 0.0  ;;  %v3867_v41 = vmax.f32 %v3611_v57, 0.0  ;;  %v10647_v37 = vld [vmem:[#allocation344_spill] sm:$0xff] }
 0x5d6   :  { %v3677_v40 = vadd.f32 %v3421_v4, %v2781_v55  ;;  %v3615_v0 = vadd.f32 %v3359_v28, %v3054_v5  ;;  %4217 = vmatprep.subr.bf16.mxu0 %v4120_v32  ;;  %v3426_v4 = vmul.f32 %v7797_v26, %v10641_v18  ;;  %v10642_v28 = vld [vmem:[#allocation120_spill] sm:$0xff]  ;;  %v10643_v32 = vld [vmem:[#allocation342_spill] sm:$0xff]  ;;  %v3930_v5 = vmax.f32 %v3674_v22, 0.0 }
 0x5d7   :  { %v2783_v56 = vpop.f32.mrf.mxu0  ;;  %v3056_v38 = vpop.f32.mrf.mxu1  ;;  %4218 = vmatpush2.bf16.msra.mxu0 %v4119_v2  ;;  %v3364_v55 = vmul.f32 %v10643_v32, %v10642_v28  ;;  %v3868_v36 = vmax.f32 %v3612_v27, 0.0  ;;  %v10650_v18 = vld [vmem:[#allocation124_spill] sm:$0xff] }
 0x5d8   :  { %v3933_v47 = vmax.f32 %v3677_v40, 0.0  ;;  %v3871_v13 = vmax.f32 %v3615_v0, 0.0  ;;  %v3678_v6 = vadd.f32 %v3422_v3, %v2783_v56  ;;  %v3616_v25 = vadd.f32 %v3360_v50, %v3056_v38  ;;  %4219 = vmatprep.subr.bf16.mxu0 %v4116_v24  ;;  %v10644_v0 = vld [vmem:[#allocation156_spill] sm:$0xff]  ;;  %v10645_v3 = vld [vmem:[#allocation343_spill] sm:$0xff]  ;;  %v10646_v24 = vld [vmem:[#allocation122_spill] sm:$0xff] }
 0x5d9   :  { %v2787_v33 = vpop.f32.mrf.mxu0  ;;  %v3060_v8 = vpop.f32.mrf.mxu1  ;;  %v3429_v50 = vmul.f32 %v10645_v3, %v10644_v0  ;;  %v3367_v31 = vmul.f32 %v10647_v37, %v10646_v24  ;;  %v10654_v3 = vld [vmem:[#allocation126_spill] sm:$0xff]  ;;  %v10655_v24 = vld [vmem:[#allocation348_spill] sm:$0xff] }
 0x5da   :  { %v8570_v58 = vpack.c.bf16 %v3933_v47, %v3929_v63  ;;  %v8572_v57 = vpack.c.bf16 %v3871_v13, %v3867_v41  ;;  %v3934_v2 = vmax.f32 %v3678_v6, 0.0  ;;  %v3872_v40 = vmax.f32 %v3616_v25, 0.0  ;;  %v10648_v13 = vld [vmem:[#allocation159_spill] sm:$0xff]  ;;  %v10649_v6 = vld [vmem:[#allocation345_spill] sm:$0xff] }
 0x5db   :  { %v3681_v26 = vadd.f32 %v3425_v7, %v2787_v33  ;;  %v3619_v15 = vadd.f32 %v3363_v45, %v3060_v8  ;;  %v2789_v20 = vpop.f32.mrf.mxu0  ;;  %v3062_v56 = vpop.f32.mrf.mxu1  ;;  %4220 = vmatpush2.bf16.msra.mxu0 %v8524_v1  ;;  %v3430_v25 = vmul.f32 %v10649_v6, %v10648_v13  ;;  %v10651_v7 = vld [vmem:[#allocation346_spill] sm:$0xff]  ;;  %v3371_v37 = vmul.f32 %v10655_v24, %v10654_v3  ;;  %v10658_v6 = vld [vmem:[#allocation349_spill] sm:$0xff] }
 0x5dc   :  { %v8579_v22 = vpack.c.bf16 %v3934_v2, %v3930_v5  ;;  %v8581_v27 = vpack.c.bf16 %v3872_v40, %v3868_v36  ;;  %v3682_v63 = vadd.f32 %v3426_v4, %v2789_v20  ;;  %v3620_v41 = vadd.f32 %v3364_v55, %v3062_v56  ;;  %4221 = vmatprep.subr.bf16.mxu0 %v8510_v59  ;;  %v10652_v2 = vld [vmem:[#allocation162_spill] sm:$0xff]  ;;  %v10653_v40 = vld [vmem:[#allocation347_spill] sm:$0xff]  ;;  %v10666_v3 = vld [vmem:[#allocation353_spill] sm:$0xff] }
 0x5dd   :  { %v2791_v38 = vpop.f32.mrf.mxu0  ;;  %v3064_v47 = vpop.f32.mrf.mxu1  ;;  %v3368_v45 = vmul.f32 %v10651_v7, %v10650_v18  ;;  %v3937_v33 = vmax.f32 %v3681_v26, 0.0  ;;  %v3875_v1 = vmax.f32 %v3619_v15, 0.0  ;;  %v3433_v0 = vmul.f32 %v10653_v40, %v10652_v2  ;;  %v10663_v2 = vld [vmem:[#allocation171_spill] sm:$0xff]  ;;  %v10664_v40 = vld [vmem:[#allocation352_spill] sm:$0xff] }
 0x5de   :  { %v3685_v28 = vadd.f32 %v3429_v50, %v2791_v38  ;;  %v3623_v32 = vadd.f32 %v3367_v31, %v3064_v47  ;;  %v3938_v50 = vmax.f32 %v3682_v63, 0.0  ;;  %v3876_v31 = vmax.f32 %v3620_v41, 0.0  ;;  %v10656_v47 = vld [vmem:[#allocation165_spill] sm:$0xff]  ;;  %v10659_v63 = vld [vmem:[#allocation168_spill] sm:$0xff]  ;;  %v10660_v41 = vld [vmem:[#allocation350_spill] sm:$0xff] }
 0x5df   :  { %v2793_v5 = vpop.f32.mrf.mxu0  ;;  %v3066_v8 = vpop.f32.mrf.mxu1  ;;  %4222 = vmatpush2.bf16.msra.mxu0 %v8497_v61  ;;  %v3434_v13 = vmul.f32 %v7819_v43, %v10656_v47 }
 0x5e0   :  { %v3941_v4 = vmax.f32 %v3685_v28, 0.0  ;;  %v3879_v55 = vmax.f32 %v3623_v32, 0.0  ;;  %v3686_v36 = vadd.f32 %v3430_v25, %v2793_v5  ;;  %v3624_v59 = vadd.f32 %v3368_v45, %v3066_v8  ;;  %4223 = vmatprep.subr.bf16.mxu0 %v8483_v30  ;;  %v10657_v30 = vld [vmem:[#allocation128_spill] sm:$0xff] }
 0x5e1   :  { %v2797_v26 = vpop.f32.mrf.mxu0  ;;  %v3070_v15 = vpop.f32.mrf.mxu1  ;;  %v3372_v25 = vmul.f32 %v10658_v6, %v10657_v30  ;;  %v3437_v32 = vmul.f32 %v10660_v41, %v10659_v63  ;;  %v10667_v30 = vld [vmem:[#allocation174_spill] sm:$0xff] }
 0x5e2   :  { %v8594_v20 = vpack.c.bf16 %v3941_v4, %v3937_v33  ;;  %v8596_v56 = vpack.c.bf16 %v3879_v55, %v3875_v1  ;;  %v3942_v61 = vmax.f32 %v3686_v36, 0.0  ;;  %v3880_v38 = vmax.f32 %v3624_v59, 0.0  ;;  %v10661_v33 = vld [vmem:[#allocation130_spill] sm:$0xff]  ;;  %v10662_v1 = vld [vmem:[#allocation351_spill] sm:$0xff] }
 0x5e3   :  { %v3689_v18 = vadd.f32 %v3433_v0, %v2797_v26  ;;  %v3627_v7 = vadd.f32 %v3371_v37, %v3070_v15  ;;  %v2799_v45 = vpop.f32.mrf.mxu0  ;;  %v3072_v28 = vpop.f32.mrf.mxu1  ;;  %4224 = vmatpush2.bf16.msra.mxu0 %v8470_v48  ;;  %v3375_v5 = vmul.f32 %v10662_v1, %v10661_v33  ;;  %v3438_v0 = vmul.f32 %v10664_v40, %v10663_v2  ;;  %v10665_v48 = vld [vmem:[#allocation132_spill] sm:$0xff]  ;;  %v10668_v6 = vld [vmem:[#allocation354_spill] sm:$0xff] }
 0x5e4   :  { %v8607_v8 = vpack.c.bf16 %v3942_v61, %v3938_v50  ;;  %v8609_v4 = vpack.c.bf16 %v3880_v38, %v3876_v31  ;;  %4225 = vmatprep.subr.bf16.mxu0 %v8455_v46  ;;  %v3690_v43 = vadd.f32 %v3434_v13, %v2799_v45  ;;  %v3628_v55 = vadd.f32 %v3372_v25, %v3072_v28  ;;  %v10669_v45 = vld [vmem:[#allocation135_spill] sm:$0xff]  ;;  %v10673_v2 = vld [vmem:[#allocation356_spill] sm:$0xff] }
 0x5e5   :  { %v2801_v36 = vpop.f32.mrf.mxu0  ;;  %v3074_v59 = vpop.f32.mrf.mxu1  ;;  %v3376_v24 = vmul.f32 %v10666_v3, %v10665_v48  ;;  %v3945_v15 = vmax.f32 %v3689_v18, 0.0  ;;  %v3883_v47 = vmax.f32 %v3627_v7, 0.0  ;;  %v3441_v25 = vmul.f32 %v10668_v6, %v10667_v30  ;;  %v10670_v28 = vld [vmem:[#allocation355_spill] sm:$0xff] }
 0x5e6   :  { %v3693_v37 = vadd.f32 %v3437_v32, %v2801_v36  ;;  %v3631_v26 = vadd.f32 %v3375_v5, %v3074_v59  ;;  %v3379_v63 = vmul.f32 %v10670_v28, %v10669_v45  ;;  %v3946_v41 = vmax.f32 %v3690_v43, 0.0  ;;  %v10671_v36 = vld [vmem:[#allocation177_spill] sm:$0xff]  ;;  %v10674_v43 = vld [vmem:[#allocation180_spill] sm:$0xff]  ;;  %v10679_v30 = vld [vmem:[#allocation359_spill] sm:$0xff] }
 0x5e7   :  { %v2803_v50 = vpop.f32.mrf.mxu0  ;;  %v3076_v61 = vpop.f32.mrf.mxu1  ;;  %4226 = vmatpush2.bf16.msra.mxu0 %v8444_v10  ;;  %v3884_v32 = vmax.f32 %v3628_v55, 0.0  ;;  %v3442_v59 = vmul.f32 %v7841_v16, %v10671_v36  ;;  %v10675_v55 = vld [vmem:[#allocation357_spill] sm:$0xff] }
 0x5e8   :  { %v3949_v31 = vmax.f32 %v3693_v37, 0.0  ;;  %v3887_v46 = vmax.f32 %v3631_v26, 0.0  ;;  %v3694_v38 = vadd.f32 %v3438_v0, %v2803_v50  ;;  %v3632_v13 = vadd.f32 %v3376_v24, %v3076_v61  ;;  %4227 = vmatprep.subr.bf16.mxu0 %v8424_v54  ;;  %v10672_v54 = vld [vmem:[#allocation139_spill] sm:$0xff]  ;;  %v10676_v26 = vld [vmem:[#allocation141_spill] sm:$0xff] }
 0x5e9   :  { %v2807_v18 = vpop.f32.mrf.mxu0  ;;  %v3080_v7 = vpop.f32.mrf.mxu1  ;;  %v3380_v40 = vmul.f32 %v10673_v2, %v10672_v54  ;;  %v3445_v37 = vmul.f32 %v10675_v55, %v10674_v43 }
 0x5ea   :  { %v8622_v33 = vpack.c.bf16 %v3949_v31, %v3945_v15  ;;  %v8624_v1 = vpack.c.bf16 %v3887_v46, %v3883_v47  ;;  %v3950_v10 = vmax.f32 %v3694_v38, 0.0  ;;  %v3888_v5 = vmax.f32 %v3632_v13, 0.0  ;;  %v10677_v15 = vld [vmem:[#allocation358_spill] sm:$0xff]  ;;  %v10678_v13 = vld [vmem:[#allocation183_spill] sm:$0xff] }
 0x5eb   :  { %v3697_v0 = vadd.f32 %v3441_v25, %v2807_v18  ;;  %v3635_v48 = vadd.f32 %v3379_v63, %v3080_v7  ;;  %v2809_v3 = vpop.f32.mrf.mxu0  ;;  %v3082_v24 = vpop.f32.mrf.mxu1  ;;  %4228 = vmatpush2.bf16.msra.mxu0 %v8413_v9  ;;  %v3383_v47 = vmul.f32 %v10677_v15, %v10676_v26  ;;  %v3446_v6 = vmul.f32 %v10679_v30, %v10678_v13  ;;  %v10680_v9 = vld [vmem:[#allocation144_spill] sm:$0xff]  ;;  %v10682_v18 = vld [vmem:[#allocation186_spill] sm:$0xff]  ;;  %v10683_v7 = vld [vmem:[#allocation361_spill] sm:$0xff] }
 0x5ec   :  { %v8635_v50 = vpack.c.bf16 %v3950_v10, %v3946_v41  ;;  %v8637_v61 = vpack.c.bf16 %v3888_v5, %v3884_v32  ;;  %4229 = vmatprep.subr.bf16.mxu0 %v8393_v60  ;;  %v3698_v16 = vadd.f32 %v3442_v59, %v2809_v3  ;;  %v3636_v31 = vadd.f32 %v3380_v40, %v3082_v24  ;;  %v10681_v25 = vld [vmem:[#allocation360_spill] sm:$0xff]  ;;  %v10684_v40 = vld [vmem:[#allocation147_spill] sm:$0xff]  ;;  %v10685_v3 = vld [vmem:[#allocation362_spill] sm:$0xff] }
 0x5ed   :  { %v2811_v46 = vpop.f32.mrf.mxu0  ;;  %v3084_v38 = vpop.f32.mrf.mxu1  ;;  %v3384_v45 = vmul.f32 %v10681_v25, %v10680_v9  ;;  %v3449_v41 = vmul.f32 %v10683_v7, %v10682_v18  ;;  %v3953_v10 = vmax.f32 %v3697_v0, 0.0  ;;  %v3891_v32 = vmax.f32 %v3635_v48, 0.0  ;;  %v5511_v0 = vld [vmem:[%s9380_s3] sm:$0xff]  ;;  %v10687_v13 = vld [vmem:[#allocation152_spill] sm:$0xff] }
 0x5ee   :  { %v3701_v28 = vadd.f32 %v3445_v37, %v2811_v46  ;;  %v3639_v63 = vadd.f32 %v3383_v47, %v3084_v38  ;;  %v3387_v24 = vmul.f32 %v10685_v3, %v10684_v40  ;;  %v3954_v43 = vmax.f32 %v3698_v16, 0.0  ;;  %v10688_v16 = vld [vmem:[#allocation363_spill] sm:$0xff]  ;;  %v10691_v7 = vld [vmem:[#allocation154_spill] sm:$0xff] }
 0x5ef   :  { %v2813_v5 = vpop.f32.mrf.mxu0  ;;  %v3086_v36 = vpop.f32.mrf.mxu1  ;;  %4230 = vmatpush2.bf16.msra.mxu0 %v8382_v44  ;;  %v3892_v55 = vmax.f32 %v3636_v31, 0.0  ;;  %v8653_v48 = vcombine.low %v5511_v0, %v5511_v0  ;;  %v3388_v31 = vmul.f32 %v10688_v16, %v10687_v13  ;;  %v10695_v3 = vld [vmem:[#allocation158_spill] sm:$0xff] }
 0x5f0   :  { %v3957_v60 = vmax.f32 %v3701_v28, 0.0  ;;  %v3895_v59 = vmax.f32 %v3639_v63, 0.0  ;;  %v3702_v54 = vadd.f32 %v3446_v6, %v2813_v5  ;;  %v3640_v2 = vadd.f32 %v3384_v45, %v3086_v36  ;;  %4231 = vmatprep.subr.bf16.mxu0 %v8362_v19  ;;  %v10686_v19 = vld [vmem:[#allocation189_spill] sm:$0xff]  ;;  %v4058_v45 = vld [vmem:[%s9380_s3 + $0x8] sm:$0xff]  ;;  %v10689_v28 = vld [vmem:[#allocation192_spill] sm:$0xff] }
 0x5f1   :  { %v2817_v37 = vpop.f32.mrf.mxu0  ;;  %v3090_v26 = vpop.f32.mrf.mxu1  ;;  %v3450_v38 = vmul.f32 %v7863_v52, %v10686_v19  ;;  %v10690_v63 = vld [vmem:[#allocation364_spill] sm:$0xff]  ;;  %v10697_v16 = vld [vmem:[#allocation198_spill] sm:$0xff] }
 0x5f2   :  { %v8655_v44 = vpack.c.bf16 %v3957_v60, %v3953_v10  ;;  %v8657_v15 = vpack.c.bf16 %v3895_v59, %v3891_v32  ;;  %v3958_v47 = vmax.f32 %v3702_v54, 0.0  ;;  %v3896_v46 = vmax.f32 %v3640_v2, 0.0  ;;  %v10692_v10 = vld [vmem:[#allocation365_spill] sm:$0xff]  ;;  %v10693_v54 = vld [vmem:[#allocation195_spill] sm:$0xff]  ;;  %v10694_v2 = vld [vmem:[#allocation366_spill] sm:$0xff] }
 0x5f3   :  { %v3705_v30 = vadd.f32 %v3449_v41, %v2817_v37  ;;  %v3643_v6 = vadd.f32 %v3387_v24, %v3090_v26  ;;  %v2819_v9 = vpop.f32.mrf.mxu0  ;;  %v3092_v25 = vpop.f32.mrf.mxu1  ;;  %4232 = vmatpush2.bf16.msra.mxu0 %v8353_v29  ;;  %v3453_v18 = vmul.f32 %v10690_v63, %v10689_v28  ;;  %v3391_v32 = vmul.f32 %v10692_v10, %v10691_v7  ;;  %v10696_v24 = vld [vmem:[#allocation367_spill] sm:$0xff] }
 0x5f4   :  { %v8671_v52 = vpack.c.bf16 %v3958_v47, %v3954_v43  ;;  %v8673_v5 = vpack.c.bf16 %v3896_v46, %v3892_v55  ;;  %4283 = vmatprep.subr.bf16.mxu0 %v8556_v53  ;;  %v3706_v41 = vadd.f32 %v3450_v38, %v2819_v9  ;;  %v3644_v36 = vadd.f32 %v3388_v31, %v3092_v25  ;;  %v10698_v31 = vld [vmem:[#allocation368_spill] sm:$0xff] }
 0x5f5   :  { %v2821_v60 = vpop.f32.mrf.mxu0  ;;  %v3094_v29 = vpop.f32.mrf.mxu1  ;;  %v8676_v59 = vcombine.high %v4058_v45, %v4058_v45  ;;  %v3454_v40 = vmul.f32 %v10694_v2, %v10693_v54  ;;  %v3392_v37 = vmul.f32 %v10696_v24, %v10695_v3  ;;  %v3961_v43 = vmax.f32 %v3705_v30, 0.0  ;;  %v10699_v25 = vld [vmem:[#allocation160_spill] sm:$0xff]  ;;  %v10700_v30 = vld [vmem:[#allocation369_spill] sm:$0xff] }
 0x5f6   :  { %v3709_v26 = vadd.f32 %v3453_v18, %v2821_v60  ;;  %v3647_v0 = vadd.f32 %v3391_v32, %v3094_v29  ;;  %4234 = vmatmul.mubr.bf16.vlgmr.msra.gmra.mxu0 %v8653_v48  ;;  %v3899_v55 = vmax.f32 %v3643_v6, 0.0  ;;  %v3457_v9 = vmul.f32 %v10698_v31, %v10697_v16  ;;  %v10701_v60 = vld [vmem:[#allocation201_spill] sm:$0xff]  ;;  %v10703_v29 = vld [vmem:[#allocation370_spill] sm:$0xff] }
 0x5f7   :  { %v2823_v47 = vpop.f32.mrf.mxu0  ;;  %v3096_v53 = vpop.f32.mrf.mxu1  ;;  %4284 = vmatpush1.bf16.msra.mxu0 %v8550_v23  ;;  %4274 = vmatprep.mubr.bf16.mxu1 %v8676_v59  ;;  %v3395_v6 = vmul.f32 %v10700_v30, %v10699_v25  ;;  %v3962_v45 = vmax.f32 %v3706_v41, 0.0  ;;  %v3900_v28 = vmax.f32 %v3644_v36, 0.0  ;;  %v10704_v41 = vld [vmem:[#allocation204_spill] sm:$0xff]  ;;  %v10705_v36 = vld [vmem:[#allocation371_spill] sm:$0xff]  ;;  %v10711_v31 = vld [vmem:[#allocation374_spill] sm:$0xff] }
 0x5f8   :  { %v3965_v46 = vmax.f32 %v3709_v26, 0.0  ;;  %v3903_v19 = vmax.f32 %v3647_v0, 0.0  ;;  %v3710_v38 = vadd.f32 %v3454_v40, %v2823_v47  ;;  %v3648_v13 = vadd.f32 %v3392_v37, %v3096_v53  ;;  %4285 = vmatprep.subr.bf16.mxu0 %v8536_v12  ;;  %4315 = vmatprep.mubr.bf16.mxu0 %v8296_v35  ;;  %v10702_v35 = vld [vmem:[#allocation164_spill] sm:$0xff]  ;;  %v10706_v26 = vld [vmem:[#allocation166_spill] sm:$0xff] }
 0x5f9   :  { %v2827_v63 = vpop.f32.mrf.mxu0  ;;  %v3100_v23 = vpop.f32.mrf.mxu1  ;;  %v3458_v12 = vmul.f32 %v7885_v62, %v10701_v60  ;;  %v3396_v54 = vmul.f32 %v10703_v29, %v10702_v35  ;;  %v3461_v37 = vmul.f32 %v10705_v36, %v10704_v41  ;;  %v10707_v0 = vld [vmem:[#allocation372_spill] sm:$0xff]  ;;  %v10712_v60 = vld [vmem:[#allocation210_spill] sm:$0xff] }
 0x5fa   :  { %v8691_v18 = vpack.c.bf16 %v3965_v46, %v3961_v43  ;;  %v8693_v7 = vpack.c.bf16 %v3903_v19, %v3899_v55  ;;  %v3966_v10 = vmax.f32 %v3710_v38, 0.0  ;;  %v3904_v32 = vmax.f32 %v3648_v13, 0.0  ;;  %v10708_v38 = vld [vmem:[#allocation207_spill] sm:$0xff]  ;;  %v10709_v13 = vld [vmem:[#allocation373_spill] sm:$0xff]  ;;  %v10714_v29 = vld [vmem:[#allocation172_spill] sm:$0xff] }
 0x5fb   :  { %v3713_v2 = vadd.f32 %v3457_v9, %v2827_v63  ;;  %v3651_v40 = vadd.f32 %v3395_v6, %v3100_v23  ;;  %v2829_v3 = vpop.f32.mrf.mxu0  ;;  %v3102_v24 = vpop.f32.mrf.mxu1  ;;  %4286 = vmatpush1.bf16.msra.mxu0 %v8526_v51  ;;  %v3399_v43 = vmul.f32 %v10707_v0, %v10706_v26  ;;  %v3462_v16 = vmul.f32 %v10709_v13, %v10708_v38  ;;  %v10710_v51 = vld [vmem:[#allocation170_spill] sm:$0xff]  ;;  %v10716_v0 = vld [vmem:[#allocation213_spill] sm:$0xff] }
 0x5fc   :  { %v8704_v55 = vpack.c.bf16 %v3966_v10, %v3962_v45  ;;  %v8706_v47 = vpack.c.bf16 %v3904_v32, %v3900_v28  ;;  %4287 = vmatprep.subr.bf16.mxu0 %v8512_v39  ;;  %v3714_v62 = vadd.f32 %v3458_v12, %v2829_v3  ;;  %v3652_v53 = vadd.f32 %v3396_v54, %v3102_v24  ;;  %v10713_v12 = vld [vmem:[#allocation375_spill] sm:$0xff]  ;;  %v10715_v54 = vld [vmem:[#allocation376_spill] sm:$0xff] }
 0x5fd   :  { %v2831_v46 = vpop.f32.mrf.mxu0  ;;  %v3104_v19 = vpop.f32.mrf.mxu1  ;;  %v3400_v9 = vmul.f32 %v10711_v31, %v10710_v51  ;;  %v3969_v6 = vmax.f32 %v3713_v2, 0.0  ;;  %v3907_v63 = vmax.f32 %v3651_v40, 0.0  ;;  %v3465_v35 = vmul.f32 %v10713_v12, %v10712_v60  ;;  %v10726_v60 = vld [vmem:[#allocation381_spill] sm:$0xff] }
 0x5fe   :  { %v3717_v25 = vadd.f32 %v3461_v37, %v2831_v46  ;;  %v3655_v30 = vadd.f32 %v3399_v43, %v3104_v19  ;;  %v3403_v3 = vmul.f32 %v10715_v54, %v10714_v29  ;;  %v3970_v24 = vmax.f32 %v3714_v62, 0.0  ;;  %v10718_v46 = vld [vmem:[#allocation377_spill] sm:$0xff]  ;;  %v10719_v62 = vld [vmem:[#allocation216_spill] sm:$0xff] }
 0x5ff   :  { %v2833_v45 = vpop.f32.mrf.mxu0  ;;  %v3106_v23 = vpop.f32.mrf.mxu1  ;;  %4288 = vmatpush1.bf16.msra.mxu0 %v8499_v49  ;;  %v3908_v41 = vmax.f32 %v3652_v53, 0.0  ;;  %v3466_v43 = vmul.f32 %v7907_v34, %v10716_v0  ;;  %v10720_v53 = vld [vmem:[#allocation378_spill] sm:$0xff] }
 0x600   :  { %v3973_v28 = vmax.f32 %v3717_v25, 0.0  ;;  %v3911_v39 = vmax.f32 %v3655_v30, 0.0  ;;  %v3718_v10 = vadd.f32 %v3462_v16, %v2833_v45  ;;  %v3656_v32 = vadd.f32 %v3400_v9, %v3106_v23  ;;  %4289 = vmatprep.subr.bf16.mxu0 %v8485_v42  ;;  %v10717_v42 = vld [vmem:[#allocation176_spill] sm:$0xff]  ;;  %v10721_v9 = vld [vmem:[#allocation178_spill] sm:$0xff]  ;;  %v10722_v25 = vld [vmem:[#allocation379_spill] sm:$0xff] }
 0x601   :  { %v2837_v2 = vpop.f32.mrf.mxu0  ;;  %v3110_v40 = vpop.f32.mrf.mxu1  ;;  %v3404_v19 = vmul.f32 %v10718_v46, %v10717_v42  ;;  %v3469_v31 = vmul.f32 %v10720_v53, %v10719_v62  ;;  %v3407_v30 = vmul.f32 %v10722_v25, %v10721_v9  ;;  %v10728_v0 = vld [vmem:[#allocation382_spill] sm:$0xff]  ;;  %v10729_v42 = vld [vmem:[#allocation184_spill] sm:$0xff]  ;;  %v10730_v46 = vld [vmem:[#allocation383_spill] sm:$0xff] }
 0x602   :  { %v8719_v36 = vpack.c.bf16 %v3973_v28, %v3969_v6  ;;  %v8721_v37 = vpack.c.bf16 %v3911_v39, %v3907_v63  ;;  %v3974_v49 = vmax.f32 %v3718_v10, 0.0  ;;  %v3912_v26 = vmax.f32 %v3656_v32, 0.0  ;;  %v10723_v39 = vld [vmem:[#allocation219_spill] sm:$0xff]  ;;  %v10724_v10 = vld [vmem:[#allocation380_spill] sm:$0xff] }
 0x603   :  { %v3721_v38 = vadd.f32 %v3465_v35, %v2837_v2  ;;  %v3659_v13 = vadd.f32 %v3403_v3, %v3110_v40  ;;  %v2839_v16 = vpop.f32.mrf.mxu0  ;;  %v3112_v51 = vpop.f32.mrf.mxu1  ;;  %4290 = vmatpush1.bf16.msra.mxu0 %v8472_v21  ;;  %v3470_v32 = vmul.f32 %v10724_v10, %v10723_v39  ;;  %v10725_v21 = vld [vmem:[#allocation182_spill] sm:$0xff]  ;;  %v10731_v9 = vld [vmem:[#allocation224_spill] sm:$0xff] }
 0x604   :  { %v8732_v6 = vpack.c.bf16 %v3974_v49, %v3970_v24  ;;  %v8734_v63 = vpack.c.bf16 %v3912_v26, %v3908_v41  ;;  %4291 = vmatprep.subr.bf16.mxu0 %v8458_v14  ;;  %v3722_v34 = vadd.f32 %v3466_v43, %v2839_v16  ;;  %v3660_v45 = vadd.f32 %v3404_v19, %v3112_v51  ;;  %v10727_v26 = vld [vmem:[#allocation221_spill] sm:$0xff]  ;;  %v10732_v25 = vld [vmem:[#allocation384_spill] sm:$0xff] }
 0x605   :  { %v2841_v23 = vpop.f32.mrf.mxu0  ;;  %v3114_v28 = vpop.f32.mrf.mxu1  ;;  %v3408_v12 = vmul.f32 %v10726_v60, %v10725_v21  ;;  %v3977_v54 = vmax.f32 %v3721_v38, 0.0  ;;  %v3915_v3 = vmax.f32 %v3659_v13, 0.0  ;;  %v3473_v43 = vmul.f32 %v10728_v0, %v10727_v26  ;;  %v10737_v60 = vld [vmem:[#allocation386_spill] sm:$0xff]  ;;  %v10741_v26 = vld [vmem:[#allocation229_spill] sm:$0xff]  ;;  %v10742_v0 = vld [vmem:[#allocation388_spill] sm:$0xff] }
 0x606   :  { %v3725_v35 = vadd.f32 %v3469_v31, %v2841_v23  ;;  %v3663_v29 = vadd.f32 %v3407_v30, %v3114_v28  ;;  %v3411_v19 = vmul.f32 %v10730_v46, %v10729_v42  ;;  %v3978_v16 = vmax.f32 %v3722_v34, 0.0  ;;  %v10734_v23 = vld [vmem:[#allocation385_spill] sm:$0xff]  ;;  %v10735_v34 = vld [vmem:[#allocation51_spill] sm:$0xff]  ;;  %v10743_v42 = vld [vmem:[#allocation194_spill] sm:$0xff] }
 0x607   :  { %v2843_v24 = vpop.f32.mrf.mxu0  ;;  %v3116_v2 = vpop.f32.mrf.mxu1  ;;  %4292 = vmatpush1.bf16.msra.mxu0 %v8446_v17  ;;  %v3916_v51 = vmax.f32 %v3660_v45, 0.0  ;;  %v3474_v30 = vmul.f32 %v10732_v25, %v10731_v9  ;;  %v10736_v45 = vld [vmem:[#allocation227_spill] sm:$0xff]  ;;  %v10744_v46 = vld [vmem:[#allocation389_spill] sm:$0xff]  ;;  %v10746_v25 = vld [vmem:[#allocation390_spill] sm:$0xff] }
 0x608   :  { %v3981_v41 = vmax.f32 %v3725_v35, 0.0  ;;  %v3919_v14 = vmax.f32 %v3663_v29, 0.0  ;;  %v3726_v40 = vadd.f32 %v3470_v32, %v2843_v24  ;;  %v3664_v49 = vadd.f32 %v3408_v12, %v3116_v2  ;;  %4293 = vmatprep.subr.bf16.mxu0 %v8427_v11  ;;  %v10733_v11 = vld [vmem:[#allocation188_spill] sm:$0xff]  ;;  %v10738_v35 = vld [vmem:[#allocation190_spill] sm:$0xff]  ;;  %v10739_v29 = vld [vmem:[#allocation387_spill] sm:$0xff] }
 0x609   :  { %v2847_v38 = vpop.f32.mrf.mxu0  ;;  %v3120_v13 = vpop.f32.mrf.mxu1  ;;  %v3412_v28 = vmul.f32 %v10734_v23, %v10733_v11  ;;  %v3477_v12 = vmul.f32 %v10737_v60, %v10736_v45  ;;  %v10740_v2 = vld [vmem:[#allocation215_spill] sm:$0xff]  ;;  %v10745_v9 = vld [vmem:[#allocation233_spill] sm:$0xff] }
 0x60a   :  { %v8747_v62 = vpack.c.bf16 %v3981_v41, %v3977_v54  ;;  %v8749_v53 = vpack.c.bf16 %v3919_v14, %v3915_v3  ;;  %v3982_v17 = vmax.f32 %v3726_v40, 0.0  ;;  %v3920_v31 = vmax.f32 %v3664_v49, 0.0 }
 0x60b   :  { %v3729_v39 = vadd.f32 %v3473_v43, %v2847_v38  ;;  %v3667_v10 = vadd.f32 %v3411_v19, %v3120_v13  ;;  %v2849_v32 = vpop.f32.mrf.mxu0  ;;  %v3122_v21 = vpop.f32.mrf.mxu1  ;;  %4294 = vmatpush1.bf16.msra.mxu0 %v10735_v34  ;;  %v3415_v54 = vmul.f32 %v10739_v29, %v10738_v35  ;;  %v3478_v43 = vmul.f32 %v10742_v0, %v10741_v26  ;;  %v10750_v35 = vld [vmem:[#allocation211_spill] sm:$0xff]  ;;  %v10752_v29 = vld [vmem:[#allocation392_spill] sm:$0xff] }
 0x60c   :  { %v8760_v3 = vpack.c.bf16 %v3982_v17, %v3978_v16  ;;  %v8762_v24 = vpack.c.bf16 %v3920_v31, %v3916_v51  ;;  %4295 = vmatprep.subr.bf16.mxu0 %v10740_v2  ;;  %v3730_v41 = vadd.f32 %v3474_v30, %v2849_v32  ;;  %v3668_v14 = vadd.f32 %v3412_v28, %v3122_v21  ;;  %v10747_v17 = vld [vmem:[#allocation196_spill] sm:$0xff]  ;;  %v10748_v51 = vld [vmem:[#allocation391_spill] sm:$0xff] }
 0x60d   :  { %v2851_v40 = vpop.f32.mrf.mxu0  ;;  %v3124_v49 = vpop.f32.mrf.mxu1  ;;  %v3416_v19 = vmul.f32 %v10744_v46, %v10743_v42  ;;  %v3481_v16 = vmul.f32 %v10746_v25, %v10745_v9  ;;  %v3419_v31 = vmul.f32 %v10748_v51, %v10747_v17  ;;  %v3985_v11 = vmax.f32 %v3729_v39, 0.0  ;;  %v10749_v32 = vld [vmem:[#allocation47_spill] sm:$0xff]  ;;  %v10753_v2 = vld [vmem:[#allocation200_spill] sm:$0xff] }
 0x60e   :  { %v3733_v38 = vadd.f32 %v3477_v12, %v2851_v40  ;;  %v3671_v13 = vadd.f32 %v3415_v54, %v3124_v49  ;;  %v3923_v23 = vmax.f32 %v3667_v10, 0.0  ;;  %v10751_v12 = vld [vmem:[#allocation236_spill] sm:$0xff]  ;;  %v10754_v40 = vld [vmem:[#allocation393_spill] sm:$0xff]  ;;  %v3986_v26 = vmax.f32 %v3730_v41, 0.0  ;;  %v10758_v17 = vld [vmem:[#allocation395_spill] sm:$0xff] }
 0x60f   :  { %v2853_v30 = vpop.f32.mrf.mxu0  ;;  %v3126_v28 = vpop.f32.mrf.mxu1  ;;  %4296 = vmatpush1.bf16.msra.mxu0 %v10749_v32  ;;  %v3482_v54 = vmul.f32 %v10752_v29, %v10751_v12  ;;  %v3420_v49 = vmul.f32 %v10754_v40, %v10753_v2  ;;  %v3924_v0 = vmax.f32 %v3668_v14, 0.0  ;;  %v10759_v12 = vld [vmem:[#allocation45_spill] sm:$0xff] }
 0x610   :  { %v3989_v21 = vmax.f32 %v3733_v38, 0.0  ;;  %v3927_v34 = vmax.f32 %v3671_v13, 0.0  ;;  %v3734_v45 = vadd.f32 %v3478_v43, %v2853_v30  ;;  %v3672_v60 = vadd.f32 %v3416_v19, %v3126_v28  ;;  %4297 = vmatprep.subr.bf16.mxu0 %v10750_v35  ;;  %v10755_v38 = vld [vmem:[#allocation240_spill] sm:$0xff]  ;;  %v10756_v13 = vld [vmem:[#allocation394_spill] sm:$0xff] }
 0x611   :  { %v2857_v39 = vpop.f32.mrf.mxu0  ;;  %v3130_v10 = vpop.f32.mrf.mxu1  ;;  %v3485_v43 = vmul.f32 %v10756_v13, %v10755_v38  ;;  %v10757_v19 = vld [vmem:[#allocation202_spill] sm:$0xff]  ;;  %v10764_v13 = vld [vmem:[#allocation248_spill] sm:$0xff] }
 0x612   :  { %v4151_v42 = vpack.c.bf16 %v3989_v21, %v3985_v11  ;;  %v4121_v46 = vpack.c.bf16 %v3927_v34, %v3923_v23  ;;  %v3990_v9 = vmax.f32 %v3734_v45, 0.0  ;;  %v3928_v25 = vmax.f32 %v3672_v60, 0.0  ;;  %v10760_v11 = vld [vmem:[#allocation244_spill] sm:$0xff]  ;;  %v10762_v34 = vld [vmem:[#allocation206_spill] sm:$0xff]  ;;  %v10763_v45 = vld [vmem:[#allocation397_spill] sm:$0xff] }
 0x613   :  { %v3423_v51 = vmul.f32 %v10758_v17, %v10757_v19  ;;  %v3737_v30 = vadd.f32 %v3481_v16, %v2857_v39  ;;  %v3675_v28 = vadd.f32 %v3419_v31, %v3130_v10  ;;  %v2859_v32 = vpop.f32.mrf.mxu0  ;;  %v3132_v35 = vpop.f32.mrf.mxu1  ;;  %4298 = vmatpush1.bf16.msra.mxu0 %v10759_v12  ;;  %v10761_v23 = vld [vmem:[#allocation396_spill] sm:$0xff]  ;;  %v3424_v60 = vmul.f32 %v10763_v45, %v10762_v34  ;;  %v10765_v19 = vld [vmem:[#allocation398_spill] sm:$0xff] }
 0x614   :  { %v4152_v41 = vpack.c.bf16 %v3990_v9, %v3986_v26  ;;  %v4122_v14 = vpack.c.bf16 %v3928_v25, %v3924_v0  ;;  %v3738_v29 = vadd.f32 %v3482_v54, %v2859_v32  ;;  %v3676_v2 = vadd.f32 %v3420_v49, %v3132_v35  ;;  %v10766_v10 = vld [vmem:[#allocation208_spill] sm:$0xff]  ;;  %v10767_v26 = vld [vmem:[#allocation399_spill] sm:$0xff]  ;;  %v10773_v45 = vld [vmem:[#allocation402_spill] sm:$0xff] }
 0x615   :  { %v3486_v21 = vmul.f32 %v10761_v23, %v10760_v11  ;;  %v2861_v40 = vpop.f32.mrf.mxu0  ;;  %v3134_v38 = vpop.f32.mrf.mxu1  ;;  %v3489_v16 = vmul.f32 %v10765_v19, %v10764_v13  ;;  %v3427_v0 = vmul.f32 %v10767_v26, %v10766_v10  ;;  %v10768_v54 = vld [vmem:[#allocation252_spill] sm:$0xff]  ;;  %v3993_v25 = vmax.f32 %v3737_v30, 0.0  ;;  %v10774_v19 = vld [vmem:[#allocation214_spill] sm:$0xff] }
 0x616   :  { %v3741_v31 = vadd.f32 %v3485_v43, %v2861_v40  ;;  %v3679_v39 = vadd.f32 %v3423_v51, %v3134_v38  ;;  %4242 = vmatprep.subr.bf16.mxu1 %v4152_v41  ;;  %4299 = vmatprep.subr.bf16.mxu0 %v4122_v14  ;;  %v10769_v49 = vld [vmem:[#allocation400_spill] sm:$0xff]  ;;  %v3931_v17 = vmax.f32 %v3675_v28, 0.0  ;;  %v10771_v51 = vld [vmem:[#allocation401_spill] sm:$0xff]  ;;  %v3994_v30 = vmax.f32 %v3738_v29, 0.0 }
 0x617   :  { %v3490_v9 = vmul.f32 %v10769_v49, %v10768_v54  ;;  %v2863_v32 = vpop.f32.mrf.mxu0  ;;  %v3136_v35 = vpop.f32.mrf.mxu1  ;;  %4243 = vmatpush1.bf16.msra.mxu1 %v4151_v42  ;;  %4300 = vmatpush2.bf16.msra.mxu0 %v4121_v46  ;;  %v10770_v43 = vld [vmem:[#allocation212_spill] sm:$0xff]  ;;  %v3932_v28 = vmax.f32 %v3676_v2, 0.0 }
 0x618   :  { %v3997_v12 = vmax.f32 %v3741_v31, 0.0  ;;  %v3935_v11 = vmax.f32 %v3679_v39, 0.0  ;;  %v3742_v23 = vadd.f32 %v3486_v21, %v2863_v32  ;;  %v3680_v34 = vadd.f32 %v3424_v60, %v3136_v35  ;;  %4244 = vmatprep.subr.bf16.mxu1 %v8760_v3  ;;  %4301 = vmatprep.subr.bf16.mxu0 %v8762_v24  ;;  %v10772_v14 = vld [vmem:[#allocation256_spill] sm:$0xff]  ;;  %v10775_v3 = vld [vmem:[#allocation403_spill] sm:$0xff]  ;;  %v10778_v35 = vld [vmem:[#allocation218_spill] sm:$0xff] }
 0x619   :  { %v3428_v41 = vmul.f32 %v10771_v51, %v10770_v43  ;;  %v3493_v40 = vmul.f32 %v10773_v45, %v10772_v14  ;;  %v2867_v38 = vpop.f32.mrf.mxu0  ;;  %v3140_v13 = vpop.f32.mrf.mxu1  ;;  %v3431_v31 = vmul.f32 %v10775_v3, %v10774_v19  ;;  %v10782_v51 = vld [vmem:[#allocation220_spill] sm:$0xff]  ;;  %v10786_v19 = vld [vmem:[#allocation223_spill] sm:$0xff]  ;;  %v10787_v3 = vld [vmem:[#allocation409_spill] sm:$0xff] }
 0x61a   :  { %v8800_v42 = vpack.c.bf16 %v3997_v12, %v3993_v25  ;;  %v8802_v46 = vpack.c.bf16 %v3935_v11, %v3931_v17  ;;  %v3998_v21 = vmax.f32 %v3742_v23, 0.0  ;;  %v3936_v60 = vmax.f32 %v3680_v34, 0.0  ;;  %v10779_v12 = vld [vmem:[#allocation405_spill] sm:$0xff]  ;;  %v10780_v23 = vld [vmem:[#allocation264_spill] sm:$0xff]  ;;  %v10781_v34 = vld [vmem:[#allocation406_spill] sm:$0xff] }
 0x61b   :  { %v3745_v24 = vadd.f32 %v3489_v16, %v2867_v38  ;;  %v3683_v39 = vadd.f32 %v3427_v0, %v3140_v13  ;;  %v2869_v10 = vpop.f32.mrf.mxu0  ;;  %v3142_v26 = vpop.f32.mrf.mxu1  ;;  %4245 = vmatpush1.bf16.msra.mxu1 %v8747_v62  ;;  %4302 = vmatpush2.bf16.msra.mxu0 %v8749_v53  ;;  %v10776_v16 = vld [vmem:[#allocation260_spill] sm:$0xff]  ;;  %v3432_v62 = vmul.f32 %v10779_v12, %v10778_v35 }
 0x61c   :  { %v8808_v29 = vpack.c.bf16 %v3998_v21, %v3994_v30  ;;  %v8810_v2 = vpack.c.bf16 %v3936_v60, %v3932_v28  ;;  %v3746_v54 = vadd.f32 %v3490_v9, %v2869_v10  ;;  %v3684_v49 = vadd.f32 %v3428_v41, %v3142_v26  ;;  %4246 = vmatprep.subr.bf16.mxu1 %v8732_v6  ;;  %v10777_v0 = vld [vmem:[#allocation404_spill] sm:$0xff]  ;;  %v10783_v9 = vld [vmem:[#allocation407_spill] sm:$0xff] }
 0x61d   :  { %4303 = vmatprep.subr.bf16.mxu0 %v8734_v63  ;;  %v2871_v25 = vpop.f32.mrf.mxu0  ;;  %v3144_v17 = vpop.f32.mrf.mxu1  ;;  %v3494_v32 = vmul.f32 %v10777_v0, %v10776_v16  ;;  %v3497_v43 = vmul.f32 %v10781_v34, %v10780_v23  ;;  %v3435_v41 = vmul.f32 %v10783_v9, %v10782_v51  ;;  %v4001_v14 = vmax.f32 %v3745_v24, 0.0  ;;  %v10785_v21 = vld [vmem:[#allocation408_spill] sm:$0xff] }
 0x61e   :  { %v3749_v11 = vadd.f32 %v3493_v40, %v2871_v25  ;;  %v3687_v53 = vadd.f32 %v3431_v31, %v3144_v17  ;;  %v3939_v6 = vmax.f32 %v3683_v39, 0.0  ;;  %v10784_v40 = vld [vmem:[#allocation268_spill] sm:$0xff]  ;;  %v3436_v31 = vmul.f32 %v10787_v3, %v10786_v19 }
 0x61f   :  { %v2873_v45 = vpop.f32.mrf.mxu0  ;;  %v3146_v63 = vpop.f32.mrf.mxu1  ;;  %4247 = vmatpush1.bf16.msra.mxu1 %v8719_v36  ;;  %4304 = vmatpush2.bf16.msra.mxu0 %v8721_v37  ;;  %v3498_v60 = vmul.f32 %v10785_v21, %v10784_v40  ;;  %v4002_v24 = vmax.f32 %v3746_v54, 0.0  ;;  %v3940_v39 = vmax.f32 %v3684_v49, 0.0  ;;  %v10788_v16 = vld [vmem:[#allocation272_spill] sm:$0xff]  ;;  %v10790_v54 = vld [vmem:[#allocation225_spill] sm:$0xff]  ;;  %v10791_v49 = vld [vmem:[#allocation411_spill] sm:$0xff] }
 0x620   :  { %v4005_v30 = vmax.f32 %v3749_v11, 0.0  ;;  %v3943_v28 = vmax.f32 %v3687_v53, 0.0  ;;  %v3750_v38 = vadd.f32 %v3494_v32, %v2873_v45  ;;  %v3688_v13 = vadd.f32 %v3432_v62, %v3146_v63  ;;  %4248 = vmatprep.subr.bf16.mxu1 %v8704_v55  ;;  %4305 = vmatprep.subr.bf16.mxu0 %v8706_v47  ;;  %v10789_v55 = vld [vmem:[#allocation410_spill] sm:$0xff]  ;;  %v10792_v9 = vld [vmem:[#allocation276_spill] sm:$0xff]  ;;  %v10799_v40 = vld [vmem:[#allocation415_spill] sm:$0xff] }
 0x621   :  { %v2877_v10 = vpop.f32.mrf.mxu0  ;;  %v3150_v36 = vpop.f32.mrf.mxu1  ;;  %v3501_v0 = vmul.f32 %v10789_v55, %v10788_v16  ;;  %v3439_v62 = vmul.f32 %v10791_v49, %v10790_v54  ;;  %v10803_v16 = vld [vmem:[#allocation417_spill] sm:$0xff]  ;;  %v10804_v49 = vld [vmem:[#allocation288_spill] sm:$0xff] }
 0x622   :  { %v8830_v26 = vpack.c.bf16 %v4005_v30, %v4001_v14  ;;  %v8832_v37 = vpack.c.bf16 %v3943_v28, %v3939_v6  ;;  %v4006_v25 = vmax.f32 %v3750_v38, 0.0  ;;  %v3944_v17 = vmax.f32 %v3688_v13, 0.0  ;;  %v10794_v14 = vld [vmem:[#allocation228_spill] sm:$0xff]  ;;  %v10797_v28 = vld [vmem:[#allocation414_spill] sm:$0xff]  ;;  %v10798_v13 = vld [vmem:[#allocation231_spill] sm:$0xff] }
 0x623   :  { %v3753_v47 = vadd.f32 %v3497_v43, %v2877_v10  ;;  %v3691_v32 = vadd.f32 %v3435_v41, %v3150_v36  ;;  %v2879_v35 = vpop.f32.mrf.mxu0  ;;  %v3152_v12 = vpop.f32.mrf.mxu1  ;;  %4249 = vmatpush1.bf16.msra.mxu1 %v8691_v18  ;;  %4306 = vmatpush2.bf16.msra.mxu0 %v8693_v7  ;;  %v10793_v41 = vld [vmem:[#allocation412_spill] sm:$0xff]  ;;  %v10795_v7 = vld [vmem:[#allocation413_spill] sm:$0xff]  ;;  %v3443_v21 = vmul.f32 %v10799_v40, %v10798_v13 }
 0x624   :  { %v8840_v11 = vpack.c.bf16 %v4006_v25, %v4002_v24  ;;  %v8842_v53 = vpack.c.bf16 %v3944_v17, %v3940_v39  ;;  %v3692_v23 = vadd.f32 %v3436_v31, %v3152_v12  ;;  %4250 = vmatprep.subr.bf16.mxu1 %v8671_v52  ;;  %v3754_v34 = vadd.f32 %v3498_v60, %v2879_v35  ;;  %v10796_v30 = vld [vmem:[#allocation280_spill] sm:$0xff]  ;;  %v10802_v17 = vld [vmem:[#allocation235_spill] sm:$0xff] }
 0x625   :  { %4307 = vmatprep.subr.bf16.mxu0 %v8673_v5  ;;  %v2881_v43 = vpop.f32.mrf.mxu0  ;;  %v3154_v51 = vpop.f32.mrf.mxu1  ;;  %v3502_v18 = vmul.f32 %v10793_v41, %v10792_v9  ;;  %v3440_v6 = vmul.f32 %v10795_v7, %v10794_v14  ;;  %v3505_v38 = vmul.f32 %v10797_v28, %v10796_v30  ;;  %v4009_v52 = vmax.f32 %v3753_v47, 0.0  ;;  %v10800_v10 = vld [vmem:[#allocation284_spill] sm:$0xff]  ;;  %v10808_v30 = vld [vmem:[#allocation54_spill] sm:$0xff] }
 0x626   :  { %v3757_v45 = vadd.f32 %v3501_v0, %v2881_v43  ;;  %v3695_v63 = vadd.f32 %v3439_v62, %v3154_v51  ;;  %v3947_v60 = vmax.f32 %v3691_v32, 0.0  ;;  %v10801_v36 = vld [vmem:[#allocation416_spill] sm:$0xff]  ;;  %v3444_v55 = vmul.f32 %v10803_v16, %v10802_v17  ;;  %v10816_v16 = vld [vmem:[#allocation58_spill] sm:$0xff] }
 0x627   :  { %v2883_v19 = vpop.f32.mrf.mxu0  ;;  %v3156_v5 = vpop.f32.mrf.mxu1  ;;  %4251 = vmatpush1.bf16.msra.mxu1 %v8655_v44  ;;  %4308 = vmatpush2.bf16.msra.mxu0 %v8657_v15  ;;  %v3506_v25 = vmul.f32 %v10801_v36, %v10800_v10  ;;  %v4010_v0 = vmax.f32 %v3754_v34, 0.0  ;;  %v3948_v47 = vmax.f32 %v3692_v23, 0.0  ;;  %v10806_v23 = vld [vmem:[#allocation237_spill] sm:$0xff]  ;;  %v10807_v34 = vld [vmem:[#allocation419_spill] sm:$0xff]  ;;  %v10809_v28 = vld [vmem:[#allocation420_spill] sm:$0xff] }
 0x628   :  { %v4013_v3 = vmax.f32 %v3757_v45, 0.0  ;;  %v3951_v31 = vmax.f32 %v3695_v63, 0.0  ;;  %v3758_v24 = vadd.f32 %v3502_v18, %v2883_v19  ;;  %v3696_v39 = vadd.f32 %v3440_v6, %v3156_v5  ;;  %4252 = vmatprep.subr.bf16.mxu1 %v8635_v50  ;;  %4309 = vmatprep.subr.bf16.mxu0 %v8637_v61  ;;  %v10805_v50 = vld [vmem:[#allocation418_spill] sm:$0xff]  ;;  %v10814_v5 = vld [vmem:[#allocation245_spill] sm:$0xff] }
 0x629   :  { %v2887_v32 = vpop.f32.mrf.mxu0  ;;  %v3160_v44 = vpop.f32.mrf.mxu1  ;;  %v3509_v62 = vmul.f32 %v10805_v50, %v10804_v49  ;;  %v3447_v41 = vmul.f32 %v10807_v34, %v10806_v23 }
 0x62a   :  { %v8862_v35 = vpack.c.bf16 %v4013_v3, %v4009_v52  ;;  %v8864_v15 = vpack.c.bf16 %v3951_v31, %v3947_v60  ;;  %v4014_v12 = vmax.f32 %v3758_v24, 0.0  ;;  %v3952_v54 = vmax.f32 %v3696_v39, 0.0  ;;  %v10812_v52 = vld [vmem:[#allocation56_spill] sm:$0xff]  ;;  %v10813_v60 = vld [vmem:[#allocation422_spill] sm:$0xff]  ;;  %v10815_v3 = vld [vmem:[#allocation423_spill] sm:$0xff] }
 0x62b   :  { %v3761_v61 = vadd.f32 %v3505_v38, %v2887_v32  ;;  %v3699_v43 = vadd.f32 %v3443_v21, %v3160_v44  ;;  %v2889_v51 = vpop.f32.mrf.mxu0  ;;  %v3162_v9 = vpop.f32.mrf.mxu1  ;;  %4253 = vmatpush1.bf16.msra.mxu1 %v8622_v33  ;;  %4310 = vmatpush2.bf16.msra.mxu0 %v8624_v1  ;;  %v3510_v33 = vmul.f32 %v10809_v28, %v10808_v30  ;;  %v10810_v38 = vld [vmem:[#allocation243_spill] sm:$0xff]  ;;  %v10811_v1 = vld [vmem:[#allocation421_spill] sm:$0xff] }
 0x62c   :  { %v8872_v18 = vpack.c.bf16 %v4014_v12, %v4010_v0  ;;  %v8874_v14 = vpack.c.bf16 %v3952_v54, %v3948_v47  ;;  %v3700_v7 = vadd.f32 %v3444_v55, %v3162_v9  ;;  %4254 = vmatprep.subr.bf16.mxu1 %v8607_v8  ;;  %v3762_v6 = vadd.f32 %v3506_v25, %v2889_v51  ;;  %v10817_v55 = vld [vmem:[#allocation424_spill] sm:$0xff]  ;;  %v10818_v47 = vld [vmem:[#allocation251_spill] sm:$0xff]  ;;  %v10819_v32 = vld [vmem:[#allocation425_spill] sm:$0xff] }
 0x62d   :  { %4311 = vmatprep.subr.bf16.mxu0 %v8609_v4  ;;  %v2891_v45 = vpop.f32.mrf.mxu0  ;;  %v3164_v63 = vpop.f32.mrf.mxu1  ;;  %v3448_v13 = vmul.f32 %v10811_v1, %v10810_v38  ;;  %v3513_v19 = vmul.f32 %v10813_v60, %v10812_v52  ;;  %v3451_v31 = vmul.f32 %v10815_v3, %v10814_v5  ;;  %v4017_v8 = vmax.f32 %v3761_v61, 0.0  ;;  %v10824_v1 = vld [vmem:[#allocation64_spill] sm:$0xff]  ;;  %v10827_v52 = vld [vmem:[#allocation429_spill] sm:$0xff] }
 0x62e   :  { %v3765_v40 = vadd.f32 %v3509_v62, %v2891_v45  ;;  %v3703_v21 = vadd.f32 %v3447_v41, %v3164_v63  ;;  %v3955_v24 = vmax.f32 %v3699_v43, 0.0  ;;  %v3514_v0 = vmul.f32 %v10817_v55, %v10816_v16  ;;  %v10820_v43 = vld [vmem:[#allocation62_spill] sm:$0xff]  ;;  %v10822_v41 = vld [vmem:[#allocation253_spill] sm:$0xff]  ;;  %v10831_v55 = vld [vmem:[#allocation431_spill] sm:$0xff] }
 0x62f   :  { %v2893_v39 = vpop.f32.mrf.mxu0  ;;  %v3166_v4 = vpop.f32.mrf.mxu1  ;;  %4255 = vmatpush1.bf16.msra.mxu1 %v8594_v20  ;;  %4312 = vmatpush2.bf16.msra.mxu0 %v8596_v56  ;;  %v3452_v44 = vmul.f32 %v10819_v32, %v10818_v47  ;;  %v4018_v12 = vmax.f32 %v3762_v6, 0.0  ;;  %v3956_v54 = vmax.f32 %v3700_v7, 0.0  ;;  %v10823_v7 = vld [vmem:[#allocation427_spill] sm:$0xff] }
 0x630   :  { %v4021_v10 = vmax.f32 %v3765_v40, 0.0  ;;  %v3959_v36 = vmax.f32 %v3703_v21, 0.0  ;;  %v3766_v25 = vadd.f32 %v3510_v33, %v2893_v39  ;;  %v3704_v17 = vadd.f32 %v3448_v13, %v3166_v4  ;;  %4256 = vmatprep.subr.bf16.mxu1 %v8579_v22  ;;  %4313 = vmatprep.subr.bf16.mxu0 %v8581_v27  ;;  %v10821_v22 = vld [vmem:[#allocation426_spill] sm:$0xff]  ;;  %v10825_v13 = vld [vmem:[#allocation428_spill] sm:$0xff]  ;;  %v10826_v21 = vld [vmem:[#allocation259_spill] sm:$0xff] }
 0x631   :  { %v2897_v49 = vpop.f32.mrf.mxu0  ;;  %v3170_v20 = vpop.f32.mrf.mxu1  ;;  %v3517_v51 = vmul.f32 %v10821_v22, %v10820_v43  ;;  %v3455_v6 = vmul.f32 %v10823_v7, %v10822_v41  ;;  %v3518_v40 = vmul.f32 %v10825_v13, %v10824_v1  ;;  %v3456_v60 = vmul.f32 %v10827_v52, %v10826_v21  ;;  %v10833_v43 = vld [vmem:[#allocation432_spill] sm:$0xff]  ;;  %v10838_v1 = vld [vmem:[#allocation269_spill] sm:$0xff]  ;;  %v10839_v13 = vld [vmem:[#allocation435_spill] sm:$0xff] }
 0x632   :  { %v8894_v50 = vpack.c.bf16 %v4021_v10, %v4017_v8  ;;  %v8896_v56 = vpack.c.bf16 %v3959_v36, %v3955_v24  ;;  %v4022_v62 = vmax.f32 %v3766_v25, 0.0  ;;  %v3960_v61 = vmax.f32 %v3704_v17, 0.0  ;;  %v5391_v8 = vld [vmem:[%s9381_s6 + $0x70] ss:$8 sps:$4 sm:$0xff]   ;;  %v5393_v36 = vld [vmem:[%s9381_s6 + $0x74] ss:$8 sps:$4 sm:$0xff]  }
 0x633   :  { %v3769_v27 = vadd.f32 %v3513_v19, %v2897_v49  ;;  %v3707_v9 = vadd.f32 %v3451_v31, %v3170_v20  ;;  %v2899_v23 = vpop.f32.mrf.mxu0  ;;  %v3172_v34 = vpop.f32.mrf.mxu1  ;;  %4257 = vmatpush1.bf16.msra.mxu1 %v8570_v58  ;;  %4314 = vmatpush2.bf16.msra.mxu0 %v8572_v57  ;;  %v10828_v25 = vld [vmem:[#allocation68_spill] sm:$0xff]  ;;  %v10829_v17 = vld [vmem:[#allocation430_spill] sm:$0xff] }
 0x634   :  { %v8904_v45 = vpack.c.bf16 %v4022_v62, %v4018_v12  ;;  %v8906_v63 = vpack.c.bf16 %v3960_v61, %v3956_v54  ;;  %v3708_v30 = vadd.f32 %v3452_v44, %v3172_v34  ;;  %v3770_v28 = vadd.f32 %v3514_v0, %v2899_v23  ;;  %4765 = vmatprep.subr.bf16.mxu0 %v5393_v36  ;;  %v10832_v61 = vld [vmem:[#allocation70_spill] sm:$0xff] }
 0x635   :  { %v2901_v33 = vpop.f32.mrf.mxu0  ;;  %v3174_v38 = vpop.f32.mrf.mxu1  ;;  %v4025_v57 = vmax.f32 %v3769_v27, 0.0  ;;  %v3963_v5 = vmax.f32 %v3707_v9, 0.0  ;;  %v3521_v16 = vmul.f32 %v10829_v17, %v10828_v25  ;;  %v3522_v22 = vmul.f32 %v10833_v43, %v10832_v61  ;;  %v10835_v27 = vld [vmem:[#allocation433_spill] sm:$0xff] }
 0x636   :  { %v3773_v58 = vadd.f32 %v3517_v51, %v2901_v33  ;;  %v3711_v19 = vadd.f32 %v3455_v6, %v3174_v38  ;;  %4316 = vmatmul.mubr.bf16.vlgmr.msra.gmra.mxu0 %v8653_v48  ;;  %v10830_v48 = vld [vmem:[#allocation261_spill] sm:$0xff]  ;;  %v4026_v47 = vmax.f32 %v3770_v28, 0.0  ;;  %v3964_v32 = vmax.f32 %v3708_v30, 0.0  ;;  %v10834_v51 = vld [vmem:[#allocation267_spill] sm:$0xff]  ;;  %v10836_v28 = vld [vmem:[#allocation74_spill] sm:$0xff] }
 0x637   :  { %v2903_v3 = vpop.f32.mrf.mxu0  ;;  %v3176_v31 = vpop.f32.mrf.mxu1  ;;  %v3459_v0 = vmul.f32 %v10831_v55, %v10830_v48  ;;  %v3460_v9 = vmul.f32 %v10835_v27, %v10834_v51  ;;  %4766 = vmatpush1.bf16.msra.mxu0 %v5391_v8  ;;  %v5397_v6 = vld [vmem:[%s9381_s6 + $0x60] ss:$8 sps:$4 sm:$0xff]   ;;  %v5399_v30 = vld [vmem:[%s9381_s6 + $0x64] ss:$8 sps:$4 sm:$0xff]   ;;  %v5403_v55 = vld [vmem:[%s9381_s6 + $0x50] ss:$8 sps:$4 sm:$0xff]  }
 0x638   :  { %v4029_v24 = vmax.f32 %v3773_v58, 0.0  ;;  %v3967_v39 = vmax.f32 %v3711_v19, 0.0  ;;  %v3774_v4 = vadd.f32 %v3518_v40, %v2903_v3  ;;  %v3712_v10 = vadd.f32 %v3456_v60, %v3176_v31  ;;  %v10837_v33 = vld [vmem:[#allocation434_spill] sm:$0xff]  ;;  %4767 = vmatprep.subr.bf16.mxu0 %v5399_v30  ;;  %v10840_v3 = vld [vmem:[#allocation76_spill] sm:$0xff]  ;;  %v10846_v43 = vld [vmem:[#allocation277_spill] sm:$0xff] }
 0x639   :  { %v2907_v44 = vpop.f32.mrf.mxu0  ;;  %v3180_v12 = vpop.f32.mrf.mxu1  ;;  %v3525_v38 = vmul.f32 %v10837_v33, %v10836_v28  ;;  %v3463_v40 = vmul.f32 %v10839_v13, %v10838_v1  ;;  %v10841_v31 = vld [vmem:[#allocation436_spill] sm:$0xff]  ;;  %v10850_v1 = vld [vmem:[#allocation283_spill] sm:$0xff]  ;;  %v10851_v13 = vld [vmem:[#allocation441_spill] sm:$0xff] }
 0x63a   :  { %v8923_v54 = vpack.c.bf16 %v4029_v24, %v4025_v57  ;;  %v8925_v49 = vpack.c.bf16 %v3967_v39, %v3963_v5  ;;  %v4030_v20 = vmax.f32 %v3774_v4, 0.0  ;;  %v3968_v62 = vmax.f32 %v3712_v10, 0.0  ;;  %v5405_v5 = vld [vmem:[%s9381_s6 + $0x54] ss:$8 sps:$4 sm:$0xff]   ;;  %v10842_v24 = vld [vmem:[#allocation275_spill] sm:$0xff] }
 0x63b   :  { %v3777_v23 = vadd.f32 %v3521_v16, %v2907_v44  ;;  %v3715_v34 = vadd.f32 %v3459_v0, %v3180_v12  ;;  %v2909_v41 = vpop.f32.mrf.mxu0  ;;  %v3182_v7 = vpop.f32.mrf.mxu1  ;;  %v3526_v8 = vmul.f32 %v10841_v31, %v10840_v3  ;;  %v10843_v39 = vld [vmem:[#allocation437_spill] sm:$0xff]  ;;  %4768 = vmatpush1.bf16.msra.mxu0 %v5397_v6  ;;  %v5411_v12 = vld [vmem:[%s9381_s6 + $0x44] ss:$8 sps:$4 sm:$0xff]   ;;  %v10848_v28 = vld [vmem:[#allocation16_spill] sm:$0xff] }
 0x63c   :  { %v8941_v21 = vpack.c.bf16 %v4030_v20, %v4026_v47  ;;  %v8943_v52 = vpack.c.bf16 %v3968_v62, %v3964_v32  ;;  %v3778_v60 = vadd.f32 %v3522_v22, %v2909_v41  ;;  %v3716_v58 = vadd.f32 %v3460_v9, %v3182_v7  ;;  %4769 = vmatprep.subr.bf16.mxu0 %v5405_v5  ;;  %v10844_v20 = vld [vmem:[#allocation14_spill] sm:$0xff]  ;;  %v10847_v22 = vld [vmem:[#allocation439_spill] sm:$0xff]  ;;  %v10849_v33 = vld [vmem:[#allocation440_spill] sm:$0xff] }
 0x63d   :  { %v2911_v19 = vpop.f32.mrf.mxu0  ;;  %v3184_v57 = vpop.f32.mrf.mxu1  ;;  %v3464_v4 = vmul.f32 %v10843_v39, %v10842_v24  ;;  %v4033_v25 = vmax.f32 %v3777_v23, 0.0  ;;  %v3971_v17 = vmax.f32 %v3715_v34, 0.0  ;;  %v10845_v62 = vld [vmem:[#allocation438_spill] sm:$0xff]  ;;  %v3467_v51 = vmul.f32 %v10847_v22, %v10846_v43  ;;  %v10854_v24 = vld [vmem:[#allocation285_spill] sm:$0xff]  ;;  %v10855_v39 = vld [vmem:[#allocation443_spill] sm:$0xff] }
 0x63e   :  { %v3781_v10 = vadd.f32 %v3525_v38, %v2911_v19  ;;  %v3719_v36 = vadd.f32 %v3463_v40, %v3184_v57  ;;  %v3529_v61 = vmul.f32 %v10845_v62, %v10844_v20  ;;  %v4034_v27 = vmax.f32 %v3778_v60, 0.0  ;;  %v5409_v60 = vld [vmem:[%s9381_s6 + $0x40] ss:$8 sps:$4 sm:$0xff]   ;;  %v10859_v20 = vld [vmem:[#allocation445_spill] sm:$0xff] }
 0x63f   :  { %v2913_v16 = vpop.f32.mrf.mxu0  ;;  %v3186_v48 = vpop.f32.mrf.mxu1  ;;  %v3972_v9 = vmax.f32 %v3716_v58, 0.0  ;;  %v3530_v38 = vmul.f32 %v10849_v33, %v10848_v28  ;;  %v3468_v40 = vmul.f32 %v10851_v13, %v10850_v1  ;;  %4770 = vmatpush1.bf16.msra.mxu0 %v5403_v55  ;;  %v10852_v58 = vld [vmem:[#allocation18_spill] sm:$0xff]  ;;  %v10862_v13 = vld [vmem:[#allocation291_spill] sm:$0xff] }
 0x640   :  { %v4037_v0 = vmax.f32 %v3781_v10, 0.0  ;;  %v3975_v47 = vmax.f32 %v3719_v36, 0.0  ;;  %v3782_v32 = vadd.f32 %v3526_v8, %v2913_v16  ;;  %v3720_v44 = vadd.f32 %v3464_v4, %v3186_v48  ;;  %v10853_v31 = vld [vmem:[#allocation442_spill] sm:$0xff]  ;;  %4771 = vmatprep.subr.bf16.mxu0 %v5411_v12 }
 0x641   :  { %v2917_v23 = vpop.f32.mrf.mxu0  ;;  %v3190_v34 = vpop.f32.mrf.mxu1  ;;  %v3533_v8 = vmul.f32 %v10853_v31, %v10852_v58  ;;  %v3471_v4 = vmul.f32 %v10855_v39, %v10854_v24  ;;  %v5423_v28 = vld [vmem:[%s9381_s6 + $0x24] ss:$8 sps:$4 sm:$0xff]   ;;  %v10864_v39 = vld [vmem:[#allocation24_spill] sm:$0xff] }
 0x642   :  { %v8962_v41 = vpack.c.bf16 %v4037_v0, %v4033_v25  ;;  %v8964_v7 = vpack.c.bf16 %v3975_v47, %v3971_v17  ;;  %v4038_v6 = vmax.f32 %v3782_v32, 0.0  ;;  %v3976_v30 = vmax.f32 %v3720_v44, 0.0  ;;  %v5417_v25 = vld [vmem:[%s9381_s6 + $0x34] ss:$8 sps:$4 sm:$0xff]   ;;  %v10858_v44 = vld [vmem:[#allocation290_spill] sm:$0xff] }
 0x643   :  { %v3785_v19 = vadd.f32 %v3529_v61, %v2917_v23  ;;  %v3723_v57 = vadd.f32 %v3467_v51, %v3190_v34  ;;  %v2919_v5 = vpop.f32.mrf.mxu0  ;;  %v3192_v3 = vpop.f32.mrf.mxu1  ;;  %v10856_v0 = vld [vmem:[#allocation20_spill] sm:$0xff]  ;;  %v3472_v62 = vmul.f32 %v10859_v20, %v10858_v44  ;;  %4772 = vmatpush1.bf16.msra.mxu0 %v5409_v60  ;;  %v10860_v33 = vld [vmem:[#allocation22_spill] sm:$0xff] }
 0x644   :  { %v8977_v10 = vpack.c.bf16 %v4038_v6, %v4034_v27  ;;  %v8979_v36 = vpack.c.bf16 %v3976_v30, %v3972_v9  ;;  %v3786_v17 = vadd.f32 %v3530_v38, %v2919_v5  ;;  %v3724_v16 = vadd.f32 %v3468_v40, %v3192_v3  ;;  %v10857_v47 = vld [vmem:[#allocation444_spill] sm:$0xff]  ;;  %4773 = vmatprep.subr.bf16.mxu0 %v5417_v25  ;;  %v10861_v38 = vld [vmem:[#allocation446_spill] sm:$0xff]  ;;  %v10863_v40 = vld [vmem:[#allocation447_spill] sm:$0xff] }
 0x645   :  { %v2921_v48 = vpop.f32.mrf.mxu0  ;;  %v3194_v55 = vpop.f32.mrf.mxu1  ;;  %v3534_v32 = vmul.f32 %v10857_v47, %v10856_v0  ;;  %v4041_v22 = vmax.f32 %v3785_v19, 0.0  ;;  %v3979_v51 = vmax.f32 %v3723_v57, 0.0  ;;  %v5415_v9 = vld [vmem:[%s9381_s6 + $0x30] ss:$8 sps:$4 sm:$0xff]   ;;  %v3537_v1 = vmul.f32 %v10861_v38, %v10860_v33 }
 0x646   :  { %v3789_v61 = vadd.f32 %v3533_v8, %v2921_v48  ;;  %v3727_v43 = vadd.f32 %v3471_v4, %v3194_v55  ;;  %v3475_v19 = vmul.f32 %v10863_v40, %v10862_v13  ;;  %v4042_v57 = vmax.f32 %v3786_v17, 0.0  ;;  %v10865_v4 = vld [vmem:[#allocation448_spill] sm:$0xff]  ;;  %v10866_v48 = vld [vmem:[#allocation294_spill] sm:$0xff]  ;;  %v10867_v55 = vld [vmem:[#allocation449_spill] sm:$0xff] }
 0x647   :  { %v2923_v27 = vpop.f32.mrf.mxu0  ;;  %v3196_v12 = vpop.f32.mrf.mxu1  ;;  %v3980_v5 = vmax.f32 %v3724_v16, 0.0  ;;  %v3538_v25 = vmul.f32 %v10865_v4, %v10864_v39  ;;  %v3476_v0 = vmul.f32 %v10867_v55, %v10866_v48  ;;  %4774 = vmatpush1.bf16.msra.mxu0 %v5415_v9  ;;  %v5421_v17 = vld [vmem:[%s9381_s6 + $0x20] ss:$8 sps:$4 sm:$0xff]   ;;  %v10872_v33 = vld [vmem:[#allocation28_spill] sm:$0xff]  ;;  %v10874_v13 = vld [vmem:[#allocation297_spill] sm:$0xff] }
 0x648   :  { %v4045_v23 = vmax.f32 %v3789_v61, 0.0  ;;  %v3983_v34 = vmax.f32 %v3727_v43, 0.0  ;;  %v3790_v6 = vadd.f32 %v3534_v32, %v2923_v27  ;;  %v3728_v30 = vadd.f32 %v3472_v62, %v3196_v12  ;;  %v10868_v16 = vld [vmem:[#allocation26_spill] sm:$0xff]  ;;  %v10870_v43 = vld [vmem:[#allocation295_spill] sm:$0xff]  ;;  %4775 = vmatprep.subr.bf16.mxu0 %v5423_v28  ;;  %v10873_v38 = vld [vmem:[#allocation452_spill] sm:$0xff] }
 0x649   :  { %v2927_v3 = vpop.f32.mrf.mxu0  ;;  %v3200_v60 = vpop.f32.mrf.mxu1  ;;  %v10869_v62 = vld [vmem:[#allocation450_spill] sm:$0xff]  ;;  %v10875_v40 = vld [vmem:[#allocation453_spill] sm:$0xff] }
 0x64a   :  { %v8998_v58 = vpack.c.bf16 %v4045_v23, %v4041_v22  ;;  %v9000_v31 = vpack.c.bf16 %v3983_v34, %v3979_v51  ;;  %v4046_v8 = vmax.f32 %v3790_v6, 0.0  ;;  %v3984_v24 = vmax.f32 %v3728_v30, 0.0  ;;  %v10871_v22 = vld [vmem:[#allocation451_spill] sm:$0xff]  ;;  %v5429_v23 = vld [vmem:[%s9381_s6 + $0x14] ss:$8 sps:$4 sm:$0xff]  }
 0x64b   :  { %v3793_v47 = vadd.f32 %v3537_v1, %v2927_v3  ;;  %v3731_v32 = vadd.f32 %v3475_v19, %v3200_v60  ;;  %v2929_v44 = vpop.f32.mrf.mxu0  ;;  %v3202_v20 = vpop.f32.mrf.mxu1  ;;  %v3541_v61 = vmul.f32 %v10869_v62, %v10868_v16  ;;  %v3479_v51 = vmul.f32 %v10871_v22, %v10870_v43  ;;  %4776 = vmatpush1.bf16.msra.mxu0 %v5421_v17  ;;  %v5435_v55 = vld [vmem:[%s9381_s6 + $0x4] ss:$8 sps:$4 sm:$0xff]  }
 0x64c   :  { %v4180_v27 = vpack.c.bf16 %v4046_v8, %v4042_v57  ;;  %v9013_v12 = vpack.c.bf16 %v3984_v24, %v3980_v5  ;;  %v3794_v34 = vadd.f32 %v3538_v25, %v2929_v44  ;;  %v3732_v9 = vadd.f32 %v3476_v0, %v3202_v20  ;;  %v5427_v24 = vld [vmem:[%s9381_s6 + $0x10] ss:$8 sps:$4 sm:$0xff]   ;;  %4777 = vmatprep.subr.bf16.mxu0 %v5429_v23  ;;  %v10876_v0 = vld [vmem:[#allocation298_spill] sm:$0xff]  ;;  %v10879_v20 = vld [vmem:[#allocation3_spill] sm:$0xff] }
 0x64d   :  { %v2931_v6 = vpop.f32.mrf.mxu0  ;;  %v3204_v30 = vpop.f32.mrf.mxu1  ;;  %v3542_v1 = vmul.f32 %v10873_v38, %v10872_v33  ;;  %v3480_v19 = vmul.f32 %v10875_v40, %v10874_v13  ;;  %v4049_v57 = vmax.f32 %v3793_v47, 0.0  ;;  %v3987_v5 = vmax.f32 %v3731_v32, 0.0  ;;  %v10877_v44 = vld [vmem:[#allocation2_spill] sm:$0xff]  ;;  %v10878_v32 = vld [vmem:[#allocation299_spill] sm:$0xff]  ;;  %v10880_v38 = vld [vmem:[#allocation300_spill] sm:$0xff] }
 0x64e   :  { %v3797_v3 = vadd.f32 %v3541_v61, %v2931_v6  ;;  %v3735_v60 = vadd.f32 %v3479_v51, %v3204_v30  ;;  %v3483_v47 = vmul.f32 %v10877_v44, %v10876_v0  ;;  %v3484_v16 = vmul.f32 %v10879_v20, %v10878_v32  ;;  %v5433_v33 = vld [vmem:[%s9381_s6] ss:$8 sps:$4 sm:$0xff]   ;;  %v5447_v44 = vld [vmem:[%s9381_s6 + $0xe4] ss:$8 sps:$4 sm:$0xff]  }
 0x64f   :  { %v2933_v8 = vpop.f32.mrf.mxu0  ;;  %v3206_v28 = vpop.f32.mrf.mxu1  ;;  %v4050_v17 = vmax.f32 %v3794_v34, 0.0  ;;  %v3988_v62 = vmax.f32 %v3732_v9, 0.0  ;;  %4778 = vmatpush1.bf16.msra.mxu0 %v5427_v24  ;;  %v5441_v9 = vld [vmem:[%s9381_s6 + $0xf4] ss:$8 sps:$4 sm:$0xff]   ;;  %v5439_v24 = vld [vmem:[%s9381_s6 + $0xf0] ss:$8 sps:$4 sm:$0xff]  }
 0x650   :  { %v4053_v39 = vmax.f32 %v3797_v3, 0.0  ;;  %v3991_v4 = vmax.f32 %v3735_v60, 0.0  ;;  %v3798_v25 = vadd.f32 %v3542_v1, %v2933_v8  ;;  %v3736_v48 = vadd.f32 %v3480_v19, %v3206_v28  ;;  %v10881_v1 = vld [vmem:[#allocation4_spill] sm:$0xff]  ;;  %4779 = vmatprep.subr.bf16.mxu0 %v5435_v55  ;;  %v10882_v60 = vld [vmem:[#allocation301_spill] sm:$0xff]  ;;  %v10887_v32 = vld [vmem:[#allocation7_spill] sm:$0xff] }
 0x651   :  { %v3210_v61 = vpop.f32.mrf.mxu1  ;;  %v3487_v13 = vmul.f32 %v10881_v1, %v10880_v38  ;;  %v5453_v1 = vld [vmem:[%s9381_s6 + $0xd4] ss:$8 sps:$4 sm:$0xff]  }
 0x652   :  { %v4183_v43 = vpack.c.bf16 %v4053_v39, %v4049_v57  ;;  %v9032_v22 = vpack.c.bf16 %v3991_v4, %v3987_v5  ;;  %v4054_v51 = vmax.f32 %v3798_v25, 0.0  ;;  %v3992_v6 = vmax.f32 %v3736_v48, 0.0  ;;  %v10883_v57 = vld [vmem:[#allocation5_spill] sm:$0xff]  ;;  %v10884_v39 = vld [vmem:[#allocation302_spill] sm:$0xff] }
 0x653   :  { %v3739_v30 = vadd.f32 %v3483_v47, %v3210_v61  ;;  %v3212_v23 = vpop.f32.mrf.mxu1  ;;  %v3488_v5 = vmul.f32 %v10883_v57, %v10882_v60  ;;  %4780 = vmatpush1.bf16.msra.mxu0 %v5433_v33  ;;  %v10885_v4 = vld [vmem:[#allocation6_spill] sm:$0xff]  ;;  %v10886_v47 = vld [vmem:[#allocation80_spill] sm:$0xff] }
 0x654   :  { %v4184_v40 = vpack.c.bf16 %v4054_v51, %v4050_v17  ;;  %v9039_v19 = vpack.c.bf16 %v3992_v6, %v3988_v62  ;;  %v3740_v34 = vadd.f32 %v3484_v16, %v3212_v23  ;;  %v3491_v25 = vmul.f32 %v10885_v4, %v10884_v39  ;;  %4781 = vmatprep.subr.bf16.mxu0 %v5441_v9  ;;  %v10888_v6 = vld [vmem:[#allocation82_spill] sm:$0xff]  ;;  %v5451_v60 = vld [vmem:[%s9381_s6 + $0xd0] ss:$8 sps:$4 sm:$0xff]  }
 0x655   :  { %v3214_v3 = vpop.f32.mrf.mxu1  ;;  %v3995_v48 = vmax.f32 %v3739_v30, 0.0  ;;  %v3492_v20 = vmul.f32 %v10887_v32, %v10886_v47  ;;  %v10889_v30 = vld [vmem:[#allocation8_spill] sm:$0xff]  ;;  %v5459_v39 = vld [vmem:[%s9381_s6 + $0xc4] ss:$8 sps:$4 sm:$0xff]  }
 0x656   :  { %v3743_v8 = vadd.f32 %v3487_v13, %v3214_v3  ;;  %4258 = vmatprep.subr.bf16.mxu1 %v4184_v40  ;;  %v3996_v17 = vmax.f32 %v3740_v34, 0.0  ;;  %v3495_v23 = vmul.f32 %v10889_v30, %v10888_v6  ;;  %v10891_v40 = vld [vmem:[#allocation9_spill] sm:$0xff]  ;;  %v10892_v57 = vld [vmem:[#allocation88_spill] sm:$0xff]  ;;  %v10895_v47 = vld [vmem:[#allocation454_spill] sm:$0xff] }
 0x657   :  { %v3216_v28 = vpop.f32.mrf.mxu1  ;;  %4259 = vmatpush2.bf16.msra.mxu1 %v4183_v43  ;;  %4782 = vmatpush2.bf16.msra.mxu0 %v5439_v24 }
 0x658   :  { %v3999_v55 = vmax.f32 %v3743_v8, 0.0  ;;  %v3744_v0 = vadd.f32 %v3488_v5, %v3216_v28  ;;  %4260 = vmatprep.subr.bf16.mxu1 %v4180_v27  ;;  %v5445_v27 = vld [vmem:[%s9381_s6 + $0xe0] ss:$8 sps:$4 sm:$0xff]   ;;  %4783 = vmatprep.subr.bf16.mxu0 %v5447_v44 }
 0x659   :  { %v3220_v16 = vpop.f32.mrf.mxu1  ;;  %v5457_v44 = vld [vmem:[%s9381_s6 + $0xc0] ss:$8 sps:$4 sm:$0xff]  }
 0x65a   :  { %v9056_v62 = vpack.c.bf16 %v3999_v55, %v3995_v48  ;;  %v4000_v61 = vmax.f32 %v3744_v0, 0.0  ;;  %v3747_v43 = vadd.f32 %v3491_v25, %v3220_v16  ;;  %v10897_v16 = vld [vmem:[#allocation11_spill] sm:$0xff] }
 0x65b   :  { %v3222_v51 = vpop.f32.mrf.mxu1  ;;  %4261 = vmatpush2.bf16.msra.mxu1 %v8998_v58  ;;  %v10890_v58 = vld [vmem:[#allocation86_spill] sm:$0xff]  ;;  %4784 = vmatpush2.bf16.msra.mxu0 %v5445_v27  ;;  %v10899_v27 = vld [vmem:[#allocation12_spill] sm:$0xff] }
 0x65c   :  { %v9064_v33 = vpack.c.bf16 %v4000_v61, %v3996_v17  ;;  %v3748_v38 = vadd.f32 %v3492_v20, %v3222_v51  ;;  %4262 = vmatprep.subr.bf16.mxu1 %v8977_v10  ;;  %v3496_v34 = vmul.f32 %v10891_v40, %v10890_v58  ;;  %v10893_v10 = vld [vmem:[#allocation10_spill] sm:$0xff]  ;;  %v4003_v8 = vmax.f32 %v3747_v43, 0.0  ;;  %4785 = vmatprep.subr.bf16.mxu0 %v5453_v1  ;;  %v5463_v1 = vld [vmem:[%s9381_s6 + $0xb0] ss:$8 sps:$4 sm:$0xff]  }
 0x65d   :  { %v3224_v13 = vpop.f32.mrf.mxu1  ;;  %v3499_v5 = vmul.f32 %v10893_v10, %v10892_v57  ;;  %v10896_v20 = vld [vmem:[#allocation94_spill] sm:$0xff] }
 0x65e   :  { %v3751_v9 = vadd.f32 %v3495_v23, %v3224_v13  ;;  %v3503_v17 = vmul.f32 %v10897_v16, %v10896_v20  ;;  %v10898_v51 = vld [vmem:[#allocation98_spill] sm:$0xff] }
 0x65f   :  { %v3226_v3 = vpop.f32.mrf.mxu1  ;;  %4263 = vmatpush2.bf16.msra.mxu1 %v8962_v41  ;;  %v4004_v41 = vmax.f32 %v3748_v38, 0.0  ;;  %4786 = vmatpush2.bf16.msra.mxu0 %v5451_v60  ;;  %v3504_v6 = vmul.f32 %v10899_v27, %v10898_v51 }
 0x660   :  { %v4007_v28 = vmax.f32 %v3751_v9, 0.0  ;;  %v3752_v24 = vadd.f32 %v3496_v34, %v3226_v3  ;;  %4264 = vmatprep.subr.bf16.mxu1 %v8941_v21  ;;  %v10894_v21 = vld [vmem:[#allocation92_spill] sm:$0xff]  ;;  %4787 = vmatprep.subr.bf16.mxu0 %v5459_v39  ;;  %v10900_v34 = vld [vmem:[#allocation134_spill] sm:$0xff]  ;;  %v10901_v9 = vld [vmem:[#allocation13_spill] sm:$0xff] }
 0x661   :  { %v3230_v4 = vpop.f32.mrf.mxu1  ;;  %v3500_v32 = vmul.f32 %v10895_v47, %v10894_v21  ;;  %v3507_v3 = vmul.f32 %v10901_v9, %v10900_v34  ;;  %v10905_v39 = vld [vmem:[#allocation17_spill] sm:$0xff] }
 0x662   :  { %v9082_v25 = vpack.c.bf16 %v4007_v28, %v4003_v8  ;;  %v4008_v48 = vmax.f32 %v3752_v24, 0.0  ;;  %v3755_v55 = vadd.f32 %v3499_v5, %v3230_v4  ;;  %v10902_v5 = vld [vmem:[#allocation136_spill] sm:$0xff]  ;;  %v10903_v8 = vld [vmem:[#allocation15_spill] sm:$0xff]  ;;  %v10904_v24 = vld [vmem:[#allocation138_spill] sm:$0xff] }
 0x663   :  { %v3232_v0 = vpop.f32.mrf.mxu1  ;;  %4265 = vmatpush2.bf16.msra.mxu1 %v8923_v54  ;;  %v5465_v54 = vld [vmem:[%s9381_s6 + $0xb4] ss:$8 sps:$4 sm:$0xff]   ;;  %4788 = vmatpush2.bf16.msra.mxu0 %v5457_v44  ;;  %v3508_v28 = vmul.f32 %v10903_v8, %v10902_v5  ;;  %v3511_v4 = vmul.f32 %v10905_v39, %v10904_v24 }
 0x664   :  { %v9092_v61 = vpack.c.bf16 %v4008_v48, %v4004_v41  ;;  %4266 = vmatprep.subr.bf16.mxu1 %v8904_v45  ;;  %v3756_v30 = vadd.f32 %v3500_v32, %v3232_v0  ;;  %v4011_v45 = vmax.f32 %v3755_v55, 0.0  ;;  %4789 = vmatprep.subr.bf16.mxu0 %v5465_v54  ;;  %v10906_v55 = vld [vmem:[#allocation142_spill] sm:$0xff]  ;;  %v10907_v0 = vld [vmem:[#allocation19_spill] sm:$0xff]  ;;  %v10909_v54 = vld [vmem:[#allocation21_spill] sm:$0xff] }
 0x665   :  { %v3234_v43 = vpop.f32.mrf.mxu1  ;;  %v3512_v44 = vmul.f32 %v10907_v0, %v10906_v55 }
 0x666   :  { %v3759_v23 = vadd.f32 %v3503_v17, %v3234_v43  ;;  %v4012_v60 = vmax.f32 %v3756_v30, 0.0  ;;  %v10908_v17 = vld [vmem:[#allocation303_spill] sm:$0xff] }
 0x667   :  { %v3236_v38 = vpop.f32.mrf.mxu1  ;;  %4267 = vmatpush2.bf16.msra.mxu1 %v8894_v50  ;;  %4790 = vmatpush2.bf16.msra.mxu0 %v5463_v1  ;;  %v3515_v43 = vmul.f32 %v10909_v54, %v10908_v17  ;;  %v5512_v30 = vld [vmem:[%s9380_s3 + $0x8] sm:$0xff]  ;;  %v10922_v17 = vld [vmem:[#allocation306_spill] sm:$0xff] }
 0x668   :  { %v4015_v13 = vmax.f32 %v3759_v23, 0.0  ;;  %v3760_v58 = vadd.f32 %v3504_v6, %v3236_v38  ;;  %4268 = vmatprep.subr.bf16.mxu1 %v8872_v18  ;;  %v9128_v23 = vcombine.low %v5512_v30, %v5512_v30  ;;  %v10910_v38 = vld [vmem:[#allocation149_spill] sm:$0xff]  ;;  %v10911_v1 = vld [vmem:[#allocation23_spill] sm:$0xff] }
 0x669   :  { %v3240_v40 = vpop.f32.mrf.mxu1  ;;  %v10923_v54 = vld [vmem:[#allocation35_spill] sm:$0xff] }
 0x66a   :  { %v9107_v57 = vpack.c.bf16 %v4015_v13, %v4011_v45  ;;  %v4016_v10 = vmax.f32 %v3760_v58, 0.0  ;;  %v3763_v41 = vadd.f32 %v3507_v3, %v3240_v40  ;;  %v10912_v45 = vld [vmem:[#allocation148_spill] sm:$0xff]  ;;  %v10913_v13 = vld [vmem:[#allocation25_spill] sm:$0xff]  ;;  %v10914_v3 = vld [vmem:[#allocation155_spill] sm:$0xff] }
 0x66b   :  { %v3242_v50 = vpop.f32.mrf.mxu1  ;;  %4269 = vmatpush2.bf16.msra.mxu1 %v8862_v35  ;;  %v3519_v58 = vmul.f32 %v10913_v13, %v10912_v45 }
 0x66c   :  { %v9114_v18 = vpack.c.bf16 %v4016_v10, %v4012_v60  ;;  %4270 = vmatprep.subr.bf16.mxu1 %v8840_v11  ;;  %v3764_v21 = vadd.f32 %v3508_v28, %v3242_v50  ;;  %v4019_v35 = vmax.f32 %v3763_v41, 0.0  ;;  %v10915_v60 = vld [vmem:[#allocation27_spill] sm:$0xff] }
 0x66d   :  { %v3244_v48 = vpop.f32.mrf.mxu1  ;;  %v3520_v10 = vmul.f32 %v10915_v60, %v10914_v3  ;;  %v10927_v3 = vld [vmem:[#allocation199_spill] sm:$0xff] }
 0x66e   :  { %v3767_v47 = vadd.f32 %v3511_v4, %v3244_v48  ;;  %v4020_v27 = vmax.f32 %v3764_v21, 0.0  ;;  %v10917_v4 = vld [vmem:[#allocation29_spill] sm:$0xff]  ;;  %v10918_v21 = vld [vmem:[#allocation304_spill] sm:$0xff] }
 0x66f   :  { %v3246_v32 = vpop.f32.mrf.mxu1  ;;  %4271 = vmatpush2.bf16.msra.mxu1 %v8830_v26 }
 0x670   :  { %v4023_v20 = vmax.f32 %v3767_v47, 0.0  ;;  %v3768_v16 = vadd.f32 %v3512_v44, %v3246_v32  ;;  %4272 = vmatprep.subr.bf16.mxu1 %v8808_v29  ;;  %v3516_v29 = vmul.f32 %v10911_v1, %v10910_v38  ;;  %v10921_v32 = vld [vmem:[#allocation33_spill] sm:$0xff] }
 0x671   :  { %v3250_v51 = vpop.f32.mrf.mxu1  ;;  %v10924_v1 = vld [vmem:[#allocation169_spill] sm:$0xff] }
 0x672   :  { %v9123_v11 = vpack.c.bf16 %v4023_v20, %v4019_v35  ;;  %v4024_v6 = vmax.f32 %v3768_v16, 0.0  ;;  %v3771_v34 = vadd.f32 %v3515_v43, %v3250_v51  ;;  %v3528_v43 = vmul.f32 %v10923_v54, %v10922_v17  ;;  %v10936_v17 = vld [vmem:[#allocation187_spill] sm:$0xff] }
 0x673   :  { %v3252_v26 = vpop.f32.mrf.mxu1  ;;  %4273 = vmatpush2.bf16.msra.mxu1 %v8800_v42 }
 0x674   :  { %v9135_v40 = vpack.c.bf16 %v4024_v6, %v4020_v27  ;;  %4324 = vmatprep.subr.bf16.mxu1 %v9039_v19  ;;  %v3772_v50 = vadd.f32 %v3516_v29, %v3252_v26  ;;  %v4027_v8 = vmax.f32 %v3771_v34, 0.0  ;;  %v10916_v19 = vld [vmem:[#allocation146_spill] sm:$0xff]  ;;  %v10925_v29 = vld [vmem:[#allocation37_spill] sm:$0xff] }
 0x675   :  { %v3254_v9 = vpop.f32.mrf.mxu1  ;;  %v3523_v41 = vmul.f32 %v10917_v4, %v10916_v19  ;;  %v3531_v45 = vmul.f32 %v10925_v29, %v10924_v1 }
 0x676   :  { %v3775_v5 = vadd.f32 %v3519_v58, %v3254_v9  ;;  %4275 = vmatmul.mubr.bf16.vlgmr.msra.gmra.mxu1 %v9128_v23  ;;  %v4028_v48 = vmax.f32 %v3772_v50, 0.0  ;;  %v10926_v9 = vld [vmem:[#allocation308_spill] sm:$0xff] }
 0x677   :  { %v3256_v42 = vpop.f32.mrf.mxu1  ;;  %4325 = vmatpush1.bf16.msra.mxu1 %v9032_v22  ;;  %4356 = vmatprep.mubr.bf16.mxu1 %v8676_v59  ;;  %v10919_v22 = vld [vmem:[#allocation31_spill] sm:$0xff]  ;;  %v3532_v60 = vmul.f32 %v10927_v3, %v10926_v9 }
 0x678   :  { %v4031_v28 = vmax.f32 %v3775_v5, 0.0  ;;  %v3776_v24 = vadd.f32 %v3520_v10, %v3256_v42  ;;  %4326 = vmatprep.subr.bf16.mxu1 %v9013_v12  ;;  %v3524_v47 = vmul.f32 %v10919_v22, %v10918_v21  ;;  %v10920_v59 = vld [vmem:[#allocation163_spill] sm:$0xff]  ;;  %v10933_v21 = vld [vmem:[#allocation41_spill] sm:$0xff] }
 0x679   :  { %v3260_v39 = vpop.f32.mrf.mxu1  ;;  %v3527_v35 = vmul.f32 %v10921_v32, %v10920_v59  ;;  %v10928_v10 = vld [vmem:[#allocation175_spill] sm:$0xff] }
 0x67a   :  { %v9146_v55 = vpack.c.bf16 %v4031_v28, %v4027_v8  ;;  %v4032_v0 = vmax.f32 %v3776_v24, 0.0  ;;  %v3779_v12 = vadd.f32 %v3523_v41, %v3260_v39  ;;  %v10930_v8 = vld [vmem:[#allocation310_spill] sm:$0xff]  ;;  %v10931_v28 = vld [vmem:[#allocation203_spill] sm:$0xff] }
 0x67b   :  { %v3262_v44 = vpop.f32.mrf.mxu1  ;;  %4327 = vmatpush1.bf16.msra.mxu1 %v9000_v31  ;;  %v3536_v24 = vmul.f32 %v10931_v28, %v10930_v8  ;;  %v5412_v3 = vld [vmem:[%s9381_s6 + $0x140] ss:$8 sps:$4 sm:$0xff]   ;;  %v5444_v28 = vld [vmem:[%s9381_s6 + $0x1f4] ss:$8 sps:$4 sm:$0xff]  }
 0x67c   :  { %v9153_v20 = vpack.c.bf16 %v4032_v0, %v4028_v48  ;;  %4328 = vmatprep.subr.bf16.mxu1 %v8979_v36  ;;  %v3780_v51 = vadd.f32 %v3524_v47, %v3262_v44  ;;  %v4035_v31 = vmax.f32 %v3779_v12, 0.0  ;;  %v10932_v44 = vld [vmem:[#allocation181_spill] sm:$0xff]  ;;  %v5436_v8 = vld [vmem:[%s9381_s6 + $0x100] ss:$8 sps:$4 sm:$0xff]  }
 0x67d   :  { %v3264_v16 = vpop.f32.mrf.mxu1  ;;  %v3539_v22 = vmul.f32 %v10933_v21, %v10932_v44  ;;  %v10935_v12 = vld [vmem:[#allocation205_spill] sm:$0xff]  ;;  %v5474_v21 = vld [vmem:[%s9381_s6 + $0x1a4] ss:$8 sps:$4 sm:$0xff]  }
 0x67e   :  { %v3783_v27 = vadd.f32 %v3527_v35, %v3264_v16  ;;  %v4036_v13 = vmax.f32 %v3780_v51, 0.0  ;;  %v10934_v35 = vld [vmem:[#allocation311_spill] sm:$0xff]  ;;  %v5466_v44 = vld [vmem:[%s9381_s6 + $0x1b0] ss:$8 sps:$4 sm:$0xff]  }
 0x67f   :  { %v3266_v6 = vpop.f32.mrf.mxu1  ;;  %4329 = vmatpush1.bf16.msra.mxu1 %v8964_v7  ;;  %v10929_v7 = vld [vmem:[#allocation39_spill] sm:$0xff]  ;;  %v3540_v16 = vmul.f32 %v10935_v12, %v10934_v35 }
 0x680   :  { %v4039_v30 = vmax.f32 %v3783_v27, 0.0  ;;  %v3784_v26 = vadd.f32 %v3528_v43, %v3266_v6  ;;  %4330 = vmatprep.subr.bf16.mxu1 %v8943_v52  ;;  %v3535_v50 = vmul.f32 %v10929_v7, %v10928_v10  ;;  %v10938_v27 = vld [vmem:[#allocation191_spill] sm:$0xff]  ;;  %v10939_v6 = vld [vmem:[#allocation209_spill] sm:$0xff] }
 0x681   :  { %v3270_v38 = vpop.f32.mrf.mxu1  ;;  %v5418_v10 = vld [vmem:[%s9381_s6 + $0x130] ss:$8 sps:$4 sm:$0xff]   ;;  %v5426_v7 = vld [vmem:[%s9381_s6 + $0x124] ss:$8 sps:$4 sm:$0xff]   ;;  %v5484_v12 = vld [vmem:[%s9381_s6 + $0x180] ss:$8 sps:$4 sm:$0xff]  }
 0x682   :  { %v4177_v36 = vpack.c.bf16 %v4039_v30, %v4035_v31  ;;  %v4040_v58 = vmax.f32 %v3784_v26, 0.0  ;;  %v3787_v42 = vadd.f32 %v3531_v45, %v3270_v38  ;;  %v3544_v31 = vmul.f32 %v10939_v6, %v10938_v27  ;;  %v5486_v35 = vld [vmem:[%s9381_s6 + $0x184] ss:$8 sps:$4 sm:$0xff]  }
 0x683   :  { %v3272_v34 = vpop.f32.mrf.mxu1  ;;  %4331 = vmatpush1.bf16.msra.mxu1 %v8925_v49 }
 0x684   :  { %v4178_v5 = vpack.c.bf16 %v4040_v58, %v4036_v13  ;;  %4332 = vmatprep.subr.bf16.mxu1 %v8906_v63  ;;  %v3788_v39 = vadd.f32 %v3532_v60, %v3272_v34  ;;  %v4043_v49 = vmax.f32 %v3787_v42, 0.0  ;;  %v5414_v34 = vld [vmem:[%s9381_s6 + $0x144] ss:$8 sps:$4 sm:$0xff]   ;;  %v5420_v60 = vld [vmem:[%s9381_s6 + $0x134] ss:$8 sps:$4 sm:$0xff]  }
 0x685   :  { %v3274_v52 = vpop.f32.mrf.mxu1  ;;  %v5430_v42 = vld [vmem:[%s9381_s6 + $0x110] ss:$8 sps:$4 sm:$0xff]  }
 0x686   :  { %v3791_v19 = vadd.f32 %v3535_v50, %v3274_v52  ;;  %v4044_v47 = vmax.f32 %v3788_v39, 0.0  ;;  %v5424_v50 = vld [vmem:[%s9381_s6 + $0x120] ss:$8 sps:$4 sm:$0xff]   ;;  %v5438_v52 = vld [vmem:[%s9381_s6 + $0x104] ss:$8 sps:$4 sm:$0xff]  }
 0x687   :  { %v3276_v4 = vpop.f32.mrf.mxu1  ;;  %4333 = vmatpush1.bf16.msra.mxu1 %v8896_v56  ;;  %v10937_v56 = vld [vmem:[#allocation43_spill] sm:$0xff] }
 0x688   :  { %v4047_v41 = vmax.f32 %v3791_v19, 0.0  ;;  %v3792_v48 = vadd.f32 %v3536_v24, %v3276_v4  ;;  %4334 = vmatprep.subr.bf16.mxu1 %v8874_v14  ;;  %v3543_v54 = vmul.f32 %v10937_v56, %v10936_v17  ;;  %v5442_v24 = vld [vmem:[%s9381_s6 + $0x1f0] ss:$8 sps:$4 sm:$0xff]   ;;  %v5450_v39 = vld [vmem:[%s9381_s6 + $0x1e4] ss:$8 sps:$4 sm:$0xff]  }
 0x689   :  { %v3280_v0 = vpop.f32.mrf.mxu1  ;;  %v5448_v19 = vld [vmem:[%s9381_s6 + $0x1e0] ss:$8 sps:$4 sm:$0xff]   ;;  %v5456_v4 = vld [vmem:[%s9381_s6 + $0x1d4] ss:$8 sps:$4 sm:$0xff]  }
 0x68a   :  { %v4181_v63 = vpack.c.bf16 %v4047_v41, %v4043_v49  ;;  %v4048_v59 = vmax.f32 %v3792_v48, 0.0  ;;  %v3795_v51 = vadd.f32 %v3539_v22, %v3280_v0  ;;  %v5454_v49 = vld [vmem:[%s9381_s6 + $0x1d0] ss:$8 sps:$4 sm:$0xff]   ;;  %v5462_v41 = vld [vmem:[%s9381_s6 + $0x1c4] ss:$8 sps:$4 sm:$0xff]  }
 0x68b   :  { %v3282_v32 = vpop.f32.mrf.mxu1  ;;  %4335 = vmatpush1.bf16.msra.mxu1 %v8864_v15  ;;  %v5460_v48 = vld [vmem:[%s9381_s6 + $0x1c0] ss:$8 sps:$4 sm:$0xff]   ;;  %v5468_v0 = vld [vmem:[%s9381_s6 + $0x1b4] ss:$8 sps:$4 sm:$0xff]  }
 0x68c   :  { %v4182_v43 = vpack.c.bf16 %v4048_v59, %v4044_v47  ;;  %4336 = vmatprep.subr.bf16.mxu1 %v8842_v53  ;;  %v3796_v30 = vadd.f32 %v3540_v16, %v3282_v32  ;;  %v4051_v15 = vmax.f32 %v3795_v51, 0.0  ;;  %v5472_v22 = vld [vmem:[%s9381_s6 + $0x1a0] ss:$8 sps:$4 sm:$0xff]   ;;  %v5480_v47 = vld [vmem:[%s9381_s6 + $0x194] ss:$8 sps:$4 sm:$0xff]  }
 0x68d   :  { %v3284_v14 = vpop.f32.mrf.mxu1  ;;  %v5478_v59 = vld [vmem:[%s9381_s6 + $0x190] ss:$8 sps:$4 sm:$0xff]  }
 0x68e   :  { %v3799_v26 = vadd.f32 %v3543_v54, %v3284_v14  ;;  %v4052_v45 = vmax.f32 %v3796_v30, 0.0  ;;  %v5487_v56 = vld [vmem:[%s9382_s8 + $0x78] sm:$0xff]  }
 0x68f   :  { %v3286_v38 = vpop.f32.mrf.mxu1  ;;  %4337 = vmatpush1.bf16.msra.mxu1 %v8832_v37  ;;  %v5469_v37 = vld [vmem:[%s9381_s6 + $0xa0] ss:$8 sps:$4 sm:$0xff]  }
 0x690   :  { %v4055_v1 = vmax.f32 %v3799_v26, 0.0  ;;  %v3800_v29 = vadd.f32 %v3544_v31, %v3286_v38  ;;  %4338 = vmatprep.subr.bf16.mxu1 %v8810_v2  ;;  %v5471_v2 = vld [vmem:[%s9381_s6 + $0xa4] ss:$8 sps:$4 sm:$0xff]   ;;  %v5488_v31 = vld [vmem:[%s9382_s8 + $0x38] sm:$0xff]   ;;  %v5489_v38 = vld [vmem:[%s9382_s8 + $0x70] sm:$0xff]  }
 0x691   :  { %4791 = vmatprep.subr.bf16.mxu0 %v5471_v2 }
 0x692   :  { %v4185_v13 = vpack.c.bf16 %v4055_v1, %v4051_v15  ;;  %v4056_v58 = vmax.f32 %v3800_v29, 0.0  ;;  %4792 = vmatpush2.bf16.msra.mxu0 %v5469_v37  ;;  %v5490_v15 = vld [vmem:[%s9382_s8 + $0x30] sm:$0xff]   ;;  %v5491_v1 = vld [vmem:[%s9382_s8 + $0x68] sm:$0xff]  }
 0x693   :  { %4339 = vmatpush1.bf16.msra.mxu1 %v8802_v46  ;;  %v5396_v46 = vld [vmem:[%s9381_s6 + $0x174] ss:$8 sps:$4 sm:$0xff]   ;;  %v5492_v29 = vld [vmem:[%s9382_s8 + $0x28] sm:$0xff]  }
 0x694   :  { %v4186_v53 = vpack.c.bf16 %v4056_v58, %v4052_v45  ;;  %v5493_v45 = vld [vmem:[%s9382_s8 + $0x60] sm:$0xff]   ;;  %v5495_v58 = vld [vmem:[%s9382_s8 + $0x58] sm:$0xff]  }
 0x696   :  { %4340 = vmatprep.subr.bf16.mxu1 %v4186_v53  ;;  %v5496_v53 = vld [vmem:[%s9382_s8 + $0x18] sm:$0xff]  }
 0x697   :  { %4341 = vmatpush2.bf16.msra.mxu1 %v4185_v13  ;;  %v5494_v13 = vld [vmem:[%s9382_s8 + $0x20] sm:$0xff]  }
 0x698   :  { %4342 = vmatprep.subr.bf16.mxu1 %v4182_v43 }
 0x69b   :  { %4343 = vmatpush2.bf16.msra.mxu1 %v4181_v63 }
 0x69c   :  { %4344 = vmatprep.subr.bf16.mxu1 %v4178_v5  ;;  %v5432_v5 = vld [vmem:[%s9381_s6 + $0x114] ss:$8 sps:$4 sm:$0xff]  }
 0x69f   :  { %4345 = vmatpush2.bf16.msra.mxu1 %v4177_v36  ;;  %v5406_v36 = vld [vmem:[%s9381_s6 + $0x150] ss:$8 sps:$4 sm:$0xff]  }
 0x6a0   :  { %4346 = vmatprep.subr.bf16.mxu1 %v9153_v20  ;;  %v5481_v20 = vld [vmem:[%s9381_s6 + $0x80] ss:$8 sps:$4 sm:$0xff]  }
 0x6a3   :  { %4347 = vmatpush2.bf16.msra.mxu1 %v9146_v55 }
 0x6a4   :  { %4348 = vmatprep.subr.bf16.mxu1 %v9135_v40 }
 0x6a7   :  { %4349 = vmatpush2.bf16.msra.mxu1 %v9123_v11  ;;  %v5408_v11 = vld [vmem:[%s9381_s6 + $0x154] ss:$8 sps:$4 sm:$0xff]  }
 0x6a8   :  { %4350 = vmatprep.subr.bf16.mxu1 %v9114_v18  ;;  %v5400_v18 = vld [vmem:[%s9381_s6 + $0x160] ss:$8 sps:$4 sm:$0xff]  }
 0x6ab   :  { %4351 = vmatpush2.bf16.msra.mxu1 %v9107_v57 }
 0x6ac   :  { %4352 = vmatprep.subr.bf16.mxu1 %v9092_v61  ;;  %v5477_v61 = vld [vmem:[%s9381_s6 + $0x94] ss:$8 sps:$4 sm:$0xff]  }
 0x6ad   :  { %4793 = vmatprep.subr.bf16.mxu0 %v5477_v61 }
 0x6af   :  { %4353 = vmatpush2.bf16.msra.mxu1 %v9082_v25  ;;  %v5394_v25 = vld [vmem:[%s9381_s6 + $0x170] ss:$8 sps:$4 sm:$0xff]  }
 0x6b0   :  { %4354 = vmatprep.subr.bf16.mxu1 %v9064_v33  ;;  %v5402_v33 = vld [vmem:[%s9381_s6 + $0x164] ss:$8 sps:$4 sm:$0xff]  }
 0x6b3   :  { %4355 = vmatpush2.bf16.msra.mxu1 %v9056_v62  ;;  %v5475_v62 = vld [vmem:[%s9381_s6 + $0x90] ss:$8 sps:$4 sm:$0xff]  }
 0x6b4   :  { %4806 = vmatprep.subr.bf16.mxu1 %v5396_v46  ;;  %4794 = vmatpush2.bf16.msra.mxu0 %v5475_v62 }
 0x6b6   :  { %4357 = vmatmul.mubr.bf16.vlgmr.msra.gmra.mxu1 %v9128_v23  ;;  %v9214_v57 = vpop.f32.mrf.mxu0  ;;  %v5483_v23 = vld [vmem:[%s9381_s6 + $0x84] ss:$8 sps:$4 sm:$0xff]  }
 0x6b7   :  { %4807 = vmatpush1.bf16.msra.mxu1 %v5394_v25  ;;  %4795 = vmatprep.subr.bf16.mxu0 %v5483_v23  ;;  %v5500_v23 = vld [vmem:[%s9382_s8 + $0x8] sm:$0xff]  }
 0x6b8   :  { %4808 = vmatprep.subr.bf16.mxu1 %v5402_v33  ;;  %v9225_v40 = vpop.f32.mrf.mxu0  ;;  %4796 = vmatpush2.bf16.msra.mxu0 %v5481_v20  ;;  %v5502_v20 = vld [vmem:[%s9382_s8] sm:$0xff]  }
 0x6b9   :  { %5332 = vmatprep.subr.bf16.mxu0 %v5487_v56 }
 0x6ba   :  { %v4239_v55 = vpop.f32.mrf.mxu0 }
 0x6bb   :  { %4809 = vmatpush1.bf16.msra.mxu1 %v5400_v18  ;;  %v5497_v18 = vld [vmem:[%s9382_s8 + $0x50] sm:$0xff]   ;;  %v5501_v55 = vld [vmem:[%s9382_s8 + $0x40] sm:$0xff]  }
 0x6bc   :  { %4810 = vmatprep.subr.bf16.mxu1 %v5408_v11  ;;  %v4240_v9 = vpop.f32.mrf.mxu0  ;;  %v5498_v11 = vld [vmem:[%s9382_s8 + $0x10] sm:$0xff]  }
 0x6bf   :  { %4811 = vmatpush1.bf16.msra.mxu1 %v5406_v36 }
 0x6c0   :  { %4812 = vmatprep.subr.bf16.mxu1 %v5414_v34 }
 0x6c3   :  { %4813 = vmatpush1.bf16.msra.mxu1 %v5412_v3 }
 0x6c4   :  { %4814 = vmatprep.subr.bf16.mxu1 %v5420_v60  ;;  %v4433_v60 = vld [vmem:[%s9383_s7] sm:$0x3] }
 0x6c7   :  { %4815 = vmatpush1.bf16.msra.mxu1 %v5418_v10  ;;  %v10940_v10 = vld [vmem:[#allocation193_spill] sm:$0xff] }
 0x6c8   :  { %4816 = vmatprep.subr.bf16.mxu1 %v5426_v7  ;;  %v4438_v7 = vrot.slane %v4433_v60, %v10940_v10 }
 0x6cb   :  { %4817 = vmatpush1.bf16.msra.mxu1 %v5424_v50  ;;  %v10941_v50 = vld [vmem:[#allocation197_spill] sm:$0xff] }
 0x6cc   :  { %4818 = vmatprep.subr.bf16.mxu1 %v5432_v5  ;;  %v4442_v5 = vrot.slane %v4433_v60, %v10941_v50 }
 0x6cf   :  { %4819 = vmatpush1.bf16.msra.mxu1 %v5430_v42 }
 0x6d0   :  { %4820 = vmatprep.subr.bf16.mxu1 %v5438_v52 }
 0x6d3   :  { %4821 = vmatpush1.bf16.msra.mxu1 %v5436_v8 }
 0x6d4   :  { %4822 = vmatprep.subr.bf16.mxu1 %v5444_v28 }
 0x6d7   :  { %4823 = vmatpush2.bf16.msra.mxu1 %v5442_v24 }
 0x6d8   :  { %4824 = vmatprep.subr.bf16.mxu1 %v5450_v39 }
 0x6db   :  { %4825 = vmatpush2.bf16.msra.mxu1 %v5448_v19 }
 0x6dc   :  { %4826 = vmatprep.subr.bf16.mxu1 %v5456_v4 }
 0x6df   :  { %4827 = vmatpush2.bf16.msra.mxu1 %v5454_v49 }
 0x6e0   :  { %4828 = vmatprep.subr.bf16.mxu1 %v5462_v41 }
 0x6e3   :  { %4829 = vmatpush2.bf16.msra.mxu1 %v5460_v48 }
 0x6e4   :  { %4830 = vmatprep.subr.bf16.mxu1 %v5468_v0 }
 0x6e7   :  { %4831 = vmatpush2.bf16.msra.mxu1 %v5466_v44 }
 0x6e8   :  { %4832 = vmatprep.subr.bf16.mxu1 %v5474_v21  ;;  %v5315_v21 = vld [vmem:[%s9384_s9] ss:$0 sm:$0xff] }
 0x6eb   :  { %4833 = vmatpush2.bf16.msra.mxu1 %v5472_v22 }
 0x6ec   :  { %4834 = vmatprep.subr.bf16.mxu1 %v5480_v47 }
 0x6ef   :  { %4835 = vmatpush2.bf16.msra.mxu1 %v5478_v59 }
 0x6f0   :  { %4836 = vmatprep.subr.bf16.mxu1 %v5486_v35 }
 0x6f3   :  { %4837 = vmatpush2.bf16.msra.mxu1 %v5484_v12 }
 0x6f6   :  { %v4317_v63 = vpop.f32.mrf.mxu0 }
 0x6f8   :  { %v4319_v32 = vpop.f32.mrf.mxu0 }
 0x6fa   :  { %v4321_v16 = vpop.f32.mrf.mxu0 }
 0x6fc   :  { %v4322_v17 = vpop.f32.mrf.mxu0 }
 0x736   :  { %v4276_v54 = vpop.f32.mrf.mxu1 }
 0x737   :  { %v4277_v43 = vadd.f32 %v4276_v54, %v9214_v57 }
 0x738   :  { %v4278_v51 = vpop.f32.mrf.mxu1 }
 0x739   :  { %v4279_v14 = vadd.f32 %v4278_v51, %v9225_v40  ;;  %v4365_v30 = vpack.c.bf16 %v4277_v43, %v4277_v43  ;;  %v5499_v40 = vld [vmem:[%s9382_s8 + $0x48] sm:$0xff]  }
 0x73a   :  { %v4280_v27 = vpop.f32.mrf.mxu1 }
 0x73b   :  { %v4366_v6 = vpack.c.bf16 %v4279_v14, %v4279_v14 }
 0x73c   :  { %v4281_v26 = vpop.f32.mrf.mxu1 }
 0x73d   :  { %4797 = vmatprep.mubr.bf16.mxu0 %v4366_v6 }
 0x73e   :  { %4798 = vmatmul.mubr.bf16.vlgmr.msra.gmra.mxu0 %v4365_v30 }
 0x73f   :  { %5333 = vmatpush3.bf16.msra.mxu0 %v5488_v31 }
 0x740   :  { %5334 = vmatprep.subr.bf16.mxu0 %v5489_v38 }
 0x743   :  { %5335 = vmatpush3.bf16.msra.mxu0 %v5490_v15 }
 0x744   :  { %5336 = vmatprep.subr.bf16.mxu0 %v5491_v1 }
 0x747   :  { %5337 = vmatpush3.bf16.msra.mxu0 %v5492_v29 }
 0x748   :  { %5338 = vmatprep.subr.bf16.mxu0 %v5493_v45 }
 0x74b   :  { %5339 = vmatpush3.bf16.msra.mxu0 %v5494_v13 }
 0x74c   :  { %5340 = vmatprep.subr.bf16.mxu0 %v5495_v58 }
 0x74f   :  { %5341 = vmatpush3.bf16.msra.mxu0 %v5496_v53 }
 0x750   :  { %5342 = vmatprep.subr.bf16.mxu0 %v5497_v18 }
 0x753   :  { %5343 = vmatpush3.bf16.msra.mxu0 %v5498_v11 }
 0x754   :  { %5344 = vmatprep.subr.bf16.mxu0 %v5499_v40 }
 0x757   :  { %5345 = vmatpush3.bf16.msra.mxu0 %v5500_v23 }
 0x758   :  { %5346 = vmatprep.subr.bf16.mxu0 %v5501_v55 }
 0x75b   :  { %5347 = vmatpush3.bf16.msra.mxu0 %v5502_v20 }
 0x776   :  { %v4358_v46 = vpop.f32.mrf.mxu1 }
 0x777   :  { %v4359_v2 = vadd.f32 %v4358_v46, %v4317_v63 }
 0x778   :  { %v4360_v37 = vpop.f32.mrf.mxu1 }
 0x779   :  { %v4361_v25 = vadd.f32 %v4360_v37, %v4319_v32  ;;  %v4367_v57 = vpack.c.bf16 %v4359_v2, %v4359_v2 }
 0x77a   :  { %v4362_v33 = vpop.f32.mrf.mxu1 }
 0x77b   :  { %v4368_v61 = vpack.c.bf16 %v4361_v25, %v4361_v25 }
 0x77c   :  { %v4363_v62 = vpop.f32.mrf.mxu1 }
 0x77d   :  { %4838 = vmatprep.mubr.bf16.mxu1 %v4368_v61 }
 0x77e   :  { %4839 = vmatmul.mubr.bf16.vlgmr.msra.gmra.mxu1 %v4367_v57 }
 0x7fe   :  { %v4799_v36 = vpop.f32.mrf.mxu0 }
 0x7ff   :  { %v4800_v42 = vadd.f32 %v4799_v36, %v4438_v7 }
 0x800   :  { %v4801_v34 = vpop.f32.mrf.mxu0 }
 0x801   :  { %v4802_v8 = vadd.f32 %v4801_v34, %v4442_v5 }
 0x802   :  { %v4803_v9 = vpop.f32.mrf.mxu0 }
 0x804   :  { %v4804_v3 = vpop.f32.mrf.mxu0 }
 0x83e   :  { %v4840_v52 = vpop.f32.mrf.mxu1 }
 0x83f   :  { %v4841_v28 = vadd.f32 %v4840_v52, %v4800_v42 }
 0x840   :  { %v4842_v24 = vpop.f32.mrf.mxu1 }
 0x841   :  { %v4843_v39 = vadd.f32 %v4842_v24, %v4802_v8  ;;  %v4847_v19 = vmax.f32 %v4841_v28, 0.0 }
 0x842   :  { %v4844_v4 = vpop.f32.mrf.mxu1 }
 0x843   :  { %v4848_v49 = vmax.f32 %v4843_v39, 0.0  ;;  %v4849_v0 = vpack.c.bf16 %v4847_v19, %v4847_v19 }
 0x844   :  { %v4845_v41 = vpop.f32.mrf.mxu1 }
 0x845   :  { %v4850_v48 = vpack.c.bf16 %v4848_v49, %v4848_v49 }
 0x847   :  { %5018 = vmatprep.mubr.bf16.mxu0 %v4850_v48 }
 0x848   :  { %5019 = vmatmul.mubr.bf16.vlgmr.msra.gmra.mxu0 %v4849_v0 }
 0x908   :  { %v5348_v44 = vpop.f32.mrf.mxu0 }
 0x90a   :  { %v5349_v22 = vpop.f32.mrf.mxu0 }
 0x90b   :  { %v5350_v47 = vadd.f32 %v5349_v22, %v5348_v44 }
 0x90c   :  { %v5351_v63 = vpop.f32.mrf.mxu0 }
 0x90d   :  { %v5021_v59 = vadd.f32 %v5350_v47, %v5315_v21 }
 0x90e   :  { %v5352_v32 = vpop.f32.mrf.mxu0 }
 0x90f   :  { %5026 = vst [vmem:[%s9385_s10] sm:$0xff] %v5021_v59 }

</bundles_post_ra>
